<compile_context>
chip_gen: v7x
topology: tpu7x:2x2x1
jax: 0.10.0
libtpu: 0.0.40
codegen_flags: <defaults>
</compile_context>

<pallas_src>
import jax
import jax.numpy as jnp
import numpy as np
from jax import lax
from jax.experimental import pallas as pl
from jax.experimental.pallas import tpu as pltpu


def conv_encoder_kernel(xp_ref, w1_ref, b1_ref, w2_ref, b2_ref, o_ref,
                        im1_ref, h1p_ref, im2_ref):
    """One batch-tile per grid step, NHWC with channels on the lane axis.

    xp_ref : (bt, H+2, W+2, Cin)        bf16 zero-padded input tile
    w1_ref : (9*Cin, Chid)              bf16 conv1 weights, im2col order (kh, kw, cin)
    b1_ref : (1, Chid)                  f32
    w2_ref : (9*Chid, Chid)             bf16 conv2 weights, im2col order (kh, kw, c)
    b2_ref : (1, Chid)                  f32
    o_ref  : (bt*(H//2), (W//2)*Chid)   lane-dense pooled output tile
    im1_ref: (bt*H*W, 9*Cin)  bf16 scratch  (conv1 im2col patches)
    h1p_ref: (bt, H+2, W+2, Chid) bf16 scratch (zero-padded conv1 activation)
    im2_ref: (bt*H*W, 9*Chid) bf16 scratch  (conv2 im2col patches)
    """
    BT, Hp2, Wp2, Cin = xp_ref.shape
    H, W = Hp2 - 2, Wp2 - 2
    Chid = w1_ref.shape[1]
    M = BT * H * W

    taps = [(dh, dw) for dh in range(3) for dw in range(3)]

    # ---- conv1: im2col patches (lane bands) -> one fused MXU matmul -> bias+ReLU in f32
    x = xp_ref[...]                                            # (bt, H+2, W+2, Cin) bf16
    for t, (dh, dw) in enumerate(taps):
        im1_ref[:, t * Cin:(t + 1) * Cin] = (
            x[:, dh:dh + H, dw:dw + W, :].reshape(M, Cin))
    acc1 = jnp.dot(im1_ref[...], w1_ref[...],
                   preferred_element_type=jnp.float32)         # (M, Chid) f32
    h1 = jnp.maximum(acc1 + b1_ref[...], 0.0)

    # ---- zero-padded conv1 activation (re-zeroed each step: scratch is per-core and the
    # interior is fully overwritten; only the 1-pixel border uses the zeros)
    h1p_ref[...] = jnp.zeros(h1p_ref.shape, h1p_ref.dtype)
    h1p_ref[:, 1:H + 1, 1:W + 1, :] = (
        h1.reshape(BT, H, W, Chid).astype(h1p_ref.dtype))

    # ---- conv2: im2col with K = 9*Chid -> single fused matmul -> bias+ReLU in f32
    for t, (dh, dw) in enumerate(taps):
        im2_ref[:, t * Chid:(t + 1) * Chid] = (
            h1p_ref[:, dh:dh + H, dw:dw + W, :].reshape(M, Chid))
    acc2 = jnp.dot(im2_ref[...], w2_ref[...],
                   preferred_element_type=jnp.float32)         # (M, Chid) f32
    h2 = jnp.maximum(acc2 + b2_ref[...], 0.0)

    # ---- 2x2 max pool, stride 2 (channels stay on lanes). Batch folded into the leading
    # "row" axis; H even => row pairs never cross an image boundary.
    h2 = h2.reshape(BT * H, W, Chid)
    m1 = h2.reshape(BT * H, W // 2, 2, Chid).max(axis=2)          # pool along W
    pooled = m1.reshape(BT * H // 2, 2, W // 2, Chid).max(axis=1)  # pool along H
    # lane-dense store: last dim (W//2)*Chid is a multiple of 128 -> unmasked vst
    o_ref[...] = pooled.reshape(BT * (H // 2), (W // 2) * Chid).astype(o_ref.dtype)


def conv_encoder_forward(x_nchw, w1, b1, w2, b2):
    """PyTorch-convention I/O: x (B,Cin,H,W), w (Cout,Cin,3,3) -> out (B,Chid,H/2,W/2)."""
    B, Cin, H, W = x_nchw.shape
    Chid = w1.shape[0]
    assert H % 2 == 0 and W % 2 == 0
    Ho, Wo = H // 2, W // 2

    # Batch tile: smallest divisor of B whose pooled-row count stays sublane (8) aligned.
    # bt=1 at the test shapes -> grid=(B,), which megacore (v7x) splits across both TCs.
    bt = B
    for cand in range(1, B + 1):
        if B % cand == 0 and (cand * Ho) % 8 == 0:
            bt = cand
            break
    n_bt = B // bt

    # Layout plumbing in XLA: NCHW -> NHWC, spatial zero-pad for conv1 (padding=1),
    # weights OIHW -> HWIO -> (9*Cin, Cout) im2col matrices, bf16 matmul inputs.
    x_nhwc = jnp.transpose(x_nchw, (0, 2, 3, 1))
    xp = jnp.pad(x_nhwc, ((0, 0), (1, 1), (1, 1), (0, 0))).astype(jnp.bfloat16)
    w1_mat = jnp.transpose(w1, (2, 3, 1, 0)).reshape(9 * Cin, Chid).astype(jnp.bfloat16)
    w2_mat = jnp.transpose(w2, (2, 3, 1, 0)).reshape(9 * Chid, Chid).astype(jnp.bfloat16)
    b1r = b1.reshape(1, Chid).astype(jnp.float32)
    b2r = b2.reshape(1, Chid).astype(jnp.float32)

    out_lane = pl.pallas_call(
        conv_encoder_kernel,
        out_shape=jax.ShapeDtypeStruct((B * Ho, Wo * Chid), x_nchw.dtype),
        grid_spec=pltpu.PrefetchScalarGridSpec(
            num_scalar_prefetch=0,
            grid=(n_bt,),
            in_specs=[
                pl.BlockSpec((bt, H + 2, W + 2, Cin), lambda i: (i, 0, 0, 0)),
                pl.BlockSpec((9 * Cin, Chid), lambda i: (0, 0)),
                pl.BlockSpec((1, Chid), lambda i: (0, 0)),
                pl.BlockSpec((9 * Chid, Chid), lambda i: (0, 0)),
                pl.BlockSpec((1, Chid), lambda i: (0, 0)),
            ],
            out_specs=pl.BlockSpec((bt * Ho, Wo * Chid), lambda i: (i, 0)),
            scratch_shapes=[
                pltpu.VMEM((bt * H * W, 9 * Cin), jnp.bfloat16),
                pltpu.VMEM((bt, H + 2, W + 2, Chid), jnp.bfloat16),
                pltpu.VMEM((bt * H * W, 9 * Chid), jnp.bfloat16),
            ],
        ),
        compiler_params=pltpu.CompilerParams(
            dimension_semantics=("parallel",)),
    )(xp, w1_mat, b1r, w2_mat, b2r)

    # lane-dense slab -> NHWC -> NCHW (PyTorch output convention)
    out_nhwc = out_lane.reshape(B, Ho, Wo, Chid)
    return jnp.transpose(out_nhwc, (0, 3, 1, 2))


def conv_encoder_ref(x, w1, b1, w2, b2):
    """Pure-JAX f32 reference matching the PyTorch forward."""
    dn = ('NCHW', 'OIHW', 'NCHW')
    h = lax.conv_general_dilated(x, w1, (1, 1), 'SAME', dimension_numbers=dn)
    h = jax.nn.relu(h + b1[None, :, None, None])
    h = lax.conv_general_dilated(h, w2, (1, 1), 'SAME', dimension_numbers=dn)
    h = jax.nn.relu(h + b2[None, :, None, None])
    h = lax.reduce_window(h, -jnp.inf, lax.max,
                          (1, 1, 2, 2), (1, 1, 2, 2), 'VALID')
    return h


if __name__ == "__main__":
    B, Cin, H, W, Chid = 2, 4, 16, 16, 32

    key = jax.random.PRNGKey(0)
    kx, kw1, kb1, kw2, kb2 = jax.random.split(key, 5)

    x = jax.random.normal(kx, (B, Cin, H, W), jnp.float32)

    # Deterministic init mimicking nn.Conv2d's uniform(-1/sqrt(fan_in), 1/sqrt(fan_in))
    bound1 = 1.0 / np.sqrt(Cin * 3 * 3)
    w1 = jax.random.uniform(kw1, (Chid, Cin, 3, 3), jnp.float32, -bound1, bound1)
    b1 = jax.random.uniform(kb1, (Chid,), jnp.float32, -bound1, bound1)
    bound2 = 1.0 / np.sqrt(Chid * 3 * 3)
    w2 = jax.random.uniform(kw2, (Chid, Chid, 3, 3), jnp.float32, -bound2, bound2)
    b2 = jax.random.uniform(kb2, (Chid,), jnp.float32, -bound2, bound2)

    out = jax.jit(conv_encoder_forward)(x, w1, b1, w2, b2)
    out = jax.block_until_ready(out)

    ref = conv_encoder_ref(x, w1, b1, w2, b2)
    assert out.shape == (B, Chid, H // 2, W // 2), out.shape
    # bf16 matmul inputs (f32 accumulation) -> relaxed tolerance vs f32 reference
    np.testing.assert_allclose(np.asarray(out), np.asarray(ref),
                               atol=3e-2, rtol=3e-2)
    print("KERNEL_OK")
</pallas_src>

<mosaic_0001>
module attributes {stable_mosaic.version = 11 : i64} {
  func.func @conv_encoder_kernel(%arg0: i32, %arg1: memref<1x18x18x4xbf16, #tpu.memory_space<vmem>>, %arg2: memref<36x32xbf16, #tpu.memory_space<vmem>>, %arg3: memref<1x32xf32, #tpu.memory_space<vmem>>, %arg4: memref<288x32xbf16, #tpu.memory_space<vmem>>, %arg5: memref<1x32xf32, #tpu.memory_space<vmem>>, %arg6: memref<8x256xf32, #tpu.memory_space<vmem>>, %arg7: memref<256x36xbf16, #tpu.memory_space<vmem>>, %arg8: memref<1x18x18x32xbf16, #tpu.memory_space<vmem>>, %arg9: memref<256x288xbf16, #tpu.memory_space<vmem>>) attributes {dimension_semantics = [#tpu.dimension_semantics<parallel>], iteration_bounds = array<i64: 2>, scalar_prefetch = 0 : i64, scratch_operands = 3 : i64, tpu.core_type = #tpu.core_type<tc>, window_params = [{transform_indices = @transform_0, window_bounds = array<i64: 1, 18, 18, 4>}, {pipeline_mode = #tpu.pipeline_mode<synchronous>, transform_indices = @transform_1, window_bounds = array<i64: 36, 32>}, {pipeline_mode = #tpu.pipeline_mode<synchronous>, transform_indices = @transform_2, window_bounds = array<i64: 1, 32>}, {pipeline_mode = #tpu.pipeline_mode<synchronous>, transform_indices = @transform_3, window_bounds = array<i64: 288, 32>}, {pipeline_mode = #tpu.pipeline_mode<synchronous>, transform_indices = @transform_4, window_bounds = array<i64: 1, 32>}, {transform_indices = @transform_5, window_bounds = array<i64: 8, 256>}]} {
    %c0 = arith.constant 0 : index
    %c0_0 = arith.constant 0 : index
    %c0_1 = arith.constant 0 : index
    %c0_2 = arith.constant 0 : index
    %0 = vector.load %arg1[%c0, %c0_0, %c0_1, %c0_2] : memref<1x18x18x4xbf16, #tpu.memory_space<vmem>>, vector<1x18x18x4xbf16>
    %1 = vector.extract_strided_slice %0 {offsets = [0, 0, 0, 0], sizes = [1, 16, 16, 4], strides = [1, 1, 1, 1]} : vector<1x18x18x4xbf16> to vector<1x16x16x4xbf16>
    %2 = vector.shape_cast %1 : vector<1x16x16x4xbf16> to vector<256x4xbf16>
    %c0_3 = arith.constant 0 : index
    %c0_4 = arith.constant 0 : index
    %3 = vector.load %arg7[%c0_3, %c0_4] : memref<256x36xbf16, #tpu.memory_space<vmem>>, vector<256x4xbf16>
    tpu.vector_store %arg7[%c0_3, %c0_4], %2 {strides = array<i32>} : memref<256x36xbf16, #tpu.memory_space<vmem>>, vector<256x4xbf16>,
    %4 = vector.extract_strided_slice %0 {offsets = [0, 0, 1, 0], sizes = [1, 16, 16, 4], strides = [1, 1, 1, 1]} : vector<1x18x18x4xbf16> to vector<1x16x16x4xbf16>
    %5 = vector.shape_cast %4 : vector<1x16x16x4xbf16> to vector<256x4xbf16>
    %c0_5 = arith.constant 0 : index
    %c4 = arith.constant 4 : index
    %6 = vector.load %arg7[%c0_5, %c4] : memref<256x36xbf16, #tpu.memory_space<vmem>>, vector<256x4xbf16>
    tpu.vector_store %arg7[%c0_5, %c4], %5 {strides = array<i32>} : memref<256x36xbf16, #tpu.memory_space<vmem>>, vector<256x4xbf16>,
    %7 = vector.extract_strided_slice %0 {offsets = [0, 0, 2, 0], sizes = [1, 16, 16, 4], strides = [1, 1, 1, 1]} : vector<1x18x18x4xbf16> to vector<1x16x16x4xbf16>
    %8 = vector.shape_cast %7 : vector<1x16x16x4xbf16> to vector<256x4xbf16>
    %c0_6 = arith.constant 0 : index
    %c8 = arith.constant 8 : index
    %9 = vector.load %arg7[%c0_6, %c8] : memref<256x36xbf16, #tpu.memory_space<vmem>>, vector<256x4xbf16>
    tpu.vector_store %arg7[%c0_6, %c8], %8 {strides = array<i32>} : memref<256x36xbf16, #tpu.memory_space<vmem>>, vector<256x4xbf16>,
    %10 = vector.extract_strided_slice %0 {offsets = [0, 1, 0, 0], sizes = [1, 16, 16, 4], strides = [1, 1, 1, 1]} : vector<1x18x18x4xbf16> to vector<1x16x16x4xbf16>
    %11 = vector.shape_cast %10 : vector<1x16x16x4xbf16> to vector<256x4xbf16>
    %c0_7 = arith.constant 0 : index
    %c12 = arith.constant 12 : index
    %12 = vector.load %arg7[%c0_7, %c12] : memref<256x36xbf16, #tpu.memory_space<vmem>>, vector<256x4xbf16>
    tpu.vector_store %arg7[%c0_7, %c12], %11 {strides = array<i32>} : memref<256x36xbf16, #tpu.memory_space<vmem>>, vector<256x4xbf16>,
    %13 = vector.extract_strided_slice %0 {offsets = [0, 1, 1, 0], sizes = [1, 16, 16, 4], strides = [1, 1, 1, 1]} : vector<1x18x18x4xbf16> to vector<1x16x16x4xbf16>
    %14 = vector.shape_cast %13 : vector<1x16x16x4xbf16> to vector<256x4xbf16>
    %c0_8 = arith.constant 0 : index
    %c16 = arith.constant 16 : index
    %15 = vector.load %arg7[%c0_8, %c16] : memref<256x36xbf16, #tpu.memory_space<vmem>>, vector<256x4xbf16>
    tpu.vector_store %arg7[%c0_8, %c16], %14 {strides = array<i32>} : memref<256x36xbf16, #tpu.memory_space<vmem>>, vector<256x4xbf16>,
    %16 = vector.extract_strided_slice %0 {offsets = [0, 1, 2, 0], sizes = [1, 16, 16, 4], strides = [1, 1, 1, 1]} : vector<1x18x18x4xbf16> to vector<1x16x16x4xbf16>
    %17 = vector.shape_cast %16 : vector<1x16x16x4xbf16> to vector<256x4xbf16>
    %c0_9 = arith.constant 0 : index
    %c20 = arith.constant 20 : index
    %18 = vector.load %arg7[%c0_9, %c20] : memref<256x36xbf16, #tpu.memory_space<vmem>>, vector<256x4xbf16>
    tpu.vector_store %arg7[%c0_9, %c20], %17 {strides = array<i32>} : memref<256x36xbf16, #tpu.memory_space<vmem>>, vector<256x4xbf16>,
    %19 = vector.extract_strided_slice %0 {offsets = [0, 2, 0, 0], sizes = [1, 16, 16, 4], strides = [1, 1, 1, 1]} : vector<1x18x18x4xbf16> to vector<1x16x16x4xbf16>
    %20 = vector.shape_cast %19 : vector<1x16x16x4xbf16> to vector<256x4xbf16>
    %c0_10 = arith.constant 0 : index
    %c24 = arith.constant 24 : index
    %21 = vector.load %arg7[%c0_10, %c24] : memref<256x36xbf16, #tpu.memory_space<vmem>>, vector<256x4xbf16>
    tpu.vector_store %arg7[%c0_10, %c24], %20 {strides = array<i32>} : memref<256x36xbf16, #tpu.memory_space<vmem>>, vector<256x4xbf16>,
    %22 = vector.extract_strided_slice %0 {offsets = [0, 2, 1, 0], sizes = [1, 16, 16, 4], strides = [1, 1, 1, 1]} : vector<1x18x18x4xbf16> to vector<1x16x16x4xbf16>
    %23 = vector.shape_cast %22 : vector<1x16x16x4xbf16> to vector<256x4xbf16>
    %c0_11 = arith.constant 0 : index
    %c28 = arith.constant 28 : index
    %24 = vector.load %arg7[%c0_11, %c28] : memref<256x36xbf16, #tpu.memory_space<vmem>>, vector<256x4xbf16>
    tpu.vector_store %arg7[%c0_11, %c28], %23 {strides = array<i32>} : memref<256x36xbf16, #tpu.memory_space<vmem>>, vector<256x4xbf16>,
    %25 = vector.extract_strided_slice %0 {offsets = [0, 2, 2, 0], sizes = [1, 16, 16, 4], strides = [1, 1, 1, 1]} : vector<1x18x18x4xbf16> to vector<1x16x16x4xbf16>
    %26 = vector.shape_cast %25 : vector<1x16x16x4xbf16> to vector<256x4xbf16>
    %c0_12 = arith.constant 0 : index
    %c32 = arith.constant 32 : index
    %27 = vector.load %arg7[%c0_12, %c32] : memref<256x36xbf16, #tpu.memory_space<vmem>>, vector<256x4xbf16>
    tpu.vector_store %arg7[%c0_12, %c32], %26 {strides = array<i32>} : memref<256x36xbf16, #tpu.memory_space<vmem>>, vector<256x4xbf16>,
    %c0_13 = arith.constant 0 : index
    %c0_14 = arith.constant 0 : index
    %28 = vector.load %arg7[%c0_13, %c0_14] : memref<256x36xbf16, #tpu.memory_space<vmem>>, vector<256x36xbf16>
    %c0_15 = arith.constant 0 : index
    %c0_16 = arith.constant 0 : index
    %29 = vector.load %arg2[%c0_15, %c0_16] : memref<36x32xbf16, #tpu.memory_space<vmem>>, vector<36x32xbf16>
    %cst = arith.constant dense<0.000000e+00> : vector<256x32xf32>
    %30 = tpu.matmul %28, %29, %cst {dimension_numbers = #tpu.dot_dimension_numbers<[1], [0], [0], [1], [0, 0, 1, 1], [], []>} : vector<256x36xbf16>, vector<36x32xbf16>, vector<256x32xf32> -> vector<256x32xf32>
    %c0_17 = arith.constant 0 : index
    %c0_18 = arith.constant 0 : index
    %31 = vector.load %arg3[%c0_17, %c0_18] : memref<1x32xf32, #tpu.memory_space<vmem>>, vector<1x32xf32>
    %32 = vector.broadcast %31 : vector<1x32xf32> to vector<256x32xf32>
    %33 = arith.addf %30, %32 : vector<256x32xf32>
    %cst_19 = arith.constant 0.000000e+00 : f32
    %34 = vector.broadcast %cst_19 : f32 to vector<256x32xf32>
    %35 = arith.maximumf %33, %34 : vector<256x32xf32>
    %cst_20 = arith.constant 0.000000e+00 : bf16
    %36 = vector.broadcast %cst_20 : bf16 to vector<1x18x18x32xbf16>
    %c0_21 = arith.constant 0 : index
    %c0_22 = arith.constant 0 : index
    %c0_23 = arith.constant 0 : index
    %c0_24 = arith.constant 0 : index
    %37 = vector.load %arg8[%c0_21, %c0_22, %c0_23, %c0_24] : memref<1x18x18x32xbf16, #tpu.memory_space<vmem>>, vector<1x18x18x32xbf16>
    tpu.vector_store %arg8[%c0_21, %c0_22, %c0_23, %c0_24], %36 {strides = array<i32>} : memref<1x18x18x32xbf16, #tpu.memory_space<vmem>>, vector<1x18x18x32xbf16>,
    %38 = vector.shape_cast %35 : vector<256x32xf32> to vector<1x16x16x32xf32>
    %39 = arith.truncf %38 : vector<1x16x16x32xf32> to vector<1x16x16x32xbf16>
    %c0_25 = arith.constant 0 : index
    %c1 = arith.constant 1 : index
    %c1_26 = arith.constant 1 : index
    %c0_27 = arith.constant 0 : index
    %40 = vector.load %arg8[%c0_25, %c1, %c1_26, %c0_27] : memref<1x18x18x32xbf16, #tpu.memory_space<vmem>>, vector<1x16x16x32xbf16>
    tpu.vector_store %arg8[%c0_25, %c1, %c1_26, %c0_27], %39 {strides = array<i32>} : memref<1x18x18x32xbf16, #tpu.memory_space<vmem>>, vector<1x16x16x32xbf16>,
    %c0_28 = arith.constant 0 : index
    %c0_29 = arith.constant 0 : index
    %c0_30 = arith.constant 0 : index
    %c0_31 = arith.constant 0 : index
    %41 = vector.load %arg8[%c0_28, %c0_29, %c0_30, %c0_31] : memref<1x18x18x32xbf16, #tpu.memory_space<vmem>>, vector<1x16x16x32xbf16>
    %42 = vector.shape_cast %41 : vector<1x16x16x32xbf16> to vector<256x32xbf16>
    %c0_32 = arith.constant 0 : index
    %c0_33 = arith.constant 0 : index
    %43 = vector.load %arg9[%c0_32, %c0_33] : memref<256x288xbf16, #tpu.memory_space<vmem>>, vector<256x32xbf16>
    tpu.vector_store %arg9[%c0_32, %c0_33], %42 {strides = array<i32>} : memref<256x288xbf16, #tpu.memory_space<vmem>>, vector<256x32xbf16>,
    %c0_34 = arith.constant 0 : index
    %c0_35 = arith.constant 0 : index
    %c1_36 = arith.constant 1 : index
    %c0_37 = arith.constant 0 : index
    %44 = vector.load %arg8[%c0_34, %c0_35, %c1_36, %c0_37] : memref<1x18x18x32xbf16, #tpu.memory_space<vmem>>, vector<1x16x16x32xbf16>
    %45 = vector.shape_cast %44 : vector<1x16x16x32xbf16> to vector<256x32xbf16>
    %c0_38 = arith.constant 0 : index
    %c32_39 = arith.constant 32 : index
    %46 = vector.load %arg9[%c0_38, %c32_39] : memref<256x288xbf16, #tpu.memory_space<vmem>>, vector<256x32xbf16>
    tpu.vector_store %arg9[%c0_38, %c32_39], %45 {strides = array<i32>} : memref<256x288xbf16, #tpu.memory_space<vmem>>, vector<256x32xbf16>,
    %c0_40 = arith.constant 0 : index
    %c0_41 = arith.constant 0 : index
    %c2 = arith.constant 2 : index
    %c0_42 = arith.constant 0 : index
    %47 = vector.load %arg8[%c0_40, %c0_41, %c2, %c0_42] : memref<1x18x18x32xbf16, #tpu.memory_space<vmem>>, vector<1x16x16x32xbf16>
    %48 = vector.shape_cast %47 : vector<1x16x16x32xbf16> to vector<256x32xbf16>
    %c0_43 = arith.constant 0 : index
    %c64 = arith.constant 64 : index
    %49 = vector.load %arg9[%c0_43, %c64] : memref<256x288xbf16, #tpu.memory_space<vmem>>, vector<256x32xbf16>
    tpu.vector_store %arg9[%c0_43, %c64], %48 {strides = array<i32>} : memref<256x288xbf16, #tpu.memory_space<vmem>>, vector<256x32xbf16>,
    %c0_44 = arith.constant 0 : index
    %c1_45 = arith.constant 1 : index
    %c0_46 = arith.constant 0 : index
    %c0_47 = arith.constant 0 : index
    %50 = vector.load %arg8[%c0_44, %c1_45, %c0_46, %c0_47] : memref<1x18x18x32xbf16, #tpu.memory_space<vmem>>, vector<1x16x16x32xbf16>
    %51 = vector.shape_cast %50 : vector<1x16x16x32xbf16> to vector<256x32xbf16>
    %c0_48 = arith.constant 0 : index
    %c96 = arith.constant 96 : index
    %52 = vector.load %arg9[%c0_48, %c96] : memref<256x288xbf16, #tpu.memory_space<vmem>>, vector<256x32xbf16>
    tpu.vector_store %arg9[%c0_48, %c96], %51 {strides = array<i32>} : memref<256x288xbf16, #tpu.memory_space<vmem>>, vector<256x32xbf16>,
    %c0_49 = arith.constant 0 : index
    %c1_50 = arith.constant 1 : index
    %c1_51 = arith.constant 1 : index
    %c0_52 = arith.constant 0 : index
    %53 = vector.load %arg8[%c0_49, %c1_50, %c1_51, %c0_52] : memref<1x18x18x32xbf16, #tpu.memory_space<vmem>>, vector<1x16x16x32xbf16>
    %54 = vector.shape_cast %53 : vector<1x16x16x32xbf16> to vector<256x32xbf16>
    %c0_53 = arith.constant 0 : index
    %c128 = arith.constant 128 : index
    %55 = vector.load %arg9[%c0_53, %c128] : memref<256x288xbf16, #tpu.memory_space<vmem>>, vector<256x32xbf16>
    tpu.vector_store %arg9[%c0_53, %c128], %54 {strides = array<i32>} : memref<256x288xbf16, #tpu.memory_space<vmem>>, vector<256x32xbf16>,
    %c0_54 = arith.constant 0 : index
    %c1_55 = arith.constant 1 : index
    %c2_56 = arith.constant 2 : index
    %c0_57 = arith.constant 0 : index
    %56 = vector.load %arg8[%c0_54, %c1_55, %c2_56, %c0_57] : memref<1x18x18x32xbf16, #tpu.memory_space<vmem>>, vector<1x16x16x32xbf16>
    %57 = vector.shape_cast %56 : vector<1x16x16x32xbf16> to vector<256x32xbf16>
    %c0_58 = arith.constant 0 : index
    %c160 = arith.constant 160 : index
    %58 = vector.load %arg9[%c0_58, %c160] : memref<256x288xbf16, #tpu.memory_space<vmem>>, vector<256x32xbf16>
    tpu.vector_store %arg9[%c0_58, %c160], %57 {strides = array<i32>} : memref<256x288xbf16, #tpu.memory_space<vmem>>, vector<256x32xbf16>,
    %c0_59 = arith.constant 0 : index
    %c2_60 = arith.constant 2 : index
    %c0_61 = arith.constant 0 : index
    %c0_62 = arith.constant 0 : index
    %59 = vector.load %arg8[%c0_59, %c2_60, %c0_61, %c0_62] : memref<1x18x18x32xbf16, #tpu.memory_space<vmem>>, vector<1x16x16x32xbf16>
    %60 = vector.shape_cast %59 : vector<1x16x16x32xbf16> to vector<256x32xbf16>
    %c0_63 = arith.constant 0 : index
    %c192 = arith.constant 192 : index
    %61 = vector.load %arg9[%c0_63, %c192] : memref<256x288xbf16, #tpu.memory_space<vmem>>, vector<256x32xbf16>
    tpu.vector_store %arg9[%c0_63, %c192], %60 {strides = array<i32>} : memref<256x288xbf16, #tpu.memory_space<vmem>>, vector<256x32xbf16>,
    %c0_64 = arith.constant 0 : index
    %c2_65 = arith.constant 2 : index
    %c1_66 = arith.constant 1 : index
    %c0_67 = arith.constant 0 : index
    %62 = vector.load %arg8[%c0_64, %c2_65, %c1_66, %c0_67] : memref<1x18x18x32xbf16, #tpu.memory_space<vmem>>, vector<1x16x16x32xbf16>
    %63 = vector.shape_cast %62 : vector<1x16x16x32xbf16> to vector<256x32xbf16>
    %c0_68 = arith.constant 0 : index
    %c224 = arith.constant 224 : index
    %64 = vector.load %arg9[%c0_68, %c224] : memref<256x288xbf16, #tpu.memory_space<vmem>>, vector<256x32xbf16>
    tpu.vector_store %arg9[%c0_68, %c224], %63 {strides = array<i32>} : memref<256x288xbf16, #tpu.memory_space<vmem>>, vector<256x32xbf16>,
    %c0_69 = arith.constant 0 : index
    %c2_70 = arith.constant 2 : index
    %c2_71 = arith.constant 2 : index
    %c0_72 = arith.constant 0 : index
    %65 = vector.load %arg8[%c0_69, %c2_70, %c2_71, %c0_72] : memref<1x18x18x32xbf16, #tpu.memory_space<vmem>>, vector<1x16x16x32xbf16>
    %66 = vector.shape_cast %65 : vector<1x16x16x32xbf16> to vector<256x32xbf16>
    %c0_73 = arith.constant 0 : index
    %c256 = arith.constant 256 : index
    %67 = vector.load %arg9[%c0_73, %c256] : memref<256x288xbf16, #tpu.memory_space<vmem>>, vector<256x32xbf16>
    tpu.vector_store %arg9[%c0_73, %c256], %66 {strides = array<i32>} : memref<256x288xbf16, #tpu.memory_space<vmem>>, vector<256x32xbf16>,
    %c0_74 = arith.constant 0 : index
    %c0_75 = arith.constant 0 : index
    %68 = vector.load %arg9[%c0_74, %c0_75] : memref<256x288xbf16, #tpu.memory_space<vmem>>, vector<256x288xbf16>
    %c0_76 = arith.constant 0 : index
    %c0_77 = arith.constant 0 : index
    %69 = vector.load %arg4[%c0_76, %c0_77] : memref<288x32xbf16, #tpu.memory_space<vmem>>, vector<288x32xbf16>
    %cst_78 = arith.constant dense<0.000000e+00> : vector<256x32xf32>
    %70 = tpu.matmul %68, %69, %cst_78 {dimension_numbers = #tpu.dot_dimension_numbers<[1], [0], [0], [1], [0, 0, 1, 1], [], []>} : vector<256x288xbf16>, vector<288x32xbf16>, vector<256x32xf32> -> vector<256x32xf32>
    %c0_79 = arith.constant 0 : index
    %c0_80 = arith.constant 0 : index
    %71 = vector.load %arg5[%c0_79, %c0_80] : memref<1x32xf32, #tpu.memory_space<vmem>>, vector<1x32xf32>
    %72 = vector.broadcast %71 : vector<1x32xf32> to vector<256x32xf32>
    %73 = arith.addf %70, %72 : vector<256x32xf32>
    %cst_81 = arith.constant 0.000000e+00 : f32
    %74 = vector.broadcast %cst_81 : f32 to vector<256x32xf32>
    %75 = arith.maximumf %73, %74 : vector<256x32xf32>
    %76 = vector.shape_cast %75 : vector<256x32xf32> to vector<16x16x32xf32>
    %77 = vector.shape_cast %76 : vector<16x16x32xf32> to vector<16x8x2x32xf32>
    %cst_82 = arith.constant dense<0xFF800000> : vector<16x8x32xf32>
    %78 = vector.multi_reduction <maximumf>, %77, %cst_82 [2] : vector<16x8x2x32xf32> to vector<16x8x32xf32>
    %79 = vector.shape_cast %78 : vector<16x8x32xf32> to vector<8x2x8x32xf32>
    %cst_83 = arith.constant dense<0xFF800000> : vector<8x8x32xf32>
    %80 = vector.multi_reduction <maximumf>, %79, %cst_83 [1] : vector<8x2x8x32xf32> to vector<8x8x32xf32>
    %81 = vector.shape_cast %80 : vector<8x8x32xf32> to vector<8x256xf32>
    %c0_84 = arith.constant 0 : index
    %c0_85 = arith.constant 0 : index
    %82 = vector.load %arg6[%c0_84, %c0_85] : memref<8x256xf32, #tpu.memory_space<vmem>>, vector<8x256xf32>
    tpu.vector_store %arg6[%c0_84, %c0_85], %81 {strides = array<i32>} : memref<8x256xf32, #tpu.memory_space<vmem>>, vector<8x256xf32>,
    return
  }
  func.func @transform_0(%arg0: i32) -> (i32, i32, i32, i32) {
    %c0_i32 = arith.constant 0 : i32
    %c0_i32_0 = arith.constant 0 : i32
    %c0_i32_1 = arith.constant 0 : i32
    %c0_i32_2 = arith.constant 0 : i32
    return %arg0, %c0_i32, %c0_i32_0, %c0_i32_1 : i32, i32, i32, i32
  }
  func.func @transform_1(%arg0: i32) -> (i32, i32) {
    %c0_i32 = arith.constant 0 : i32
    %c0_i32_0 = arith.constant 0 : i32
    %c0_i32_1 = arith.constant 0 : i32
    return %c0_i32, %c0_i32_0 : i32, i32
  }
  func.func @transform_2(%arg0: i32) -> (i32, i32) {
    %c0_i32 = arith.constant 0 : i32
    %c0_i32_0 = arith.constant 0 : i32
    %c0_i32_1 = arith.constant 0 : i32
    return %c0_i32, %c0_i32_0 : i32, i32
  }
  func.func @transform_3(%arg0: i32) -> (i32, i32) {
    %c0_i32 = arith.constant 0 : i32
    %c0_i32_0 = arith.constant 0 : i32
    %c0_i32_1 = arith.constant 0 : i32
    return %c0_i32, %c0_i32_0 : i32, i32
  }
  func.func @transform_4(%arg0: i32) -> (i32, i32) {
    %c0_i32 = arith.constant 0 : i32
    %c0_i32_0 = arith.constant 0 : i32
    %c0_i32_1 = arith.constant 0 : i32
    return %c0_i32, %c0_i32_0 : i32, i32
  }
  func.func @transform_5(%arg0: i32) -> (i32, i32) {
    %c0_i32 = arith.constant 0 : i32
    %c0_i32_0 = arith.constant 0 : i32
    return %arg0, %c0_i32 : i32, i32
  }
}

</mosaic_0001>

<bundles_post_ra>
// kernel: conv_encoder_forward.1
= control target key start
LH: loop header
LB: loop body
LE: loop exit
PB: predicated region body
PF: predicated region fallthrough
CT: control target
= control target key end

     0   :  { %s9076_s18 = smov 0   ;;  %s12250_s0 = inlined_call_operand.vmem [shape: bf16[2,18,18,4], index: 0, kind: input, shape index: {}]   ;;  %s12251_s1 = inlined_call_operand.vmem [shape: bf16[36,32], index: 1, kind: input, shape index: {}]   ;;  %s12252_s2 = inlined_call_operand.vmem [shape: f32[1,32], index: 2, kind: input, shape index: {}]   ;;  %s12253_s3 = inlined_call_operand.vmem [shape: bf16[288,32], index: 3, kind: input, shape index: {}]   ;;  %s12254_s4 = inlined_call_operand.vmem [shape: f32[1,32], index: 4, kind: input, shape index: {}]   ;;  %s12255_s5 = inlined_call_operand.vmem [shape: f32[16,256], index: 5, kind: output, shape index: {}]  }
   0x1 LB: > { %s8278_s19 = sadd.s32 4294967295, %s9031_s18   ;;  %p8282_p0 = scmp.ge.s32.totalorder %s9031_s18, 1  ;;  %s9031_s18 = sphi %s9076_s18, %s15_s18  }
   0x2   : > { %p187_p1 = scmp.lt.s32.totalorder %s9031_s18, 3 }
   0x4   : > { %p188_p2 = pnand %p8282_p0, %p187_p1 }
   0x6   : > { %191 = sbr.rel (%p188_p2) target bundleno = 1340 (0x53c), region = 40 }
   0xd   : > { %p215_p3 = scmp.lt.s32.totalorder %s8278_s19, 1  ;;  %vm376_vm0 = vcmask 31744   ;;  %vm909_vm1 = vcmask 1042432   ;;  %vm910_vm2 = vcmask 1046532   ;;  %vm393_vm3 = vsmask.f32 3328 }
   0xe   : > { %vm394_vm4 = vsmask.f32 7440  ;;  %vm9110_vm5 = vmor %vm909_vm1, %vm910_vm2  ;;  %s9033_s24 = smov 12   ;;  %s9034_s25 = smov 20   ;;  %vm1705_vm7 = vcmask 1041408   ;;  %vm876_vm8 = vcmask 64544  }
   0xf   : > { %s12374_s19 = smov (!%p215_p3, %s8278_s19), 1  ;;  %vm9147_vm6 = vmor %vm393_vm3, %vm394_vm4  ;;  %s9035_s26 = smov 8   ;;  %vm1120_vm9 = vcmask 97344   ;;  %vm1190_vm10 = vcmask 130144   ;;  %vm1282_vm11 = vcmask 162944   ;;  %vm1358_vm12 = vcmask 195744  }
  0x10   : > { %s8912_s20 = smul.u32 216, %s12374_s19  ;;  %s9036_s27 = smov 4   ;;  %vm1428_vm13 = vcmask 228544   ;;  %vm1520_vm14 = vcmask 261344   ;;  %vm1596_vm15 = vcmask 294144   ;;  %vm1902_vm1 = vcmask 257024  }
  0x11   : > { %s9037_s30 = smov 16   ;;  %s9038_s8 = smov 24   ;;  %vm1905_vm2 = vcmask 253952   ;;  %vm2379_vm3 = vsmask.f32 7938 }
  0x12   : > { %s9090_s23 = scalar_lea.vmem %s12250_s0, %s8912_s20  ;;  %s9039_s9 = smov 28   ;;  %vm2054_vm4 = vsmask.f32 256 }
  0x13   : > { %v9093_v0 = vld [vmem:[%s9090_s23 + $0x18] sm:$0xf]  ;;  %v9096_v1 = vld [vmem:[%s9090_s23 + $0x1c] sm:$0xf]  ;;  %v229_v2 = vld [vmem:[%s9090_s23 + $0xc] sm:$0xf] }
  0x14   : > { %v9101_v3 = vcombine.low %v9093_v0, %v9096_v1  ;;  %v445_v4 = vshrl.u32 %v9093_v0, 16  ;;  %v448_v5 = vshll.u32 %v9093_v0, 16  ;;  %v458_v6 = vshrl.u32 %v9096_v1, 16  ;;  %v230_v7 = vld [vmem:[%s9090_s23 + $0x10] sm:$0xf]  ;;  %s9040_s10 = smov 32  }
  0x15   : > { %v8287_v8 = vcombine.low %v229_v2, %v230_v7  ;;  %v421_v9 = vshrl.u32 %v229_v2, 16  ;;  %v424_v10 = vshll.u32 %v229_v2, 16  ;;  %v430_v11 = vshll.u32 %v230_v7, 16  ;;  %v231_v12 = vld [vmem:[%s9090_s23 + $0x14] sm:$0x1]  ;;  %s9042_s13 = smov 64  }
  0x16   : > { %1144 = vrot.lane.b32.xlu1 %v9101_v3, %s9033_s24  ;;  %v434_v14 = vshrl.u32 %v230_v7, 16  ;;  %379 = vst.msk [vmem:[#allocation2 + $0x10] sm:$0xff] %vm376_vm0, %v9101_v3  ;;  %v8319_v15 = vrot.slane %v229_v2, 9  ;;  %v921_v16 = vrot.slane %v230_v7, 5  ;;  %v924_v17 = vrot.slane %v231_v12, 5  ;;  %s9043_s16 = smov 96  }
  0x17   : > { %v9119_v18 = vld [vmem:[%s9090_s23] sm:$0xf]  ;;  %v423_v19 = vrot.slane %v421_v9, 4  ;;  %v426_v20 = vrot.slane %v424_v10, 5  ;;  %1142 = vrot.lane.b32.xlu0 %v8287_v8, %s9033_s24  ;;  %378 = vst.msk [vmem:[#allocation2 + $0x8] sm:$0xff] %vm376_vm0, %v8287_v8  ;;  %v8320_v45 = vrot.slane %v9093_v0, 9 }
  0x18   : > { %v9124_v21 = vld [vmem:[%s9090_s23 + $0x4] sm:$0xf]  ;;  %v228_v22 = vld [vmem:[%s9090_s23 + $0x8] sm:$0x1]  ;;  %v436_v23 = vrot.slane %v434_v14, 4  ;;  %v922_v24 = vsel %vm9110_vm5, %v8319_v15, %v921_v16  ;;  %v923_v25 = vrot.slane %v921_v16, 4 }
  0x19   : > { %v8318_v26 = vrot.slane %v9119_v18, 9  ;;  %v914_v27 = vrot.slane %v9124_v21, 5  ;;  %v917_v28 = vrot.slane %v228_v22, 5  ;;  %v397_v29 = vshrl.u32 %v9119_v18, 16  ;;  %v234_v35 = vld [vmem:[%s9090_s23 + $0x20] sm:$0x1] }
  0x1a   : > { %v400_v30 = vshll.u32 %v9119_v18, 16  ;;  %v925_v31 = vsel %vm9110_vm5, %v923_v25, %v924_v17  ;;  %v406_v32 = vshll.u32 %v9124_v21, 16  ;;  %v410_v33 = vshrl.u32 %v9124_v21, 16  ;;  %v9161_v7 = vld [vmem:[%s9090_s23 + $0x24] sm:$0xf] }
  0x1b   : > { %v416_v34 = vshll.u32 %v228_v22, 16  ;;  %v8335_v36 = vcombine.low %v922_v24, %v925_v31  ;;  %v915_v37 = vsel %vm9110_vm5, %v8318_v26, %v914_v27  ;;  %v916_v38 = vrot.slane %v914_v27, 4 }
  0x1c   : > { %v399_v39 = vrot.slane %v397_v29, 4  ;;  %v402_v40 = vrot.slane %v400_v30, 5  ;;  %v408_v41 = vrot.slane %v406_v32, 5  ;;  %v412_v42 = vrot.slane %v410_v33, 4  ;;  %v9198_v33 = vld [vmem:[%s9090_s23 + $0x30] sm:$0xf] }
  0x1d   : > { %v418_v43 = vrot.slane %v416_v34, 5  ;;  %1310 = vrot.lane.b32.xlu0 %v8335_v36, %s9034_s25  ;;  %v918_v44 = vsel %vm9110_vm5, %v916_v38, %v917_v28  ;;  %v928_v46 = vrot.slane %v9096_v1, 5  ;;  %v931_v47 = vrot.slane %v234_v35, 5  ;;  %v9204_v38 = vld [vmem:[%s9090_s23 + $0x34] sm:$0xf] }
  0x1e   : > { %v8334_v48 = vcombine.low %v915_v37, %v918_v44  ;;  %v403_v49 = vor.u32 %v402_v40, %v399_v39  ;;  %v413_v50 = vor.u32 %v412_v42, %v408_v41  ;;  %v427_v51 = vor.u32 %v426_v20, %v423_v19 }
  0x1f   : > { %v929_v53 = vsel %vm9110_vm5, %v8320_v45, %v928_v46  ;;  %v930_v54 = vrot.slane %v928_v46, 4  ;;  %v432_v55 = vrot.slane %v430_v11, 5  ;;  %v440_v56 = vshll.u32 %v231_v12, 16  ;;  %v9215_v46 = vld [vmem:[%s9090_s23 + $0x38] sm:$0x1] }
  0x20   : > { %1072 = vrot.lane.b32.xlu1 %v8334_v48, %s9035_s26  ;;  %v404_v57 = vrot.slane %v403_v49, 4  ;;  %v414_v58 = vrot.slane %v413_v50, 4  ;;  %v428_v59 = vrot.slane %v427_v51, 4  ;;  %v447_v60 = vrot.slane %v445_v4, 4 }
  0x21   : > { %v932_v61 = vsel %vm9110_vm5, %v930_v54, %v931_v47  ;;  %v437_v62 = vor.u32 %v436_v23, %v432_v55  ;;  %v442_v63 = vrot.slane %v440_v56, 5  ;;  %v450_v2 = vrot.slane %v448_v5, 5  ;;  %v9173_v5 = vld [vmem:[%s9090_s23 + $0x28] sm:$0xf]  ;;  %v8944_v47 = vld [vmem:[%s12251_s1] sm:$0xff]  }
  0x22   : > { %v409_v8 = vsel %vm9147_vm6, %v404_v57, %v408_v41  ;;  %v419_v9 = vsel %vm9147_vm6, %v414_v58, %v418_v43  ;;  %v9167_v10 = vcombine.low %v929_v53, %v932_v61  ;;  %v433_v4 = vsel %vm9147_vm6, %v428_v59, %v432_v55  ;;  %v9228_v53 = vld [vmem:[%s9090_s23 + $0x3c] sm:$0xf]  ;;  %v9232_v56 = vld [vmem:[%s9090_s23 + $0x40] sm:$0xf]  ;;  %8821 = vmatprep.subr.bf16.mxu0 %v8944_v47 }
  0x23   : > { %v8302_v11 = vcombine.low %v409_v8, %v419_v9  ;;  %v438_v12 = vrot.slane %v437_v62, 4  ;;  %v451_v14 = vor.u32 %v450_v2, %v447_v60  ;;  %v454_v0 = vshll.u32 %v9096_v1, 16  ;;  %v9188_v1 = vld [vmem:[%s9090_s23 + $0x2c] sm:$0x1]  ;;  %8822 = vmatpush3.bf16.msra.mxu0 %v8944_v47 }
  0x24   : > { %1074 = vrot.lane.b32.xlu1 %v8335_v36, %s9035_s26  ;;  %v460_v15 = vrot.slane %v458_v6, 4  ;;  %v464_v16 = vshll.u32 %v234_v35, 16  ;;  %v9180_v17 = vcombine.low %v9161_v7, %v9173_v5  ;;  %v469_v19 = vshrl.u32 %v9161_v7, 16  ;;  %v8945_v8 = vld [vmem:[%s12251_s1 + $0x8] sm:$0xff]  }
  0x25   : > { %828 = vrot.lane.b32.xlu0 %v8302_v11, %s9036_s27  ;;  %v443_v20 = vsel %vm9147_vm6, %v438_v12, %v442_v63  ;;  %v452_v22 = vrot.slane %v451_v14, 4  ;;  %v456_v23 = vrot.slane %v454_v0, 5  ;;  %v472_v24 = vshll.u32 %v9161_v7, 16  ;;  %8823 = vmatprep.subr.bf16.mxu0 %v8945_v8 }
  0x26   : > { %v8303_v6 = vcombine.low %v433_v4, %v443_v20  ;;  %v482_v25 = vshrl.u32 %v9173_v5, 16  ;;  %380 = vst.msk [vmem:[#allocation2 + $0x18] sm:$0xff] %vm376_vm0, %v9180_v17  ;;  %v471_v26 = vrot.slane %v469_v19, 4  ;;  %v466_v28 = vrot.slane %v464_v16, 5 }
  0x27   : > { %v461_v27 = vor.u32 %v460_v15, %v456_v23  ;;  %v474_v29 = vrot.slane %v472_v24, 5  ;;  %v478_v30 = vshll.u32 %v9173_v5, 16  ;;  %v488_v32 = vshll.u32 %v9188_v1, 16  ;;  %8824 = vmatpush3.bf16.msra.mxu0 %v8945_v8  ;;  %v9275_v24 = vld [vmem:[%s9090_s23 + $0x48] sm:$0xf] }
  0x28   : > { %1312 = vrot.lane.b32.xlu1 %v9167_v10, %s9034_s25  ;;  %v484_v31 = vrot.slane %v482_v25, 4  ;;  %v457_v34 = vsel %vm9147_vm6, %v452_v22, %v456_v23  ;;  %v935_v40 = vrot.slane %v9173_v5, 5  ;;  %v9209_v41 = vcombine.low %v9198_v33, %v9204_v38 }
  0x29   : > { %830 = vrot.lane.b32.xlu0 %v8303_v6, %s9036_s27  ;;  %v462_v35 = vrot.slane %v461_v27, 4  ;;  %v475_v36 = vor.u32 %v474_v29, %v471_v26  ;;  %v480_v37 = vrot.slane %v478_v30, 5  ;;  %v490_v39 = vrot.slane %v488_v32, 5  ;;  %v9282_v27 = vld [vmem:[%s9090_s23 + $0x4c] sm:$0xf] }
  0x2a   : > { %v493_v45 = vshrl.u32 %v9198_v33, 16  ;;  %v8321_v49 = vrot.slane %v9161_v7, 9  ;;  %v496_v50 = vshll.u32 %v9198_v33, 16  ;;  %v506_v51 = vshrl.u32 %v9204_v38, 16  ;;  %381 = vst.msk [vmem:[#allocation2 + $0x20] sm:$0xff] %vm376_vm0, %v9209_v41 }
  0x2b   : > { %v467_v42 = vsel %vm9147_vm6, %v462_v35, %v466_v28  ;;  %v476_v43 = vrot.slane %v475_v36, 4  ;;  %v485_v44 = vor.u32 %v484_v31, %v480_v37  ;;  %v938_v57 = vrot.slane %v9188_v1, 5  ;;  %v9244_v7 = vld [vmem:[%s9090_s23 + $0x44] sm:$0x1]  ;;  %v9291_v32 = vld [vmem:[%s9090_s23 + $0x50] sm:$0x1] }
  0x2c   : > { %v9220_v48 = vcombine.low %v457_v34, %v467_v42  ;;  %v495_v55 = vrot.slane %v493_v45, 4  ;;  %v498_v58 = vrot.slane %v496_v50, 5  ;;  %v502_v59 = vshll.u32 %v9204_v38, 16  ;;  %v9318_v50 = vld [vmem:[%s9090_s23 + $0x54] sm:$0xf] }
  0x2d   : > { %1234 = vrot.lane.b32.xlu0 %v8303_v6, %s9037_s30  ;;  %v486_v54 = vrot.slane %v485_v44, 4  ;;  %v508_v60 = vrot.slane %v506_v51, 4  ;;  %v481_v61 = vsel %vm9147_vm6, %v476_v43, %v480_v37  ;;  %v937_v63 = vrot.slane %v935_v40, 4  ;;  %v9321_v51 = vld [vmem:[%s9090_s23 + $0x58] sm:$0xf] }
  0x2e   : > { %1236 = vrot.lane.b32.xlu1 %v9220_v48, %s9037_s30  ;;  %v512_v2 = vshll.u32 %v9215_v46, 16  ;;  %v9249_v9 = vrot.slane %v502_v59, 5  ;;  %v8322_v4 = vrot.slane %v9198_v33, 9  ;;  %v499_v11 = vor.u32 %v498_v58, %v495_v55 }
  0x2f   : > { %v491_v62 = vsel %vm9147_vm6, %v486_v54, %v490_v39  ;;  %v942_v12 = vrot.slane %v9204_v38, 5  ;;  %v9257_v14 = vcombine.low %v9228_v53, %v9232_v56  ;;  %v517_v0 = vshrl.u32 %v9228_v53, 16 }
  0x30   : > { %v9262_v5 = vcombine.low %v481_v61, %v491_v62  ;;  %v509_v15 = vor.u32 %v508_v60, %v9249_v9  ;;  %v530_v16 = vshrl.u32 %v9232_v56, 16  ;;  %v9267_v19 = vrot.slane %v512_v2, 5 }
  0x31   : > { %1380 = vrot.lane.b32.xlu0 %v9101_v3, %s9038_s8  ;;  %v520_v3 = vshll.u32 %v9228_v53, 16  ;;  %v945_v20 = vrot.slane %v9215_v46, 5  ;;  %382 = vst.msk [vmem:[#allocation2 + $0x28] sm:$0xff] %vm376_vm0, %v9257_v14  ;;  %v526_v22 = vshll.u32 %v9232_v56, 16  ;;  %v536_v23 = vshll.u32 %v9244_v7, 16 }
  0x32   : > { %1382 = vrot.lane.b32.xlu1 %v9180_v17, %s9038_s8  ;;  %v936_v1 = vsel %vm9110_vm5, %v8321_v49, %v935_v40  ;;  %v939_v6 = vsel %vm9110_vm5, %v937_v63, %v938_v57  ;;  %v519_v25 = vrot.slane %v517_v0, 4  ;;  %v9286_v28 = vrot.slane %v499_v11, 4 }
  0x33   : > { %v522_v26 = vrot.slane %v520_v3, 5  ;;  %v944_v29 = vrot.slane %v942_v12, 4  ;;  %v9288_v30 = vrot.slane %v526_v22, 5  ;;  %v532_v31 = vrot.slane %v530_v16, 4 }
  0x34   : > { %v9295_v33 = vrot.slane %v509_v15, 4  ;;  %v9297_v34 = vrot.slane %v536_v23, 5  ;;  %v9299_v35 = vcombine.low %v936_v1, %v939_v6  ;;  %v8323_v36 = vrot.slane %v9228_v53, 9 }
  0x35   : > { %1472 = vrot.lane.b32.xlu0 %v9220_v48, %s9039_s9  ;;  %v9304_v37 = vcombine.low %v9275_v24, %v9282_v27  ;;  %v541_v38 = vshrl.u32 %v9275_v24, 16  ;;  %v523_v39 = vor.u32 %v522_v26, %v519_v25  ;;  %v949_v40 = vrot.slane %v9232_v56, 5 }
  0x36   : > { %1474 = vrot.lane.b32.xlu1 %v9262_v5, %s9039_s9  ;;  %v952_v42 = vrot.slane %v9244_v7, 5  ;;  %v544_v43 = vshll.u32 %v9275_v24, 16  ;;  %v533_v44 = vor.u32 %v532_v31, %v9288_v30  ;;  %v554_v45 = vshrl.u32 %v9282_v27, 16  ;;  %v9384_v31 = vld [vmem:[%s9090_s23 + $0x64] sm:$0xf] }
  0x37   : > { %383 = vst.msk [vmem:[#allocation2 + $0x30] sm:$0xff] %vm376_vm0, %v9304_v37  ;;  %v543_v47 = vrot.slane %v541_v38, 4  ;;  %v550_v49 = vshll.u32 %v9282_v27, 16  ;;  %v560_v54 = vshll.u32 %v9291_v32, 16  ;;  %v943_v57 = vsel %vm9110_vm5, %v8322_v4, %v942_v12 }
  0x38   : > { %v546_v53 = vrot.slane %v544_v43, 5  ;;  %v556_v56 = vrot.slane %v554_v45, 4  ;;  %v524_v58 = vrot.slane %v523_v39, 4  ;;  %v951_v59 = vrot.slane %v949_v40, 4 }
  0x39   : > { %1548 = vrot.lane.b32.xlu0 %v9167_v10, %s9040_s10  ;;  %v552_v55 = vrot.slane %v550_v49, 5  ;;  %v534_v61 = vrot.slane %v533_v44, 4  ;;  %v956_v63 = vrot.slane %v9282_v27, 5  ;;  %v562_v2 = vrot.slane %v560_v54, 5  ;;  %v253_v49 = vld [vmem:[%s9090_s23 + $0x6c] sm:$0xf] }
  0x3a   : > { %832 = vrot.lane.b32.xlu1 %v9220_v48, %s9036_s27  ;;  %v547_v60 = vor.u32 %v546_v53, %v543_v47  ;;  %v9333_v48 = vcombine.low %v9318_v50, %v9321_v51  ;;  %v565_v7 = vshrl.u32 %v9318_v50, 16  ;;  %v568_v8 = vshll.u32 %v9318_v50, 16  ;;  %v9413_v47 = vld [vmem:[%s9090_s23 + $0x68] sm:$0x1] }
  0x3b   : > { %v557_v62 = vor.u32 %v556_v56, %v552_v55  ;;  %v578_v4 = vshrl.u32 %v9321_v51, 16  ;;  %v8324_v0 = vrot.slane %v9275_v24, 9  ;;  %v574_v15 = vshll.u32 %v9321_v51, 16 }
  0x3c   : > { %v548_v11 = vrot.slane %v547_v60, 4  ;;  %384 = vst.msk [vmem:[#allocation2 + $0x38] sm:$0xff] %vm376_vm0, %v9333_v48  ;;  %v958_v3 = vrot.slane %v956_v63, 4  ;;  %v959_v16 = vrot.slane %v9291_v32, 5  ;;  %v567_v22 = vrot.slane %v565_v7, 4 }
  0x3d   : > { %1550 = vrot.lane.b32.xlu0 %v9299_v35, %s9040_s10  ;;  %v558_v12 = vrot.slane %v557_v62, 4  ;;  %v570_v23 = vrot.slane %v568_v8, 5  ;;  %v505_v24 = vsel %vm9147_vm6, %v9286_v28, %v9249_v9  ;;  %v515_v1 = vsel %vm9147_vm6, %v9295_v33, %v9267_v19 }
  0x3e   : > { %834 = vrot.lane.b32.xlu1 %v9262_v5, %s9036_s27  ;;  %v946_v6 = vsel %vm9110_vm5, %v944_v29, %v945_v20  ;;  %v950_v25 = vsel %vm9110_vm5, %v8323_v36, %v949_v40  ;;  %v529_v9 = vsel %vm9147_vm6, %v524_v58, %v9288_v30  ;;  %v953_v19 = vsel %vm9110_vm5, %v951_v59, %v952_v42  ;;  %v250_v30 = vld [vmem:[%s9090_s23 + $0x60] sm:$0xf] }
  0x3f   : > { %v9371_v26 = vrot.slane %v574_v15, 5  ;;  %v580_v46 = vrot.slane %v578_v4, 4  ;;  %v539_v20 = vsel %vm9147_vm6, %v534_v61, %v9297_v34  ;;  %v553_v27 = vsel %vm9147_vm6, %v548_v11, %v552_v55 }
  0x40   : > { %v563_v28 = vsel %vm9147_vm6, %v558_v12, %v562_v2  ;;  %v957_v29 = vsel %vm9110_vm5, %v8324_v0, %v956_v63  ;;  %v960_v32 = vsel %vm9110_vm5, %v958_v3, %v959_v16  ;;  %v571_v33 = vor.u32 %v570_v23, %v567_v22  ;;  %v255_v2 = vld [vmem:[%s9090_s23 + $0x74] sm:$0x1] }
  0x41   : > { %1076 = vrot.lane.b32.xlu0 %v9167_v10, %s9035_s26  ;;  %v9362_v10 = vld [vmem:[%s9090_s23 + $0x5c] sm:$0x1]  ;;  %v9390_v36 = vcombine.low %v250_v30, %v9384_v31  ;;  %v9396_v38 = vcombine.low %v505_v24, %v515_v1  ;;  %v9398_v39 = vcombine.low %v943_v57, %v946_v6  ;;  %v9400_v40 = vcombine.low %v950_v25, %v953_v19  ;;  %v254_v57 = vld [vmem:[%s9090_s23 + $0x70] sm:$0xf] }
  0x42   : > { %1078 = vrot.lane.b32.xlu1 %v9299_v35, %s9035_s26  ;;  %v584_v34 = vshll.u32 %v9362_v10, 16  ;;  %v581_v42 = vor.u32 %v580_v46, %v9371_v26  ;;  %v9405_v43 = vcombine.low %v529_v9, %v539_v20  ;;  %v9407_v44 = vcombine.low %v553_v27, %v563_v28 }
  0x43   : > { %385 = vst.msk [vmem:[#allocation2 + $0x40] sm:$0xff] %vm376_vm0, %v9390_v36  ;;  %v8325_v45 = vrot.slane %v9318_v50, 9  ;;  %v9416_v53 = vrot.slane %v571_v33, 4  ;;  %v963_v55 = vrot.slane %v9321_v51, 5  ;;  %v966_v56 = vrot.slane %v9362_v10, 5 }
  0x44   : > { %v9418_v54 = vrot.slane %v584_v34, 5  ;;  %v589_v58 = vshrl.u32 %v250_v30, 16  ;;  %v8326_v59 = vrot.slane %v250_v30, 9  ;;  %v970_v50 = vrot.slane %v9384_v31, 5  ;;  %v257_v34 = vld [vmem:[%s9090_s23 + $0x7c] sm:$0xf] }
  0x45   : > { %1146 = vrot.lane.b32.xlu0 %v9180_v17, %s9033_s24  ;;  %v9409_v17 = vcombine.low %v957_v29, %v960_v32  ;;  %v973_v60 = vrot.slane %v9413_v47, 5  ;;  %v582_v61 = vrot.slane %v581_v42, 4  ;;  %v592_v62 = vshll.u32 %v250_v30, 16  ;;  %v256_v29 = vld [vmem:[%s9090_s23 + $0x78] sm:$0xf] }
  0x46   : > { %1148 = vrot.lane.b32.xlu1 %v9209_v41, %s9033_s24  ;;  %v9429_v63 = vcombine.low %v253_v49, %v254_v57  ;;  %v613_v51 = vshrl.u32 %v253_v49, 16  ;;  %v971_v7 = vsel %vm9110_vm5, %v8326_v59, %v970_v50  ;;  %v972_v8 = vrot.slane %v970_v50, 4 }
  0x47   : > { %v626_v4 = vshrl.u32 %v254_v57, 16  ;;  %v964_v11 = vsel %vm9110_vm5, %v8325_v45, %v963_v55  ;;  %v965_v12 = vrot.slane %v963_v55, 4  ;;  %v622_v15 = vshll.u32 %v254_v57, 16 }
  0x48   : > { %386 = vst.msk [vmem:[#allocation2 + $0x48] sm:$0xff] %vm376_vm0, %v9429_v63  ;;  %v615_v0 = vrot.slane %v613_v51, 4  ;;  %v974_v3 = vsel %vm9110_vm5, %v972_v8, %v973_v60  ;;  %v632_v23 = vshll.u32 %v255_v2, 16  ;;  %v577_v24 = vsel %vm9147_vm6, %v9416_v53, %v9371_v26 }
  0x49   : > { %1238 = vrot.lane.b32.xlu0 %v9262_v5, %s9037_s30  ;;  %v616_v5 = vshll.u32 %v253_v49, 16  ;;  %v628_v22 = vrot.slane %v626_v4, 4  ;;  %v602_v1 = vshrl.u32 %v9384_v31, 16  ;;  %v9449_v6 = vcombine.low %v971_v7, %v974_v3  ;;  %v8947_v3 = vld [vmem:[%s12251_s1 + $0x10] ss:$0 sps:$4 sm:$0x33]  }
  0x4a   : > { %1240 = vrot.lane.b32.xlu1 %v9396_v38, %s9037_s30  ;;  %v9451_v25 = vrot.slane %v589_v58, 4  ;;  %v9453_v10 = vrot.slane %v592_v62, 5  ;;  %v634_v19 = vrot.slane %v632_v23, 5  ;;  %v8286_v20 = vcombine.low %v9119_v18, %v9124_v21  ;;  %v259_v62 = vld [vmem:[%s9090_s23 + $0x84] sm:$0xf]  ;;  %8911 = vmatprep.subr.msk.bf16.mxu0 %vm1705_vm7, %v8947_v3 }
  0x4b   : > { %v618_v16 = vrot.slane %v616_v5, 5  ;;  %v8327_v27 = vrot.slane %v253_v49, 9  ;;  %v977_v28 = vrot.slane %v254_v57, 5  ;;  %v587_v26 = vsel %vm9147_vm6, %v582_v61, %v9418_v54  ;;  %v258_v54 = vld [vmem:[%s9090_s23 + $0x80] sm:$0x1] }
  0x4c   : > { %v598_v30 = vshll.u32 %v9384_v31, 16  ;;  %v980_v33 = vrot.slane %v255_v2, 5  ;;  %v967_v18 = vsel %vm9110_vm5, %v965_v12, %v966_v56  ;;  %377 = vst.msk [vmem:[#allocation2] sm:$0xff] %vm376_vm0, %v8286_v20  ;;  %v9472_v45 = vrot.slane %v602_v1, 4  ;;  %v260_v5 = vld [vmem:[%s9090_s23 + $0x88] sm:$0xf] }
  0x4d   : > { %1314 = vrot.lane.b32.xlu0 %v9299_v35, %s9034_s25  ;;  %v624_v35 = vrot.slane %v622_v15, 5  ;;  %v619_v9 = vor.u32 %v618_v16, %v615_v0  ;;  %v979_v42 = vrot.slane %v977_v28, 4  ;;  %v9476_v49 = vcombine.low %v256_v29, %v257_v34 }
  0x4e   : > { %1316 = vrot.lane.b32.xlu1 %v9398_v39, %s9034_s25  ;;  %v637_v53 = vshrl.u32 %v256_v29, 16  ;;  %v640_v57 = vshll.u32 %v256_v29, 16  ;;  %v650_v58 = vshrl.u32 %v257_v34, 16  ;;  %v9485_v59 = vcombine.low %v577_v24, %v587_v26 }
  0x4f   : > { %v629_v46 = vor.u32 %v628_v22, %v624_v35  ;;  %v620_v32 = vrot.slane %v619_v9, 4  ;;  %v981_v56 = vsel %vm9110_vm5, %v979_v42, %v980_v33  ;;  %387 = vst.msk [vmem:[#allocation2 + $0x50] sm:$0xff] %vm376_vm0, %v9476_v49  ;;  %v646_v2 = vshll.u32 %v257_v34, 16 }
  0x50   : > { %v639_v61 = vrot.slane %v637_v53, 4  ;;  %v642_v51 = vrot.slane %v640_v57, 5  ;;  %v652_v7 = vrot.slane %v650_v58, 4  ;;  %v656_v8 = vshll.u32 %v258_v54, 16  ;;  %v262_v53 = vld [vmem:[%s9090_s23 + $0x90] sm:$0xf] }
  0x51   : > { %1384 = vrot.lane.b32.xlu0 %v9209_v41, %s9038_s8  ;;  %v630_v21 = vrot.slane %v629_v46, 4  ;;  %v978_v41 = vsel %vm9110_vm5, %v8327_v27, %v977_v28  ;;  %v625_v31 = vsel %vm9147_vm6, %v620_v32, %v624_v35  ;;  %v9497_v4 = vcombine.low %v964_v11, %v967_v18  ;;  %v261_v27 = vld [vmem:[%s9090_s23 + $0x8c] sm:$0x1]  ;;  %v263_v58 = vld [vmem:[%s9090_s23 + $0x94] sm:$0xf] }
  0x52   : > { %1386 = vrot.lane.b32.xlu1 %v9257_v14, %s9038_s8  ;;  %v9489_v60 = vcombine.low %v978_v41, %v981_v56  ;;  %v8328_v12 = vrot.slane %v256_v29, 9  ;;  %v984_v0 = vrot.slane %v257_v34, 5  ;;  %v987_v15 = vrot.slane %v258_v54, 5 }
  0x53   : > { %v635_v55 = vsel %vm9147_vm6, %v630_v21, %v634_v19  ;;  %v643_v16 = vor.u32 %v642_v51, %v639_v61  ;;  %v648_v22 = vrot.slane %v646_v2, 5  ;;  %v658_v23 = vrot.slane %v656_v8, 5 }
  0x54   : > { %v9487_v50 = vcombine.low %v625_v31, %v635_v55  ;;  %v9502_v24 = vcombine.low %v259_v62, %v260_v5  ;;  %v985_v11 = vsel %vm9110_vm5, %v8328_v12, %v984_v0  ;;  %v986_v1 = vrot.slane %v984_v0, 4 }
  0x55   : > { %1476 = vrot.lane.b32.xlu0 %v9396_v38, %s9039_s9  ;;  %v661_v35 = vshrl.u32 %v259_v62, 16  ;;  %v664_v9 = vshll.u32 %v259_v62, 16  ;;  %v644_v19 = vrot.slane %v643_v16, 4  ;;  %v653_v46 = vor.u32 %v652_v7, %v648_v22  ;;  %v264_v7 = vld [vmem:[%s9090_s23 + $0x98] sm:$0x1] }
  0x56   : > { %1478 = vrot.lane.b32.xlu1 %v9405_v43, %s9039_s9  ;;  %v674_v20 = vshrl.u32 %v260_v5, 16  ;;  %388 = vst.msk [vmem:[#allocation2 + $0x58] sm:$0xff] %vm376_vm0, %v9502_v24  ;;  %v9513_v28 = vrot.slane %v598_v30, 5  ;;  %v988_v29 = vsel %vm9110_vm5, %v986_v1, %v987_v15  ;;  %v1707_v26 = vsel %vm1705_vm7, %v8947_v3, 0 }
  0x57   : > { %v663_v32 = vrot.slane %v661_v35, 4  ;;  %v649_v33 = vsel %vm9147_vm6, %v644_v19, %v648_v22  ;;  %v654_v34 = vrot.slane %v653_v46, 4  ;;  %v9519_v18 = vcombine.low %v985_v11, %v988_v29  ;;  %8826 = vmatpush3.bf16.msra.mxu0 %v1707_v26  ;;  %v265_v46 = vld [vmem:[%s9090_s23 + $0x9c] sm:$0xf] }
  0x58   : > { %v666_v21 = vrot.slane %v664_v9, 5  ;;  %v670_v30 = vshll.u32 %v260_v5, 16  ;;  %v676_v41 = vrot.slane %v674_v20, 4  ;;  %v680_v42 = vshll.u32 %v261_v27, 16 }
  0x59   : > { %1552 = vrot.lane.b32.xlu0 %v9398_v39, %s9040_s10  ;;  %v8329_v31 = vrot.slane %v259_v62, 9  ;;  %v659_v54 = vsel %vm9147_vm6, %v654_v34, %v658_v23  ;;  %v991_v56 = vrot.slane %v260_v5, 5  ;;  %v994_v57 = vrot.slane %v261_v27, 5 }
  0x5a   : > { %1554 = vrot.lane.b32.xlu1 %v9400_v40, %s9040_s10  ;;  %v667_v55 = vor.u32 %v666_v21, %v663_v32  ;;  %v9529_v61 = vcombine.low %v649_v33, %v659_v54  ;;  %v672_v51 = vrot.slane %v670_v30, 5  ;;  %v9531_v2 = vcombine.low %v262_v53, %v263_v58  ;;  %v266_v32 = vld [vmem:[%s9090_s23 + $0xa0] sm:$0xf] }
  0x5b   : > { %v992_v62 = vsel %vm9110_vm5, %v8329_v31, %v991_v56  ;;  %v993_v12 = vrot.slane %v991_v56, 4  ;;  %v685_v0 = vshrl.u32 %v262_v53, 16  ;;  %v688_v15 = vshll.u32 %v262_v53, 16 }
  0x5c   : > { %v668_v8 = vrot.slane %v667_v55, 4  ;;  %v677_v5 = vor.u32 %v676_v41, %v672_v51  ;;  %v698_v3 = vshrl.u32 %v263_v58, 16  ;;  %389 = vst.msk [vmem:[#allocation2 + $0x60] sm:$0xff] %vm376_vm0, %v9531_v2  ;;  %v694_v16 = vshll.u32 %v263_v58, 16  ;;  %v267_v41 = vld [vmem:[%s9090_s23 + $0xa4] sm:$0x1] }
  0x5d   : > { %836 = vrot.lane.b32.xlu0 %v9396_v38, %s9036_s27  ;;  %v682_v38 = vrot.slane %v680_v42, 5  ;;  %v995_v23 = vsel %vm9110_vm5, %v993_v12, %v994_v57  ;;  %v687_v11 = vrot.slane %v685_v0, 4  ;;  %v704_v1 = vshll.u32 %v264_v7, 16 }
  0x5e   : > { %838 = vrot.lane.b32.xlu1 %v9405_v43, %s9036_s27  ;;  %v673_v22 = vsel %vm9147_vm6, %v668_v8, %v672_v51  ;;  %v9546_v35 = vcombine.low %v992_v62, %v995_v23  ;;  %v690_v9 = vrot.slane %v688_v15, 5  ;;  %v696_v19 = vrot.slane %v694_v16, 5 }
  0x5f   : > { %v700_v20 = vrot.slane %v698_v3, 4  ;;  %v706_v27 = vrot.slane %v704_v1, 5  ;;  %v8330_v29 = vrot.slane %v262_v53, 9  ;;  %v998_v26 = vrot.slane %v263_v58, 5 }
  0x60   : > { %v691_v34 = vor.u32 %v690_v9, %v687_v11  ;;  %v1001_v21 = vrot.slane %v264_v7, 5  ;;  %v9554_v30 = vcombine.low %v265_v46, %v266_v32  ;;  %v709_v55 = vshrl.u32 %v265_v46, 16 }
  0x61   : > { %1080 = vrot.lane.b32.xlu0 %v9398_v39, %s9035_s26  ;;  %v678_v39 = vrot.slane %v677_v5, 4  ;;  %v701_v31 = vor.u32 %v700_v20, %v696_v19  ;;  %v999_v53 = vsel %vm9110_vm5, %v8330_v29, %v998_v26  ;;  %v1000_v54 = vrot.slane %v998_v26, 4  ;;  %v268_v5 = vld [vmem:[%s9090_s23 + $0xa8] sm:$0xf]  ;;  %v270_v26 = vld [vmem:[%s9090_s23 + $0xb0] sm:$0x1] }
  0x62   : > { %1082 = vrot.lane.b32.xlu1 %v9400_v40, %s9035_s26  ;;  %v712_v56 = vshll.u32 %v265_v46, 16  ;;  %v722_v57 = vshrl.u32 %v266_v32, 16  ;;  %390 = vst.msk [vmem:[#allocation2 + $0x68] sm:$0xff] %vm376_vm0, %v9554_v30  ;;  %v728_v7 = vshll.u32 %v267_v41, 16  ;;  %v711_v12 = vrot.slane %v709_v55, 4 }
  0x63   : > { %v683_v33 = vsel %vm9147_vm6, %v678_v39, %v682_v38  ;;  %v702_v58 = vrot.slane %v701_v31, 4  ;;  %v1002_v51 = vsel %vm9110_vm5, %v1000_v54, %v1001_v21  ;;  %v718_v38 = vshll.u32 %v266_v32, 16  ;;  %v269_v39 = vld [vmem:[%s9090_s23 + $0xac] sm:$0xf] }
  0x64   : > { %v9559_v42 = vcombine.low %v673_v22, %v683_v33  ;;  %v9571_v62 = vcombine.low %v999_v53, %v1002_v51  ;;  %v714_v0 = vrot.slane %v712_v56, 5  ;;  %v724_v16 = vrot.slane %v722_v57, 4  ;;  %v271_v51 = vld [vmem:[%s9090_s23 + $0xb4] sm:$0xf] }
  0x65   : > { %1150 = vrot.lane.b32.xlu0 %v9257_v14, %s9033_s24  ;;  %v692_v14 = vrot.slane %v691_v34, 4  ;;  %v707_v15 = vsel %vm9147_vm6, %v702_v58, %v706_v27  ;;  %v720_v3 = vrot.slane %v718_v38, 5  ;;  %v730_v22 = vrot.slane %v728_v7, 5  ;;  %v272_v38 = vld [vmem:[%s9090_s23 + $0xb8] sm:$0xf] }
  0x66   : > { %1152 = vrot.lane.b32.xlu1 %v9304_v37, %s9033_s24  ;;  %v8331_v11 = vrot.slane %v265_v46, 9  ;;  %v1005_v1 = vrot.slane %v266_v32, 5  ;;  %v9581_v20 = vcombine.low %v268_v5, %v269_v39  ;;  %v733_v29 = vshrl.u32 %v268_v5, 16 }
  0x67   : > { %v697_v8 = vsel %vm9147_vm6, %v692_v14, %v696_v19  ;;  %v725_v9 = vor.u32 %v724_v16, %v720_v3  ;;  %v1008_v19 = vrot.slane %v267_v41, 5  ;;  %v736_v21 = vshll.u32 %v268_v5, 16 }
  0x68   : > { %v9578_v23 = vcombine.low %v697_v8, %v707_v15  ;;  %v1006_v27 = vsel %vm9110_vm5, %v8331_v11, %v1005_v1  ;;  %v1007_v34 = vrot.slane %v1005_v1, 4  ;;  %v746_v32 = vshrl.u32 %v269_v39, 16  ;;  %391 = vst.msk [vmem:[#allocation2 + $0x70] sm:$0xff] %vm376_vm0, %v9581_v20 }
  0x69   : > { %1242 = vrot.lane.b32.xlu0 %v9405_v43, %s9037_s30  ;;  %v715_v43 = vor.u32 %v714_v0, %v711_v12  ;;  %v726_v46 = vrot.slane %v725_v9, 4  ;;  %v735_v41 = vrot.slane %v733_v29, 4  ;;  %v742_v31 = vshll.u32 %v269_v39, 16 }
  0x6a   : > { %1244 = vrot.lane.b32.xlu1 %v9407_v44, %s9037_s30  ;;  %v1009_v53 = vsel %vm9110_vm5, %v1007_v34, %v1008_v19  ;;  %v738_v54 = vrot.slane %v736_v21, 5  ;;  %v752_v14 = vshll.u32 %v270_v26, 16  ;;  %v748_v58 = vrot.slane %v746_v32, 4  ;;  %v273_v19 = vld [vmem:[%s9090_s23 + $0xbc] sm:$0x1] }
  0x6b   : > { %v716_v33 = vrot.slane %v715_v43, 4  ;;  %v731_v55 = vsel %vm9147_vm6, %v726_v46, %v730_v22  ;;  %v9598_v56 = vcombine.low %v1006_v27, %v1009_v53  ;;  %v744_v57 = vrot.slane %v742_v31, 5 }
  0x6c   : > { %v739_v8 = vor.u32 %v738_v54, %v735_v41  ;;  %v754_v12 = vrot.slane %v752_v14, 5  ;;  %v8332_v0 = vrot.slane %v268_v5, 9  ;;  %v1015_v16 = vrot.slane %v270_v26, 5 }
  0x6d   : > { %1318 = vrot.lane.b32.xlu0 %v9400_v40, %s9034_s25  ;;  %v721_v40 = vsel %vm9147_vm6, %v716_v33, %v720_v3  ;;  %v749_v15 = vor.u32 %v748_v58, %v744_v57  ;;  %v1012_v3 = vrot.slane %v269_v39, 5  ;;  %v9608_v22 = vcombine.low %v271_v51, %v272_v38 }
  0x6e   : > { %1320 = vrot.lane.b32.xlu1 %v9409_v17, %s9034_s25  ;;  %v9604_v7 = vcombine.low %v721_v40, %v731_v55  ;;  %v740_v43 = vrot.slane %v739_v8, 4  ;;  %v757_v11 = vshrl.u32 %v271_v51, 16  ;;  %v760_v1 = vshll.u32 %v271_v51, 16 }
  0x6f   : > { %v770_v9 = vshrl.u32 %v272_v38, 16  ;;  %v750_v29 = vrot.slane %v749_v15, 4  ;;  %v1014_v33 = vrot.slane %v1012_v3, 4  ;;  %392 = vst.msk [vmem:[#allocation2 + $0x78] sm:$0xff] %vm376_vm0, %v9608_v22  ;;  %v766_v5 = vshll.u32 %v272_v38, 16 }
  0x70   : > { %v745_v39 = vsel %vm9147_vm6, %v740_v43, %v744_v57  ;;  %v759_v26 = vrot.slane %v757_v11, 4  ;;  %v762_v27 = vrot.slane %v760_v1, 5  ;;  %v776_v41 = vshll.u32 %v273_v19, 16 }
  0x71   : > { %1388 = vrot.lane.b32.xlu0 %v9304_v37, %s9038_s8  ;;  %v1013_v37 = vsel %vm9110_vm5, %v8332_v0, %v1012_v3  ;;  %v772_v34 = vrot.slane %v770_v9, 4  ;;  %v755_v21 = vsel %vm9147_vm6, %v750_v29, %v754_v12  ;;  %v1016_v46 = vsel %vm9110_vm5, %v1014_v33, %v1015_v16 }
  0x72   : > { %1390 = vrot.lane.b32.xlu1 %v9333_v48, %s9038_s8  ;;  %v768_v32 = vrot.slane %v766_v5, 5  ;;  %v9625_v31 = vcombine.low %v745_v39, %v755_v21  ;;  %v9627_v40 = vcombine.low %v1013_v37, %v1016_v46  ;;  %v763_v53 = vor.u32 %v762_v27, %v759_v26 }
  0x73   : > { %v8333_v54 = vrot.slane %v271_v51, 9  ;;  %v778_v55 = vrot.slane %v776_v41, 5  ;;  %v1019_v57 = vrot.slane %v272_v38, 5  ;;  %v1022_v58 = vrot.slane %v273_v19, 5 }
  0x74   : > { %v773_v14 = vor.u32 %v772_v34, %v768_v32  ;;  %v764_v8 = vrot.slane %v763_v53, 4  ;;  %v595_v3 = vor.u32 %v9453_v10, %v9451_v25  ;;  %v605_v51 = vor.u32 %v9472_v45, %v9513_v28 }
  0x75   : > { %1480 = vrot.lane.b32.xlu0 %v9407_v44, %s9039_s9  ;;  %v1020_v0 = vsel %vm9110_vm5, %v8333_v54, %v1019_v57  ;;  %v1021_v15 = vrot.slane %v1019_v57, 4  ;;  %v608_v38 = vshll.u32 %v9413_v47, 16  ;;  %vm1656_vm0 = vcmask 293888  }
  0x76   : > { %1482 = vrot.lane.b32.xlu1 %v9485_v59, %s9039_s9  ;;  %v774_v12 = vrot.slane %v773_v14, 4  ;;  %v769_v16 = vsel %vm9147_vm6, %v764_v8, %v768_v32  ;;  %v596_v47 = vrot.slane %v595_v3, 4  ;;  %v606_v10 = vrot.slane %v605_v51, 4 }
  0x77   : > { %v1023_v11 = vsel %vm9110_vm5, %v1021_v15, %v1022_v58  ;;  %v610_v45 = vrot.slane %v608_v38, 5  ;;  %vm2055_vm7 = vsmask.f32 4368 }
  0x78   : > { %v779_v43 = vsel %vm9147_vm6, %v774_v12, %v778_v55  ;;  %v9650_v25 = vcombine.low %v1020_v0, %v1023_v11 }
  0x79   : > { %1556 = vrot.lane.b32.xlu0 %v9409_v17, %s9040_s10  ;;  %v9648_v1 = vcombine.low %v769_v16, %v779_v43  ;;  %v611_v9 = vsel %vm9147_vm6, %v606_v10, %v610_v45 }
  0x7a   : > { %1558 = vrot.lane.b32.xlu1 %v9497_v4, %s9040_s10 }
  0x7d   : > { %840 = vrot.lane.b32.xlu0 %v9407_v44, %s9036_s27  ;;  %v601_v44 = vsel %vm9147_vm6, %v596_v47, %v9513_v28 }
  0x7e   : > { %842 = vrot.lane.b32.xlu1 %v9485_v59, %s9036_s27  ;;  %v8310_v19 = vcombine.low %v601_v44, %v611_v9  ;;  %v9821_v9 = vld [vmem:[%s9090_s23 + $0xc0] sm:$0xf] }
  0x81   : > { %1084 = vrot.lane.b32.xlu0 %v9409_v17, %s9035_s26 }
  0x82   : > { %1086 = vrot.lane.b32.xlu1 %v9497_v4, %s9035_s26 }
  0x85   : > { %1154 = vrot.lane.b32.xlu0 %v9333_v48, %s9033_s24 }
  0x86   : > { %1156 = vrot.lane.b32.xlu1 %v9390_v36, %s9033_s24 }
  0x88   : > { %v1145_v29 = vpop.permute.xlu1 %1144 }
  0x89   : > { %1246 = vrot.lane.b32.xlu0 %v9485_v59, %s9037_s30  ;;  %v1143_v17 = vpop.permute.xlu0 %1142 }
  0x8a   : > { %1248 = vrot.lane.b32.xlu1 %v8310_v19, %s9037_s30 }
  0x8d   : > { %1322 = vrot.lane.b32.xlu0 %v9497_v4, %s9034_s25 }
  0x8e   : > { %1324 = vrot.lane.b32.xlu1 %v9449_v6, %s9034_s25 }
  0x8f   : > { %v1311_v48 = vpop.permute.xlu0 %1310 }
  0x91   : > { %1392 = vrot.lane.b32.xlu0 %v9390_v36, %s9038_s8 }
  0x92   : > { %1394 = vrot.lane.b32.xlu1 %v9429_v63, %s9038_s8  ;;  %v1073_v28 = vpop.permute.xlu1 %1072 }
  0x95   : > { %1484 = vrot.lane.b32.xlu0 %v8310_v19, %s9039_s9 }
  0x96   : > { %1486 = vrot.lane.b32.xlu1 %v9487_v50, %s9039_s9  ;;  %v1075_v59 = vpop.permute.xlu1 %1074 }
  0x97   : > { %v829_v4 = vpop.permute.xlu0 %828 }
  0x98   : > { %877 = vst.msk [vmem:[#allocation2] sm:$0xff] %vm876_vm8, %v829_v4 }
  0x99   : > { %1121 = vst.msk [vmem:[#allocation2] sm:$0xff] %vm1120_vm9, %v1073_v28  ;;  %1560 = vrot.lane.b32.xlu0 %v9449_v6, %s9040_s10 }
  0x9a   : > { %1562 = vrot.lane.b32.xlu1 %v9489_v60, %s9040_s10  ;;  %v1313_v36 = vpop.permute.xlu1 %1312  ;;  %1191 = vst.msk [vmem:[#allocation2] sm:$0xff] %vm1190_vm10, %v1143_v17  ;;  %v9825_v17 = vld [vmem:[%s9090_s23 + $0xc4] sm:$0xf] }
  0x9b   : > { %v831_v37 = vpop.permute.xlu0 %830  ;;  %v1217_v4 = vshll.u32 %v9825_v17, 16 }
  0x9c   : > { %878 = vst.msk [vmem:[#allocation2 + $0x8] sm:$0xff] %vm876_vm8, %v831_v37 }
  0x9d   : > { %1122 = vst.msk [vmem:[#allocation2 + $0x8] sm:$0xff] %vm1120_vm9, %v1075_v59  ;;  %844 = vrot.lane.b32.xlu0 %v8310_v19, %s9036_s27  ;;  %v1221_v59 = vshrl.u32 %v9825_v17, 16 }
  0x9e   : > { %846 = vrot.lane.b32.xlu1 %v9487_v50, %s9036_s27  ;;  %1192 = vst.msk [vmem:[#allocation2 + $0x8] sm:$0xff] %vm1190_vm10, %v1145_v29  ;;  %v1208_v29 = vshrl.u32 %v9821_v9, 16 }
  0x9f   : > { %v1235_v33 = vpop.permute.xlu0 %1234 }
  0xa0   : > { %v1237_v5 = vpop.permute.xlu1 %1236  ;;  %1283 = vst.msk [vmem:[#allocation2] sm:$0xff] %vm1282_vm11, %v1235_v33  ;;  %v1210_v37 = vrot.slane %v1208_v29, 4 }
  0xa1   : > { %1284 = vst.msk [vmem:[#allocation2 + $0x8] sm:$0xff] %vm1282_vm11, %v1237_v5  ;;  %1088 = vrot.lane.b32.xlu0 %v9449_v6, %s9035_s26 }
  0xa2   : > { %1359 = vst.msk [vmem:[#allocation2] sm:$0xff] %vm1358_vm12, %v1311_v48  ;;  %1090 = vrot.lane.b32.xlu1 %v9489_v60, %s9035_s26  ;;  %1360 = vst.msk [vmem:[#allocation2 + $0x8] sm:$0xff] %vm1358_vm12, %v1313_v36 }
  0xa3   : > { %v1381_v39 = vpop.permute.xlu0 %1380 }
  0xa4   : > { %1429 = vst.msk [vmem:[#allocation2] sm:$0xff] %vm1428_vm13, %v1381_v39  ;;  %v1383_v26 = vpop.permute.xlu1 %1382  ;;  %v1219_v39 = vrot.slane %v1217_v4, 5 }
  0xa5   : > { %1430 = vst.msk [vmem:[#allocation2 + $0x8] sm:$0xff] %vm1428_vm13, %v1383_v26  ;;  %1158 = vrot.lane.b32.xlu0 %v9429_v63, %s9033_s24  ;;  %v1223_v26 = vrot.slane %v1221_v59, 4 }
  0xa6   : > { %1160 = vrot.lane.b32.xlu1 %v9476_v49, %s9033_s24 }
  0xa7   : > { %v1473_v6 = vpop.permute.xlu0 %1472 }
  0xa8   : > { %1521 = vst.msk [vmem:[#allocation2] sm:$0xff] %vm1520_vm14, %v1473_v6  ;;  %v1475_v27 = vpop.permute.xlu1 %1474 }
  0xa9   : > { %1522 = vst.msk [vmem:[#allocation2 + $0x8] sm:$0xff] %vm1520_vm14, %v1475_v27  ;;  %1250 = vrot.lane.b32.xlu0 %v9487_v50, %s9037_s30  ;;  %v276_v27 = vld [vmem:[%s9090_s23 + $0xc8] sm:$0x1] }
  0xaa   : > { %1252 = vrot.lane.b32.xlu1 %v9529_v61, %s9037_s30 }
  0xab   : > { %v1549_v34 = vpop.permute.xlu0 %1548 }
  0xac   : > { %1597 = vst.msk [vmem:[#allocation2] sm:$0xff] %vm1596_vm15, %v1549_v34  ;;  %v833_v63 = vpop.permute.xlu1 %832 }
  0xad   : > { %879 = vst.msk [vmem:[#allocation2 + $0x10] sm:$0xff] %vm876_vm8, %v833_v63  ;;  %1326 = vrot.lane.b32.xlu0 %v9489_v60, %s9034_s25 }
  0xae   : > { %1328 = vrot.lane.b32.xlu1 %v9519_v18, %s9034_s25 }
  0xaf   : > { %v1551_v21 = vpop.permute.xlu0 %1550 }
  0xb0   : > { %1598 = vst.msk [vmem:[#allocation2 + $0x8] sm:$0xff] %vm1596_vm15, %v1551_v21  ;;  %v835_v50 = vpop.permute.xlu1 %834  ;;  %v1224_v21 = vor.u32 %v1223_v26, %v1219_v39 }
  0xb1   : > { %880 = vst.msk [vmem:[#allocation2 + $0x18] sm:$0xff] %vm876_vm8, %v835_v50  ;;  %1396 = vrot.lane.b32.xlu0 %v9476_v49, %s9038_s8  ;;  %v1227_v50 = vshll.u32 %v276_v27, 16 }
  0xb2   : > { %1398 = vrot.lane.b32.xlu1 %v9502_v24, %s9038_s8 }
  0xb3   : > { %v1077_v46 = vpop.permute.xlu0 %1076  ;;  %v1613_v32 = vld [vmem:[#allocation2] sm:$0xff] }
  0xb4   : > { %1123 = vst.msk [vmem:[#allocation2 + $0x10] sm:$0xff] %vm1120_vm9, %v1077_v46  ;;  %v1079_v60 = vpop.permute.xlu1 %1078  ;;  %8827 = vmatprep.mubr.msk.bf16.mxu0 %vm1656_vm0, %v1613_v32  ;;  %v9852_v46 = vld [vmem:[%s9090_s23 + $0xcc] sm:$0xf]  ;;  %v9855_v32 = vld [vmem:[%s9090_s23 + $0xd0] sm:$0xf] }
  0xb5   : > { %1124 = vst.msk [vmem:[#allocation2 + $0x18] sm:$0xff] %vm1120_vm9, %v1079_v60  ;;  %1488 = vrot.lane.b32.xlu0 %v9529_v61, %s9039_s9  ;;  %v8354_v29 = vcombine.low %v9852_v46, %v9855_v32 }
  0xb6   : > { %1490 = vrot.lane.b32.xlu1 %v9559_v42, %s9039_s9 }
  0xb7   : > { %v1147_v49 = vpop.permute.xlu0 %1146  ;;  %v1614_v41 = vld [vmem:[#allocation2 + $0x8] sm:$0xff] }
  0xb8   : > { %1193 = vst.msk [vmem:[#allocation2 + $0x10] sm:$0xff] %vm1190_vm10, %v1147_v49  ;;  %v1149_v53 = vpop.permute.xlu1 %1148  ;;  %8828 = vmatmul.mubr.msk.bf16.vlgmr.msra.gmra.mrb[0].mxu0 %vm1656_vm0, %v1614_v41  ;;  %v1446_v41 = vshrl.u32 %v9852_v46, 16 }
  0xb9   : > { %1194 = vst.msk [vmem:[#allocation2 + $0x18] sm:$0xff] %vm1190_vm10, %v1149_v53  ;;  %1564 = vrot.lane.b32.xlu0 %v9519_v18, %s9040_s10  ;;  %v1449_v53 = vshll.u32 %v9852_v46, 16 }
  0xba   : > { %1566 = vrot.lane.b32.xlu1 %v9546_v35, %s9040_s10 }
  0xbb   : > { %v1239_v54 = vpop.permute.xlu0 %1238 }
  0xbc   : > { %1285 = vst.msk [vmem:[#allocation2 + $0x10] sm:$0xff] %vm1282_vm11, %v1239_v54  ;;  %v1241_v14 = vpop.permute.xlu1 %1240  ;;  %v1459_v54 = vshrl.u32 %v9855_v32, 16 }
  0xbd   : > { %1286 = vst.msk [vmem:[#allocation2 + $0x18] sm:$0xff] %vm1282_vm11, %v1241_v14  ;;  %848 = vrot.lane.b32.xlu0 %v9529_v61, %s9036_s27  ;;  %v1455_v14 = vshll.u32 %v9855_v32, 16 }
  0xbe   : > { %850 = vrot.lane.b32.xlu1 %v9559_v42, %s9036_s27 }
  0xbf   : > { %v1315_v55 = vpop.permute.xlu0 %1314 }
  0xc0   : > { %1361 = vst.msk [vmem:[#allocation2 + $0x10] sm:$0xff] %vm1358_vm12, %v1315_v55  ;;  %v1317_v57 = vpop.permute.xlu1 %1316 }
  0xc1   : > { %1362 = vst.msk [vmem:[#allocation2 + $0x18] sm:$0xff] %vm1358_vm12, %v1317_v57  ;;  %1092 = vrot.lane.b32.xlu0 %v9519_v18, %s9035_s26  ;;  %v1225_v57 = vrot.slane %v1224_v21, 4 }
  0xc2   : > { %1094 = vrot.lane.b32.xlu1 %v9546_v35, %s9035_s26 }
  0xc3   : > { %v1385_v58 = vpop.permute.xlu0 %1384 }
  0xc4   : > { %1431 = vst.msk [vmem:[#allocation2 + $0x10] sm:$0xff] %vm1428_vm13, %v1385_v58  ;;  %v1387_v8 = vpop.permute.xlu1 %1386  ;;  %v1229_v58 = vrot.slane %v1227_v50, 5 }
  0xc5   : > { %1432 = vst.msk [vmem:[#allocation2 + $0x18] sm:$0xff] %vm1428_vm13, %v1387_v8  ;;  %1162 = vrot.lane.b32.xlu0 %v9502_v24, %s9033_s24  ;;  %v1302_v8 = vrot.slane %v9825_v17, 5 }
  0xc6   : > { %1164 = vrot.lane.b32.xlu1 %v9531_v2, %s9033_s24 }
  0xc7   : > { %v1477_v61 = vpop.permute.xlu0 %1476 }
  0xc8   : > { %1523 = vst.msk [vmem:[#allocation2 + $0x10] sm:$0xff] %vm1520_vm14, %v1477_v61  ;;  %v1479_v12 = vpop.permute.xlu1 %1478  ;;  %v9874_v61 = vcombine.low %v9821_v9, %v9825_v17 }
  0xc9   : > { %1524 = vst.msk [vmem:[#allocation2 + $0x18] sm:$0xff] %vm1520_vm14, %v1479_v12  ;;  %1254 = vrot.lane.b32.xlu0 %v9559_v42, %s9037_s30 }
  0xca   : > { %1256 = vrot.lane.b32.xlu1 %v9578_v23, %s9037_s30 }
  0xcb   : > { %v1553_v18 = vpop.permute.xlu0 %1552 }
  0xcc   : > { %1599 = vst.msk [vmem:[#allocation2 + $0x10] sm:$0xff] %vm1596_vm15, %v1553_v18  ;;  %v1555_v0 = vpop.permute.xlu1 %1554  ;;  %v1448_v18 = vrot.slane %v1446_v41, 4 }
  0xcd   : > { %1600 = vst.msk [vmem:[#allocation2 + $0x18] sm:$0xff] %vm1596_vm15, %v1555_v0  ;;  %1330 = vrot.lane.b32.xlu0 %v9546_v35, %s9034_s25  ;;  %v1451_v0 = vrot.slane %v1449_v53, 5 }
  0xce   : > { %1332 = vrot.lane.b32.xlu1 %v9571_v62, %s9034_s25 }
  0xcf   : > { %v837_v24 = vpop.permute.xlu0 %836 }
  0xd0   : > { %881 = vst.msk [vmem:[#allocation2 + $0x20] sm:$0xff] %vm876_vm8, %v837_v24  ;;  %v839_v15 = vpop.permute.xlu1 %838  ;;  %v9880_v24 = vrot.slane %v1455_v14, 5 }
  0xd1   : > { %882 = vst.msk [vmem:[#allocation2 + $0x28] sm:$0xff] %vm876_vm8, %v839_v15  ;;  %1400 = vrot.lane.b32.xlu0 %v9531_v2, %s9038_s8  ;;  %v1461_v15 = vrot.slane %v1459_v54, 4 }
  0xd2   : > { %1402 = vrot.lane.b32.xlu1 %v9554_v30, %s9038_s8 }
  0xd3   : > { %v1081_v42 = vpop.permute.xlu0 %1080  ;;  %v1615_v3 = vld [vmem:[#allocation2 + $0x10] sm:$0xff] }
  0xd4   : > { %1125 = vst.msk [vmem:[#allocation2 + $0x20] sm:$0xff] %vm1120_vm9, %v1081_v42  ;;  %v1083_v35 = vpop.permute.xlu1 %1082  ;;  %8831 = vmatprep.mubr.msk.bf16.mxu0 %vm1656_vm0, %v1615_v3  ;;  %v1616_v51 = vld [vmem:[#allocation2 + $0x18] sm:$0xff]  ;;  %v1230_v3 = vsel %vm9147_vm6, %v1225_v57, %v1229_v58 }
  0xd5   : > { %1126 = vst.msk [vmem:[#allocation2 + $0x28] sm:$0xff] %vm1120_vm9, %v1083_v35  ;;  %1492 = vrot.lane.b32.xlu0 %v9578_v23, %s9039_s9  ;;  %8832 = vmatmul.mubr.msk.bf16.gmra.mrb[4].mxu0 %vm1656_vm0, %v1616_v51  ;;  %v1304_v35 = vrot.slane %v1302_v8, 4  ;;  %v1305_v51 = vrot.slane %v276_v27, 5 }
  0xd6   : > { %1494 = vrot.lane.b32.xlu1 %v9604_v7, %s9039_s9 }
  0xd7   : > { %v1151_v2 = vpop.permute.xlu0 %1150 }
  0xd8   : > { %1195 = vst.msk [vmem:[#allocation2 + $0x20] sm:$0xff] %vm1190_vm10, %v1151_v2  ;;  %v1153_v38 = vpop.permute.xlu1 %1152  ;;  %v9886_v2 = vld [vmem:[%s9090_s23 + $0xd4] sm:$0x1] }
  0xd9   : > { %1196 = vst.msk [vmem:[#allocation2 + $0x28] sm:$0xff] %vm1190_vm10, %v1153_v38  ;;  %1568 = vrot.lane.b32.xlu0 %v9571_v62, %s9040_s10  ;;  %v1543_v4 = vrot.slane %v9886_v2, 5 }
  0xda   : > { %1570 = vrot.lane.b32.xlu1 %v9598_v56, %s9040_s10 }
  0xdb   : > { %v1243_v16 = vpop.permute.xlu0 %1242 }
  0xdc   : > { %1287 = vst.msk [vmem:[#allocation2 + $0x20] sm:$0xff] %vm1282_vm11, %v1243_v16  ;;  %v1245_v43 = vpop.permute.xlu1 %1244 }
  0xdd   : > { %1288 = vst.msk [vmem:[#allocation2 + $0x28] sm:$0xff] %vm1282_vm11, %v1245_v43  ;;  %852 = vrot.lane.b32.xlu0 %v9578_v23, %s9036_s27  ;;  %v1452_v43 = vor.u32 %v1451_v0, %v1448_v18 }
  0xde   : > { %854 = vrot.lane.b32.xlu1 %v9604_v7, %s9036_s27 }
  0xdf   : > { %v1319_v11 = vpop.permute.xlu0 %1318 }
  0xe0   : > { %1363 = vst.msk [vmem:[#allocation2 + $0x20] sm:$0xff] %vm1358_vm12, %v1319_v11  ;;  %v1321_v47 = vpop.permute.xlu1 %1320  ;;  %v1462_v11 = vor.u32 %v1461_v15, %v9880_v24 }
  0xe1   : > { %1364 = vst.msk [vmem:[#allocation2 + $0x28] sm:$0xff] %vm1358_vm12, %v1321_v47  ;;  %1096 = vrot.lane.b32.xlu0 %v9571_v62, %s9035_s26  ;;  %v1465_v47 = vshll.u32 %v9886_v2, 16 }
  0xe2   : > { %1098 = vrot.lane.b32.xlu1 %v9598_v56, %s9035_s26 }
  0xe3   : > { %v1389_v10 = vpop.permute.xlu0 %1388 }
  0xe4   : > { %1433 = vst.msk [vmem:[#allocation2 + $0x20] sm:$0xff] %vm1428_vm13, %v1389_v10  ;;  %v1391_v45 = vpop.permute.xlu1 %1390 }
  0xe5   : > { %1434 = vst.msk [vmem:[#allocation2 + $0x28] sm:$0xff] %vm1428_vm13, %v1391_v45  ;;  %1166 = vrot.lane.b32.xlu0 %v9554_v30, %s9033_s24 }
  0xe6   : > { %1168 = vrot.lane.b32.xlu1 %v9581_v20, %s9033_s24 }
  0xe7   : > { %v1481_v23 = vpop.permute.xlu0 %1480 }
  0xe8   : > { %1525 = vst.msk [vmem:[#allocation2 + $0x20] sm:$0xff] %vm1520_vm14, %v1481_v23  ;;  %v1483_v62 = vpop.permute.xlu1 %1482  ;;  %v1306_v23 = vsel %vm9110_vm5, %v1304_v35, %v1305_v51 }
  0xe9   : > { %1526 = vst.msk [vmem:[#allocation2 + $0x28] sm:$0xff] %vm1520_vm14, %v1483_v62  ;;  %1258 = vrot.lane.b32.xlu0 %v9604_v7, %s9037_s30 }
  0xea   : > { %1260 = vrot.lane.b32.xlu1 %v9625_v31, %s9037_s30 }
  0xeb   : > { %v1557_v44 = vpop.permute.xlu0 %1556 }
  0xec   : > { %1601 = vst.msk [vmem:[#allocation2 + $0x20] sm:$0xff] %vm1596_vm15, %v1557_v44  ;;  %v1559_v30 = vpop.permute.xlu1 %1558  ;;  %v9910_v44 = vrot.slane %v1452_v43, 4 }
  0xed   : > { %1602 = vst.msk [vmem:[#allocation2 + $0x28] sm:$0xff] %vm1596_vm15, %v1559_v30  ;;  %1334 = vrot.lane.b32.xlu0 %v9598_v56, %s9034_s25  ;;  %v1211_v56 = vshll.u32 %v9821_v9, 16  ;;  %v9912_v30 = vrot.slane %v1462_v11, 4 }
  0xee   : > { %1336 = vrot.lane.b32.xlu1 %v9627_v40, %s9034_s25 }
  0xef   : > { %v841_v19 = vpop.permute.xlu0 %840  ;;  %v1213_v33 = vrot.slane %v1211_v56, 5  ;;  %v1458_v56 = vsel %vm9147_vm6, %v9910_v44, %v9880_v24 }
  0xf0   : > { %883 = vst.msk [vmem:[#allocation2 + $0x30] sm:$0xff] %vm876_vm8, %v841_v19  ;;  %v843_v7 = vpop.permute.xlu1 %842  ;;  %v9041_v19 = vmov 0  }
  0xf1   : > { %884 = vst.msk [vmem:[#allocation2 + $0x38] sm:$0xff] %vm876_vm8, %v843_v7  ;;  %1404 = vrot.lane.b32.xlu0 %v9581_v20, %s9038_s8  ;;  %v1214_v34 = vor.u32 %v1213_v33, %v1210_v37  ;;  %v1540_v7 = vrot.slane %v9855_v32, 5 }
  0xf2   : > { %1406 = vrot.lane.b32.xlu1 %v9608_v22, %s9038_s8  ;;  %1910 = vst.msk [vmem:[#allocation3 + $0x18] sm:$0xf] %vm1902_vm1, %v9041_v19  ;;  %1903 = vst.msk [vmem:[#allocation3] sm:$0xf] %vm1902_vm1, %v9041_v19 }
  0xf3   : > { %v1085_v48 = vpop.permute.xlu0 %1084  ;;  %v1617_v28 = vld [vmem:[#allocation2 + $0x20] sm:$0xff]  ;;  %v1215_v49 = vrot.slane %v1214_v34, 4  ;;  %1904 = vst.msk [vmem:[#allocation3 + $0x4] sm:$0xf] %vm1902_vm1, %v9041_v19  ;;  %1907 = vst.msk [vmem:[#allocation3 + $0xc] sm:$0xf] %vm1902_vm1, %v9041_v19 }
  0xf4   : > { %1127 = vst.msk [vmem:[#allocation2 + $0x30] sm:$0xff] %vm1120_vm9, %v1085_v48  ;;  %v1087_v36 = vpop.permute.xlu1 %1086  ;;  %8835 = vmatprep.mubr.msk.bf16.mxu0 %vm1656_vm0, %v1617_v28  ;;  %v1618_v20 = vld [vmem:[#allocation2 + $0x28] sm:$0xff]  ;;  %v8356_v28 = vrot.slane %v9852_v46, 9  ;;  %v1542_v59 = vrot.slane %v1540_v7, 4 }
  0xf5   : > { %1128 = vst.msk [vmem:[#allocation2 + $0x38] sm:$0xff] %vm1120_vm9, %v1087_v36  ;;  %1496 = vrot.lane.b32.xlu0 %v9625_v31, %s9039_s9  ;;  %8836 = vmatmul.mubr.msk.bf16.gmra.mrb[8].mxu0 %vm1656_vm0, %v1618_v20  ;;  %v1220_v12 = vsel %vm9147_vm6, %v1215_v49, %v1219_v39 }
  0xf6   : > { %1498 = vrot.lane.b32.xlu1 %v9648_v1, %s9039_s9  ;;  %v9894_v16 = vcombine.low %v1220_v12, %v1230_v3  ;;  %1908 = vst.msk [vmem:[#allocation3 + $0x10] sm:$0xf] %vm1902_vm1, %v9041_v19  ;;  %1911 = vst.msk [vmem:[#allocation3 + $0x1c] sm:$0xf] %vm1902_vm1, %v9041_v19  ;;  %v1544_v21 = vsel %vm9110_vm5, %v1542_v59, %v1543_v4 }
  0xf7   : > { %v1155_v5 = vpop.permute.xlu0 %1154  ;;  %1913 = vst.msk [vmem:[#allocation3 + $0x24] sm:$0xf] %vm1902_vm1, %v9041_v19  ;;  %1914 = vst.msk [vmem:[#allocation3 + $0x28] sm:$0xf] %vm1902_vm1, %v9041_v19 }
  0xf8   : > { %1197 = vst.msk [vmem:[#allocation2 + $0x30] sm:$0xff] %vm1190_vm10, %v1155_v5  ;;  %v1157_v6 = vpop.permute.xlu1 %1156 }
  0xf9   : > { %1198 = vst.msk [vmem:[#allocation2 + $0x38] sm:$0xff] %vm1190_vm10, %v1157_v6  ;;  %1572 = vrot.lane.b32.xlu0 %v9627_v40, %s9040_s10  ;;  %v2640_v37 = vld [vmem:[#allocation3] sm:$0xf] }
  0xfa   : > { %1574 = vrot.lane.b32.xlu1 %v9650_v25, %s9040_s10  ;;  %1916 = vst.msk [vmem:[#allocation3 + $0x30] sm:$0xf] %vm1902_vm1, %v9041_v19  ;;  %1917 = vst.msk [vmem:[#allocation3 + $0x34] sm:$0xf] %vm1902_vm1, %v9041_v19  ;;  %v2641_v33 = vld [vmem:[#allocation3 + $0x4] sm:$0xf] }
  0xfb   : > { %v1247_v63 = vpop.permute.xlu0 %1246  ;;  %1919 = vst.msk [vmem:[#allocation3 + $0x3c] sm:$0xf] %vm1902_vm1, %v9041_v19  ;;  %1920 = vst.msk [vmem:[#allocation3 + $0x40] sm:$0xf] %vm1902_vm1, %v9041_v19  ;;  %v2689_v5 = vshrl.u32 %v2640_v37, 16  ;;  %v2692_v39 = vshll.u32 %v2640_v37, 16 }
  0xfc   : > { %1289 = vst.msk [vmem:[#allocation2 + $0x30] sm:$0xff] %vm1282_vm11, %v1247_v63  ;;  %v1249_v60 = vpop.permute.xlu1 %1248  ;;  %v2698_v26 = vshll.u32 %v2641_v33, 16  ;;  %v2702_v6 = vshrl.u32 %v2641_v33, 16  ;;  %v1541_v63 = vsel %vm9110_vm5, %v8356_v28, %v1540_v7  ;;  %v3186_v24 = vld [vmem:[#allocation3 + $0x4] sm:$0xf] }
  0xfd   : > { %1290 = vst.msk [vmem:[#allocation2 + $0x38] sm:$0xff] %vm1282_vm11, %v1249_v60  ;;  %856 = vrot.lane.b32.xlu0 %v9625_v31, %s9036_s27  ;;  %v2691_v32 = vrot.slane %v2689_v5, 4  ;;  %v2694_v60 = vrot.slane %v2692_v39, 5  ;;  %v8357_v54 = vcombine.low %v1541_v63, %v1544_v21  ;;  %v3185_v3 = vld [vmem:[#allocation3] sm:$0xe] }
  0xfe   : > { %858 = vrot.lane.b32.xlu1 %v9648_v1, %s9036_s27  ;;  %1922 = vst.msk [vmem:[#allocation3 + $0x48] sm:$0xf] %vm1902_vm1, %v9041_v19  ;;  %1923 = vst.msk [vmem:[#allocation3 + $0x4c] sm:$0xf] %vm1902_vm1, %v9041_v19  ;;  %v2700_v49 = vrot.slane %v2698_v26, 5  ;;  %v2704_v41 = vrot.slane %v2702_v6, 4 }
  0xff   : > { %v1323_v55 = vpop.permute.xlu0 %1322  ;;  %1925 = vst.msk [vmem:[#allocation3 + $0x54] sm:$0xf] %vm1902_vm1, %v9041_v19  ;;  %1926 = vst.msk [vmem:[#allocation3 + $0x58] sm:$0xf] %vm1902_vm1, %v9041_v19  ;;  %v2695_v14 = vor.u32 %v2694_v60, %v2691_v32  ;;  %v8442_v2 = vrot.slane %v3185_v3, 9  ;;  %s8639_s27 = sshll.u32 %s12374_s19, 4 }
 0x100   : > { %1365 = vst.msk [vmem:[#allocation2 + $0x30] sm:$0xff] %vm1358_vm12, %v1323_v55  ;;  %v1325_v31 = vpop.permute.xlu1 %1324  ;;  %v2705_v55 = vor.u32 %v2704_v41, %v2700_v49  ;;  %s224_s29 = scalar_lea.vmem %s12255_s5, %s8639_s27 }
 0x101   : > { %1366 = vst.msk [vmem:[#allocation2 + $0x38] sm:$0xff] %vm1358_vm12, %v1325_v31  ;;  %1100 = vrot.lane.b32.xlu0 %v9627_v40, %s9035_s26  ;;  %v8352_v40 = vrot.slane %v9821_v9, 9  ;;  %v9914_v9 = vrot.slane %v1465_v47, 5  ;;  %v2696_v31 = vrot.slane %v2695_v14, 4 }
 0x102   : > { %1102 = vrot.lane.b32.xlu1 %v9650_v25, %s9035_s26  ;;  %1928 = vst.msk [vmem:[#allocation3 + $0x60] sm:$0xf] %vm1902_vm1, %v9041_v19  ;;  %1929 = vst.msk [vmem:[#allocation3 + $0x64] sm:$0xf] %vm1902_vm1, %v9041_v19 }
 0x103   : > { %v1393_v42 = vpop.permute.xlu0 %1392  ;;  %v1303_v45 = vsel %vm9110_vm5, %v8352_v40, %v1302_v8  ;;  %1931 = vst.msk [vmem:[#allocation3 + $0x6c] sm:$0xf] %vm1902_vm1, %v9041_v19  ;;  %1932 = vst.msk [vmem:[#allocation3 + $0x70] sm:$0xf] %vm1902_vm1, %v9041_v19  ;;  %v1468_v48 = vsel %vm9147_vm6, %v9912_v30, %v9914_v9  ;;  %v2701_v18 = vsel %vm9147_vm6, %v2696_v31, %v2700_v49  ;;  %v3283_v40 = vrot.slane %v3186_v24, 5 }
 0x104   : > { %1435 = vst.msk [vmem:[#allocation2 + $0x30] sm:$0xff] %vm1428_vm13, %v1393_v42  ;;  %v1395_v38 = vpop.permute.xlu1 %1394  ;;  %v9908_v62 = vcombine.low %v1303_v45, %v1306_v23  ;;  %v8355_v20 = vcombine.low %v1458_v56, %v1468_v48 }
 0x105   : > { %1436 = vst.msk [vmem:[#allocation2 + $0x38] sm:$0xff] %vm1428_vm13, %v1395_v38  ;;  %1170 = vrot.lane.b32.xlu0 %v9608_v22, %s9033_s24  ;;  %v3285_v38 = vrot.slane %v3283_v40, 4  ;;  %v3284_v43 = vsel %vm9110_vm5, %v8442_v2, %v3283_v40 }
 0x106   : > { %1172 = vrot.lane.b32.xlu1 %v9874_v61, %s9033_s24  ;;  %1934 = vst.msk [vmem:[#allocation3 + $0x78] sm:$0xf] %vm1902_vm1, %v9041_v19  ;;  %1935 = vst.msk [vmem:[#allocation3 + $0x7c] sm:$0xf] %vm1902_vm1, %v9041_v19 }
 0x107   : > { %v1485_v10 = vpop.permute.xlu0 %1484  ;;  %1937 = vst.msk [vmem:[#allocation3 + $0x84] sm:$0xf] %vm1902_vm1, %v9041_v19  ;;  %1938 = vst.msk [vmem:[#allocation3 + $0x88] sm:$0xf] %vm1902_vm1, %v9041_v19 }
 0x108   : > { %1527 = vst.msk [vmem:[#allocation2 + $0x30] sm:$0xff] %vm1520_vm14, %v1485_v10  ;;  %v1487_v22 = vpop.permute.xlu1 %1486 }
 0x109   : > { %1528 = vst.msk [vmem:[#allocation2 + $0x38] sm:$0xff] %vm1520_vm14, %v1487_v22  ;;  %1262 = vrot.lane.b32.xlu0 %v9648_v1, %s9037_s30 }
 0x10a   : > { %1264 = vrot.lane.b32.xlu1 %v9894_v16, %s9037_s30  ;;  %1940 = vst.msk [vmem:[#allocation3 + $0x90] sm:$0xf] %vm1902_vm1, %v9041_v19  ;;  %1941 = vst.msk [vmem:[#allocation3 + $0x94] sm:$0xf] %vm1902_vm1, %v9041_v19 }
 0x10b   : > { %1943 = vst.msk [vmem:[#allocation3 + $0x9c] sm:$0xf] %vm1902_vm1, %v9041_v19  ;;  %1944 = vst.msk [vmem:[#allocation3 + $0xa0] sm:$0xf] %vm1902_vm1, %v9041_v19  ;;  %v1561_v1 = vpop.permute.xlu0 %1560 }
 0x10c   : > { %1946 = vst.msk [vmem:[#allocation3 + $0xa8] sm:$0xf] %vm1902_vm1, %v9041_v19  ;;  %1947 = vst.msk [vmem:[#allocation3 + $0xac] sm:$0xf] %vm1902_vm1, %v9041_v19  ;;  %v1563_v17 = vpop.permute.xlu1 %1562 }
 0x10d   : > { %1949 = vst.msk [vmem:[#allocation3 + $0xb4] sm:$0xf] %vm1902_vm1, %v9041_v19  ;;  %1950 = vst.msk [vmem:[#allocation3 + $0xb8] sm:$0xf] %vm1902_vm1, %v9041_v19  ;;  %1338 = vrot.lane.b32.xlu0 %v9650_v25, %s9034_s25 }
 0x10e   : > { %1952 = vst.msk [vmem:[#allocation3 + $0xc0] sm:$0xf] %vm1902_vm1, %v9041_v19  ;;  %1953 = vst.msk [vmem:[#allocation3 + $0xc4] sm:$0xf] %vm1902_vm1, %v9041_v19  ;;  %1340 = vrot.lane.b32.xlu1 %v9908_v62, %s9034_s25 }
 0x10f   : > { %1955 = vst.msk [vmem:[#allocation3 + $0xcc] sm:$0xf] %vm1902_vm1, %v9041_v19  ;;  %1956 = vst.msk [vmem:[#allocation3 + $0xd0] sm:$0xf] %vm1902_vm1, %v9041_v19  ;;  %v845_v25 = vpop.permute.xlu0 %844 }
 0x110   : > { %1603 = vst.msk [vmem:[#allocation2 + $0x30] sm:$0xff] %vm1596_vm15, %v1561_v1  ;;  %1604 = vst.msk [vmem:[#allocation2 + $0x38] sm:$0xff] %vm1596_vm15, %v1563_v17  ;;  %v847_v36 = vpop.permute.xlu1 %846 }
 0x111   : > { %1912 = vst.msk [vmem:[#allocation3 + $0x20] sm:$0x1] %vm1905_vm2, %v9041_v19  ;;  %1906 = vst.msk [vmem:[#allocation3 + $0x8] sm:$0x1] %vm1905_vm2, %v9041_v19  ;;  %1408 = vrot.lane.b32.xlu0 %v9874_v61, %s9038_s8  ;;  %v2706_v61 = vrot.slane %v2705_v55, 4 }
 0x112   : > { %1909 = vst.msk [vmem:[#allocation3 + $0x14] sm:$0x1] %vm1905_vm2, %v9041_v19  ;;  %1915 = vst.msk [vmem:[#allocation3 + $0x2c] sm:$0x1] %vm1905_vm2, %v9041_v19  ;;  %1410 = vrot.lane.b32.xlu1 %v8354_v29, %s9038_s8 }
 0x113   : > { %1918 = vst.msk [vmem:[#allocation3 + $0x38] sm:$0x1] %vm1905_vm2, %v9041_v19  ;;  %1921 = vst.msk [vmem:[#allocation3 + $0x44] sm:$0x1] %vm1905_vm2, %v9041_v19  ;;  %v1089_v27 = vpop.permute.xlu0 %1088 }
 0x114   : > { %1924 = vst.msk [vmem:[#allocation3 + $0x50] sm:$0x1] %vm1905_vm2, %v9041_v19  ;;  %1927 = vst.msk [vmem:[#allocation3 + $0x5c] sm:$0x1] %vm1905_vm2, %v9041_v19  ;;  %v1091_v50 = vpop.permute.xlu1 %1090 }
 0x115   : > { %1930 = vst.msk [vmem:[#allocation3 + $0x68] sm:$0x1] %vm1905_vm2, %v9041_v19  ;;  %1933 = vst.msk [vmem:[#allocation3 + $0x74] sm:$0x1] %vm1905_vm2, %v9041_v19  ;;  %1500 = vrot.lane.b32.xlu0 %v9894_v16, %s9039_s9 }
 0x116   : > { %1936 = vst.msk [vmem:[#allocation3 + $0x80] sm:$0x1] %vm1905_vm2, %v9041_v19  ;;  %1939 = vst.msk [vmem:[#allocation3 + $0x8c] sm:$0x1] %vm1905_vm2, %v9041_v19  ;;  %1502 = vrot.lane.b32.xlu1 %v8355_v20, %s9039_s9 }
 0x117   : > { %1942 = vst.msk [vmem:[#allocation3 + $0x98] sm:$0x1] %vm1905_vm2, %v9041_v19  ;;  %1945 = vst.msk [vmem:[#allocation3 + $0xa4] sm:$0x1] %vm1905_vm2, %v9041_v19  ;;  %v1619_v34 = vld [vmem:[#allocation2 + $0x30] sm:$0xff]  ;;  %v1620_v46 = vld [vmem:[#allocation2 + $0x38] sm:$0xff]  ;;  %v1159_v58 = vpop.permute.xlu0 %1158 }
 0x118   : > { %1948 = vst.msk [vmem:[#allocation3 + $0xb0] sm:$0x1] %vm1905_vm2, %v9041_v19  ;;  %1951 = vst.msk [vmem:[#allocation3 + $0xbc] sm:$0x1] %vm1905_vm2, %v9041_v19  ;;  %8839 = vmatprep.mubr.msk.bf16.mxu0 %vm1656_vm0, %v1619_v34  ;;  %v2642_v53 = vld [vmem:[#allocation3 + $0x8] sm:$0x1]  ;;  %v1161_v8 = vpop.permute.xlu1 %1160 }
 0x119   : > { %1954 = vst.msk [vmem:[#allocation3 + $0xc8] sm:$0x1] %vm1905_vm2, %v9041_v19  ;;  %1957 = vst.msk [vmem:[#allocation3 + $0xd4] sm:$0x1] %vm1905_vm2, %v9041_v19  ;;  %8840 = vmatmul.mubr.msk.bf16.gmra.mrb[12].mxu0 %vm1656_vm0, %v1620_v46  ;;  %v2708_v57 = vshll.u32 %v2642_v53, 16  ;;  %1576 = vrot.lane.b32.xlu0 %v9908_v62, %s9040_s10 }
 0x11a   : > { %885 = vst.msk [vmem:[#allocation2 + $0x40] sm:$0xff] %vm876_vm8, %v845_v25  ;;  %886 = vst.msk [vmem:[#allocation2 + $0x48] sm:$0xff] %vm876_vm8, %v847_v36  ;;  %1578 = vrot.lane.b32.xlu1 %v8357_v54, %s9040_s10  ;;  %v3187_v51 = vld [vmem:[#allocation3 + $0x8] sm:$0x1] }
 0x11b   : > { %1129 = vst.msk [vmem:[#allocation2 + $0x40] sm:$0xff] %vm1120_vm9, %v1089_v27  ;;  %1130 = vst.msk [vmem:[#allocation2 + $0x48] sm:$0xff] %vm1120_vm9, %v1091_v50  ;;  %v2710_v12 = vrot.slane %v2708_v57, 5  ;;  %v1251_v15 = vpop.permute.xlu0 %1250  ;;  %v3286_v16 = vrot.slane %v3187_v51, 5 }
 0x11c   : > { %1199 = vst.msk [vmem:[#allocation2 + $0x40] sm:$0xff] %vm1190_vm10, %v1159_v58  ;;  %1200 = vst.msk [vmem:[#allocation2 + $0x48] sm:$0xff] %vm1190_vm10, %v1161_v8  ;;  %v1253_v35 = vpop.permute.xlu1 %1252 }
 0x11d   : > { %v2711_v0 = vsel %vm9147_vm6, %v2706_v61, %v2710_v12  ;;  %1291 = vst.msk [vmem:[#allocation2 + $0x40] sm:$0xff] %vm1282_vm11, %v1251_v15  ;;  %1292 = vst.msk [vmem:[#allocation2 + $0x48] sm:$0xff] %vm1282_vm11, %v1253_v35  ;;  %v3287_v47 = vsel %vm9110_vm5, %v3285_v38, %v3286_v16 }
 0x11e   : > { %v8426_v42 = vcombine.low %v2701_v18, %v2711_v0  ;;  %v8458_v45 = vcombine.low %v3284_v43, %v3287_v47 }
 0x11f   : > { %v1327_v11 = vpop.permute.xlu0 %1326 }
 0x120   : > { %3120 = vrot.lane.b32.xlu1 %v8426_v42, %s9040_s10  ;;  %1367 = vst.msk [vmem:[#allocation2 + $0x40] sm:$0xff] %vm1358_vm12, %v1327_v11  ;;  %v1329_v10 = vpop.permute.xlu1 %1328  ;;  %v10139_v11 = vld [vmem:[%s12252_s2] ss:$0 sm:$0xff] }
 0x121   : > { %1368 = vst.msk [vmem:[#allocation2 + $0x48] sm:$0xff] %vm1358_vm12, %v1329_v10 }
 0x123   : > { %v1397_v23 = vpop.permute.xlu0 %1396 }
 0x124   : > { %3441 = vrot.lane.b32.xlu1 %v8458_v45, %s9042_s13  ;;  %1437 = vst.msk [vmem:[#allocation2 + $0x40] sm:$0xff] %vm1428_vm13, %v1397_v23  ;;  %v1399_v22 = vpop.permute.xlu1 %1398 }
 0x125   : > { %1438 = vst.msk [vmem:[#allocation2 + $0x48] sm:$0xff] %vm1428_vm13, %v1399_v22 }
 0x127   : > { %v1489_v62 = vpop.permute.xlu0 %1488 }
 0x128   : > { %1529 = vst.msk [vmem:[#allocation2 + $0x40] sm:$0xff] %vm1520_vm14, %v1489_v62  ;;  %v1491_v44 = vpop.permute.xlu1 %1490 }
 0x129   : > { %1530 = vst.msk [vmem:[#allocation2 + $0x48] sm:$0xff] %vm1520_vm14, %v1491_v44 }
 0x12b   : > { %v1565_v30 = vpop.permute.xlu0 %1564 }
 0x12c   : > { %1605 = vst.msk [vmem:[#allocation2 + $0x40] sm:$0xff] %vm1596_vm15, %v1565_v30  ;;  %v1567_v9 = vpop.permute.xlu1 %1566 }
 0x12d   : > { %1606 = vst.msk [vmem:[#allocation2 + $0x48] sm:$0xff] %vm1596_vm15, %v1567_v9 }
 0x12f   : > { %v849_v19 = vpop.permute.xlu0 %848 }
 0x130   : > { %887 = vst.msk [vmem:[#allocation2 + $0x50] sm:$0xff] %vm876_vm8, %v849_v19  ;;  %v851_v1 = vpop.permute.xlu1 %850 }
 0x131   : > { %888 = vst.msk [vmem:[#allocation2 + $0x58] sm:$0xff] %vm876_vm8, %v851_v1 }
 0x133   : > { %v1093_v7 = vpop.permute.xlu0 %1092  ;;  %v1621_v17 = vld [vmem:[#allocation2 + $0x40] sm:$0xff] }
 0x134   : > { %1131 = vst.msk [vmem:[#allocation2 + $0x50] sm:$0xff] %vm1120_vm9, %v1093_v7  ;;  %v1095_v29 = vpop.permute.xlu1 %1094  ;;  %8843 = vmatprep.mubr.msk.bf16.mxu0 %vm1656_vm0, %v1621_v17  ;;  %v1622_v56 = vld [vmem:[#allocation2 + $0x48] sm:$0xff] }
 0x135   : > { %1132 = vst.msk [vmem:[#allocation2 + $0x58] sm:$0xff] %vm1120_vm9, %v1095_v29  ;;  %8844 = vmatmul.mubr.msk.bf16.gmra.mrb[16].mxu0 %vm1656_vm0, %v1622_v56 }
 0x137   : > { %v1163_v48 = vpop.permute.xlu0 %1162 }
 0x138   : > { %1201 = vst.msk [vmem:[#allocation2 + $0x50] sm:$0xff] %vm1190_vm10, %v1163_v48  ;;  %v1165_v25 = vpop.permute.xlu1 %1164 }
 0x139   : > { %1202 = vst.msk [vmem:[#allocation2 + $0x58] sm:$0xff] %vm1190_vm10, %v1165_v25 }
 0x13b   : > { %v1255_v28 = vpop.permute.xlu0 %1254 }
 0x13c   : > { %1293 = vst.msk [vmem:[#allocation2 + $0x50] sm:$0xff] %vm1282_vm11, %v1255_v28  ;;  %v1257_v59 = vpop.permute.xlu1 %1256 }
 0x13d   : > { %1294 = vst.msk [vmem:[#allocation2 + $0x58] sm:$0xff] %vm1282_vm11, %v1257_v59 }
 0x13f   : > { %v1331_v4 = vpop.permute.xlu0 %1330 }
 0x140   : > { %1369 = vst.msk [vmem:[#allocation2 + $0x50] sm:$0xff] %vm1358_vm12, %v1331_v4  ;;  %v1333_v36 = vpop.permute.xlu1 %1332 }
 0x141   : > { %1370 = vst.msk [vmem:[#allocation2 + $0x58] sm:$0xff] %vm1358_vm12, %v1333_v36 }
 0x143   : > { %v1401_v20 = vpop.permute.xlu0 %1400 }
 0x144   : > { %1439 = vst.msk [vmem:[#allocation2 + $0x50] sm:$0xff] %vm1428_vm13, %v1401_v20  ;;  %v1403_v37 = vpop.permute.xlu1 %1402 }
 0x145   : > { %1440 = vst.msk [vmem:[#allocation2 + $0x58] sm:$0xff] %vm1428_vm13, %v1403_v37 }
 0x147   : > { %v1493_v33 = vpop.permute.xlu0 %1492 }
 0x148   : > { %1531 = vst.msk [vmem:[#allocation2 + $0x50] sm:$0xff] %vm1520_vm14, %v1493_v33  ;;  %v1495_v5 = vpop.permute.xlu1 %1494 }
 0x149   : > { %1532 = vst.msk [vmem:[#allocation2 + $0x58] sm:$0xff] %vm1520_vm14, %v1495_v5 }
 0x14b   : > { %v1569_v39 = vpop.permute.xlu0 %1568 }
 0x14c   : > { %1607 = vst.msk [vmem:[#allocation2 + $0x50] sm:$0xff] %vm1596_vm15, %v1569_v39  ;;  %v1571_v26 = vpop.permute.xlu1 %1570 }
 0x14d   : > { %1608 = vst.msk [vmem:[#allocation2 + $0x58] sm:$0xff] %vm1596_vm15, %v1571_v26  ;;  %v2390_v26 = vld [vmem:[#allocation3 + $0x18] sm:$0xf] }
 0x14f   : > { %v853_v6 = vpop.permute.xlu0 %852 }
 0x150   : > { %889 = vst.msk [vmem:[#allocation2 + $0x60] sm:$0xff] %vm876_vm8, %v853_v6  ;;  %v855_v27 = vpop.permute.xlu1 %854 }
 0x151   : > { %890 = vst.msk [vmem:[#allocation2 + $0x68] sm:$0xff] %vm876_vm8, %v855_v27 }
 0x153   : > { %v1097_v34 = vpop.permute.xlu0 %1096  ;;  %v1623_v63 = vld [vmem:[#allocation2 + $0x50] sm:$0xff] }
 0x154   : > { %1133 = vst.msk [vmem:[#allocation2 + $0x60] sm:$0xff] %vm1120_vm9, %v1097_v34  ;;  %v1099_v21 = vpop.permute.xlu1 %1098  ;;  %8847 = vmatprep.mubr.msk.bf16.mxu0 %vm1656_vm0, %v1623_v63  ;;  %v1624_v50 = vld [vmem:[#allocation2 + $0x58] sm:$0xff] }
 0x155   : > { %1134 = vst.msk [vmem:[#allocation2 + $0x68] sm:$0xff] %vm1120_vm9, %v1099_v21  ;;  %8848 = vmatmul.mubr.msk.bf16.gmra.mrb[20].mxu0 %vm1656_vm0, %v1624_v50  ;;  %v2381_v21 = vld [vmem:[#allocation3 + $0xc] sm:$0xf] }
 0x157   : > { %v1167_v46 = vpop.permute.xlu0 %1166 }
 0x158   : > { %1203 = vst.msk [vmem:[#allocation2 + $0x60] sm:$0xff] %vm1190_vm10, %v1167_v46  ;;  %v1169_v32 = vpop.permute.xlu1 %1168 }
 0x159   : > { %1204 = vst.msk [vmem:[#allocation2 + $0x68] sm:$0xff] %vm1190_vm10, %v1169_v32 }
 0x15b   : > { %v1259_v60 = vpop.permute.xlu0 %1258 }
 0x15c   : > { %1295 = vst.msk [vmem:[#allocation2 + $0x60] sm:$0xff] %vm1282_vm11, %v1259_v60  ;;  %v1261_v49 = vpop.permute.xlu1 %1260 }
 0x15d   : > { %1296 = vst.msk [vmem:[#allocation2 + $0x68] sm:$0xff] %vm1282_vm11, %v1261_v49 }
 0x15f   : > { %v1335_v41 = vpop.permute.xlu0 %1334 }
 0x160   : > { %1371 = vst.msk [vmem:[#allocation2 + $0x60] sm:$0xff] %vm1358_vm12, %v1335_v41  ;;  %v1337_v53 = vpop.permute.xlu1 %1336 }
 0x161   : > { %1372 = vst.msk [vmem:[#allocation2 + $0x68] sm:$0xff] %vm1358_vm12, %v1337_v53  ;;  %v2394_v53 = vld [vmem:[#allocation3 + $0x20] sm:$0x1] }
 0x163   : > { %v1405_v54 = vpop.permute.xlu0 %1404 }
 0x164   : > { %1441 = vst.msk [vmem:[#allocation2 + $0x60] sm:$0xff] %vm1428_vm13, %v1405_v54  ;;  %v1407_v14 = vpop.permute.xlu1 %1406 }
 0x165   : > { %1442 = vst.msk [vmem:[#allocation2 + $0x68] sm:$0xff] %vm1428_vm13, %v1407_v14 }
 0x167   : > { %v1497_v55 = vpop.permute.xlu0 %1496 }
 0x168   : > { %1533 = vst.msk [vmem:[#allocation2 + $0x60] sm:$0xff] %vm1520_vm14, %v1497_v55  ;;  %v1499_v57 = vpop.permute.xlu1 %1498 }
 0x169   : > { %1534 = vst.msk [vmem:[#allocation2 + $0x68] sm:$0xff] %vm1520_vm14, %v1499_v57 }
 0x16b   : > { %v1573_v58 = vpop.permute.xlu0 %1572 }
 0x16c   : > { %1609 = vst.msk [vmem:[#allocation2 + $0x60] sm:$0xff] %vm1596_vm15, %v1573_v58  ;;  %v1575_v8 = vpop.permute.xlu1 %1574 }
 0x16d   : > { %1610 = vst.msk [vmem:[#allocation2 + $0x68] sm:$0xff] %vm1596_vm15, %v1575_v8 }
 0x16f   : > { %v857_v31 = vpop.permute.xlu0 %856 }
 0x170   : > { %891 = vst.msk [vmem:[#allocation2 + $0x70] sm:$0xff] %vm876_vm8, %v857_v31  ;;  %v859_v61 = vpop.permute.xlu1 %858  ;;  %v2387_v31 = vld [vmem:[#allocation3 + $0x14] sm:$0x1] }
 0x171   : > { %892 = vst.msk [vmem:[#allocation2 + $0x78] sm:$0xff] %vm876_vm8, %v859_v61  ;;  %vm10149_vm8 = vmand %vm1902_vm1, %vm2379_vm3  ;;  %vm7992_vm3 = vcmask 1046534  }
 0x173   : > { %v1101_v12 = vpop.permute.xlu0 %1100  ;;  %v1625_v18 = vld [vmem:[#allocation2 + $0x60] sm:$0xff] }
 0x174   : > { %1135 = vst.msk [vmem:[#allocation2 + $0x70] sm:$0xff] %vm1120_vm9, %v1101_v12  ;;  %v1103_v0 = vpop.permute.xlu1 %1102  ;;  %8851 = vmatprep.mubr.msk.bf16.mxu0 %vm1656_vm0, %v1625_v18  ;;  %v1626_v24 = vld [vmem:[#allocation2 + $0x68] sm:$0xff] }
 0x175   : > { %1136 = vst.msk [vmem:[#allocation2 + $0x78] sm:$0xff] %vm1120_vm9, %v1103_v0  ;;  %8852 = vmatmul.mubr.msk.bf16.gmra.mrb[24].mxu0 %vm1656_vm0, %v1626_v24  ;;  %vm10156_vm9 = vmor %vm2054_vm4, %vm2055_vm7  ;;  %v8969_v0 = vld [vmem:[#allocation3] sm:$0xff]   ;;  %vm8214_vm7 = vcmask 523264  }
 0x177   : > { %v1171_v15 = vpop.permute.xlu0 %1170 }
 0x178   : > { %1205 = vst.msk [vmem:[#allocation2 + $0x70] sm:$0xff] %vm1190_vm10, %v1171_v15  ;;  %v1173_v42 = vpop.permute.xlu1 %1172 }
 0x179   : > { %1206 = vst.msk [vmem:[#allocation2 + $0x78] sm:$0xff] %vm1190_vm10, %v1173_v42  ;;  %vm10162_vm10 = vmand %vm1905_vm2, %vm2054_vm4  ;;  %vm7990_vm2 = vcmask 1045509   ;;  %vm7994_vm4 = vcmask 1047559  }
 0x17b   : > { %v1263_v3 = vpop.permute.xlu0 %1262 }
 0x17c   : > { %1297 = vst.msk [vmem:[#allocation2 + $0x70] sm:$0xff] %vm1282_vm11, %v1263_v3  ;;  %v1265_v40 = vpop.permute.xlu1 %1264 }
 0x17d   : > { %1298 = vst.msk [vmem:[#allocation2 + $0x78] sm:$0xff] %vm1282_vm11, %v1265_v40  ;;  %vm3168_vm11 = vcmask 523520  }
 0x17f   : > { %v1339_v35 = vpop.permute.xlu0 %1338 }
 0x180   : > { %1373 = vst.msk [vmem:[#allocation2 + $0x70] sm:$0xff] %vm1358_vm12, %v1339_v35  ;;  %v1341_v51 = vpop.permute.xlu1 %1340 }
 0x181   : > { %1374 = vst.msk [vmem:[#allocation2 + $0x78] sm:$0xff] %vm1358_vm12, %v1341_v51  ;;  %vm2623_vm12 = vcmask 261120  }
 0x182   : > { %2624 = vst.msk [vmem:[#allocation4] sm:$0xff] %vm2623_vm12, %v8969_v0 }
 0x183   : > { %v1409_v2 = vpop.permute.xlu0 %1408 }
 0x184   : > { %1443 = vst.msk [vmem:[#allocation2 + $0x70] sm:$0xff] %vm1428_vm13, %v1409_v2  ;;  %v1411_v38 = vpop.permute.xlu1 %1410 }
 0x185   : > { %1444 = vst.msk [vmem:[#allocation2 + $0x78] sm:$0xff] %vm1428_vm13, %v1411_v38  ;;  %vm3489_vm13 = vcmask 785920  }
 0x187   : > { %v1501_v16 = vpop.permute.xlu0 %1500 }
 0x188   : > { %1535 = vst.msk [vmem:[#allocation2 + $0x70] sm:$0xff] %vm1520_vm14, %v1501_v16  ;;  %v1503_v43 = vpop.permute.xlu1 %1502 }
 0x189   : > { %1536 = vst.msk [vmem:[#allocation2 + $0x78] sm:$0xff] %vm1520_vm14, %v1503_v43  ;;  %vm3666_vm14 = vcmask 1048320  }
 0x18b   : > { %v1577_v47 = vpop.permute.xlu0 %1576  ;;  %v8829_v10 = vpop.f32.mrb[0].mxu0 }
 0x18c   : > { %1611 = vst.msk [vmem:[#allocation2 + $0x70] sm:$0xff] %vm1596_vm15, %v1577_v47  ;;  %v1752_v45 = vadd.f32 %v8829_v10, %v10139_v11  ;;  %v1579_v23 = vpop.permute.xlu1 %1578  ;;  %v1743_v22 = vpop.f32.mrb[1].mxu0 }
 0x18d   : > { %1612 = vst.msk [vmem:[#allocation2 + $0x78] sm:$0xff] %vm1596_vm15, %v1579_v23  ;;  %v1744_v62 = vadd.f32 %v10139_v11, %v1743_v22  ;;  %v8830_v44 = vpop.f32.mrb[2].mxu0  ;;  %vm7984_vm15 = vcmask 1042434  }
 0x18e   : > { %v1872_v30 = vmax.f32 %v1752_v45, 0.0  ;;  %v1755_v9 = vadd.f32 %v8830_v44, %v10139_v11  ;;  %v1746_v19 = vpop.f32.mrb[3].mxu0 }
 0x18f   : > { %v1870_v1 = vmax.f32 %v1744_v62, 0.0  ;;  %v1747_v7 = vadd.f32 %v10139_v11, %v1746_v19 }
 0x190   : > { %v8642_v17 = vpack.c.bf16 %v1872_v30, %v1872_v30  ;;  %v1873_v29 = vmax.f32 %v1755_v9, 0.0 }
 0x191   : > { %v8640_v56 = vpack.c.bf16 %v1870_v1, %v1870_v1  ;;  %v1871_v48 = vmax.f32 %v1747_v7, 0.0 }
 0x192   : > { %v2075_v25 = vshrl.u32 %v8642_v17, 16  ;;  %v8643_v28 = vpack.c.bf16 %v1873_v29, %v1873_v29  ;;  %v2078_v37 = vshll.u32 %v8642_v17, 16  ;;  %v3121_v24 = vpop.permute.xlu1 %3120 }
 0x193   : > { %v2058_v59 = vshrl.u32 %v8640_v56, 16  ;;  %v8641_v4 = vpack.c.bf16 %v1871_v48, %v1871_v48  ;;  %v1627_v36 = vld [vmem:[#allocation2 + $0x70] sm:$0xff]  ;;  %v2061_v27 = vshll.u32 %v8640_v56, 16  ;;  %3169 = vst.msk [vmem:[#allocation4] sm:$0xff] %vm3168_vm11, %v3121_v24 }
 0x194   : > { %v2077_v20 = vrot.slane %v2075_v25, 7  ;;  %v2083_v33 = vshrl.u32 %v8643_v28, 16  ;;  %8855 = vmatprep.mubr.msk.bf16.mxu0 %vm1656_vm0, %v1627_v36  ;;  %v1628_v5 = vld [vmem:[#allocation2 + $0x78] sm:$0xff]  ;;  %v2086_v32 = vshll.u32 %v8643_v28, 16 }
 0x195   : > { %v2060_v6 = vrot.slane %v2058_v59, 7  ;;  %v2066_v34 = vshrl.u32 %v8641_v4, 16  ;;  %8856 = vmatmul.mubr.msk.bf16.gmra.mrb[28].mxu0 %vm1656_vm0, %v1628_v5  ;;  %v2069_v14 = vshll.u32 %v8641_v4, 16  ;;  %vm7986_vm0 = vcmask 1043459  }
 0x196   : > { %v2080_v63 = vor.u32 %v2078_v37, %v2077_v20  ;;  %v2085_v46 = vrot.slane %v2083_v33, 7  ;;  %v2081_v60 = vrot.slane %v2077_v20, 4  ;;  %v3442_v35 = vpop.permute.xlu1 %3441 }
 0x197   : > { %v2063_v49 = vor.u32 %v2061_v27, %v2060_v6  ;;  %v2068_v54 = vrot.slane %v2066_v34, 7  ;;  %v2064_v57 = vrot.slane %v2060_v6, 4  ;;  %3490 = vst.msk [vmem:[#allocation4] sm:$0xff] %vm3489_vm13, %v3442_v35 }
 0x198   : > { %v2391_v55 = vsel %vm10149_vm8, %v2080_v63, %v2390_v26  ;;  %v2088_v58 = vor.u32 %v2086_v32, %v2085_v46  ;;  %v2090_v8 = vrot.slane %v2085_v46, 4 }
 0x199   : > { %2392 = vst [vmem:[#allocation3 + $0x18] sm:$0xf] %v2391_v55  ;;  %v2382_v61 = vsel %vm10149_vm8, %v2063_v49, %v2381_v21  ;;  %v2071_v12 = vor.u32 %v2069_v14, %v2068_v54  ;;  %v2073_v18 = vrot.slane %v2068_v54, 4 }
 0x19a   : > { %2383 = vst [vmem:[#allocation3 + $0xc] sm:$0xf] %v2382_v61  ;;  %v2089_v15 = vsel %vm10156_vm9, %v2081_v60, %v2088_v58  ;;  %v2395_v42 = vsel %vm10162_vm10, %v2090_v8, %v2394_v53 }
 0x19b   : > { %2393 = vst.msk [vmem:[#allocation3 + $0x1c] sm:$0xf] %vm1902_vm1, %v2089_v15  ;;  %2396 = vst [vmem:[#allocation3 + $0x20] sm:$0x1] %v2395_v42  ;;  %v2072_v3 = vsel %vm10156_vm9, %v2064_v57, %v2071_v12  ;;  %v2388_v40 = vsel %vm10162_vm10, %v2073_v18, %v2387_v31 }
 0x19c   : > { %2384 = vst.msk [vmem:[#allocation3 + $0x10] sm:$0xf] %vm1902_vm1, %v2072_v3  ;;  %2389 = vst [vmem:[#allocation3 + $0x14] sm:$0x1] %v2388_v40 }
 0x1a0   : > { %v4198_v51 = vld [vmem:[#allocation3 + $0x18] sm:$0xe] }
 0x1a1   : > { %v3191_v2 = vld [vmem:[#allocation3 + $0x18] sm:$0xe]  ;;  %v8507_v43 = vrot.slane %v4198_v51, 9  ;;  %v4195_v7 = vld [vmem:[#allocation3 + $0xc] sm:$0xe] }
 0x1a2   : > { %v8954_v38 = vld [vmem:[#allocation3 + $0x18] sm:$0xff]   ;;  %v8444_v47 = vrot.slane %v3191_v2, 9  ;;  %v4200_v45 = vld [vmem:[#allocation3 + $0x20] sm:$0x1]  ;;  %v3188_v25 = vld [vmem:[#allocation3 + $0xc] sm:$0xe] }
 0x1a3   : > { %v8955_v16 = vld [vmem:[#allocation3 + $0x18] sm:$0xff]   ;;  %4628 = vrot.lane.b32.xlu0 %v8954_v38, %s9042_s13  ;;  %v8956_v22 = vld [vmem:[#allocation3 + $0xc] sm:$0xff]   ;;  %v3193_v44 = vld [vmem:[#allocation3 + $0x20] sm:$0x1]  ;;  %v4303_v19 = vrot.slane %v4200_v45, 5  ;;  %v8506_v36 = vrot.slane %v4195_v7, 9 }
 0x1a4   : > { %v4199_v10 = vld [vmem:[#allocation3 + $0x1c] sm:$0xf]  ;;  %3620 = vrot.lane.b32.xlu1 %v8955_v16, %s9043_s16  ;;  %v3300_v1 = vrot.slane %v3193_v44, 5  ;;  %v4196_v17 = vld [vmem:[#allocation3 + $0x10] sm:$0xf]  ;;  %v8443_v49 = vrot.slane %v3188_v25, 9 }
 0x1a5   : > { %v3192_v23 = vld [vmem:[#allocation3 + $0x1c] sm:$0xf]  ;;  %v4300_v62 = vrot.slane %v4199_v10, 5  ;;  %v4197_v48 = vld [vmem:[#allocation3 + $0x14] sm:$0x1]  ;;  %v4293_v20 = vrot.slane %v4196_v17, 5 }
 0x1a6   : > { %v3297_v30 = vrot.slane %v3192_v23, 5  ;;  %v8984_v9 = vld [vmem:[#allocation3 + $0x18] sm:$0xff]   ;;  %v3189_v37 = vld [vmem:[#allocation3 + $0x10] sm:$0xf]  ;;  %v4296_v27 = vrot.slane %v4197_v48, 5 }
 0x1a7   : > { %v4302_v29 = vrot.slane %v4300_v62, 4  ;;  %2626 = vst.msk [vmem:[#allocation4 + $0x30] sm:$0xff] %vm2623_vm12, %v8984_v9  ;;  %v4301_v59 = vsel %vm9110_vm5, %v8507_v43, %v4300_v62  ;;  %v10196_v34 = vld [vmem:[#allocation3 + $0x18] sm:$0xf]  ;;  %v3190_v60 = vld [vmem:[#allocation3 + $0x14] sm:$0x1]  ;;  %v4294_v61 = vsel %vm9110_vm5, %v8506_v36, %v4293_v20 }
 0x1a8   : > { %v3299_v56 = vrot.slane %v3297_v30, 4  ;;  %v8833_v28 = vpop.f32.mrb[4].mxu0  ;;  %v3298_v4 = vsel %vm9110_vm5, %v8444_v47, %v3297_v30  ;;  %3618 = vrot.lane.b32.xlu1 %v8956_v22, %s9043_s16  ;;  %v8989_v53 = vld [vmem:[#allocation3 + $0xc] sm:$0xff]   ;;  %v4295_v57 = vrot.slane %v4293_v20, 4  ;;  %v3290_v58 = vrot.slane %v3189_v37, 5  ;;  %v8972_v43 = vld [vmem:[%s12253_s3 + $0x40] sm:$0xff]  }
 0x1a9   : > { %v1768_v33 = vadd.f32 %v8833_v28, %v10139_v11  ;;  %v1759_v5 = vpop.f32.mrb[5].mxu0  ;;  %v4304_v26 = vsel %vm9110_vm5, %v4302_v29, %v4303_v19  ;;  %v2737_v12 = vshrl.u32 %v10196_v34, 16  ;;  %2625 = vst.msk [vmem:[#allocation4 + $0x18] sm:$0xff] %vm2623_vm12, %v8989_v53  ;;  %v3293_v15 = vrot.slane %v3190_v60, 5  ;;  %v2404_v47 = vld [vmem:[#allocation3 + $0x30] sm:$0xf]  ;;  %8691 = vmatprep.subr.bf16.mxu0 %v8972_v43  ;;  %8895 = vmatprep.subr.bf16.mxu1 %v8972_v43 }
 0x1aa   : > { %v3301_v6 = vsel %vm9110_vm5, %v3299_v56, %v3300_v1  ;;  %v1760_v63 = vadd.f32 %v10139_v11, %v1759_v5  ;;  %v8523_v21 = vcombine.low %v4301_v59, %v4304_v26  ;;  %v8834_v46 = vpop.f32.mrb[6].mxu0  ;;  %v4297_v24 = vsel %vm9110_vm5, %v4295_v57, %v4296_v27  ;;  %v2647_v22 = vld [vmem:[#allocation3 + $0x1c] sm:$0xf]  ;;  %v2397_v9 = vld [vmem:[#allocation3 + $0x24] sm:$0xf] }
 0x1ab   : > { %v8460_v32 = vcombine.low %v3298_v4, %v3301_v6  ;;  %v1876_v54 = vmax.f32 %v1768_v33, 0.0  ;;  %v1771_v14 = vadd.f32 %v8834_v46, %v10139_v11  ;;  %v1762_v55 = vpop.f32.mrb[7].mxu0  ;;  %v8522_v40 = vcombine.low %v4294_v61, %v4297_v24  ;;  %v2408_v29 = vld [vmem:[#allocation3 + $0x38] sm:$0x1]  ;;  %v2401_v4 = vld [vmem:[#allocation3 + $0x2c] sm:$0x1] }
 0x1ac   : > { %v1874_v8 = vmax.f32 %v1760_v63, 0.0  ;;  %4453 = vrot.lane.b32.xlu0 %v8523_v21, %s9040_s10  ;;  %v1763_v31 = vadd.f32 %v10139_v11, %v1762_v55  ;;  %v3292_v35 = vrot.slane %v3290_v58, 4  ;;  %v3291_v16 = vsel %vm9110_vm5, %v8443_v49, %v3290_v58  ;;  %v2648_v36 = vld [vmem:[#allocation3 + $0x20] sm:$0x1]  ;;  %v4692_v37 = vld [vmem:[#allocation3 + $0x18] sm:$0xf] }
 0x1ad   : > { %v8646_v18 = vpack.c.bf16 %v1876_v54, %v1876_v54  ;;  %v1877_v0 = vmax.f32 %v1771_v14, 0.0  ;;  %3445 = vrot.lane.b32.xlu1 %v8460_v32, %s9042_s13  ;;  %v2739_v62 = vrot.slane %v2737_v12, 4  ;;  %v2740_v48 = vshll.u32 %v10196_v34, 16  ;;  %v8973_v27 = vld [vmem:[%s12253_s3] sm:$0xff]   ;;  %v4693_v32 = vld [vmem:[#allocation3 + $0x1c] sm:$0xf] }
 0x1ae   : > { %v8644_v42 = vpack.c.bf16 %v1874_v8, %v1874_v8  ;;  %v1875_v3 = vmax.f32 %v1763_v31, 0.0  ;;  %v3294_v23 = vsel %vm9110_vm5, %v3292_v35, %v3293_v15  ;;  %v2746_v20 = vshll.u32 %v2647_v22, 16  ;;  %8692 = vmatpush3.bf16.msra.mxu0 %v8973_v27  ;;  %8903 = vmatpush3.bf16.msra.mxu1 %v8973_v27  ;;  %v4694_v8 = vld [vmem:[#allocation3 + $0x20] sm:$0x1] }
 0x1af   : > { %v2109_v51 = vshrl.u32 %v8646_v18, 16  ;;  %v2112_v2 = vshll.u32 %v8646_v18, 16  ;;  %v8647_v38 = vpack.c.bf16 %v1877_v0, %v1877_v0  ;;  %v8459_v1 = vcombine.low %v3291_v16, %v3294_v23  ;;  %v2643_v0 = vld [vmem:[#allocation3 + $0xc] sm:$0xf] }
 0x1b0   : > { %v2092_v10 = vshrl.u32 %v8644_v42, 16  ;;  %v8645_v45 = vpack.c.bf16 %v1875_v3, %v1875_v3  ;;  %4451 = vrot.lane.b32.xlu0 %v8522_v40, %s9040_s10  ;;  %v2095_v30 = vshll.u32 %v8644_v42, 16  ;;  %v2742_v6 = vrot.slane %v2740_v48, 5  ;;  %v10236_v3 = vld [vmem:[#allocation3 + $0x10] sm:$0xf] }
 0x1b1   : > { %v2111_v44 = vrot.slane %v2109_v51, 7  ;;  %v2117_v19 = vshrl.u32 %v8647_v38, 16  ;;  %v2120_v17 = vshll.u32 %v8647_v38, 16  ;;  %3443 = vrot.lane.b32.xlu1 %v8459_v1, %s9042_s13  ;;  %v2748_v57 = vrot.slane %v2746_v20, 5  ;;  %v8974_v38 = vld [vmem:[%s12253_s3 + $0x48] sm:$0xff]  }
 0x1b2   : > { %v2094_v7 = vrot.slane %v2092_v10, 7  ;;  %v2100_v56 = vshrl.u32 %v8645_v45, 16  ;;  %v2103_v59 = vshll.u32 %v8645_v45, 16  ;;  %v2743_v54 = vor.u32 %v2742_v6, %v2739_v62  ;;  %v8977_v45 = vld [vmem:[%s12253_s3 + $0x8] sm:$0xff]   ;;  %8693 = vmatprep.subr.bf16.mxu0 %v8974_v38  ;;  %8896 = vmatprep.subr.bf16.mxu1 %v8974_v38  ;;  %v2645_v20 = vld [vmem:[#allocation3 + $0x14] sm:$0x1] }
 0x1b3   : > { %v2114_v25 = vor.u32 %v2112_v2, %v2111_v44  ;;  %v2119_v28 = vrot.slane %v2117_v19, 7  ;;  %v2115_v33 = vrot.slane %v2111_v44, 4  ;;  %v2750_v58 = vshrl.u32 %v2647_v22, 16  ;;  %8694 = vmatpush3.bf16.msra.mxu0 %v8977_v45  ;;  %8904 = vmatpush3.bf16.msra.mxu1 %v8977_v45 }
 0x1b4   : > { %v2097_v5 = vor.u32 %v2095_v30, %v2094_v7  ;;  %v2102_v26 = vrot.slane %v2100_v56, 7  ;;  %v2098_v63 = vrot.slane %v2094_v7, 4  ;;  %v2756_v12 = vshll.u32 %v2648_v36, 16  ;;  %v8978_v30 = vld [vmem:[%s12253_s3 + $0x50] sm:$0xff]  }
 0x1b5   : > { %v2405_v34 = vsel %vm10149_vm8, %v2114_v25, %v2404_v47  ;;  %v2122_v21 = vor.u32 %v2120_v17, %v2119_v28  ;;  %v2124_v46 = vrot.slane %v2119_v28, 4  ;;  %v4741_v18 = vshrl.u32 %v4692_v37, 16  ;;  %8695 = vmatprep.subr.bf16.mxu0 %v8978_v30  ;;  %8897 = vmatprep.subr.bf16.mxu1 %v8978_v30  ;;  %v8980_v30 = vld [vmem:[%s12253_s3 + $0x58] sm:$0xff]  }
 0x1b6   : > { %2406 = vst [vmem:[#allocation3 + $0x30] sm:$0xf] %v2405_v34  ;;  %v2398_v60 = vsel %vm10149_vm8, %v2097_v5, %v2397_v9  ;;  %v2105_v49 = vor.u32 %v2103_v59, %v2102_v26  ;;  %v2107_v53 = vrot.slane %v2102_v26, 4  ;;  %v2752_v24 = vrot.slane %v2750_v58, 4 }
 0x1b7   : > { %2399 = vst [vmem:[#allocation3 + $0x24] sm:$0xf] %v2398_v60  ;;  %v2123_v14 = vsel %vm10156_vm9, %v2115_v33, %v2122_v21  ;;  %v2409_v55 = vsel %vm10162_vm10, %v2124_v46, %v2408_v29  ;;  %v4744_v15 = vshll.u32 %v4692_v37, 16  ;;  %v4750_v42 = vshll.u32 %v4693_v32, 16 }
 0x1b8   : > { %2407 = vst.msk [vmem:[#allocation3 + $0x34] sm:$0xf] %vm1902_vm1, %v2123_v14  ;;  %2410 = vst [vmem:[#allocation3 + $0x38] sm:$0x1] %v2409_v55  ;;  %v2106_v31 = vsel %vm10156_vm9, %v2098_v63, %v2105_v49  ;;  %v2402_v61 = vsel %vm10162_vm10, %v2107_v53, %v2401_v4  ;;  %v2744_v40 = vrot.slane %v2743_v54, 4  ;;  %v4743_v35 = vrot.slane %v4741_v18, 4 }
 0x1b9   : > { %2400 = vst.msk [vmem:[#allocation3 + $0x28] sm:$0xf] %vm1902_vm1, %v2106_v31  ;;  %2403 = vst [vmem:[#allocation3 + $0x2c] sm:$0x1] %v2402_v61  ;;  %v4754_v51 = vshrl.u32 %v4693_v32, 16  ;;  %v4760_v2 = vshll.u32 %v4694_v8, 16  ;;  %v2753_v16 = vor.u32 %v2752_v24, %v2748_v57 }
 0x1ba   : > { %v4746_v43 = vrot.slane %v4744_v15, 5  ;;  %v4752_v47 = vrot.slane %v4750_v42, 5  ;;  %v2713_v10 = vshrl.u32 %v2643_v0, 16  ;;  %v2758_v23 = vrot.slane %v2756_v12, 5 }
 0x1bb   : > { %v4756_v22 = vrot.slane %v4754_v51, 4  ;;  %v4762_v62 = vrot.slane %v4760_v2, 5  ;;  %v2716_v44 = vshll.u32 %v2643_v0, 16  ;;  %v2754_v9 = vrot.slane %v2753_v16, 4 }
 0x1bc   : > { %v4747_v19 = vor.u32 %v4746_v43, %v4743_v35  ;;  %v2722_v1 = vshll.u32 %v10236_v3, 16  ;;  %v2715_v48 = vrot.slane %v2713_v10, 4  ;;  %v2749_v4 = vsel %vm9147_vm6, %v2744_v40, %v2748_v57 }
 0x1bd   : > { %v4757_v17 = vor.u32 %v4756_v22, %v4752_v47  ;;  %v2759_v56 = vsel %vm9147_vm6, %v2754_v9, %v2758_v23  ;;  %v4204_v34 = vld [vmem:[#allocation3 + $0x30] sm:$0xe]  ;;  %v2718_v63 = vrot.slane %v2716_v44, 5  ;;  %v2726_v31 = vshrl.u32 %v10236_v3, 16 }
 0x1be   : > { %v10248_v7 = vld [vmem:[#allocation3 + $0x24] sm:$0xe]  ;;  %v4748_v36 = vrot.slane %v4747_v19, 4  ;;  %v8428_v27 = vcombine.low %v2749_v4, %v2759_v56  ;;  %v8509_v49 = vrot.slane %v4204_v34, 9  ;;  %v10267_v53 = vrot.slane %v2722_v1, 5 }
 0x1bf   : > { %v8957_v29 = vld [vmem:[#allocation3 + $0x30] sm:$0xff]   ;;  %v8571_v37 = vrot.slane %v10248_v7, 9  ;;  %v4758_v26 = vrot.slane %v4757_v17, 4  ;;  %v4206_v60 = vld [vmem:[#allocation3 + $0x38] sm:$0x1]  ;;  %v2719_v57 = vor.u32 %v2718_v63, %v2715_v48  ;;  %v2732_v61 = vshll.u32 %v2645_v20, 16 }
 0x1c0   : > { %v10252_v25 = vld [vmem:[#allocation3 + $0x28] sm:$0xf]  ;;  %v10254_v28 = vld [vmem:[#allocation3 + $0x2c] sm:$0x1]  ;;  %v8958_v59 = vld [vmem:[#allocation3 + $0x30] sm:$0xff]   ;;  %4632 = vrot.lane.b32.xlu0 %v8957_v29, %s9042_s13  ;;  %v4753_v21 = vsel %vm9147_vm6, %v4748_v36, %v4752_v47  ;;  %v4317_v55 = vrot.slane %v4206_v60, 5 }
 0x1c1   : > { %v5341_v33 = vrot.slane %v10252_v25, 5  ;;  %v5344_v5 = vrot.slane %v10254_v28, 5  ;;  %3624 = vrot.lane.b32.xlu1 %v8958_v59, %s9043_s16  ;;  %v8959_v6 = vld [vmem:[#allocation3 + $0x24] sm:$0xff]   ;;  %v4763_v46 = vsel %vm9147_vm6, %v4758_v26, %v4762_v62  ;;  %v4205_v32 = vld [vmem:[#allocation3 + $0x34] sm:$0xf]  ;;  %v2720_v40 = vrot.slane %v2719_v57, 4 }
 0x1c2   : > { %v8554_v54 = vcombine.low %v4753_v21, %v4763_v46  ;;  %v4314_v14 = vrot.slane %v4205_v32, 5  ;;  %v4201_v58 = vld [vmem:[#allocation3 + $0x24] sm:$0xe]  ;;  %v4202_v8 = vld [vmem:[#allocation3 + $0x28] sm:$0xf]  ;;  %v2728_v2 = vrot.slane %v2726_v31, 4 }
 0x1c3   : > { %v4203_v12 = vld [vmem:[#allocation3 + $0x2c] sm:$0x1]  ;;  %v8508_v18 = vrot.slane %v4201_v58, 9  ;;  %v4307_v0 = vrot.slane %v4202_v8, 5  ;;  %v8960_v24 = vld [vmem:[#allocation3 + $0x24] sm:$0xff]   ;;  %v2734_v38 = vrot.slane %v2732_v61, 5  ;;  %v2725_v23 = vsel %vm9147_vm6, %v2720_v40, %v10267_v53 }
 0x1c4   : > { %4630 = vrot.lane.b32.xlu0 %v8959_v6, %s9042_s13  ;;  %v4315_v15 = vsel %vm9110_vm5, %v8509_v49, %v4314_v14  ;;  %v4316_v42 = vrot.slane %v4314_v14, 4  ;;  %v4310_v35 = vrot.slane %v4203_v12, 5  ;;  %v3197_v51 = vld [vmem:[#allocation3 + $0x30] sm:$0xe]  ;;  %v3198_v43 = vld [vmem:[#allocation3 + $0x34] sm:$0xf]  ;;  %v2729_v17 = vor.u32 %v2728_v2, %v10267_v53 }
 0x1c5   : > { %3124 = vrot.lane.b32.xlu1 %v8428_v27, %s9040_s10  ;;  %v10276_v16 = vsel %vm9110_vm5, %v8508_v18, %v4307_v0  ;;  %v4309_v3 = vrot.slane %v4307_v0, 4  ;;  %v8979_v47 = vld [vmem:[%s12253_s3 + $0x10] sm:$0xff]   ;;  %v3199_v22 = vld [vmem:[#allocation3 + $0x38] sm:$0x1]  ;;  %v8446_v62 = vrot.slane %v3197_v51, 9  ;;  %v3311_v44 = vrot.slane %v3198_v43, 5 }
 0x1c6   : > { %v4318_v45 = vsel %vm9110_vm5, %v4316_v42, %v4317_v55  ;;  %v3194_v56 = vld [vmem:[#allocation3 + $0x24] sm:$0xe]  ;;  %v3195_v48 = vld [vmem:[#allocation3 + $0x28] sm:$0xf]  ;;  %8696 = vmatpush3.bf16.msra.mxu0 %v8979_v47  ;;  %v2730_v63 = vrot.slane %v2729_v17, 4  ;;  %v3314_v21 = vrot.slane %v3199_v22, 5  ;;  %8905 = vmatpush3.bf16.msra.mxu1 %v8979_v47 }
 0x1c7   : > { %v8525_v1 = vcombine.low %v4315_v15, %v4318_v45  ;;  %v4311_v29 = vsel %vm9110_vm5, %v4309_v3, %v4310_v35  ;;  %v10299_v20 = vsel %vm9110_vm5, %v8446_v62, %v3311_v44  ;;  %v3313_v26 = vrot.slane %v3311_v44, 4  ;;  %8697 = vmatprep.subr.bf16.mxu0 %v8980_v30  ;;  %v8981_v53 = vld [vmem:[%s12253_s3 + $0x18] sm:$0xff]   ;;  %8898 = vmatprep.subr.bf16.mxu1 %v8980_v30  ;;  %v3196_v12 = vld [vmem:[#allocation3 + $0x2c] sm:$0x1]  ;;  %v10319_v42 = vld [vmem:[#allocation3 + $0x30] sm:$0xf] }
 0x1c8   : > { %v8837_v10 = vpop.f32.mrb[8].mxu0  ;;  %5172 = vrot.lane.b32.xlu0 %v8554_v54, %s9043_s16  ;;  %v8524_v36 = vcombine.low %v10276_v16, %v4311_v29  ;;  %v8445_v60 = vrot.slane %v3194_v56, 9  ;;  %v3304_v49 = vrot.slane %v3195_v48, 5  ;;  %v2735_v55 = vsel %vm9147_vm6, %v2730_v63, %v2734_v38  ;;  %v2418_v40 = vld [vmem:[#allocation3 + $0x48] sm:$0xf]  ;;  %v8983_v16 = vld [vmem:[%s12253_s3 + $0x20] sm:$0xff]  }
 0x1c9   : > { %v1784_v9 = vadd.f32 %v8837_v10, %v10139_v11  ;;  %v1775_v19 = vpop.f32.mrb[9].mxu0  ;;  %3622 = vrot.lane.b32.xlu1 %v8960_v24, %s9043_s16  ;;  %v3315_v57 = vsel %vm9110_vm5, %v3313_v26, %v3314_v21  ;;  %v8427_v31 = vcombine.low %v2725_v23, %v2735_v55  ;;  %v2411_v43 = vld [vmem:[#allocation3 + $0x3c] sm:$0xf]  ;;  %v3307_v45 = vrot.slane %v3196_v12, 5  ;;  %v2422_v22 = vld [vmem:[#allocation3 + $0x50] sm:$0x1] }
 0x1ca   : > { %v1776_v59 = vadd.f32 %v10139_v11, %v1775_v19  ;;  %v8838_v4 = vpop.f32.mrb[10].mxu0  ;;  %v8462_v61 = vcombine.low %v10299_v20, %v3315_v57  ;;  %8698 = vmatpush3.bf16.msra.mxu0 %v8981_v53  ;;  %v10317_v15 = vsel %vm9110_vm5, %v8445_v60, %v3304_v49  ;;  %8906 = vmatpush3.bf16.msra.mxu1 %v8981_v53  ;;  %v3306_v38 = vrot.slane %v3304_v49, 4  ;;  %v8985_v29 = vld [vmem:[%s12253_s3 + $0x68] sm:$0xff]   ;;  %v8987_v48 = vld [vmem:[%s12253_s3 + $0x70] sm:$0xff]   ;;  %v2415_v20 = vld [vmem:[#allocation3 + $0x44] sm:$0x1] }
 0x1cb   : > { %v1880_v6 = vmax.f32 %v1784_v9, 0.0  ;;  %v1787_v27 = vadd.f32 %v8838_v4, %v10139_v11  ;;  %v1778_v34 = vpop.f32.mrb[11].mxu0  ;;  %v4789_v30 = vshrl.u32 %v10319_v42, 16  ;;  %v8986_v56 = vld [vmem:[%s12253_s3 + $0x28] sm:$0xff]   ;;  %v4700_v21 = vld [vmem:[#allocation3 + $0x38] sm:$0x1] }
 0x1cc   : > { %v1878_v46 = vmax.f32 %v1776_v59, 0.0  ;;  %v1779_v32 = vadd.f32 %v10139_v11, %v1778_v34  ;;  %4457 = vrot.lane.b32.xlu0 %v8525_v1, %s9040_s10  ;;  %v8982_v11 = vld [vmem:[%s12253_s3 + $0x60] sm:$0xff]   ;;  %v3308_v17 = vsel %vm9110_vm5, %v3306_v38, %v3307_v45  ;;  %v8988_v55 = vld [vmem:[%s12253_s3 + $0x30] sm:$0xff]  }
 0x1cd   : > { %v8650_v54 = vpack.c.bf16 %v1880_v6, %v1880_v6  ;;  %v1881_v14 = vmax.f32 %v1787_v27, 0.0  ;;  %8699 = vmatprep.subr.bf16.mxu0 %v8982_v11  ;;  %3122 = vrot.lane.b32.xlu1 %v8427_v31, %s9040_s10  ;;  %v8461_v26 = vcombine.low %v10317_v15, %v3308_v17  ;;  %v4699_v6 = vld [vmem:[#allocation3 + $0x34] sm:$0xf]  ;;  %v2654_v31 = vld [vmem:[#allocation3 + $0x38] sm:$0x1] }
 0x1ce   : > { %v8648_v58 = vpack.c.bf16 %v1878_v46, %v1878_v46  ;;  %v1879_v8 = vmax.f32 %v1779_v32, 0.0  ;;  %8899 = vmatprep.subr.bf16.mxu1 %v8982_v11  ;;  %8700 = vmatpush3.bf16.msra.mxu0 %v8983_v16  ;;  %v4791_v46 = vrot.slane %v4789_v30, 4  ;;  %v2652_v32 = vld [vmem:[#allocation3 + $0x30] sm:$0xf]  ;;  %v4695_v15 = vld [vmem:[#allocation3 + $0x24] sm:$0xf] }
 0x1cf   : > { %v2143_v18 = vshrl.u32 %v8650_v54, 16  ;;  %v2146_v0 = vshll.u32 %v8650_v54, 16  ;;  %v8651_v24 = vpack.c.bf16 %v1881_v14, %v1881_v14  ;;  %8907 = vmatpush3.bf16.msra.mxu1 %v8983_v16  ;;  %8701 = vmatprep.subr.bf16.mxu0 %v8985_v29  ;;  %v4792_v54 = vshll.u32 %v10319_v42, 16  ;;  %v2653_v14 = vld [vmem:[#allocation3 + $0x34] sm:$0xf] }
 0x1d0   : > { %v2126_v35 = vshrl.u32 %v8648_v58, 16  ;;  %v2129_v51 = vshll.u32 %v8648_v58, 16  ;;  %v8649_v2 = vpack.c.bf16 %v1879_v8, %v1879_v8  ;;  %4455 = vrot.lane.b32.xlu0 %v8524_v36, %s9040_s10  ;;  %8900 = vmatprep.subr.bf16.mxu1 %v8985_v29  ;;  %v4798_v58 = vshll.u32 %v4699_v6, 16 }
 0x1d1   : > { %v2145_v3 = vrot.slane %v2143_v18, 7  ;;  %v2151_v47 = vshrl.u32 %v8651_v24, 16  ;;  %v2154_v10 = vshll.u32 %v8651_v24, 16  ;;  %3449 = vrot.lane.b32.xlu1 %v8462_v61, %s9042_s13  ;;  %v4802_v8 = vshrl.u32 %v4699_v6, 16  ;;  %v8990_v61 = vld [vmem:[%s12253_s3 + $0x78] sm:$0xff]  }
 0x1d2   : > { %v2128_v23 = vrot.slane %v2126_v35, 7  ;;  %v2134_v62 = vshrl.u32 %v8649_v2, 16  ;;  %v2137_v44 = vshll.u32 %v8649_v2, 16  ;;  %8702 = vmatpush3.bf16.msra.mxu0 %v8986_v56  ;;  %v4808_v24 = vshll.u32 %v4700_v21, 16  ;;  %v2650_v6 = vld [vmem:[#allocation3 + $0x28] sm:$0xf] }
 0x1d3   : > { %v2148_v9 = vor.u32 %v2146_v0, %v2145_v3  ;;  %v2149_v19 = vrot.slane %v2145_v3, 4  ;;  %v2153_v1 = vrot.slane %v2151_v47, 7  ;;  %8703 = vmatprep.subr.bf16.mxu0 %v8987_v48  ;;  %8908 = vmatpush3.bf16.msra.mxu1 %v8986_v56  ;;  %v4794_v0 = vrot.slane %v4792_v54, 5 }
 0x1d4   : > { %v2131_v59 = vor.u32 %v2129_v51, %v2128_v23  ;;  %v2132_v4 = vrot.slane %v2128_v23, 4  ;;  %v2136_v36 = vrot.slane %v2134_v62, 7  ;;  %8901 = vmatprep.subr.bf16.mxu1 %v8987_v48  ;;  %v4800_v42 = vrot.slane %v4798_v58, 5  ;;  %v2649_v48 = vld [vmem:[#allocation3 + $0x24] sm:$0xf] }
 0x1d5   : > { %v2419_v27 = vsel %vm10149_vm8, %v2148_v9, %v2418_v40  ;;  %v2156_v34 = vor.u32 %v2154_v10, %v2153_v1  ;;  %v2158_v63 = vrot.slane %v2153_v1, 4  ;;  %3447 = vrot.lane.b32.xlu1 %v8461_v26, %s9042_s13  ;;  %v4804_v40 = vrot.slane %v4802_v8, 4  ;;  %v4696_v9 = vld [vmem:[#allocation3 + $0x28] sm:$0xf] }
 0x1d6   : > { %2420 = vst [vmem:[#allocation3 + $0x48] sm:$0xf] %v2419_v27  ;;  %v2412_v60 = vsel %vm10149_vm8, %v2131_v59, %v2411_v43  ;;  %v2139_v49 = vor.u32 %v2137_v44, %v2136_v36  ;;  %v2141_v53 = vrot.slane %v2136_v36, 4  ;;  %v2785_v35 = vshrl.u32 %v2652_v32, 16  ;;  %8704 = vmatpush3.bf16.msra.mxu0 %v8988_v55  ;;  %v8993_v43 = vld [vmem:[%s12253_s3 + $0x38] sm:$0xff]  }
 0x1d7   : > { %2413 = vst [vmem:[#allocation3 + $0x3c] sm:$0xf] %v2412_v60  ;;  %v2157_v57 = vsel %vm10156_vm9, %v2149_v19, %v2156_v34  ;;  %v2423_v11 = vsel %vm10162_vm10, %v2158_v63, %v2422_v22  ;;  %v2788_v51 = vshll.u32 %v2652_v32, 16  ;;  %v4795_v2 = vor.u32 %v4794_v0, %v4791_v46  ;;  %8705 = vmatprep.subr.bf16.mxu0 %v8990_v61  ;;  %v8994_v22 = vld [vmem:[%s12253_s3 + $0x80] sm:$0xff]   ;;  %v4697_v19 = vld [vmem:[#allocation3 + $0x2c] sm:$0x1] }
 0x1d8   : > { %2421 = vst.msk [vmem:[#allocation3 + $0x4c] sm:$0xf] %vm1902_vm1, %v2157_v57  ;;  %2424 = vst [vmem:[#allocation3 + $0x50] sm:$0x1] %v2423_v11  ;;  %v2140_v12 = vsel %vm10156_vm9, %v2132_v4, %v2139_v49  ;;  %v2416_v18 = vsel %vm10162_vm10, %v2141_v53, %v2415_v20  ;;  %v4810_v38 = vrot.slane %v4808_v24, 5  ;;  %v2794_v16 = vshll.u32 %v2653_v14, 16  ;;  %8909 = vmatpush3.bf16.msra.mxu1 %v8988_v55 }
 0x1d9   : > { %2414 = vst.msk [vmem:[#allocation3 + $0x40] sm:$0xf] %vm1902_vm1, %v2140_v12  ;;  %2417 = vst [vmem:[#allocation3 + $0x44] sm:$0x1] %v2416_v18  ;;  %v2798_v3 = vshrl.u32 %v2653_v14, 16  ;;  %v4805_v47 = vor.u32 %v4804_v40, %v4800_v42  ;;  %v2787_v10 = vrot.slane %v2785_v35, 4  ;;  %8902 = vmatprep.subr.bf16.mxu1 %v8990_v61 }
 0x1da   : > { %v2790_v45 = vrot.slane %v2788_v51, 5  ;;  %v2804_v23 = vshll.u32 %v2654_v31, 16  ;;  %v4796_v62 = vrot.slane %v4795_v2, 4  ;;  %v2796_v44 = vrot.slane %v2794_v16, 5  ;;  %8706 = vmatpush3.bf16.msra.mxu0 %v8993_v43  ;;  %v2651_v55 = vld [vmem:[#allocation3 + $0x2c] sm:$0x1] }
 0x1db   : > { %v2800_v30 = vrot.slane %v2798_v3, 4  ;;  %v4765_v1 = vshrl.u32 %v4695_v15, 16  ;;  %v4806_v17 = vrot.slane %v4805_v47, 4  ;;  %v4768_v36 = vshll.u32 %v4695_v15, 16  ;;  %8859 = vmatprep.subr.bf16.mxu0 %v8994_v22 }
 0x1dc   : > { %v2791_v29 = vor.u32 %v2790_v45, %v2787_v10  ;;  %v2806_v56 = vrot.slane %v2804_v23, 5  ;;  %8910 = vmatpush3.bf16.msra.mxu1 %v8993_v43  ;;  %v4801_v34 = vsel %vm9147_vm6, %v4796_v62, %v4800_v42  ;;  %v4774_v60 = vshll.u32 %v4696_v9, 16 }
 0x1dd   : > { %v2801_v59 = vor.u32 %v2800_v30, %v2796_v44  ;;  %v4767_v4 = vrot.slane %v4765_v1, 4  ;;  %v4811_v63 = vsel %vm9147_vm6, %v4806_v17, %v4810_v38  ;;  %v4770_v46 = vrot.slane %v4768_v36, 5  ;;  %v4210_v12 = vld [vmem:[#allocation3 + $0x48] sm:$0xe] }
 0x1de   : > { %v2792_v26 = vrot.slane %v2791_v29, 4  ;;  %v4778_v49 = vshrl.u32 %v4696_v9, 16  ;;  %v4784_v53 = vshll.u32 %v4697_v19, 16  ;;  %v2761_v57 = vshrl.u32 %v2649_v48, 16  ;;  %v3203_v30 = vld [vmem:[#allocation3 + $0x48] sm:$0xe] }
 0x1df   : > { %v8961_v20 = vld [vmem:[#allocation3 + $0x48] sm:$0xff]   ;;  %v2802_v21 = vrot.slane %v2801_v59, 4  ;;  %v4771_v14 = vor.u32 %v4770_v46, %v4767_v4  ;;  %v2764_v11 = vshll.u32 %v2649_v48, 16  ;;  %v8556_v58 = vcombine.low %v4801_v34, %v4811_v63  ;;  %v4212_v38 = vld [vmem:[#allocation3 + $0x50] sm:$0x1] }
 0x1e0   : > { %v8962_v27 = vld [vmem:[#allocation3 + $0x48] sm:$0xff]   ;;  %4636 = vrot.lane.b32.xlu0 %v8961_v20, %s9042_s13  ;;  %v2797_v32 = vsel %vm9147_vm6, %v2792_v26, %v2796_v44  ;;  %v4776_v31 = vrot.slane %v4774_v60, 5  ;;  %v4780_v61 = vrot.slane %v4778_v49, 4  ;;  %v2763_v24 = vrot.slane %v2761_v57, 4  ;;  %v8963_v45 = vld [vmem:[#allocation3 + $0x3c] sm:$0xff]  }
 0x1e1   : > { %3628 = vrot.lane.b32.xlu1 %v8962_v27, %s9043_s16  ;;  %v2807_v54 = vsel %vm9147_vm6, %v2802_v21, %v2806_v56  ;;  %v4211_v18 = vld [vmem:[#allocation3 + $0x4c] sm:$0xf]  ;;  %v4772_v0 = vrot.slane %v4771_v14, 4  ;;  %v2766_v15 = vrot.slane %v2764_v11, 5  ;;  %v2770_v42 = vshll.u32 %v2650_v6, 16  ;;  %v8964_v19 = vld [vmem:[#allocation3 + $0x3c] sm:$0xff]  }
 0x1e2   : > { %v8430_v8 = vcombine.low %v2797_v32, %v2807_v54  ;;  %v4781_v40 = vor.u32 %v4780_v61, %v4776_v31  ;;  %v4786_v35 = vrot.slane %v4784_v53, 5  ;;  %v2774_v51 = vshrl.u32 %v2650_v6, 16  ;;  %v3204_v10 = vld [vmem:[#allocation3 + $0x4c] sm:$0xf]  ;;  %v10387_v48 = vld [vmem:[%s12252_s2] ss:$0 sm:$0xff] }
 0x1e3   : > { %v2780_v2 = vshll.u32 %v2651_v55, 16  ;;  %v2767_v16 = vor.u32 %v2766_v15, %v2763_v24  ;;  %v2772_v3 = vrot.slane %v2770_v42, 5  ;;  %v8511_v43 = vrot.slane %v4210_v12, 9  ;;  %v3205_v21 = vld [vmem:[#allocation3 + $0x50] sm:$0x1] }
 0x1e4   : > { %5176 = vrot.lane.b32.xlu0 %v8556_v58, %s9043_s16  ;;  %v4328_v47 = vrot.slane %v4211_v18, 5  ;;  %v4777_v23 = vsel %vm9147_vm6, %v4772_v0, %v4776_v31  ;;  %v4782_v22 = vrot.slane %v4781_v40, 4  ;;  %v2776_v62 = vrot.slane %v2774_v51, 4  ;;  %v4207_v58 = vld [vmem:[#allocation3 + $0x3c] sm:$0xe] }
 0x1e5   : > { %3128 = vrot.lane.b32.xlu1 %v8430_v8, %s9040_s10  ;;  %v2782_v44 = vrot.slane %v2780_v2, 5  ;;  %v2768_v1 = vrot.slane %v2767_v16, 4  ;;  %v4331_v56 = vrot.slane %v4212_v38, 5  ;;  %v3325_v26 = vrot.slane %v3204_v10, 5  ;;  %v4208_v42 = vld [vmem:[#allocation3 + $0x40] sm:$0xf] }
 0x1e6   : > { %v4329_v17 = vsel %vm9110_vm5, %v8511_v43, %v4328_v47  ;;  %v4330_v29 = vrot.slane %v4328_v47, 4  ;;  %v4787_v36 = vsel %vm9147_vm6, %v4782_v22, %v4786_v35  ;;  %v2777_v20 = vor.u32 %v2776_v62, %v2772_v3  ;;  %v2432_v16 = vld [vmem:[#allocation3 + $0x60] sm:$0xf]  ;;  %v4209_v10 = vld [vmem:[#allocation3 + $0x44] sm:$0x1] }
 0x1e7   : > { %v8555_v34 = vcombine.low %v4777_v23, %v4787_v36  ;;  %v8448_v46 = vrot.slane %v3203_v30, 9  ;;  %v2773_v53 = vsel %vm9147_vm6, %v2768_v1, %v2772_v3  ;;  %v3327_v11 = vrot.slane %v3325_v26, 4  ;;  %v2425_v23 = vld [vmem:[#allocation3 + $0x54] sm:$0xf]  ;;  %v2656_v7 = vld [vmem:[#allocation3 + $0x40] sm:$0xf] }
 0x1e8   : > { %4634 = vrot.lane.b32.xlu0 %v8963_v45, %s9042_s13  ;;  %v4332_v63 = vsel %vm9110_vm5, %v4330_v29, %v4331_v56  ;;  %v2778_v54 = vrot.slane %v2777_v20, 4  ;;  %v3328_v12 = vrot.slane %v3205_v21, 5  ;;  %v8510_v2 = vrot.slane %v4207_v58, 9  ;;  %v3200_v20 = vld [vmem:[#allocation3 + $0x3c] sm:$0xe] }
 0x1e9   : > { %3626 = vrot.lane.b32.xlu1 %v8964_v19, %s9043_s16  ;;  %v8527_v57 = vcombine.low %v4329_v17, %v4332_v63  ;;  %v3326_v15 = vsel %vm9110_vm5, %v8448_v46, %v3325_v26  ;;  %v2436_v19 = vld [vmem:[#allocation3 + $0x68] sm:$0x1]  ;;  %v4324_v36 = vrot.slane %v4209_v10, 5  ;;  %v3201_v26 = vld [vmem:[#allocation3 + $0x40] sm:$0xf] }
 0x1ea   : > { %v2783_v61 = vsel %vm9147_vm6, %v2778_v54, %v2782_v44  ;;  %v3329_v51 = vsel %vm9110_vm5, %v3327_v11, %v3328_v12  ;;  %v4321_v44 = vrot.slane %v4208_v42, 5  ;;  %v3202_v21 = vld [vmem:[#allocation3 + $0x44] sm:$0x1]  ;;  %v4704_v46 = vld [vmem:[#allocation3 + $0x48] sm:$0xf]  ;;  %v8447_v42 = vrot.slane %v3200_v20, 9 }
 0x1eb   : > { %v8429_v24 = vcombine.low %v2773_v53, %v2783_v61  ;;  %v8464_v62 = vcombine.low %v3326_v15, %v3329_v51  ;;  %v3321_v51 = vrot.slane %v3202_v21, 5  ;;  %v2659_v10 = vld [vmem:[#allocation3 + $0x4c] sm:$0xf]  ;;  %v4703_v21 = vld [vmem:[#allocation3 + $0x44] sm:$0x1] }
 0x1ec   : > { %v8841_v9 = vpop.f32.mrb[12].mxu0  ;;  %5174 = vrot.lane.b32.xlu0 %v8555_v34, %s9043_s16  ;;  %v4322_v34 = vsel %vm9110_vm5, %v8510_v2, %v4321_v44  ;;  %v4323_v63 = vrot.slane %v4321_v44, 4  ;;  %v4706_v2 = vld [vmem:[#allocation3 + $0x50] sm:$0x1]  ;;  %v2846_v20 = vshrl.u32 %v2659_v10, 16 }
 0x1ed   : > { %v1800_v59 = vadd.f32 %v10387_v48, %v8841_v9  ;;  %v1791_v4 = vpop.f32.mrb[13].mxu0  ;;  %3126 = vrot.lane.b32.xlu1 %v8429_v24, %s9040_s10  ;;  %v2660_v44 = vld [vmem:[#allocation3 + $0x50] sm:$0x1] }
 0x1ee   : > { %v1792_v6 = vadd.f32 %v10387_v48, %v1791_v4  ;;  %v8842_v27 = vpop.f32.mrb[14].mxu0  ;;  %v2429_v4 = vld [vmem:[#allocation3 + $0x5c] sm:$0x1] }
 0x1ef   : > { %v1884_v32 = vmax.f32 %v1800_v59, 0.0  ;;  %v1803_v60 = vadd.f32 %v10387_v48, %v8842_v27  ;;  %v1794_v49 = vpop.f32.mrb[15].mxu0 }
 0x1f0   : > { %v1882_v14 = vmax.f32 %v1792_v6, 0.0  ;;  %v1795_v55 = vadd.f32 %v10387_v48, %v1794_v49  ;;  %4461 = vrot.lane.b32.xlu0 %v8527_v57, %s9040_s10 }
 0x1f1   : > { %v8654_v8 = vpack.c.bf16 %v1884_v32, %v1884_v32  ;;  %v1885_v31 = vmax.f32 %v1803_v60, 0.0  ;;  %3453 = vrot.lane.b32.xlu1 %v8464_v62, %s9042_s13  ;;  %v8998_v32 = vld [vmem:[#allocation3 + $0x30] sm:$0xff]  }
 0x1f2   : > { %v8652_v18 = vpack.c.bf16 %v1882_v14, %v1882_v14  ;;  %v1883_v0 = vmax.f32 %v1795_v55, 0.0  ;;  %v4705_v14 = vld [vmem:[#allocation3 + $0x4c] sm:$0xf]  ;;  %v2658_v55 = vld [vmem:[#allocation3 + $0x48] sm:$0xf]  ;;  %2628 = vst.msk [vmem:[#allocation4 + $0x60] sm:$0xff] %vm2623_vm12, %v8998_v32 }
 0x1f3   : > { %v2177_v40 = vshrl.u32 %v8654_v8, 16  ;;  %v8655_v35 = vpack.c.bf16 %v1885_v31, %v1885_v31  ;;  %v2180_v38 = vshll.u32 %v8654_v8, 16  ;;  %v4325_v8 = vsel %vm9110_vm5, %v4323_v63, %v4324_v36  ;;  %v8999_v31 = vld [vmem:[#allocation3 + $0x24] sm:$0xff]  }
 0x1f4   : > { %v2160_v3 = vshrl.u32 %v8652_v18, 16  ;;  %v2163_v43 = vshll.u32 %v8652_v18, 16  ;;  %v8653_v47 = vpack.c.bf16 %v1883_v0, %v1883_v0  ;;  %v8526_v18 = vcombine.low %v4322_v34, %v4325_v8  ;;  %2627 = vst.msk [vmem:[#allocation4 + $0x48] sm:$0xff] %vm2623_vm12, %v8999_v31 }
 0x1f5   : > { %v2179_v45 = vrot.slane %v2177_v40, 7  ;;  %v2185_v22 = vshrl.u32 %v8655_v35, 16  ;;  %v2188_v9 = vshll.u32 %v8655_v35, 16  ;;  %v3318_v0 = vrot.slane %v3201_v26, 5 }
 0x1f6   : > { %v2162_v30 = vrot.slane %v2160_v3, 7  ;;  %v2168_v1 = vshrl.u32 %v8653_v47, 16  ;;  %v2171_v17 = vshll.u32 %v8653_v47, 16  ;;  %v4837_v40 = vshrl.u32 %v4704_v46, 16  ;;  %4459 = vrot.lane.b32.xlu0 %v8526_v18, %s9040_s10 }
 0x1f7   : > { %v2182_v29 = vor.u32 %v2180_v38, %v2179_v45  ;;  %v2183_v56 = vrot.slane %v2179_v45, 4  ;;  %v2187_v59 = vrot.slane %v2185_v22, 7  ;;  %v3320_v35 = vrot.slane %v3318_v0, 4 }
 0x1f8   : > { %v2165_v6 = vor.u32 %v2163_v43, %v2162_v30  ;;  %v2170_v27 = vrot.slane %v2168_v1, 7  ;;  %v2166_v49 = vrot.slane %v2162_v30, 4  ;;  %v4840_v38 = vshll.u32 %v4704_v46, 16 }
 0x1f9   : > { %v2433_v60 = vsel %vm10149_vm8, %v2182_v29, %v2432_v16  ;;  %v2190_v53 = vor.u32 %v2188_v9, %v2187_v59  ;;  %v2192_v54 = vrot.slane %v2187_v59, 4  ;;  %v4846_v16 = vshll.u32 %v4705_v14, 16 }
 0x1fa   : > { %2434 = vst [vmem:[#allocation3 + $0x60] sm:$0xf] %v2433_v60  ;;  %v2426_v57 = vsel %vm10149_vm8, %v2165_v6, %v2425_v23  ;;  %v2173_v11 = vor.u32 %v2171_v17, %v2170_v27  ;;  %v2175_v58 = vrot.slane %v2170_v27, 4  ;;  %v3319_v3 = vsel %vm9110_vm5, %v8447_v42, %v3318_v0  ;;  %v4702_v6 = vld [vmem:[#allocation3 + $0x40] sm:$0xf] }
 0x1fb   : > { %2427 = vst [vmem:[#allocation3 + $0x54] sm:$0xf] %v2426_v57  ;;  %v2191_v61 = vsel %vm10156_vm9, %v2183_v56, %v2190_v53  ;;  %v2437_v12 = vsel %vm10162_vm10, %v2192_v54, %v2436_v19  ;;  %v4839_v43 = vrot.slane %v4837_v40, 4  ;;  %v4850_v47 = vshrl.u32 %v4705_v14, 16 }
 0x1fc   : > { %2435 = vst.msk [vmem:[#allocation3 + $0x64] sm:$0xf] %vm1902_vm1, %v2191_v61  ;;  %2438 = vst [vmem:[#allocation3 + $0x68] sm:$0x1] %v2437_v12  ;;  %v2174_v24 = vsel %vm10156_vm9, %v2166_v49, %v2173_v11  ;;  %v2430_v15 = vsel %vm10162_vm10, %v2175_v58, %v2429_v4  ;;  %v2833_v45 = vshrl.u32 %v2658_v55, 16  ;;  %v3322_v23 = vsel %vm9110_vm5, %v3320_v35, %v3321_v51 }
 0x1fd   : > { %2428 = vst.msk [vmem:[#allocation3 + $0x58] sm:$0xf] %vm1902_vm1, %v2174_v24  ;;  %2431 = vst [vmem:[#allocation3 + $0x5c] sm:$0x1] %v2430_v15  ;;  %v4842_v22 = vrot.slane %v4840_v38, 5  ;;  %v4848_v62 = vrot.slane %v4846_v16, 5  ;;  %v8463_v9 = vcombine.low %v3319_v3, %v3322_v23  ;;  %v10446_v57 = vsel %vm9110_vm5, %v8571_v37, %v5341_v33 }
 0x1fe   : > { %v2836_v30 = vshll.u32 %v2658_v55, 16  ;;  %v4852_v19 = vrot.slane %v4850_v47, 4  ;;  %v4856_v1 = vshll.u32 %v4706_v2, 16  ;;  %v2835_v17 = vrot.slane %v2833_v45, 4  ;;  %v4701_v4 = vld [vmem:[#allocation3 + $0x3c] sm:$0xf] }
 0x1ff   : > { %v4843_v29 = vor.u32 %v4842_v22, %v4839_v43  ;;  %v2842_v59 = vshll.u32 %v2659_v10, 16  ;;  %3451 = vrot.lane.b32.xlu1 %v8463_v9, %s9042_s13  ;;  %v2852_v26 = vshll.u32 %v2660_v44, 16  ;;  %v2848_v53 = vrot.slane %v2846_v20, 4  ;;  %v2655_v61 = vld [vmem:[#allocation3 + $0x3c] sm:$0xf] }
 0x200   : > { %v2838_v56 = vrot.slane %v2836_v30, 5  ;;  %v4853_v36 = vor.u32 %v4852_v19, %v4848_v62  ;;  %v4858_v60 = vrot.slane %v4856_v1, 5  ;;  %v4813_v8 = vshrl.u32 %v4701_v4, 16  ;;  %v2657_v2 = vld [vmem:[#allocation3 + $0x44] sm:$0x1] }
 0x201   : > { %v4844_v34 = vrot.slane %v4843_v29, 4  ;;  %v2844_v49 = vrot.slane %v2842_v59, 5  ;;  %v2854_v55 = vrot.slane %v2852_v26, 5  ;;  %v4816_v31 = vshll.u32 %v4701_v4, 16  ;;  %v4216_v45 = vld [vmem:[#allocation3 + $0x60] sm:$0xe] }
 0x202   : > { %v2839_v63 = vor.u32 %v2838_v56, %v2835_v17  ;;  %v4854_v32 = vrot.slane %v4853_v36, 4  ;;  %v4822_v0 = vshll.u32 %v4702_v6, 16  ;;  %v4826_v24 = vshrl.u32 %v4702_v6, 16 }
 0x203   : > { %v8965_v27 = vld [vmem:[#allocation3 + $0x60] sm:$0xff]   ;;  %v4849_v54 = vsel %vm9147_vm6, %v4844_v34, %v4848_v62  ;;  %v2849_v58 = vor.u32 %v2848_v53, %v2844_v49  ;;  %v4815_v42 = vrot.slane %v4813_v8, 4  ;;  %v4818_v37 = vrot.slane %v4816_v31, 5 }
 0x204   : > { %v8966_v46 = vld [vmem:[#allocation3 + $0x60] sm:$0xff]   ;;  %4640 = vrot.lane.b32.xlu0 %v8965_v27, %s9042_s13  ;;  %v2840_v14 = vrot.slane %v2839_v63, 4  ;;  %v4859_v11 = vsel %vm9147_vm6, %v4854_v32, %v4858_v60  ;;  %v4832_v40 = vshll.u32 %v4703_v21, 16  ;;  %v4824_v35 = vrot.slane %v4822_v0, 5  ;;  %v8967_v22 = vld [vmem:[#allocation3 + $0x54] sm:$0xff]  }
 0x205   : > { %3632 = vrot.lane.b32.xlu1 %v8966_v46, %s9043_s16  ;;  %v8558_v12 = vcombine.low %v4849_v54, %v4859_v11  ;;  %v2850_v15 = vrot.slane %v2849_v58, 4  ;;  %v4828_v51 = vrot.slane %v4826_v24, 4  ;;  %v2809_v38 = vshrl.u32 %v2655_v61, 16  ;;  %v4217_v21 = vld [vmem:[#allocation3 + $0x64] sm:$0xf]  ;;  %v8968_v60 = vld [vmem:[#allocation3 + $0x54] sm:$0xff]  }
 0x206   : > { %v2845_v18 = vsel %vm9147_vm6, %v2840_v14, %v2844_v49  ;;  %v2812_v16 = vshll.u32 %v2655_v61, 16  ;;  %v4819_v43 = vor.u32 %v4818_v37, %v4815_v42  ;;  %v4834_v47 = vrot.slane %v4832_v40, 5  ;;  %v4218_v14 = vld [vmem:[#allocation3 + $0x68] sm:$0x1] }
 0x207   : > { %v2855_v3 = vsel %vm9147_vm6, %v2850_v15, %v2854_v55  ;;  %v2818_v10 = vshll.u32 %v2656_v7, 16  ;;  %v4829_v62 = vor.u32 %v4828_v51, %v4824_v35  ;;  %v2811_v44 = vrot.slane %v2809_v38, 4  ;;  %v2446_v51 = vld [vmem:[#allocation3 + $0x78] sm:$0xf] }
 0x208   : > { %5180 = vrot.lane.b32.xlu0 %v8558_v12, %s9043_s16  ;;  %v8432_v23 = vcombine.low %v2845_v18, %v2855_v3  ;;  %v2814_v30 = vrot.slane %v2812_v16, 5  ;;  %v8845_v9 = vpop.f32.mrb[16].mxu0  ;;  %v4820_v19 = vrot.slane %v4819_v43, 4  ;;  %v2822_v17 = vshrl.u32 %v2656_v7, 16  ;;  %v3209_v43 = vld [vmem:[#allocation3 + $0x60] sm:$0xe] }
 0x209   : > { %v2820_v1 = vrot.slane %v2818_v10, 5  ;;  %v2828_v29 = vshll.u32 %v2657_v2, 16  ;;  %v1816_v56 = vadd.f32 %v10387_v48, %v8845_v9  ;;  %v1807_v59 = vpop.f32.mrb[17].mxu0  ;;  %v4830_v4 = vrot.slane %v4829_v62, 4  ;;  %v2439_v10 = vld [vmem:[#allocation3 + $0x6c] sm:$0xf] }
 0x20a   : > { %3132 = vrot.lane.b32.xlu1 %v8432_v23, %s9040_s10  ;;  %v2815_v36 = vor.u32 %v2814_v30, %v2811_v44  ;;  %v8513_v20 = vrot.slane %v4216_v45, 9  ;;  %v1808_v26 = vadd.f32 %v10387_v48, %v1807_v59  ;;  %v8846_v6 = vpop.f32.mrb[18].mxu0  ;;  %v4825_v27 = vsel %vm9147_vm6, %v4820_v19, %v4824_v35  ;;  %v2450_v44 = vld [vmem:[#allocation3 + $0x80] sm:$0x1]  ;;  %v3210_v59 = vld [vmem:[#allocation3 + $0x64] sm:$0xf] }
 0x20b   : > { %v2824_v34 = vrot.slane %v2822_v17, 4  ;;  %v2830_v63 = vrot.slane %v2828_v29, 5  ;;  %v1888_v46 = vmax.f32 %v1816_v56, 0.0  ;;  %v1819_v32 = vadd.f32 %v10387_v48, %v8846_v6  ;;  %v1810_v49 = vpop.f32.mrb[19].mxu0  ;;  %v2443_v56 = vld [vmem:[#allocation3 + $0x74] sm:$0x1] }
 0x20c   : > { %4638 = vrot.lane.b32.xlu0 %v8967_v22, %s9042_s13  ;;  %v4835_v53 = vsel %vm9147_vm6, %v4830_v4, %v4834_v47  ;;  %v2816_v54 = vrot.slane %v2815_v36, 4  ;;  %v1886_v55 = vmax.f32 %v1808_v26, 0.0  ;;  %v1811_v11 = vadd.f32 %v10387_v48, %v1810_v49  ;;  %v9004_v36 = vld [vmem:[#allocation3 + $0x48] sm:$0xff]   ;;  %v4214_v49 = vld [vmem:[#allocation3 + $0x58] sm:$0xf] }
 0x20d   : > { %v8557_v58 = vcombine.low %v4825_v27, %v4835_v53  ;;  %v2825_v8 = vor.u32 %v2824_v34, %v2820_v1  ;;  %v8658_v31 = vpack.c.bf16 %v1888_v46, %v1888_v46  ;;  %v1889_v61 = vmax.f32 %v1819_v32, 0.0  ;;  %v3211_v34 = vld [vmem:[#allocation3 + $0x68] sm:$0x1]  ;;  %v4215_v53 = vld [vmem:[#allocation3 + $0x5c] sm:$0x1]  ;;  %2630 = vst.msk [vmem:[#allocation4 + $0x90] sm:$0xff] %vm2623_vm12, %v9004_v36 }
 0x20e   : > { %3630 = vrot.lane.b32.xlu1 %v8968_v60, %s9043_s16  ;;  %v2821_v12 = vsel %vm9147_vm6, %v2816_v54, %v2820_v1  ;;  %v4342_v18 = vrot.slane %v4217_v21, 5  ;;  %v8656_v0 = vpack.c.bf16 %v1886_v55, %v1886_v55  ;;  %v1887_v24 = vmax.f32 %v1811_v11, 0.0  ;;  %v9005_v54 = vld [vmem:[#allocation3 + $0x3c] sm:$0xff]  }
 0x20f   : > { %v2826_v7 = vrot.slane %v2825_v8, 4  ;;  %v4345_v15 = vrot.slane %v4218_v14, 5  ;;  %v2211_v42 = vshrl.u32 %v8658_v31, 16  ;;  %v2214_v37 = vshll.u32 %v8658_v31, 16  ;;  %v3206_v8 = vld [vmem:[#allocation3 + $0x54] sm:$0xe] }
 0x210   : > { %5178 = vrot.lane.b32.xlu0 %v8557_v58, %s9043_s16  ;;  %v8659_v40 = vpack.c.bf16 %v1889_v61, %v1889_v61  ;;  %v4343_v35 = vsel %vm9110_vm5, %v8513_v20, %v4342_v18  ;;  %v2194_v2 = vshrl.u32 %v8656_v0, 16  ;;  %v2197_v38 = vshll.u32 %v8656_v0, 16  ;;  %v3207_v31 = vld [vmem:[#allocation3 + $0x58] sm:$0xf]  ;;  %2629 = vst.msk [vmem:[#allocation4 + $0x78] sm:$0xff] %vm2623_vm12, %v9005_v54 }
 0x211   : > { %v8657_v16 = vpack.c.bf16 %v1887_v24, %v1887_v24  ;;  %v2831_v3 = vsel %vm9147_vm6, %v2826_v7, %v2830_v63  ;;  %v2213_v47 = vrot.slane %v2211_v42, 7  ;;  %v4344_v19 = vrot.slane %v4342_v18, 4  ;;  %v4213_v63 = vld [vmem:[#allocation3 + $0x54] sm:$0xe]  ;;  %v3208_v24 = vld [vmem:[#allocation3 + $0x5c] sm:$0x1] }
 0x212   : > { %v2219_v45 = vshrl.u32 %v8659_v40, 16  ;;  %v2222_v23 = vshll.u32 %v8659_v40, 16  ;;  %v8431_v22 = vcombine.low %v2821_v12, %v2831_v3  ;;  %v2196_v62 = vrot.slane %v2194_v2, 7  ;;  %v4710_v36 = vld [vmem:[#allocation3 + $0x60] sm:$0xf] }
 0x213   : > { %v2202_v30 = vshrl.u32 %v8657_v16, 16  ;;  %v2205_v9 = vshll.u32 %v8657_v16, 16  ;;  %v2216_v1 = vor.u32 %v2214_v37, %v2213_v47  ;;  %v2217_v17 = vrot.slane %v2213_v47, 4 }
 0x214   : > { %v2221_v29 = vrot.slane %v2219_v45, 7  ;;  %3130 = vrot.lane.b32.xlu1 %v8431_v22, %s9040_s10  ;;  %v8450_v4 = vrot.slane %v3209_v43, 9  ;;  %v2199_v20 = vor.u32 %v2197_v38, %v2196_v62  ;;  %v2200_v26 = vrot.slane %v2196_v62, 4  ;;  %v3687_v43 = vld [vmem:[#allocation3 + $0x1c] sm:$0xf] }
 0x215   : > { %v2204_v6 = vrot.slane %v2202_v30, 7  ;;  %v4346_v27 = vsel %vm9110_vm5, %v4344_v19, %v4345_v15  ;;  %v2447_v21 = vsel %vm10149_vm8, %v2216_v1, %v2446_v51  ;;  %v3339_v58 = vrot.slane %v3210_v59, 5  ;;  %v3686_v15 = vld [vmem:[#allocation3 + $0x18] sm:$0xf]  ;;  %v3688_v51 = vld [vmem:[#allocation3 + $0x20] sm:$0x1] }
 0x216   : > { %v2224_v46 = vor.u32 %v2222_v23, %v2221_v29  ;;  %v2226_v32 = vrot.slane %v2221_v29, 4  ;;  %v8529_v60 = vcombine.low %v4343_v35, %v4346_v27  ;;  %2448 = vst [vmem:[#allocation3 + $0x78] sm:$0xf] %v2447_v21  ;;  %v2440_v14 = vsel %vm10149_vm8, %v2199_v20, %v2439_v10  ;;  %v10487_v7 = vpop.permute.xlu1 %3620  ;;  %v3684_v22 = vld [vmem:[#allocation3 + $0x10] sm:$0xf] }
 0x217   : > { %v2207_v55 = vor.u32 %v2205_v9, %v2204_v6  ;;  %v2209_v11 = vrot.slane %v2204_v6, 4  ;;  %2441 = vst [vmem:[#allocation3 + $0x6c] sm:$0xf] %v2440_v14  ;;  %v3342_v18 = vrot.slane %v3211_v34, 5  ;;  %v8512_v0 = vrot.slane %v4213_v63, 9 }
 0x218   : > { %v2225_v61 = vsel %vm10156_vm9, %v2217_v17, %v2224_v46  ;;  %v2451_v12 = vsel %vm10162_vm10, %v2226_v32, %v2450_v44  ;;  %4465 = vrot.lane.b32.xlu0 %v8529_v60, %s9040_s10  ;;  %v3340_v40 = vsel %vm9110_vm5, %v8450_v4, %v3339_v58  ;;  %v3341_v35 = vrot.slane %v3339_v58, 4  ;;  %v3685_v1 = vld [vmem:[#allocation3 + $0x14] sm:$0x1]  ;;  %v3683_v17 = vld [vmem:[#allocation3 + $0xc] sm:$0xf] }
 0x219   : > { %2449 = vst.msk [vmem:[#allocation3 + $0x7c] sm:$0xf] %vm1902_vm1, %v2225_v61  ;;  %2452 = vst [vmem:[#allocation3 + $0x80] sm:$0x1] %v2451_v12  ;;  %v2208_v42 = vsel %vm10156_vm9, %v2200_v26, %v2207_v55  ;;  %v2444_v37 = vsel %vm10162_vm10, %v2209_v11, %v2443_v56  ;;  %v4335_v2 = vrot.slane %v4214_v49, 5  ;;  %v4338_v38 = vrot.slane %v4215_v53, 5  ;;  %v10511_v11 = vpop.permute.xlu0 %4628 }
 0x21a   : > { %2442 = vst.msk [vmem:[#allocation3 + $0x70] sm:$0xf] %vm1902_vm1, %v2208_v42  ;;  %2445 = vst [vmem:[#allocation3 + $0x74] sm:$0x1] %v2444_v37  ;;  %v8449_v16 = vrot.slane %v3206_v8, 9  ;;  %v3332_v3 = vrot.slane %v3207_v31, 5  ;;  %v3343_v47 = vsel %vm9110_vm5, %v3341_v35, %v3342_v18  ;;  %v3619_v19 = vpop.permute.xlu1 %3618 }
 0x21b   : > { %v3335_v10 = vrot.slane %v3208_v24, 5  ;;  %v3756_v45 = vshrl.u32 %v3686_v15, 16  ;;  %v3759_v23 = vshll.u32 %v3686_v15, 16  ;;  %v8466_v62 = vcombine.low %v3340_v40, %v3343_v47  ;;  %3667 = vst.msk [vmem:[#allocation4] sm:$0xff] %vm3666_vm14, %v3619_v19  ;;  %v4711_v14 = vld [vmem:[#allocation3 + $0x64] sm:$0xf] }
 0x21c   : > { %v4336_v44 = vsel %vm9110_vm5, %v8512_v0, %v4335_v2  ;;  %v4337_v30 = vrot.slane %v4335_v2, 4  ;;  %v3333_v9 = vsel %vm9110_vm5, %v8449_v16, %v3332_v3  ;;  %v3334_v29 = vrot.slane %v3332_v3, 4  ;;  %v4712_v55 = vld [vmem:[#allocation3 + $0x68] sm:$0x1]  ;;  %v2664_v12 = vld [vmem:[#allocation3 + $0x60] sm:$0xf] }
 0x21d   : > { %v3758_v56 = vrot.slane %v3756_v45, 4  ;;  %v3761_v59 = vrot.slane %v3759_v23, 5  ;;  %v3775_v4 = vshll.u32 %v3688_v51, 16  ;;  %3457 = vrot.lane.b32.xlu1 %v8466_v62, %s9042_s13  ;;  %v3765_v26 = vshll.u32 %v3687_v43, 16 }
 0x21e   : > { %v4339_v20 = vsel %vm9110_vm5, %v4337_v30, %v4338_v38  ;;  %v3769_v6 = vshrl.u32 %v3687_v43, 16  ;;  %v3741_v27 = vshll.u32 %v3684_v22, 16  ;;  %v3336_v63 = vsel %vm9110_vm5, %v3334_v29, %v3335_v10  ;;  %v4454_v43 = vpop.permute.xlu0 %4453  ;;  %v2665_v30 = vld [vmem:[#allocation3 + $0x64] sm:$0xf] }
 0x21f   : > { %v8528_v34 = vcombine.low %v4336_v44, %v4339_v20  ;;  %v3762_v21 = vor.u32 %v3761_v59, %v3758_v56  ;;  %v3777_v46 = vrot.slane %v3775_v4, 5  ;;  %v8465_v32 = vcombine.low %v3333_v9, %v3336_v63  ;;  %v2666_v56 = vld [vmem:[#allocation3 + $0x68] sm:$0x1] }
 0x220   : > { %v3767_v60 = vrot.slane %v3765_v26, 5  ;;  %v3771_v49 = vrot.slane %v3769_v6, 4  ;;  %v3743_v53 = vrot.slane %v3741_v27, 5  ;;  %v8970_v54 = vld [vmem:[#allocation3 + $0x78] sm:$0xff]   ;;  %v3745_v8 = vshrl.u32 %v3684_v22, 16 }
 0x221   : > { %4463 = vrot.lane.b32.xlu0 %v8528_v34, %s9040_s10  ;;  %v3763_v58 = vrot.slane %v3762_v21, 4  ;;  %v3751_v31 = vshll.u32 %v3685_v1, 16  ;;  %v3732_v61 = vshrl.u32 %v3683_v17, 16  ;;  %3455 = vrot.lane.b32.xlu1 %v8465_v32, %s9042_s13  ;;  %v3735_v0 = vshll.u32 %v3683_v17, 16  ;;  %v8971_v24 = vld [vmem:[#allocation3 + $0x78] sm:$0xff]   ;;  %v10524_v21 = vpop.permute.xlu1 %3445 }
 0x222   : > { %v3772_v18 = vor.u32 %v3771_v49, %v3767_v60  ;;  %v4885_v15 = vshrl.u32 %v4710_v36, 16  ;;  %v4888_v42 = vshll.u32 %v4710_v36, 16  ;;  %v3747_v40 = vrot.slane %v3745_v8, 4  ;;  %v2669_v25 = vld [vmem:[#allocation3 + $0x74] sm:$0x1] }
 0x223   : > { %v3768_v37 = vsel %vm9147_vm6, %v3763_v58, %v3767_v60  ;;  %v3753_v35 = vrot.slane %v3751_v31, 5  ;;  %v3734_v51 = vrot.slane %v3732_v61, 4  ;;  %v3737_v38 = vrot.slane %v3735_v0, 5 }
 0x224   : > { %v3773_v2 = vrot.slane %v3772_v18, 4  ;;  %v4887_v16 = vrot.slane %v4885_v15, 4  ;;  %v4890_v3 = vrot.slane %v4888_v42, 5  ;;  %v3748_v47 = vor.u32 %v3747_v40, %v3743_v53 }
 0x225   : > { %4644 = vrot.lane.b32.xlu0 %v8970_v54, %s9042_s13  ;;  %v4894_v10 = vshll.u32 %v4711_v14, 16  ;;  %v4898_v45 = vshrl.u32 %v4711_v14, 16  ;;  %v4904_v23 = vshll.u32 %v4712_v55, 16  ;;  %v3738_v62 = vor.u32 %v3737_v38, %v3734_v51  ;;  %3636 = vrot.lane.b32.xlu1 %v8971_v24, %s9043_s16  ;;  %v4452_v14 = vpop.permute.xlu0 %4451 }
 0x226   : > { %v3778_v22 = vsel %vm9147_vm6, %v3773_v2, %v3777_v46  ;;  %v4891_v44 = vor.u32 %v4890_v3, %v4887_v16  ;;  %v2881_v9 = vshrl.u32 %v2664_v12, 16  ;;  %v3749_v1 = vrot.slane %v3748_v47, 4 }
 0x227   : > { %v8491_v19 = vcombine.low %v3768_v37, %v3778_v22  ;;  %v4896_v17 = vrot.slane %v4894_v10, 5  ;;  %v4900_v29 = vrot.slane %v4898_v45, 4  ;;  %v3739_v59 = vrot.slane %v3738_v62, 4 }
 0x228   : > { %v4892_v4 = vrot.slane %v4891_v44, 4  ;;  %v4906_v36 = vrot.slane %v4904_v23, 5  ;;  %v2883_v20 = vrot.slane %v2881_v9, 4  ;;  %v3754_v26 = vsel %vm9147_vm6, %v3749_v1, %v3753_v35  ;;  %v8849_v63 = vpop.f32.mrb[20].mxu0 }
 0x229   : > { %4180 = vst.msk [vmem:[#allocation4 + $0x20] sm:$0xff] %vm2623_vm12, %v8491_v19  ;;  %v4901_v6 = vor.u32 %v4900_v29, %v4896_v17  ;;  %v2884_v27 = vshll.u32 %v2664_v12, 16  ;;  %v2890_v34 = vshll.u32 %v2665_v30, 16  ;;  %v3744_v46 = vsel %vm9147_vm6, %v3739_v59, %v3743_v53  ;;  %v1823_v54 = vpop.f32.mrb[21].mxu0  ;;  %v4707_v53 = vld [vmem:[#allocation3 + $0x54] sm:$0xf] }
 0x22a   : > { %4500 = vst.msk [vmem:[#allocation4 + $0x20] sm:$0xff] %vm3168_vm11, %v4454_v43  ;;  %v4897_v32 = vsel %vm9147_vm6, %v4892_v4, %v4896_v17  ;;  %v2894_v60 = vshrl.u32 %v2665_v30, 16  ;;  %v2900_v49 = vshll.u32 %v2666_v56, 16  ;;  %v8490_v55 = vcombine.low %v3744_v46, %v3754_v26  ;;  %v8850_v61 = vpop.f32.mrb[22].mxu0  ;;  %v8975_v56 = vld [vmem:[#allocation3 + $0x6c] sm:$0xff]  }
 0x22b   : > { %v4902_v58 = vrot.slane %v4901_v6, 4  ;;  %v2886_v8 = vrot.slane %v2884_v27, 5  ;;  %v2892_v31 = vrot.slane %v2890_v34, 5  ;;  %v1832_v0 = vadd.f32 %v10387_v48, %v8849_v63  ;;  %v1826_v15 = vpop.f32.mrb[23].mxu0  ;;  %v4708_v59 = vld [vmem:[#allocation3 + $0x58] sm:$0xf] }
 0x22c   : > { %v2896_v12 = vrot.slane %v2894_v60, 4  ;;  %v2902_v18 = vrot.slane %v2900_v49, 5  ;;  %v1824_v24 = vadd.f32 %v10387_v48, %v1823_v54  ;;  %4179 = vst.msk [vmem:[#allocation4 + $0x8] sm:$0xff] %vm2623_vm12, %v8490_v55  ;;  %v1835_v40 = vadd.f32 %v10387_v48, %v8850_v61  ;;  %v2453_v63 = vld [vmem:[#allocation3 + $0x84] sm:$0xf] }
 0x22d   : > { %v4907_v42 = vsel %vm9147_vm6, %v4902_v58, %v4906_v36  ;;  %v2887_v37 = vor.u32 %v2886_v8, %v2883_v20  ;;  %v1827_v35 = vadd.f32 %v10387_v48, %v1826_v15  ;;  %4499 = vst.msk [vmem:[#allocation4 + $0x8] sm:$0xff] %vm3168_vm11, %v4452_v14  ;;  %v1892_v38 = vmax.f32 %v1832_v0, 0.0  ;;  %v10541_v48 = vpop.permute.xlu1 %3443  ;;  %v2460_v36 = vld [vmem:[#allocation3 + $0x90] sm:$0xf]  ;;  %v2464_v54 = vld [vmem:[#allocation3 + $0x98] sm:$0x1] }
 0x22e   : > { %v8560_v51 = vcombine.low %v4897_v32, %v4907_v42  ;;  %v2897_v2 = vor.u32 %v2896_v12, %v2892_v31  ;;  %v1890_v16 = vmax.f32 %v1824_v24, 0.0  ;;  %4676 = vst.msk [vmem:[#allocation4 + $0x8] sm:$0xff] %vm3489_vm13, %v10511_v11  ;;  %v1893_v43 = vmax.f32 %v1835_v40, 0.0  ;;  %v2457_v0 = vld [vmem:[#allocation3 + $0x8c] sm:$0x1] }
 0x22f   : > { %v2888_v3 = vrot.slane %v2887_v37, 4  ;;  %v1891_v47 = vmax.f32 %v1827_v35, 0.0  ;;  %v4861_v10 = vshrl.u32 %v4707_v53, 16  ;;  %v8662_v23 = vpack.c.bf16 %v1892_v38, %v1892_v38  ;;  %v4709_v24 = vld [vmem:[#allocation3 + $0x5c] sm:$0x1]  ;;  %v8976_v42 = vld [vmem:[#allocation3 + $0x6c] sm:$0xff]  }
 0x230   : > { %5184 = vrot.lane.b32.xlu0 %v8560_v51, %s9043_s16  ;;  %v2898_v45 = vrot.slane %v2897_v2, 4  ;;  %v8660_v22 = vpack.c.bf16 %v1890_v16, %v1890_v16  ;;  %v4864_v62 = vshll.u32 %v4707_v53, 16  ;;  %v8663_v30 = vpack.c.bf16 %v1893_v43, %v1893_v43  ;;  %v2661_v35 = vld [vmem:[#allocation3 + $0x54] sm:$0xf]  ;;  %v2663_v43 = vld [vmem:[#allocation3 + $0x5c] sm:$0x1] }
 0x231   : > { %v2893_v44 = vsel %vm9147_vm6, %v2888_v3, %v2892_v31  ;;  %v8661_v9 = vpack.c.bf16 %v1891_v47, %v1891_v47  ;;  %v4863_v19 = vrot.slane %v4861_v10, 4  ;;  %v2245_v1 = vshrl.u32 %v8662_v23, 16  ;;  %v2662_v3 = vld [vmem:[#allocation3 + $0x58] sm:$0xf] }
 0x232   : > { %v2903_v11 = vsel %vm9147_vm6, %v2898_v45, %v2902_v18  ;;  %v2248_v17 = vshll.u32 %v8662_v23, 16  ;;  %v2228_v29 = vshrl.u32 %v8660_v22, 16  ;;  %v2231_v20 = vshll.u32 %v8660_v22, 16  ;;  %v10548_v60 = vpop.permute.xlu0 %4632 }
 0x233   : > { %v8434_v4 = vcombine.low %v2893_v44, %v2903_v11  ;;  %v2253_v26 = vshrl.u32 %v8663_v30, 16  ;;  %v2256_v6 = vshll.u32 %v8663_v30, 16  ;;  %v2247_v27 = vrot.slane %v2245_v1, 7  ;;  %v10551_v8 = vpop.permute.xlu1 %3624  ;;  %v4223_v44 = vld [vmem:[#allocation3 + $0x7c] sm:$0xf] }
 0x234   : > { %v2230_v34 = vrot.slane %v2228_v29, 7  ;;  %4642 = vrot.lane.b32.xlu0 %v8975_v56, %s9042_s13  ;;  %v2236_v46 = vshrl.u32 %v8661_v9, 16  ;;  %v2239_v32 = vshll.u32 %v8661_v9, 16  ;;  %v4866_v14 = vrot.slane %v4864_v62, 5  ;;  %v4222_v62 = vld [vmem:[#allocation3 + $0x78] sm:$0xe] }
 0x235   : > { %3136 = vrot.lane.b32.xlu1 %v8434_v4, %s9040_s10  ;;  %v2255_v49 = vrot.slane %v2253_v26, 7  ;;  %v4870_v55 = vshll.u32 %v4708_v59, 16  ;;  %v4874_v58 = vshrl.u32 %v4708_v59, 16  ;;  %v2250_v31 = vor.u32 %v2248_v17, %v2247_v27  ;;  %v4224_v17 = vld [vmem:[#allocation3 + $0x80] sm:$0x1] }
 0x236   : > { %v2251_v61 = vrot.slane %v2247_v27, 4  ;;  %v2233_v12 = vor.u32 %v2231_v20, %v2230_v34  ;;  %v2234_v18 = vrot.slane %v2230_v34, 4  ;;  %v2238_v37 = vrot.slane %v2236_v46, 7  ;;  %v4631_v47 = vpop.permute.xlu0 %4630  ;;  %v3216_v20 = vld [vmem:[#allocation3 + $0x7c] sm:$0xf] }
 0x237   : > { %v2258_v15 = vor.u32 %v2256_v6, %v2255_v49  ;;  %v2260_v53 = vrot.slane %v2255_v49, 4  ;;  %v4867_v40 = vor.u32 %v4866_v14, %v4863_v19  ;;  %v2461_v51 = vsel %vm10149_vm8, %v2250_v31, %v2460_v36  ;;  %4677 = vst.msk [vmem:[#allocation4 + $0x20] sm:$0xff] %vm3489_vm13, %v4631_v47  ;;  %v3125_v30 = vpop.permute.xlu1 %3124  ;;  %v3215_v36 = vld [vmem:[#allocation3 + $0x78] sm:$0xe]  ;;  %v4219_v46 = vld [vmem:[#allocation3 + $0x6c] sm:$0xe] }
 0x238   : > { %v2454_v2 = vsel %vm10149_vm8, %v2233_v12, %v2453_v63  ;;  %v4872_v38 = vrot.slane %v4870_v55, 5  ;;  %v4876_v16 = vrot.slane %v4874_v58, 4  ;;  %2462 = vst [vmem:[#allocation3 + $0x90] sm:$0xf] %v2461_v51  ;;  %v2241_v23 = vor.u32 %v2239_v32, %v2238_v37  ;;  %3171 = vst.msk [vmem:[#allocation4 + $0x30] sm:$0xff] %vm3168_vm11, %v3125_v30 }
 0x239   : > { %2455 = vst [vmem:[#allocation3 + $0x84] sm:$0xf] %v2454_v2  ;;  %v2259_v10 = vsel %vm10156_vm9, %v2251_v61, %v2258_v15  ;;  %v2465_v45 = vsel %vm10162_vm10, %v2260_v53, %v2464_v54  ;;  %3634 = vrot.lane.b32.xlu1 %v8976_v42, %s9043_s16  ;;  %v2243_v22 = vrot.slane %v2238_v37, 4  ;;  %v4868_v9 = vrot.slane %v4867_v40, 4  ;;  %3492 = vst.msk [vmem:[#allocation4 + $0x30] sm:$0xff] %vm3489_vm13, %v10524_v21 }
 0x23a   : > { %2463 = vst.msk [vmem:[#allocation3 + $0x94] sm:$0xf] %vm1902_vm1, %v2259_v10  ;;  %2466 = vst [vmem:[#allocation3 + $0x98] sm:$0x1] %v2465_v45  ;;  %v4877_v19 = vor.u32 %v4876_v16, %v4872_v38  ;;  %v4880_v11 = vshll.u32 %v4709_v24, 16  ;;  %v2857_v1 = vshrl.u32 %v2661_v35, 16  ;;  %v2242_v29 = vsel %vm10156_vm9, %v2234_v18, %v2241_v23  ;;  %v5173_v32 = vpop.permute.xlu0 %5172 }
 0x23b   : > { %v2458_v56 = vsel %vm10162_vm10, %v2243_v22, %v2457_v0  ;;  %v2860_v59 = vshll.u32 %v2661_v35, 16  ;;  %v2866_v4 = vshll.u32 %v2662_v3, 16  ;;  %2456 = vst.msk [vmem:[#allocation3 + $0x88] sm:$0xf] %vm1902_vm1, %v2242_v29  ;;  %v4873_v26 = vsel %vm9147_vm6, %v4868_v9, %v4872_v38  ;;  %v3217_v63 = vld [vmem:[#allocation3 + $0x80] sm:$0x1]  ;;  %v3623_v21 = vpop.permute.xlu1 %3622 }
 0x23c   : > { %2459 = vst [vmem:[#allocation3 + $0x8c] sm:$0x1] %v2458_v56  ;;  %v4878_v6 = vrot.slane %v4877_v19, 4  ;;  %v4882_v27 = vrot.slane %v4880_v11, 5  ;;  %v2859_v34 = vrot.slane %v2857_v1, 4  ;;  %v2870_v14 = vshrl.u32 %v2662_v3, 16 }
 0x23d   : > { %v2862_v49 = vrot.slane %v2860_v59, 5  ;;  %v2868_v54 = vrot.slane %v2866_v4, 5  ;;  %v2876_v55 = vshll.u32 %v2663_v43, 16  ;;  %v4220_v58 = vld [vmem:[#allocation3 + $0x70] sm:$0xf]  ;;  %5220 = vst.msk [vmem:[#allocation4 + $0x8] sm:$0xff] %vm3666_vm14, %v5173_v32 }
 0x23e   : > { %v4883_v31 = vsel %vm9147_vm6, %v4878_v6, %v4882_v27  ;;  %v8515_v61 = vrot.slane %v4222_v62, 9  ;;  %v4356_v12 = vrot.slane %v4223_v44, 5  ;;  %v4359_v18 = vrot.slane %v4224_v17, 5  ;;  %v4221_v0 = vld [vmem:[#allocation3 + $0x74] sm:$0x1]  ;;  %3669 = vst.msk [vmem:[#allocation4 + $0x30] sm:$0xff] %vm3666_vm14, %v3623_v21 }
 0x23f   : > { %v8559_v24 = vcombine.low %v4873_v26, %v4883_v31  ;;  %v2863_v15 = vor.u32 %v2862_v49, %v2859_v34  ;;  %v2872_v53 = vrot.slane %v2870_v14, 4  ;;  %v2878_v42 = vrot.slane %v2876_v55, 5  ;;  %v3212_v37 = vld [vmem:[#allocation3 + $0x6c] sm:$0xe]  ;;  %v3213_v38 = vld [vmem:[#allocation3 + $0x70] sm:$0xf]  ;;  %v3123_v29 = vpop.permute.xlu1 %3122 }
 0x240   : > { %v4357_v40 = vsel %vm9110_vm5, %v8515_v61, %v4356_v12  ;;  %v4358_v35 = vrot.slane %v4356_v12, 4  ;;  %v8452_v51 = vrot.slane %v3215_v36, 9  ;;  %v3353_v2 = vrot.slane %v3216_v20, 5  ;;  %v3214_v16 = vld [vmem:[#allocation3 + $0x74] sm:$0x1]  ;;  %v8996_v56 = vld [vmem:[%s12253_s3 + $0x88] sm:$0xff]  }
 0x241   : > { %5182 = vrot.lane.b32.xlu0 %v8559_v24, %s9043_s16  ;;  %v2864_v3 = vrot.slane %v2863_v15, 4  ;;  %v2873_v43 = vor.u32 %v2872_v53, %v2868_v54  ;;  %v3356_v47 = vrot.slane %v3217_v63, 5  ;;  %v8514_v10 = vrot.slane %v4219_v46, 9  ;;  %v3692_v45 = vld [vmem:[#allocation3 + $0x30] sm:$0xf]  ;;  %3170 = vst.msk [vmem:[#allocation4 + $0x18] sm:$0xff] %vm3168_vm11, %v3123_v29 }
 0x242   : > { %v4360_v23 = vsel %vm9110_vm5, %v4358_v35, %v4359_v18  ;;  %v10585_v22 = vsel %vm9110_vm5, %v8452_v51, %v3353_v2  ;;  %v3355_v62 = vrot.slane %v3353_v2, 4  ;;  %v4349_v44 = vrot.slane %v4220_v58, 5  ;;  %v3693_v30 = vld [vmem:[#allocation3 + $0x34] sm:$0xf]  ;;  %v3694_v17 = vld [vmem:[#allocation3 + $0x38] sm:$0x1] }
 0x243   : > { %v2869_v9 = vsel %vm9147_vm6, %v2864_v3, %v2868_v54  ;;  %v2874_v19 = vrot.slane %v2873_v43, 4  ;;  %v8531_v11 = vcombine.low %v4357_v40, %v4360_v23  ;;  %v4352_v1 = vrot.slane %v4221_v0, 5  ;;  %v5524_v6 = vld [vmem:[#allocation4] sm:$0xff]  ;;  %3491 = vst.msk [vmem:[#allocation4 + $0x18] sm:$0xff] %vm3489_vm13, %v10541_v48  ;;  %v3689_v55 = vld [vmem:[#allocation3 + $0x24] sm:$0xf] }
 0x244   : > { %v3357_v59 = vsel %vm9110_vm5, %v3355_v62, %v3356_v47  ;;  %v4350_v4 = vsel %vm9110_vm5, %v8514_v10, %v4349_v44  ;;  %v4351_v36 = vrot.slane %v4349_v44, 4  ;;  %v8451_v20 = vrot.slane %v3212_v37, 9  ;;  %v5525_v26 = vld [vmem:[#allocation4 + $0x8] sm:$0xff]  ;;  %3668 = vst.msk [vmem:[#allocation4 + $0x18] sm:$0xff] %vm3666_vm14, %v10487_v7  ;;  %v3690_v12 = vld [vmem:[#allocation3 + $0x28] sm:$0xf]  ;;  %v4458_v47 = vpop.permute.xlu0 %4457 }
 0x245   : > { %v2879_v27 = vsel %vm9147_vm6, %v2874_v19, %v2878_v42  ;;  %4469 = vrot.lane.b32.xlu0 %v8531_v11, %s9040_s10  ;;  %v8468_v34 = vcombine.low %v10585_v22, %v3357_v59  ;;  %v3346_v63 = vrot.slane %v3213_v38, 5  ;;  %v3349_v46 = vrot.slane %v3214_v16, 5  ;;  %5803 = vmatprep.mubr.bf16.mxu0 %v5525_v26  ;;  %v3691_v48 = vld [vmem:[#allocation3 + $0x2c] sm:$0x1]  ;;  %v9021_v18 = vld [vmem:[%s12253_s3 + $0x80] sm:$0xff]   ;;  %v8991_v40 = vld [vmem:[#allocation3 + $0x90] sm:$0xff]  }
 0x246   : > { %v8433_v32 = vcombine.low %v2869_v9, %v2879_v27  ;;  %v4353_v49 = vsel %vm9110_vm5, %v4351_v36, %v4352_v1  ;;  %v3804_v54 = vshrl.u32 %v3692_v45, 16  ;;  %v3807_v14 = vshll.u32 %v3692_v45, 16  ;;  %5804 = vmatmul.mubr.bf16.vlgmr.msra.gmra.mrb[32].mxu0 %v5524_v6  ;;  %v4716_v53 = vld [vmem:[#allocation3 + $0x78] sm:$0xf]  ;;  %v4717_v10 = vld [vmem:[#allocation3 + $0x7c] sm:$0xf] }
 0x247   : > { %v8530_v58 = vcombine.low %v4350_v4, %v4353_v49  ;;  %v3347_v21 = vsel %vm9110_vm5, %v8451_v20, %v3346_v63  ;;  %v3348_v31 = vrot.slane %v3346_v63, 4  ;;  %v3813_v61 = vshll.u32 %v3693_v30, 16  ;;  %8860 = vmatpush3.bf16.msra.mxu0 %v9021_v18  ;;  %v9010_v19 = vld [vmem:[#allocation3 + $0x60] sm:$0xff]   ;;  %v2670_v27 = vld [vmem:[#allocation3 + $0x78] sm:$0xf] }
 0x248   : > { %3134 = vrot.lane.b32.xlu1 %v8433_v32, %s9040_s10  ;;  %v3806_v0 = vrot.slane %v3804_v54, 4  ;;  %v3809_v24 = vrot.slane %v3807_v14, 5  ;;  %v3817_v7 = vshrl.u32 %v3693_v30, 16  ;;  %v3823_v15 = vshll.u32 %v3694_v17, 16  ;;  %8861 = vmatprep.subr.bf16.mxu0 %v8996_v56  ;;  %v10616_v2 = vpop.f32.mrb[24].mxu0  ;;  %v10620_v30 = vpop.permute.xlu1 %3449  ;;  %2632 = vst.msk [vmem:[#allocation4 + $0xc0] sm:$0xff] %vm2623_vm12, %v9010_v19 }
 0x249   : > { %4467 = vrot.lane.b32.xlu0 %v8530_v58, %s9040_s10  ;;  %v3350_v42 = vsel %vm9110_vm5, %v3348_v31, %v3349_v46  ;;  %v3815_v37 = vrot.slane %v3813_v61, 5  ;;  %v3780_v35 = vshrl.u32 %v3689_v55, 16  ;;  %v3783_v51 = vshll.u32 %v3689_v55, 16  ;;  %v10618_v45 = vpop.f32.mrb[25].mxu0  ;;  %v4718_v29 = vld [vmem:[#allocation3 + $0x80] sm:$0x1]  ;;  %v4456_v31 = vpop.permute.xlu0 %4455 }
 0x24a   : > { %v8467_v38 = vcombine.low %v3347_v21, %v3350_v42  ;;  %v3810_v16 = vor.u32 %v3809_v24, %v3806_v0  ;;  %v3819_v3 = vrot.slane %v3817_v7, 4  ;;  %v3825_v43 = vrot.slane %v3823_v15, 5  ;;  %v10622_v9 = vpop.f32.mrb[26].mxu0  ;;  %v9012_v32 = vld [vmem:[#allocation3 + $0x54] sm:$0xff]  }
 0x24b   : > { %v3782_v23 = vrot.slane %v3780_v35, 4  ;;  %v3785_v22 = vrot.slane %v3783_v51, 5  ;;  %v3789_v62 = vshll.u32 %v3690_v12, 16  ;;  %v3793_v44 = vshrl.u32 %v3690_v12, 16  ;;  %8862 = vmatpush3.bf16.msra.mxu0 %v8996_v56  ;;  %v10625_v4 = vpop.f32.mrb[27].mxu0  ;;  %v8992_v21 = vld [vmem:[#allocation3 + $0x90] sm:$0xff]  }
 0x24c   : > { %3461 = vrot.lane.b32.xlu1 %v8468_v34, %s9042_s13  ;;  %v3811_v11 = vrot.slane %v3810_v16, 4  ;;  %v3820_v1 = vor.u32 %v3819_v3, %v3815_v37  ;;  %v3799_v17 = vshll.u32 %v3691_v48, 16  ;;  %v4933_v59 = vshrl.u32 %v4716_v53, 16  ;;  %v2671_v48 = vld [vmem:[#allocation3 + $0x7c] sm:$0xf]  ;;  %2631 = vst.msk [vmem:[#allocation4 + $0xa8] sm:$0xff] %vm2623_vm12, %v9012_v32  ;;  %v10637_v42 = vpop.permute.xlu1 %3447 }
 0x24d   : > { %4648 = vrot.lane.b32.xlu0 %v8991_v40, %s9042_s13  ;;  %v3786_v36 = vor.u32 %v3785_v22, %v3782_v23  ;;  %v3791_v20 = vrot.slane %v3789_v62, 5  ;;  %v3795_v26 = vrot.slane %v3793_v44, 4  ;;  %v4936_v6 = vshll.u32 %v4716_v53, 16  ;;  %v2672_v53 = vld [vmem:[#allocation3 + $0x80] sm:$0x1] }
 0x24e   : > { %v3816_v56 = vsel %vm9147_vm6, %v3811_v11, %v3815_v37  ;;  %v3821_v34 = vrot.slane %v3820_v1, 4  ;;  %v3801_v63 = vrot.slane %v3799_v17, 5  ;;  %v4935_v46 = vrot.slane %v4933_v59, 4  ;;  %v5237_v23 = vld [vmem:[#allocation3 + $0x1c] sm:$0xf] }
 0x24f   : > { %v3787_v49 = vrot.slane %v3786_v36, 4  ;;  %v3796_v54 = vor.u32 %v3795_v26, %v3791_v20  ;;  %v4938_v14 = vrot.slane %v4936_v6, 5  ;;  %v4942_v55 = vshll.u32 %v4717_v10, 16  ;;  %v5238_v11 = vld [vmem:[#allocation3 + $0x20] sm:$0x1] }
 0x250   : > { %3459 = vrot.lane.b32.xlu1 %v8467_v38, %s9042_s13  ;;  %v3826_v58 = vsel %vm9147_vm6, %v3821_v34, %v3825_v43  ;;  %v4946_v61 = vshrl.u32 %v4717_v10, 16  ;;  %v4952_v12 = vshll.u32 %v4718_v29, 16  ;;  %v2929_v18 = vshrl.u32 %v2670_v27, 16  ;;  %v5236_v38 = vld [vmem:[#allocation3 + $0x18] sm:$0xe] }
 0x251   : > { %v8493_v0 = vcombine.low %v3816_v56, %v3826_v58  ;;  %v3792_v24 = vsel %vm9147_vm6, %v3787_v49, %v3791_v20  ;;  %v3797_v7 = vrot.slane %v3796_v54, 4  ;;  %v4939_v15 = vor.u32 %v4938_v14, %v4935_v46 }
 0x252   : > { %v4944_v37 = vrot.slane %v4942_v55, 5  ;;  %v4948_v40 = vrot.slane %v4946_v61, 4  ;;  %v4954_v35 = vrot.slane %v4952_v12, 5  ;;  %v2931_v51 = vrot.slane %v2929_v18, 4  ;;  %v10644_v1 = vpop.permute.xlu0 %4636 }
 0x253   : > { %4182 = vst.msk [vmem:[#allocation4 + $0x50] sm:$0xff] %vm2623_vm12, %v8493_v0  ;;  %v3802_v16 = vsel %vm9147_vm6, %v3797_v7, %v3801_v63  ;;  %v4940_v3 = vrot.slane %v4939_v15, 4  ;;  %v2932_v43 = vshll.u32 %v2670_v27, 16  ;;  %v2938_v10 = vshll.u32 %v2671_v48, 16  ;;  %v10648_v20 = vpop.permute.xlu1 %3628  ;;  %v10655_v63 = vld [vmem:[%s12252_s2] ss:$0 sm:$0xff] }
 0x254   : > { %4502 = vst.msk [vmem:[#allocation4 + $0x50] sm:$0xff] %vm3168_vm11, %v4458_v47  ;;  %3640 = vrot.lane.b32.xlu1 %v8992_v21, %s9043_s16  ;;  %v8492_v22 = vcombine.low %v3792_v24, %v3802_v16  ;;  %v4949_v62 = vor.u32 %v4948_v40, %v4944_v37  ;;  %v2942_v44 = vshrl.u32 %v2671_v48, 16  ;;  %v2948_v19 = vshll.u32 %v2672_v53, 16 }
 0x255   : > { %v4945_v17 = vsel %vm9147_vm6, %v4940_v3, %v4944_v37  ;;  %v2934_v29 = vrot.slane %v2932_v43, 5  ;;  %v2940_v59 = vrot.slane %v2938_v10, 5  ;;  %v8570_v36 = vrot.slane %v5236_v38, 9  ;;  %v8995_v10 = vld [vmem:[#allocation3 + $0x84] sm:$0xff]  }
 0x256   : > { %4181 = vst.msk [vmem:[#allocation4 + $0x38] sm:$0xff] %vm2623_vm12, %v8492_v22  ;;  %v4950_v47 = vrot.slane %v4949_v62, 4  ;;  %v2944_v26 = vrot.slane %v2942_v44, 4  ;;  %v2950_v6 = vrot.slane %v2948_v19, 5  ;;  %v5334_v27 = vrot.slane %v5237_v23, 5  ;;  %v5177_v58 = vpop.permute.xlu0 %5176 }
 0x257   : > { %4501 = vst.msk [vmem:[#allocation4 + $0x38] sm:$0xff] %vm3168_vm11, %v4456_v31  ;;  %v2935_v56 = vor.u32 %v2934_v29, %v2931_v51  ;;  %v5337_v34 = vrot.slane %v5238_v11, 5  ;;  %v1848_v46 = vadd.f32 %v10655_v63, %v10616_v2  ;;  %v1840_v32 = vadd.f32 %v10655_v63, %v10618_v45  ;;  %v4713_v2 = vld [vmem:[#allocation3 + $0x6c] sm:$0xf]  ;;  %v3129_v45 = vpop.permute.xlu1 %3128  ;;  %v2474_v22 = vld [vmem:[#allocation3 + $0xa8] sm:$0xf] }
 0x258   : > { %4678 = vst.msk [vmem:[#allocation4 + $0x38] sm:$0xff] %vm3489_vm13, %v10548_v60  ;;  %v4955_v49 = vsel %vm9147_vm6, %v4950_v47, %v4954_v35  ;;  %v2945_v54 = vor.u32 %v2944_v26, %v2940_v59  ;;  %v5335_v14 = vsel %vm9110_vm5, %v8570_v36, %v5334_v27  ;;  %v5336_v55 = vrot.slane %v5334_v27, 4  ;;  %v4714_v35 = vld [vmem:[#allocation3 + $0x70] sm:$0xf]  ;;  %v2467_v62 = vld [vmem:[#allocation3 + $0x9c] sm:$0xf] }
 0x259   : > { %v8562_v21 = vcombine.low %v4945_v17, %v4955_v49  ;;  %v2936_v31 = vrot.slane %v2935_v56, 4  ;;  %v1896_v61 = vmax.f32 %v1848_v46, 0.0  ;;  %v1894_v12 = vmax.f32 %v1840_v32, 0.0  ;;  %5222 = vst.msk [vmem:[#allocation4 + $0x38] sm:$0xff] %vm3666_vm14, %v5177_v58  ;;  %v4715_v11 = vld [vmem:[#allocation3 + $0x74] sm:$0x1] }
 0x25a   : > { %v2946_v48 = vrot.slane %v2945_v54, 4  ;;  %v5338_v60 = vsel %vm9110_vm5, %v5336_v55, %v5337_v34  ;;  %v1851_v18 = vadd.f32 %v10655_v63, %v10622_v9  ;;  %v1843_v0 = vadd.f32 %v10655_v63, %v10625_v4  ;;  %3173 = vst.msk [vmem:[#allocation4 + $0x60] sm:$0xff] %vm3168_vm11, %v3129_v45  ;;  %v4635_v51 = vpop.permute.xlu0 %4634  ;;  %v8997_v27 = vld [vmem:[#allocation3 + $0x84] sm:$0xff]   ;;  %v2478_v55 = vld [vmem:[#allocation3 + $0xb0] sm:$0x1] }
 0x25b   : > { %5188 = vrot.lane.b32.xlu0 %v8562_v21, %s9043_s16  ;;  %v2941_v24 = vsel %vm9147_vm6, %v2936_v31, %v2940_v59  ;;  %v8586_v7 = vcombine.low %v5335_v14, %v5338_v60  ;;  %v8666_v15 = vpack.c.bf16 %v1896_v61, %v1896_v61  ;;  %v8664_v53 = vpack.c.bf16 %v1894_v12, %v1894_v12  ;;  %v3627_v23 = vpop.permute.xlu1 %3626  ;;  %v2471_v45 = vld [vmem:[#allocation3 + $0xa4] sm:$0x1] }
 0x25c   : > { %3494 = vst.msk [vmem:[#allocation4 + $0x60] sm:$0xff] %vm3489_vm13, %v10620_v30  ;;  %v2951_v37 = vsel %vm9147_vm6, %v2946_v48, %v2950_v6  ;;  %v1897_v9 = vmax.f32 %v1851_v18, 0.0  ;;  %v1895_v40 = vmax.f32 %v1843_v0, 0.0  ;;  %v4909_v4 = vshrl.u32 %v4713_v2, 16  ;;  %4679 = vst.msk [vmem:[#allocation4 + $0x50] sm:$0xff] %vm3489_vm13, %v4635_v51 }
 0x25d   : > { %v8436_v38 = vcombine.low %v2941_v24, %v2951_v37  ;;  %5508 = vst.msk [vmem:[#allocation4 + $0x10] sm:$0xff] %vm2623_vm12, %v8586_v7  ;;  %v2279_v16 = vshrl.u32 %v8666_v15, 16  ;;  %v2282_v3 = vshll.u32 %v8666_v15, 16  ;;  %v2262_v43 = vshrl.u32 %v8664_v53, 16  ;;  %v2667_v37 = vld [vmem:[#allocation3 + $0x6c] sm:$0xf] }
 0x25e   : > { %v2265_v30 = vshll.u32 %v8664_v53, 16  ;;  %v8667_v44 = vpack.c.bf16 %v1897_v9, %v1897_v9  ;;  %v8665_v19 = vpack.c.bf16 %v1895_v40, %v1895_v40  ;;  %v4911_v17 = vrot.slane %v4909_v4, 4  ;;  %3671 = vst.msk [vmem:[#allocation4 + $0x60] sm:$0xff] %vm3666_vm14, %v3627_v23  ;;  %v5175_v46 = vpop.permute.xlu0 %5174  ;;  %v2668_v51 = vld [vmem:[#allocation3 + $0x70] sm:$0xf] }
 0x25f   : > { %3140 = vrot.lane.b32.xlu1 %v8436_v38, %s9040_s10  ;;  %v2281_v29 = vrot.slane %v2279_v16, 7  ;;  %v2264_v59 = vrot.slane %v2262_v43, 7  ;;  %4646 = vrot.lane.b32.xlu0 %v8995_v10, %s9042_s13  ;;  %v4912_v36 = vshll.u32 %v4713_v2, 16  ;;  %v4918_v47 = vshll.u32 %v4714_v35, 16  ;;  %5221 = vst.msk [vmem:[#allocation4 + $0x20] sm:$0xff] %vm3666_vm14, %v5175_v46  ;;  %v3127_v18 = vpop.permute.xlu1 %3126  ;;  %v9014_v46 = vld [vmem:[#allocation3 + $0x6c] sm:$0xff]  }
 0x260   : > { %v2287_v26 = vshrl.u32 %v8667_v44, 16  ;;  %v2290_v6 = vshll.u32 %v8667_v44, 16  ;;  %v2270_v56 = vshrl.u32 %v8665_v19, 16  ;;  %v2273_v34 = vshll.u32 %v8665_v19, 16  ;;  %3172 = vst.msk [vmem:[#allocation4 + $0x48] sm:$0xff] %vm3168_vm11, %v3127_v18 }
 0x261   : > { %v2284_v32 = vor.u32 %v2282_v3, %v2281_v29  ;;  %v2285_v49 = vrot.slane %v2281_v29, 4  ;;  %v2267_v54 = vor.u32 %v2265_v30, %v2264_v59  ;;  %v2268_v14 = vrot.slane %v2264_v59, 4  ;;  %v10699_v38 = vld [vmem:[#allocation3 + $0x30] sm:$0xe]  ;;  %3493 = vst.msk [vmem:[#allocation4 + $0x48] sm:$0xff] %vm3489_vm13, %v10637_v42 }
 0x262   : > { %v2289_v58 = vrot.slane %v2287_v26, 7  ;;  %v2272_v21 = vrot.slane %v2270_v56, 7  ;;  %v4914_v31 = vrot.slane %v4912_v36, 5  ;;  %v10688_v61 = vrot.slane %v4918_v47, 5  ;;  %v10711_v23 = vld [vmem:[#allocation3 + $0x38] sm:$0x1] }
 0x263   : > { %v2475_v12 = vsel %vm10149_vm8, %v2284_v32, %v2474_v22  ;;  %v2468_v2 = vsel %vm10149_vm8, %v2267_v54, %v2467_v62  ;;  %3638 = vrot.lane.b32.xlu1 %v8997_v27, %s9043_s16  ;;  %v4922_v48 = vshrl.u32 %v4714_v35, 16  ;;  %v4928_v60 = vshll.u32 %v4715_v11, 16  ;;  %3670 = vst.msk [vmem:[#allocation4 + $0x48] sm:$0xff] %vm3666_vm14, %v10551_v8  ;;  %v4228_v44 = vld [vmem:[#allocation3 + $0x90] sm:$0xe]  ;;  %v9013_v47 = vld [vmem:[#allocation3 + $0x78] sm:$0xff]  }
 0x264   : > { %v5526_v0 = vld [vmem:[#allocation4 + $0x10] sm:$0xff]  ;;  %2476 = vst [vmem:[#allocation3 + $0xa8] sm:$0xf] %v2475_v12  ;;  %2469 = vst [vmem:[#allocation3 + $0x9c] sm:$0xf] %v2468_v2  ;;  %v2292_v24 = vor.u32 %v2290_v6, %v2289_v58  ;;  %v2294_v7 = vrot.slane %v2289_v58, 4  ;;  %v2275_v15 = vor.u32 %v2273_v34, %v2272_v21  ;;  %v4915_v9 = vor.u32 %v4914_v31, %v4911_v17  ;;  %v10734_v58 = vpop.permute.xlu0 %4461 }
 0x265   : > { %v2277_v53 = vrot.slane %v2272_v21, 4  ;;  %8863 = vmatprep.mubr.msk.bf16.mxu0 %vm2623_vm12, %v5526_v0  ;;  %v4924_v40 = vrot.slane %v4922_v48, 4  ;;  %v4930_v4 = vrot.slane %v4928_v60, 5  ;;  %v5343_v35 = vrot.slane %v5341_v33, 4  ;;  %v5243_v33 = vld [vmem:[#allocation3 + $0x34] sm:$0xf] }
 0x266   : > { %v2293_v16 = vsel %vm10156_vm9, %v2285_v49, %v2292_v24  ;;  %v2479_v3 = vsel %vm10162_vm10, %v2294_v7, %v2478_v55  ;;  %v2276_v43 = vsel %vm10156_vm9, %v2268_v14, %v2275_v15  ;;  %v4916_v42 = vrot.slane %v4915_v9, 4  ;;  %v4229_v29 = vld [vmem:[#allocation3 + $0x94] sm:$0xf]  ;;  %v10723_v59 = vld [vmem:[#allocation3 + $0x98] sm:$0x1]  ;;  %2634 = vst.msk [vmem:[#allocation4 + $0xf0] sm:$0xff] %vm2623_vm12, %v9013_v47  ;;  %v10745_v15 = vpop.permute.xlu1 %3453 }
 0x267   : > { %v2472_v10 = vsel %vm10162_vm10, %v2277_v53, %v2471_v45  ;;  %2477 = vst.msk [vmem:[#allocation3 + $0xac] sm:$0xf] %vm1902_vm1, %v2293_v16  ;;  %2480 = vst [vmem:[#allocation3 + $0xb0] sm:$0x1] %v2479_v3  ;;  %v4925_v22 = vor.u32 %v4924_v40, %v10688_v61  ;;  %v5345_v30 = vsel %vm9110_vm5, %v5343_v35, %v5344_v5  ;;  %v2905_v62 = vshrl.u32 %v2667_v37, 16  ;;  %v5528_v36 = vld [vmem:[#allocation4 + $0x20] sm:$0xff] }
 0x268   : > { %2470 = vst.msk [vmem:[#allocation3 + $0xa0] sm:$0xf] %vm1902_vm1, %v2276_v43  ;;  %2473 = vst [vmem:[#allocation3 + $0xa4] sm:$0x1] %v2472_v10  ;;  %v8587_v19 = vcombine.low %v10446_v57, %v5345_v30  ;;  %v2908_v11 = vshll.u32 %v2667_v37, 16  ;;  %v2914_v8 = vshll.u32 %v2668_v51, 16  ;;  %v4921_v26 = vsel %vm9147_vm6, %v4916_v42, %v10688_v61  ;;  %5811 = vmatprep.mubr.bf16.mxu1 %v5528_v36 }
 0x269   : > { %v2918_v17 = vshrl.u32 %v2668_v51, 16  ;;  %v4926_v28 = vrot.slane %v4925_v22, 4  ;;  %v2907_v6 = vrot.slane %v2905_v62, 4  ;;  %v2924_v27 = vshll.u32 %v2669_v25, 16  ;;  %v3221_v5 = vld [vmem:[#allocation3 + $0x90] sm:$0xe] }
 0x26a   : > { %v3222_v56 = vld [vmem:[#allocation3 + $0x94] sm:$0xf]  ;;  %v10728_v34 = vpop.f32.mrb[28].mxu0  ;;  %5509 = vst.msk [vmem:[#allocation4 + $0x28] sm:$0xff] %vm2623_vm12, %v8587_v19  ;;  %v2910_v32 = vrot.slane %v2908_v11, 5  ;;  %v2916_v49 = vrot.slane %v2914_v8, 5 }
 0x26b   : > { %v5527_v57 = vld [vmem:[#allocation4 + $0x18] sm:$0xff]  ;;  %v2920_v54 = vrot.slane %v2918_v17, 4  ;;  %v8572_v14 = vrot.slane %v10699_v38, 9  ;;  %v10732_v55 = vld [vmem:[#allocation3 + $0x98] sm:$0x1]  ;;  %v10736_v21 = vpop.f32.mrb[29].mxu0  ;;  %v4931_v61 = vsel %vm9147_vm6, %v4926_v28, %v4930_v4 }
 0x26c   : > { %5812 = vmatmul.mubr.bf16.vlgmr.msra.gmra.mrb[0].mxu1 %v5527_v57  ;;  %v5531_v31 = vld [vmem:[#allocation4 + $0x38] sm:$0xff]  ;;  %v2926_v12 = vrot.slane %v2924_v27, 5  ;;  %v5348_v2 = vrot.slane %v5243_v33, 5  ;;  %v5351_v45 = vrot.slane %v10711_v23, 5  ;;  %v10742_v48 = vpop.f32.mrb[30].mxu0  ;;  %2633 = vst.msk [vmem:[#allocation4 + $0xd8] sm:$0xff] %vm2623_vm12, %v9014_v46  ;;  %v8561_v60 = vcombine.low %v4921_v26, %v4931_v61 }
 0x26d   : > { %5819 = vmatprep.mubr.bf16.mxu1 %v5531_v31  ;;  %v2911_v18 = vor.u32 %v2910_v32, %v2907_v6  ;;  %v2921_v0 = vor.u32 %v2920_v54, %v2916_v49  ;;  %v8517_v24 = vrot.slane %v4228_v44, 9  ;;  %v4225_v7 = vld [vmem:[#allocation3 + $0x84] sm:$0xe]  ;;  %v10747_v53 = vpop.f32.mrb[31].mxu0  ;;  %v4370_v40 = vrot.slane %v4229_v29, 5 }
 0x26e   : > { %v5349_v37 = vsel %vm9110_vm5, %v8572_v14, %v5348_v2  ;;  %v5350_v9 = vrot.slane %v5348_v2, 4  ;;  %v4373_v4 = vrot.slane %v10723_v59, 5  ;;  %v4226_v35 = vld [vmem:[#allocation3 + $0x88] sm:$0xf]  ;;  %v5245_v51 = vld [vmem:[#allocation3 + $0x3c] sm:$0xe]  ;;  %5186 = vrot.lane.b32.xlu0 %v8561_v60, %s9043_s16  ;;  %v10764_v59 = vpop.permute.xlu0 %4459 }
 0x26f   : > { %v2912_v38 = vrot.slane %v2911_v18, 4  ;;  %v2922_v16 = vrot.slane %v2921_v0, 4  ;;  %v8454_v3 = vrot.slane %v3221_v5, 9  ;;  %v3367_v43 = vrot.slane %v3222_v56, 5  ;;  %v5246_v10 = vld [vmem:[#allocation3 + $0x40] sm:$0xf] }
 0x270   : > { %v5247_v25 = vld [vmem:[#allocation3 + $0x44] sm:$0x1]  ;;  %v5352_v33 = vsel %vm9110_vm5, %v5350_v9, %v5351_v45  ;;  %v4371_v23 = vsel %vm9110_vm5, %v8517_v24, %v4370_v40  ;;  %v4372_v42 = vrot.slane %v4370_v40, 4  ;;  %v3370_v22 = vrot.slane %v10732_v55, 5  ;;  %v4227_v30 = vld [vmem:[#allocation3 + $0x8c] sm:$0x1] }
 0x271   : > { %v2917_v62 = vsel %vm9147_vm6, %v2912_v38, %v2916_v49  ;;  %v2927_v44 = vsel %vm9147_vm6, %v2922_v16, %v2926_v12  ;;  %v8588_v19 = vcombine.low %v5349_v37, %v5352_v33  ;;  %v3368_v11 = vsel %vm9110_vm5, %v8454_v3, %v3367_v43  ;;  %v3218_v8 = vld [vmem:[#allocation3 + $0x84] sm:$0xe]  ;;  %v3219_v17 = vld [vmem:[#allocation3 + $0x88] sm:$0xf]  ;;  %v3220_v27 = vld [vmem:[#allocation3 + $0x8c] sm:$0x1]  ;;  %v10770_v54 = vpop.permute.xlu1 %3451 }
 0x272   : > { %v5248_v29 = vld [vmem:[#allocation3 + $0x48] sm:$0xe]  ;;  %v5529_v36 = vld [vmem:[#allocation4 + $0x28] sm:$0xff]  ;;  %v8435_v47 = vcombine.low %v2917_v62, %v2927_v44  ;;  %v4374_v26 = vsel %vm9110_vm5, %v4372_v42, %v4373_v4  ;;  %v3369_v28 = vrot.slane %v3367_v43, 4  ;;  %v8516_v6 = vrot.slane %v4225_v7, 9 }
 0x273   : > { %v5249_v5 = vld [vmem:[#allocation3 + $0x4c] sm:$0xf]  ;;  %8864 = vmatmul.mubr.msk.bf16.vlgmr.msra.gmra.mrb[36].mxu0 %vm2623_vm12, %v5529_v36  ;;  %5510 = vst.msk [vmem:[#allocation4 + $0x40] sm:$0xff] %vm2623_vm12, %v8588_v19  ;;  %v8533_v57 = vcombine.low %v4371_v23, %v4374_v26  ;;  %v4363_v46 = vrot.slane %v4226_v35, 5  ;;  %v4366_v32 = vrot.slane %v4227_v30, 5  ;;  %v8573_v49 = vrot.slane %v5245_v51, 9 }
 0x274   : > { %v5530_v56 = vld [vmem:[#allocation4 + $0x30] sm:$0xff]  ;;  %3138 = vrot.lane.b32.xlu1 %v8435_v47, %s9040_s10  ;;  %v3371_v14 = vsel %vm9110_vm5, %v3369_v28, %v3370_v22  ;;  %v5355_v55 = vrot.slane %v5246_v10, 5  ;;  %v5358_v31 = vrot.slane %v5247_v25, 5  ;;  %v8453_v61 = vrot.slane %v3218_v8, 9  ;;  %v5250_v18 = vld [vmem:[#allocation3 + $0x50] sm:$0x1] }
 0x275   : > { %5820 = vmatmul.mubr.bf16.gmra.mrb[4].mxu1 %v5530_v56  ;;  %4473 = vrot.lane.b32.xlu0 %v8533_v57, %s9040_s10  ;;  %v8470_v12 = vcombine.low %v3368_v11, %v3371_v14  ;;  %v4364_v2 = vsel %vm9110_vm5, %v8516_v6, %v4363_v46  ;;  %v4365_v45 = vrot.slane %v4363_v46, 4  ;;  %v3360_v60 = vrot.slane %v3219_v17, 5  ;;  %v2676_v0 = vld [vmem:[#allocation3 + $0x90] sm:$0xf]  ;;  %v5251_v4 = vld [vmem:[#allocation3 + $0x54] sm:$0xe] }
 0x276   : > { %v10778_v24 = vpop.permute.xlu0 %4640  ;;  %v5356_v7 = vsel %vm9110_vm5, %v8573_v49, %v5355_v55  ;;  %v5357_v37 = vrot.slane %v5355_v55, 4  ;;  %v3363_v9 = vrot.slane %v3220_v27, 5  ;;  %v8574_v40 = vrot.slane %v5248_v29, 9  ;;  %v2677_v3 = vld [vmem:[#allocation3 + $0x94] sm:$0xf]  ;;  %v9000_v27 = vld [vmem:[#allocation3 + $0xa8] sm:$0xff]  }
 0x277   : > { %v4367_v35 = vsel %vm9110_vm5, %v4365_v45, %v4366_v32  ;;  %v3361_v51 = vsel %vm9110_vm5, %v8453_v61, %v3360_v60  ;;  %v3362_v38 = vrot.slane %v3360_v60, 4  ;;  %v5362_v16 = vrot.slane %v5249_v5, 5  ;;  %v5252_v43 = vld [vmem:[#allocation3 + $0x58] sm:$0xf]  ;;  %v10786_v10 = vpop.permute.xlu1 %3632  ;;  %v5253_v30 = vld [vmem:[#allocation3 + $0x5c] sm:$0x1] }
 0x278   : > { %3465 = vrot.lane.b32.xlu1 %v8470_v12, %s9042_s13  ;;  %v8532_v25 = vcombine.low %v4364_v2, %v4367_v35  ;;  %v5359_v33 = vsel %vm9110_vm5, %v5357_v37, %v5358_v31  ;;  %v5365_v23 = vrot.slane %v5250_v18, 5  ;;  %v2678_v42 = vld [vmem:[#allocation3 + $0x98] sm:$0x1]  ;;  %v2977_v22 = vshrl.u32 %v2676_v0, 16  ;;  %v5254_v8 = vld [vmem:[#allocation3 + $0x60] sm:$0xe] }
 0x279   : > { %v8589_v62 = vcombine.low %v5356_v7, %v5359_v33  ;;  %v3364_v44 = vsel %vm9110_vm5, %v3362_v38, %v3363_v9  ;;  %v5363_v19 = vsel %vm9110_vm5, %v8574_v40, %v5362_v16  ;;  %v5364_v11 = vrot.slane %v5362_v16, 4  ;;  %v5255_v17 = vld [vmem:[#allocation3 + $0x64] sm:$0xf]  ;;  %v5256_v32 = vld [vmem:[#allocation3 + $0x68] sm:$0x1] }
 0x27a   : > { %v10795_v29 = vpop.permute.xlu0 %5180  ;;  %v5532_v36 = vld [vmem:[#allocation4 + $0x40] sm:$0xff]  ;;  %4471 = vrot.lane.b32.xlu0 %v8532_v25, %s9040_s10  ;;  %v8469_v47 = vcombine.low %v3361_v51, %v3364_v44  ;;  %v2979_v26 = vrot.slane %v2977_v22, 4  ;;  %v2980_v28 = vshll.u32 %v2676_v0, 16  ;;  %v2986_v6 = vshll.u32 %v2677_v3, 16  ;;  %v3698_v61 = vld [vmem:[#allocation3 + $0x48] sm:$0xf] }
 0x27b   : > { %8867 = vmatprep.mubr.msk.bf16.mxu0 %vm2623_vm12, %v5532_v36  ;;  %5511 = vst.msk [vmem:[#allocation4 + $0x58] sm:$0xff] %vm2623_vm12, %v8589_v62  ;;  %v5366_v5 = vsel %vm9110_vm5, %v5364_v11, %v5365_v23  ;;  %v2990_v56 = vshrl.u32 %v2677_v3, 16  ;;  %v2996_v57 = vshll.u32 %v2678_v42, 16  ;;  %v8575_v46 = vrot.slane %v5251_v4, 9  ;;  %v3699_v51 = vld [vmem:[#allocation3 + $0x4c] sm:$0xf] }
 0x27c   : > { %3463 = vrot.lane.b32.xlu1 %v8469_v47, %s9042_s13  ;;  %v8590_v49 = vcombine.low %v5363_v19, %v5366_v5  ;;  %v2982_v14 = vrot.slane %v2980_v28, 5  ;;  %v2988_v55 = vrot.slane %v2986_v6, 5  ;;  %v5369_v31 = vrot.slane %v5252_v43, 5  ;;  %v3133_v18 = vpop.permute.xlu1 %3132  ;;  %v3700_v23 = vld [vmem:[#allocation3 + $0x50] sm:$0x1] }
 0x27d   : > { %v2992_v12 = vrot.slane %v2990_v56, 4  ;;  %v2998_v2 = vrot.slane %v2996_v57, 5  ;;  %v5372_v45 = vrot.slane %v5253_v30, 5  ;;  %v8576_v60 = vrot.slane %v5254_v8, 9  ;;  %3175 = vst.msk [vmem:[#allocation4 + $0x90] sm:$0xff] %vm3168_vm11, %v3133_v18  ;;  %v9015_v11 = vld [vmem:[#allocation3 + $0x90] sm:$0xff]  }
 0x27e   : > { %v10803_v0 = vpop.permute.xlu0 %4638  ;;  %5512 = vst.msk [vmem:[#allocation4 + $0x70] sm:$0xff] %vm2623_vm12, %v8590_v49  ;;  %v2983_v7 = vor.u32 %v2982_v14, %v2979_v26  ;;  %v5370_v37 = vsel %vm9110_vm5, %v8575_v46, %v5369_v31  ;;  %v5371_v9 = vrot.slane %v5369_v31, 4  ;;  %v5376_v40 = vrot.slane %v5255_v17, 5  ;;  %4652 = vrot.lane.b32.xlu0 %v9000_v27, %s9042_s13  ;;  %v4722_v44 = vld [vmem:[#allocation3 + $0x90] sm:$0xf]  ;;  %2636 = vst.msk [vmem:[#allocation4 + $0x120] sm:$0xff] %vm2623_vm12, %v9015_v11 }
 0x27f   : > { %v2993_v4 = vor.u32 %v2992_v12, %v2988_v55  ;;  %v5379_v35 = vrot.slane %v5256_v32, 5  ;;  %v3852_v38 = vshrl.u32 %v3698_v61, 16  ;;  %v3855_v16 = vshll.u32 %v3698_v61, 16  ;;  %3496 = vst.msk [vmem:[#allocation4 + $0x90] sm:$0xff] %vm3489_vm13, %v10745_v15  ;;  %v4723_v26 = vld [vmem:[#allocation3 + $0x94] sm:$0xf] }
 0x280   : > { %v2984_v3 = vrot.slane %v2983_v7, 4  ;;  %v5373_v43 = vsel %vm9110_vm5, %v5371_v9, %v5372_v45  ;;  %v5377_v25 = vsel %vm9110_vm5, %v8576_v60, %v5376_v40  ;;  %v5378_v33 = vrot.slane %v5376_v40, 4  ;;  %v3631_v19 = vpop.permute.xlu1 %3630  ;;  %v5257_v28 = vld [vmem:[#allocation3 + $0x6c] sm:$0xe]  ;;  %v4724_v46 = vld [vmem:[#allocation3 + $0x98] sm:$0x1] }
 0x281   : > { %v2994_v42 = vrot.slane %v2993_v4, 4  ;;  %v8591_v22 = vcombine.low %v5370_v37, %v5373_v43  ;;  %v3854_v30 = vrot.slane %v3852_v38, 4  ;;  %v3857_v62 = vrot.slane %v3855_v16, 5  ;;  %3673 = vst.msk [vmem:[#allocation4 + $0x90] sm:$0xff] %vm3666_vm14, %v3631_v19  ;;  %v5258_v32 = vld [vmem:[#allocation3 + $0x70] sm:$0xf] }
 0x282   : > { %v5535_v8 = vld [vmem:[#allocation4 + $0x58] sm:$0xff]  ;;  %v2989_v15 = vsel %vm9147_vm6, %v2984_v3, %v2988_v55  ;;  %v5380_v17 = vsel %vm9110_vm5, %v5378_v33, %v5379_v35  ;;  %v3861_v36 = vshll.u32 %v3699_v51, 16  ;;  %v3865_v47 = vshrl.u32 %v3699_v51, 16  ;;  %v5179_v6 = vpop.permute.xlu0 %5178  ;;  %v5260_v12 = vld [vmem:[#allocation3 + $0x78] sm:$0xe]  ;;  %v9016_v45 = vld [vmem:[#allocation3 + $0x84] sm:$0xff]  }
 0x283   : > { %8868 = vmatmul.mubr.msk.bf16.gmra.mrb[40].mxu0 %vm2623_vm12, %v5535_v8  ;;  %v2999_v27 = vsel %vm9147_vm6, %v2994_v42, %v2998_v2  ;;  %5513 = vst.msk [vmem:[#allocation4 + $0x88] sm:$0xff] %vm2623_vm12, %v8591_v22  ;;  %v8592_v5 = vcombine.low %v5377_v25, %v5380_v17  ;;  %v3858_v56 = vor.u32 %v3857_v62, %v3854_v30  ;;  %v3871_v57 = vshll.u32 %v3700_v23, 16  ;;  %v5259_v61 = vld [vmem:[#allocation3 + $0x74] sm:$0x1]  ;;  %v9001_v9 = vld [vmem:[#allocation3 + $0x9c] sm:$0xff]  }
 0x284   : > { %5223 = vst.msk [vmem:[#allocation4 + $0x50] sm:$0xff] %vm3666_vm14, %v5179_v6  ;;  %v8438_v49 = vcombine.low %v2989_v15, %v2999_v27  ;;  %v3863_v14 = vrot.slane %v3861_v36, 5  ;;  %v3867_v55 = vrot.slane %v3865_v47, 4  ;;  %v4981_v31 = vshrl.u32 %v4722_v44, 16  ;;  %v5261_v38 = vld [vmem:[#allocation3 + $0x7c] sm:$0xf] }
 0x285   : > { %v5538_v60 = vld [vmem:[#allocation4 + $0x70] sm:$0xff]  ;;  %5514 = vst.msk [vmem:[#allocation4 + $0xa0] sm:$0xff] %vm2623_vm12, %v8592_v5  ;;  %v3859_v2 = vrot.slane %v3858_v56, 4  ;;  %v3873_v18 = vrot.slane %v3871_v57, 5  ;;  %v4984_v7 = vshll.u32 %v4722_v44, 16  ;;  %v4990_v37 = vshll.u32 %v4723_v26, 16 }
 0x286   : > { %8871 = vmatprep.mubr.msk.bf16.mxu0 %vm2623_vm12, %v5538_v60  ;;  %3144 = vrot.lane.b32.xlu1 %v8438_v49, %s9040_s10  ;;  %v3868_v40 = vor.u32 %v3867_v55, %v3863_v14  ;;  %v4983_v4 = vrot.slane %v4981_v31, 4  ;;  %v4994_v35 = vshrl.u32 %v4723_v26, 16  ;;  %v5000_v51 = vshll.u32 %v4724_v46, 16  ;;  %2635 = vst.msk [vmem:[#allocation4 + $0x108] sm:$0xff] %vm2623_vm12, %v9016_v45  ;;  %v3131_v33 = vpop.permute.xlu1 %3130  ;;  %v5262_v62 = vld [vmem:[#allocation3 + $0x80] sm:$0x1] }
 0x287   : > { %v3864_v16 = vsel %vm9147_vm6, %v3859_v2, %v3863_v14  ;;  %v4986_v3 = vrot.slane %v4984_v7, 5  ;;  %v4992_v43 = vrot.slane %v4990_v37, 5  ;;  %v8577_v25 = vrot.slane %v5257_v28, 9  ;;  %3174 = vst.msk [vmem:[#allocation4 + $0x78] sm:$0xff] %vm3168_vm11, %v3131_v33  ;;  %v2673_v15 = vld [vmem:[#allocation3 + $0x84] sm:$0xf] }
 0x288   : > { %v3869_v23 = vrot.slane %v3868_v40, 4  ;;  %v4996_v42 = vrot.slane %v4994_v35, 4  ;;  %v5002_v22 = vrot.slane %v5000_v51, 5  ;;  %v5383_v30 = vrot.slane %v5258_v32, 5  ;;  %3495 = vst.msk [vmem:[#allocation4 + $0x78] sm:$0xff] %vm3489_vm13, %v10770_v54  ;;  %v5533_v46 = vld [vmem:[#allocation4 + $0x48] sm:$0xff] }
 0x289   : > { %v4987_v44 = vor.u32 %v4986_v3, %v4983_v4  ;;  %v5386_v19 = vrot.slane %v5259_v61, 5  ;;  %v8578_v11 = vrot.slane %v5260_v12, 9  ;;  %v5390_v8 = vrot.slane %v5261_v38, 5  ;;  %v2674_v6 = vld [vmem:[#allocation3 + $0x88] sm:$0xf]  ;;  %3672 = vst.msk [vmem:[#allocation4 + $0x78] sm:$0xff] %vm3666_vm14, %v10648_v20 }
 0x28a   : > { %v5541_v17 = vld [vmem:[#allocation4 + $0x88] sm:$0xff]  ;;  %3642 = vrot.lane.b32.xlu1 %v9001_v9, %s9043_s16  ;;  %v3874_v36 = vsel %vm9147_vm6, %v3869_v23, %v3873_v18  ;;  %v4997_v47 = vor.u32 %v4996_v42, %v4992_v43  ;;  %v5384_v26 = vsel %vm9110_vm5, %v8577_v25, %v5383_v30  ;;  %v5385_v28 = vrot.slane %v5383_v30, 4  ;;  %v2675_v12 = vld [vmem:[#allocation3 + $0x8c] sm:$0x1]  ;;  %v3695_v2 = vld [vmem:[#allocation3 + $0x3c] sm:$0xf] }
 0x28b   : > { %v5534_v27 = vld [vmem:[#allocation4 + $0x50] sm:$0xff]  ;;  %8872 = vmatmul.mubr.msk.bf16.gmra.mrb[44].mxu0 %vm2623_vm12, %v5541_v17  ;;  %v8495_v5 = vcombine.low %v3864_v16, %v3874_v36  ;;  %v4988_v54 = vrot.slane %v4987_v44, 4  ;;  %v5391_v56 = vsel %vm9110_vm5, %v8578_v11, %v5390_v8  ;;  %v5392_v57 = vrot.slane %v5390_v8, 4  ;;  %v3696_v40 = vld [vmem:[#allocation3 + $0x40] sm:$0xf] }
 0x28c   : > { %5827 = vmatprep.mubr.bf16.mxu1 %v5534_v27  ;;  %v5544_v32 = vld [vmem:[#allocation4 + $0xa0] sm:$0xff]  ;;  %v4998_v49 = vrot.slane %v4997_v47, 4  ;;  %v5387_v14 = vsel %vm9110_vm5, %v5385_v28, %v5386_v19  ;;  %v5393_v55 = vrot.slane %v5262_v62, 5  ;;  %v2953_v31 = vshrl.u32 %v2673_v15, 16  ;;  %v3697_v16 = vld [vmem:[#allocation3 + $0x44] sm:$0x1] }
 0x28d   : > { %5828 = vmatmul.mubr.bf16.gmra.mrb[8].mxu1 %v5533_v46  ;;  %8875 = vmatprep.mubr.msk.bf16.mxu0 %vm2623_vm12, %v5544_v32  ;;  %4184 = vst.msk [vmem:[#allocation4 + $0x80] sm:$0xff] %vm2623_vm12, %v8495_v5  ;;  %v4993_v20 = vsel %vm9147_vm6, %v4988_v54, %v4992_v43  ;;  %v8593_v61 = vcombine.low %v5384_v26, %v5387_v14  ;;  %v2956_v45 = vshll.u32 %v2673_v15, 16  ;;  %v2962_v60 = vshll.u32 %v2674_v6, 16  ;;  %v9002_v11 = vld [vmem:[#allocation3 + $0x9c] sm:$0xff]  }
 0x28e   : > { %4504 = vst.msk [vmem:[#allocation4 + $0x80] sm:$0xff] %vm3168_vm11, %v10734_v58  ;;  %v5003_v18 = vsel %vm9147_vm6, %v4998_v49, %v5002_v22  ;;  %v5394_v7 = vsel %vm9110_vm5, %v5392_v57, %v5393_v55  ;;  %v2955_v37 = vrot.slane %v2953_v31, 4  ;;  %v2966_v9 = vshrl.u32 %v2674_v6, 16  ;;  %v3224_v54 = vld [vmem:[#allocation3 + $0x9c] sm:$0xe] }
 0x28f   : > { %v8564_v4 = vcombine.low %v4993_v20, %v5003_v18  ;;  %5515 = vst.msk [vmem:[#allocation4 + $0xb8] sm:$0xff] %vm2623_vm12, %v8593_v61  ;;  %v8594_v35 = vcombine.low %v5391_v56, %v5394_v7  ;;  %v2958_v51 = vrot.slane %v2956_v45, 5  ;;  %v2964_v38 = vrot.slane %v2962_v60, 5  ;;  %v3225_v14 = vld [vmem:[#allocation3 + $0xa0] sm:$0xf]  ;;  %v10881_v18 = vpop.permute.xlu1 %3457 }
 0x290   : > { %4681 = vst.msk [vmem:[#allocation4 + $0x80] sm:$0xff] %vm3489_vm13, %v10803_v0  ;;  %v2968_v58 = vrot.slane %v2966_v9, 4  ;;  %v2972_v3 = vshll.u32 %v2675_v12, 16  ;;  %v1864_v43 = vadd.f32 %v10655_v63, %v10728_v34  ;;  %v3828_v25 = vshrl.u32 %v3695_v2, 16  ;;  %v2488_v7 = vld [vmem:[#allocation3 + $0xc0] sm:$0xf] }
 0x291   : > { %5192 = vrot.lane.b32.xlu0 %v8564_v4, %s9043_s16  ;;  %5516 = vst.msk [vmem:[#allocation4 + $0xd0] sm:$0xff] %vm2623_vm12, %v8594_v35  ;;  %v2959_v33 = vor.u32 %v2958_v51, %v2955_v37  ;;  %v3831_v23 = vshll.u32 %v3695_v2, 16  ;;  %v3837_v42 = vshll.u32 %v3696_v40, 16  ;;  %v3841_v22 = vshrl.u32 %v3696_v40, 16  ;;  %v10879_v2 = vpop.permute.xlu0 %4465 }
 0x292   : > { %v2969_v30 = vor.u32 %v2968_v58, %v2964_v38  ;;  %v2974_v62 = vrot.slane %v2972_v3, 5  ;;  %v1900_v44 = vmax.f32 %v1864_v43, 0.0  ;;  %v3830_v19 = vrot.slane %v3828_v25, 4 }
 0x293   : > { %v2960_v0 = vrot.slane %v2959_v33, 4  ;;  %v3833_v8 = vrot.slane %v3831_v23, 5  ;;  %v3839_v15 = vrot.slane %v3837_v42, 5  ;;  %v3843_v17 = vrot.slane %v3841_v22, 4  ;;  %v4720_v33 = vld [vmem:[#allocation3 + $0x88] sm:$0xf] }
 0x294   : > { %v2970_v36 = vrot.slane %v2969_v30, 4  ;;  %v8670_v34 = vpack.c.bf16 %v1900_v44, %v1900_v44  ;;  %v3847_v47 = vshll.u32 %v3697_v16, 16  ;;  %v1856_v26 = vadd.f32 %v10655_v63, %v10736_v21  ;;  %v4719_v16 = vld [vmem:[#allocation3 + $0x84] sm:$0xf]  ;;  %v2481_v44 = vld [vmem:[#allocation3 + $0xb4] sm:$0xf] }
 0x295   : > { %v2965_v28 = vsel %vm9147_vm6, %v2960_v0, %v2964_v38  ;;  %v3834_v6 = vor.u32 %v3833_v8, %v3830_v19  ;;  %v3844_v27 = vor.u32 %v3843_v17, %v3839_v15  ;;  %v1867_v5 = vadd.f32 %v10655_v63, %v10742_v48  ;;  %4650 = vrot.lane.b32.xlu0 %v9002_v11, %s9042_s13  ;;  %v3226_v38 = vld [vmem:[#allocation3 + $0xa4] sm:$0x1] }
 0x296   : > { %v5547_v56 = vld [vmem:[#allocation4 + $0xb8] sm:$0xff]  ;;  %v2975_v57 = vsel %vm9147_vm6, %v2970_v36, %v2974_v62  ;;  %v2313_v46 = vshrl.u32 %v8670_v34, 16  ;;  %v2316_v32 = vshll.u32 %v8670_v34, 16  ;;  %v3849_v49 = vrot.slane %v3847_v47, 5  ;;  %v10900_v47 = vpop.permute.xlu0 %4463 }
 0x297   : > { %8876 = vmatmul.mubr.msk.bf16.gmra.mrb[48].mxu0 %vm2623_vm12, %v5547_v56  ;;  %v8437_v21 = vcombine.low %v2965_v28, %v2975_v57  ;;  %v3835_v55 = vrot.slane %v3834_v6, 4  ;;  %v3845_v31 = vrot.slane %v3844_v27, 4  ;;  %v1898_v20 = vmax.f32 %v1856_v26, 0.0  ;;  %v10902_v26 = vpop.permute.xlu1 %3455 }
 0x298   : > { %v5550_v61 = vld [vmem:[#allocation4 + $0xd0] sm:$0xff]  ;;  %v10875_v12 = vrot.slane %v2313_v46, 7  ;;  %v1901_v48 = vmax.f32 %v1867_v5, 0.0  ;;  %v1859_v45 = vadd.f32 %v10655_v63, %v10747_v53  ;;  %v8455_v60 = vrot.slane %v3224_v54, 9 }
 0x299   : > { %8879 = vmatprep.mubr.msk.bf16.mxu0 %vm2623_vm12, %v5550_v61  ;;  %3142 = vrot.lane.b32.xlu1 %v8437_v21, %s9040_s10  ;;  %v3840_v37 = vsel %vm9147_vm6, %v3835_v55, %v3839_v15  ;;  %v3850_v9 = vsel %vm9147_vm6, %v3845_v31, %v3849_v49  ;;  %v8668_v40 = vpack.c.bf16 %v1898_v20, %v1898_v20  ;;  %v3374_v4 = vrot.slane %v3225_v14, 5  ;;  %v2492_v15 = vld [vmem:[#allocation3 + $0xc8] sm:$0x1]  ;;  %v4721_v5 = vld [vmem:[#allocation3 + $0x8c] sm:$0x1] }
 0x29a   : > { %v2318_v63 = vor.u32 %v2316_v32, %v10875_v12  ;;  %v2319_v53 = vrot.slane %v10875_v12, 4  ;;  %v8494_v35 = vcombine.low %v3840_v37, %v3850_v9  ;;  %v8671_v51 = vpack.c.bf16 %v1901_v48, %v1901_v48  ;;  %v5263_v32 = vld [vmem:[#allocation3 + $0x84] sm:$0xe]  ;;  %v5264_v49 = vld [vmem:[#allocation3 + $0x88] sm:$0xf]  ;;  %v10916_v37 = vpop.permute.xlu0 %4644 }
 0x29b   : > { %v2296_v58 = vshrl.u32 %v8668_v40, 16  ;;  %v2299_v3 = vshll.u32 %v8668_v40, 16  ;;  %v1899_v43 = vmax.f32 %v1859_v45, 0.0  ;;  %v3375_v25 = vsel %vm9110_vm5, %v8455_v60, %v3374_v4  ;;  %v5265_v20 = vld [vmem:[#allocation3 + $0x8c] sm:$0x1]  ;;  %v10918_v39 = vpop.permute.xlu1 %3636 }
 0x29c   : > { %v2489_v23 = vsel %vm10149_vm8, %v2318_v63, %v2488_v7  ;;  %4183 = vst.msk [vmem:[#allocation4 + $0x68] sm:$0xff] %vm2623_vm12, %v8494_v35  ;;  %v2321_v42 = vshrl.u32 %v8671_v51, 16  ;;  %v2324_v22 = vshll.u32 %v8671_v51, 16  ;;  %v3376_v30 = vrot.slane %v3374_v4, 4  ;;  %v5266_v61 = vld [vmem:[#allocation3 + $0x90] sm:$0xe] }
 0x29d   : > { %2490 = vst [vmem:[#allocation3 + $0xc0] sm:$0xf] %v2489_v23  ;;  %4503 = vst.msk [vmem:[#allocation4 + $0x68] sm:$0xff] %vm3168_vm11, %v10764_v59  ;;  %v2298_v62 = vrot.slane %v2296_v58, 7  ;;  %v8669_v19 = vpack.c.bf16 %v1899_v43, %v1899_v43  ;;  %v3377_v11 = vrot.slane %v3226_v38, 5  ;;  %v4957_v0 = vshrl.u32 %v4719_v16, 16 }
 0x29e   : > { %4680 = vst.msk [vmem:[#allocation4 + $0x68] sm:$0xff] %vm3489_vm13, %v10644_v1  ;;  %v2323_v8 = vrot.slane %v2321_v42, 7  ;;  %v4960_v17 = vshll.u32 %v4719_v16, 16  ;;  %v4966_v36 = vshll.u32 %v4720_v33, 16  ;;  %v4970_v34 = vshrl.u32 %v4720_v33, 16  ;;  %v9017_v9 = vld [vmem:[#allocation3 + $0xa8] sm:$0xff]  }
 0x29f   : > { %v2301_v28 = vor.u32 %v2299_v3, %v2298_v62  ;;  %v2302_v6 = vrot.slane %v2298_v62, 4  ;;  %v2304_v59 = vshrl.u32 %v8669_v19, 16  ;;  %v2307_v27 = vshll.u32 %v8669_v19, 16  ;;  %5224 = vst.msk [vmem:[#allocation4 + $0x68] sm:$0xff] %vm3666_vm14, %v10795_v29  ;;  %v2485_v1 = vld [vmem:[#allocation3 + $0xbc] sm:$0x1] }
 0x2a0   : > { %v2326_v54 = vor.u32 %v2324_v22, %v2323_v8  ;;  %v2328_v56 = vrot.slane %v2323_v8, 4  ;;  %v3378_v57 = vsel %vm9110_vm5, %v3376_v30, %v3377_v11  ;;  %v4959_v46 = vrot.slane %v4957_v0, 4  ;;  %v5267_v60 = vld [vmem:[#allocation3 + $0x94] sm:$0xf]  ;;  %v10914_v7 = vld [vmem:[#allocation3 + $0x98] sm:$0x1] }
 0x2a1   : > { %v2482_v14 = vsel %vm10149_vm8, %v2301_v28, %v2481_v44  ;;  %v2306_v21 = vrot.slane %v2304_v59, 7  ;;  %v8471_v55 = vcombine.low %v3375_v25, %v3378_v57  ;;  %v4962_v31 = vrot.slane %v4960_v17, 5  ;;  %v4234_v35 = vld [vmem:[#allocation3 + $0xa8] sm:$0xe]  ;;  %v4235_v51 = vld [vmem:[#allocation3 + $0xac] sm:$0xf] }
 0x2a2   : > { %2483 = vst [vmem:[#allocation3 + $0xb4] sm:$0xf] %v2482_v14  ;;  %v2327_v29 = vsel %vm10156_vm9, %v2319_v53, %v2326_v54  ;;  %v2493_v12 = vsel %vm10162_vm10, %v2328_v56, %v2492_v15  ;;  %v4968_v48 = vrot.slane %v4966_v36, 5  ;;  %v4972_v45 = vrot.slane %v4970_v34, 4  ;;  %v9003_v43 = vld [vmem:[#allocation3 + $0xa8] sm:$0xff]   ;;  %2638 = vst.msk [vmem:[#allocation4 + $0x150] sm:$0xff] %vm2623_vm12, %v9017_v9 }
 0x2a3   : > { %2491 = vst.msk [vmem:[#allocation3 + $0xc4] sm:$0xf] %vm1902_vm1, %v2327_v29  ;;  %2494 = vst [vmem:[#allocation3 + $0xc8] sm:$0x1] %v2493_v12  ;;  %v2309_v40 = vor.u32 %v2307_v27, %v2306_v21  ;;  %v2311_v4 = vrot.slane %v2306_v21, 4  ;;  %3467 = vrot.lane.b32.xlu1 %v8471_v55, %s9042_s13  ;;  %v4963_v63 = vor.u32 %v4962_v31, %v4959_v46  ;;  %v4976_v53 = vshll.u32 %v4721_v5, 16  ;;  %v10938_v5 = vpop.permute.xlu0 %5184 }
 0x2a4   : > { %v4973_v38 = vor.u32 %v4972_v45, %v4968_v48  ;;  %v8579_v16 = vrot.slane %v5263_v32, 9  ;;  %v5397_v58 = vrot.slane %v5264_v49, 5  ;;  %v5400_v3 = vrot.slane %v5265_v20, 5  ;;  %v4236_v22 = vld [vmem:[#allocation3 + $0xb0] sm:$0x1]  ;;  %v5536_v17 = vld [vmem:[#allocation4 + $0x60] sm:$0xff] }
 0x2a5   : > { %v2310_v25 = vsel %vm10156_vm9, %v2302_v6, %v2309_v40  ;;  %v2486_v33 = vsel %vm10162_vm10, %v2311_v4, %v2485_v1  ;;  %v4964_v23 = vrot.slane %v4963_v63, 4  ;;  %v4978_v42 = vrot.slane %v4976_v53, 5  ;;  %v2682_v15 = vld [vmem:[#allocation3 + $0xa8] sm:$0xf]  ;;  %v2683_v59 = vld [vmem:[#allocation3 + $0xac] sm:$0xf] }
 0x2a6   : > { %2484 = vst.msk [vmem:[#allocation3 + $0xb8] sm:$0xf] %vm1902_vm1, %v2310_v25  ;;  %2487 = vst [vmem:[#allocation3 + $0xbc] sm:$0x1] %v2486_v33  ;;  %v4974_v30 = vrot.slane %v4973_v38, 4  ;;  %v5398_v62 = vsel %vm9110_vm5, %v8579_v16, %v5397_v58  ;;  %v5399_v44 = vrot.slane %v5397_v58, 4 }
 0x2a7   : > { %v8580_v19 = vrot.slane %v5266_v61, 9  ;;  %v5537_v11 = vld [vmem:[#allocation4 + $0x68] sm:$0xff]  ;;  %v4969_v50 = vsel %vm9147_vm6, %v4964_v23, %v4968_v48  ;;  %v5404_v0 = vrot.slane %v5267_v60, 5  ;;  %v5407_v41 = vrot.slane %v10914_v7, 5  ;;  %3644 = vrot.lane.b32.xlu1 %v9003_v43, %s9043_s16  ;;  %v2684_v27 = vld [vmem:[#allocation3 + $0xb0] sm:$0x1]  ;;  %v3137_v54 = vpop.permute.xlu1 %3136 }
 0x2a8   : > { %v8519_v8 = vrot.slane %v4234_v35, 9  ;;  %5835 = vmatprep.mubr.bf16.mxu1 %v5537_v11  ;;  %v4979_v36 = vsel %vm9147_vm6, %v4974_v30, %v4978_v42  ;;  %v5401_v34 = vsel %vm9110_vm5, %v5399_v44, %v5400_v3  ;;  %v4384_v28 = vrot.slane %v4235_v51, 5  ;;  %v4231_v32 = vld [vmem:[#allocation3 + $0x9c] sm:$0xe]  ;;  %v4232_v49 = vld [vmem:[#allocation3 + $0xa0] sm:$0xf] }
 0x2a9   : > { %v4387_v6 = vrot.slane %v4236_v22, 5  ;;  %5836 = vmatmul.mubr.bf16.gmra.mrb[12].mxu1 %v5536_v17  ;;  %v8563_v56 = vcombine.low %v4969_v50, %v4979_v36  ;;  %v8595_v1 = vcombine.low %v5398_v62, %v5401_v34  ;;  %v5405_v57 = vsel %vm9110_vm5, %v8580_v19, %v5404_v0  ;;  %v4233_v14 = vld [vmem:[#allocation3 + $0xa4] sm:$0x1]  ;;  %3177 = vst.msk [vmem:[#allocation4 + $0xc0] sm:$0xff] %vm3168_vm11, %v3137_v54  ;;  %v9018_v21 = vld [vmem:[#allocation3 + $0x9c] sm:$0xff]   ;;  %v10956_v22 = vpop.permute.xlu0 %4642 }
 0x2aa   : > { %v5406_v46 = vrot.slane %v5404_v0, 4  ;;  %v4385_v55 = vsel %vm9110_vm5, %v8519_v8, %v4384_v28  ;;  %v4386_v31 = vrot.slane %v4384_v28, 4  ;;  %v3025_v20 = vshrl.u32 %v2682_v15, 16  ;;  %v5269_v29 = vld [vmem:[#allocation3 + $0x9c] sm:$0xe]  ;;  %3498 = vst.msk [vmem:[#allocation4 + $0xc0] sm:$0xff] %vm3489_vm13, %v10881_v18 }
 0x2ab   : > { %v3028_v61 = vshll.u32 %v2682_v15, 16  ;;  %v5270_v12 = vld [vmem:[#allocation3 + $0xa0] sm:$0xf]  ;;  %5190 = vrot.lane.b32.xlu0 %v8563_v56, %s9043_s16  ;;  %5517 = vst.msk [vmem:[#allocation4 + $0xe8] sm:$0xff] %vm2623_vm12, %v8595_v1  ;;  %v3034_v45 = vshll.u32 %v2683_v59, 16  ;;  %v3038_v60 = vshrl.u32 %v2683_v59, 16  ;;  %v3635_v51 = vpop.permute.xlu1 %3634 }
 0x2ac   : > { %v5408_v48 = vsel %vm9110_vm5, %v5406_v46, %v5407_v41  ;;  %v3044_v7 = vshll.u32 %v2684_v27, 16  ;;  %v5271_v9 = vld [vmem:[#allocation3 + $0xa4] sm:$0x1]  ;;  %2637 = vst.msk [vmem:[#allocation4 + $0x138] sm:$0xff] %vm2623_vm12, %v9018_v21  ;;  %v4388_v4 = vsel %vm9110_vm5, %v4386_v31, %v4387_v6  ;;  %v3027_v63 = vrot.slane %v3025_v20, 4 }
 0x2ad   : > { %v8596_v40 = vcombine.low %v5405_v57, %v5408_v48  ;;  %v3030_v53 = vrot.slane %v3028_v61, 5  ;;  %v5272_v18 = vld [vmem:[#allocation3 + $0xa8] sm:$0xe]  ;;  %v5273_v35 = vld [vmem:[#allocation3 + $0xac] sm:$0xf]  ;;  %v8535_v38 = vcombine.low %v4385_v55, %v4388_v4  ;;  %v3036_v16 = vrot.slane %v3034_v45, 5 }
 0x2ae   : > { %v3040_v58 = vrot.slane %v3038_v60, 4  ;;  %v3046_v3 = vrot.slane %v3044_v7, 5  ;;  %v5274_v43 = vld [vmem:[#allocation3 + $0xb0] sm:$0x1]  ;;  %3675 = vst.msk [vmem:[#allocation4 + $0xc0] sm:$0xff] %vm3666_vm14, %v3635_v51  ;;  %v8518_v33 = vrot.slane %v4231_v32, 9 }
 0x2af   : > { %5518 = vst.msk [vmem:[#allocation4 + $0x100] sm:$0xff] %vm2623_vm12, %v8596_v40  ;;  %v3031_v25 = vor.u32 %v3030_v53, %v3027_v63  ;;  %v4377_v23 = vrot.slane %v4232_v49, 5  ;;  %v4380_v42 = vrot.slane %v4233_v14, 5  ;;  %4477 = vrot.lane.b32.xlu0 %v8535_v38, %s9040_s10  ;;  %v8581_v62 = vrot.slane %v5269_v29, 9  ;;  %v2679_v11 = vld [vmem:[#allocation3 + $0x9c] sm:$0xf] }
 0x2b0   : > { %v3041_v30 = vor.u32 %v3040_v58, %v3036_v16  ;;  %v5411_v44 = vrot.slane %v5270_v12, 5  ;;  %v5414_v19 = vrot.slane %v5271_v9, 5  ;;  %v8582_v8 = vrot.slane %v5272_v18, 9  ;;  %v2680_v28 = vld [vmem:[#allocation3 + $0xa0] sm:$0xf] }
 0x2b1   : > { %v3032_v50 = vrot.slane %v3031_v25, 4  ;;  %v4378_v0 = vsel %vm9110_vm5, %v8518_v33, %v4377_v23  ;;  %v4379_v41 = vrot.slane %v4377_v23, 4  ;;  %v5418_v34 = vrot.slane %v5273_v35, 5  ;;  %v2681_v56 = vld [vmem:[#allocation3 + $0xa4] sm:$0x1] }
 0x2b2   : > { %v3042_v15 = vrot.slane %v3041_v30, 4  ;;  %v5412_v17 = vsel %vm9110_vm5, %v8581_v62, %v5411_v44  ;;  %v5413_v36 = vrot.slane %v5411_v44, 4  ;;  %v5553_v6 = vld [vmem:[#allocation4 + $0xe8] sm:$0xff]  ;;  %v5421_v54 = vrot.slane %v5274_v43, 5  ;;  %v4728_v14 = vld [vmem:[#allocation3 + $0xa8] sm:$0xf] }
 0x2b3   : > { %v3037_v59 = vsel %vm9147_vm6, %v3032_v50, %v3036_v16  ;;  %v4381_v27 = vsel %vm9110_vm5, %v4379_v41, %v4380_v42  ;;  %v3001_v1 = vshrl.u32 %v2679_v11, 16  ;;  %8880 = vmatmul.mubr.msk.bf16.gmra.mrb[52].mxu0 %vm2623_vm12, %v5553_v6  ;;  %v5419_v49 = vsel %vm9110_vm5, %v8582_v8, %v5418_v34  ;;  %v4729_v21 = vld [vmem:[#allocation3 + $0xac] sm:$0xf]  ;;  %v4730_v29 = vld [vmem:[#allocation3 + $0xb0] sm:$0x1]  ;;  %v5183_v12 = vpop.permute.xlu0 %5182 }
 0x2b4   : > { %v3047_v57 = vsel %vm9147_vm6, %v3042_v15, %v3046_v3  ;;  %v8534_v46 = vcombine.low %v4378_v0, %v4381_v27  ;;  %v5415_v32 = vsel %vm9110_vm5, %v5413_v36, %v5414_v19  ;;  %v5420_v20 = vrot.slane %v5418_v34, 4  ;;  %v3227_v40 = vld [vmem:[#allocation3 + $0xa8] sm:$0xe]  ;;  %5225 = vst.msk [vmem:[#allocation4 + $0x80] sm:$0xff] %vm3666_vm14, %v5183_v12  ;;  %v3228_v35 = vld [vmem:[#allocation3 + $0xac] sm:$0xf] }
 0x2b5   : > { %v8440_v55 = vcombine.low %v3037_v59, %v3047_v57  ;;  %v8597_v31 = vcombine.low %v5412_v17, %v5415_v32  ;;  %v3003_v61 = vrot.slane %v3001_v1, 4  ;;  %v3004_v45 = vshll.u32 %v2679_v11, 16  ;;  %v3229_v3 = vld [vmem:[#allocation3 + $0xb0] sm:$0x1]  ;;  %v4725_v19 = vld [vmem:[#allocation3 + $0x9c] sm:$0xf] }
 0x2b6   : > { %v5556_v48 = vld [vmem:[#allocation4 + $0x100] sm:$0xff]  ;;  %4475 = vrot.lane.b32.xlu0 %v8534_v46, %s9040_s10  ;;  %v3010_v60 = vshll.u32 %v2680_v28, 16  ;;  %v3014_v7 = vshrl.u32 %v2680_v28, 16  ;;  %v3020_v9 = vshll.u32 %v2681_v56, 16  ;;  %v5422_v4 = vsel %vm9110_vm5, %v5420_v20, %v5421_v54  ;;  %v3704_v34 = vld [vmem:[#allocation3 + $0x60] sm:$0xf] }
 0x2b7   : > { %8883 = vmatprep.mubr.msk.bf16.mxu0 %vm2623_vm12, %v5556_v48  ;;  %3148 = vrot.lane.b32.xlu1 %v8440_v55, %s9040_s10  ;;  %5519 = vst.msk [vmem:[#allocation4 + $0x118] sm:$0xff] %vm2623_vm12, %v8597_v31  ;;  %v5029_v63 = vshrl.u32 %v4728_v14, 16  ;;  %v5032_v53 = vshll.u32 %v4728_v14, 16  ;;  %v5038_v18 = vshll.u32 %v4729_v21, 16  ;;  %v8598_v51 = vcombine.low %v5419_v49, %v5422_v4  ;;  %v4726_v54 = vld [vmem:[#allocation3 + $0xa0] sm:$0xf] }
 0x2b8   : > { %v3006_v38 = vrot.slane %v3004_v45, 5  ;;  %v3012_v16 = vrot.slane %v3010_v60, 5  ;;  %v3016_v58 = vrot.slane %v3014_v7, 4  ;;  %v3022_v43 = vrot.slane %v3020_v9, 5  ;;  %v4727_v14 = vld [vmem:[#allocation3 + $0xa4] sm:$0x1] }
 0x2b9   : > { %v5031_v25 = vrot.slane %v5029_v63, 4  ;;  %v5034_v33 = vrot.slane %v5032_v53, 5  ;;  %v5040_v23 = vrot.slane %v5038_v18, 5  ;;  %5520 = vst.msk [vmem:[#allocation4 + $0x130] sm:$0xff] %vm2623_vm12, %v8598_v51  ;;  %v5042_v62 = vshrl.u32 %v4729_v21, 16  ;;  %v5539_v55 = vld [vmem:[#allocation4 + $0x78] sm:$0xff] }
 0x2ba   : > { %v3007_v42 = vor.u32 %v3006_v38, %v3003_v61  ;;  %v3017_v30 = vor.u32 %v3016_v58, %v3012_v16  ;;  %v5048_v44 = vshll.u32 %v4730_v29, 16  ;;  %v8456_v50 = vrot.slane %v3227_v40, 9  ;;  %v3135_v28 = vpop.permute.xlu1 %3134  ;;  %v3705_v12 = vld [vmem:[#allocation3 + $0x64] sm:$0xf]  ;;  %v3706_v7 = vld [vmem:[#allocation3 + $0x68] sm:$0x1] }
 0x2bb   : > { %v5035_v11 = vor.u32 %v5034_v33, %v5031_v25  ;;  %v3381_v0 = vrot.slane %v3228_v35, 5  ;;  %v3384_v41 = vrot.slane %v3229_v3, 5  ;;  %v5044_v17 = vrot.slane %v5042_v62, 4  ;;  %3176 = vst.msk [vmem:[#allocation4 + $0xa8] sm:$0xff] %vm3168_vm11, %v3135_v28  ;;  %v5540_v1 = vld [vmem:[#allocation4 + $0x80] sm:$0xff]  ;;  %v11008_v28 = vpop.permute.xlu0 %4469 }
 0x2bc   : > { %v3008_v8 = vrot.slane %v3007_v42, 4  ;;  %v3018_v15 = vrot.slane %v3017_v30, 4  ;;  %v5050_v36 = vrot.slane %v5048_v44, 5  ;;  %v5005_v56 = vshrl.u32 %v4725_v19, 16  ;;  %3497 = vst.msk [vmem:[#allocation4 + $0xa8] sm:$0xff] %vm3489_vm13, %v10902_v26  ;;  %5843 = vmatprep.mubr.bf16.mxu1 %v5540_v1 }
 0x2bd   : > { %v5036_v6 = vrot.slane %v5035_v11, 4  ;;  %v3382_v59 = vsel %vm9110_vm5, %v8456_v50, %v3381_v0  ;;  %v3383_v27 = vrot.slane %v3381_v0, 4  ;;  %v5045_v49 = vor.u32 %v5044_v17, %v5040_v23  ;;  %3674 = vst.msk [vmem:[#allocation4 + $0xa8] sm:$0xff] %vm3666_vm14, %v10786_v10  ;;  %5844 = vmatmul.mubr.bf16.gmra.mrb[16].mxu1 %v5539_v55  ;;  %v3701_v38 = vld [vmem:[#allocation3 + $0x54] sm:$0xf] }
 0x2be   : > { %v5559_v57 = vld [vmem:[#allocation4 + $0x118] sm:$0xff]  ;;  %v3013_v46 = vsel %vm9147_vm6, %v3008_v8, %v3012_v16  ;;  %v3023_v32 = vsel %vm9147_vm6, %v3018_v15, %v3022_v43  ;;  %v5008_v21 = vshll.u32 %v4725_v19, 16  ;;  %v5007_v29 = vrot.slane %v5005_v56, 4  ;;  %v3702_v25 = vld [vmem:[#allocation3 + $0x58] sm:$0xf]  ;;  %v11002_v33 = vpop.permute.xlu1 %3461 }
 0x2bf   : > { %8884 = vmatmul.mubr.msk.bf16.gmra.mrb[56].mxu0 %vm2623_vm12, %v5559_v57  ;;  %v8439_v31 = vcombine.low %v3013_v46, %v3023_v32  ;;  %v5041_v20 = vsel %vm9147_vm6, %v5036_v6, %v5040_v23  ;;  %v3385_v61 = vsel %vm9110_vm5, %v3383_v27, %v3384_v41  ;;  %v5046_v48 = vrot.slane %v5045_v49, 4  ;;  %v9007_v19 = vld [vmem:[#allocation3 + $0xb4] sm:$0xff]   ;;  %v3703_v17 = vld [vmem:[#allocation3 + $0x5c] sm:$0x1] }
 0x2c0   : > { %v8472_v45 = vcombine.low %v3382_v59, %v3385_v61  ;;  %v5010_v26 = vrot.slane %v5008_v21, 5  ;;  %v5014_v60 = vshll.u32 %v4726_v54, 16  ;;  %v5562_v9 = vld [vmem:[#allocation4 + $0x130] sm:$0xff]  ;;  %v5018_v40 = vshrl.u32 %v4726_v54, 16  ;;  %v3231_v56 = vld [vmem:[#allocation3 + $0xb8] sm:$0xf] }
 0x2c1   : > { %3146 = vrot.lane.b32.xlu1 %v8439_v31, %s9040_s10  ;;  %v5024_v4 = vshll.u32 %v4727_v14, 16  ;;  %v3900_v63 = vshrl.u32 %v3704_v34, 16  ;;  %v3903_v53 = vshll.u32 %v3704_v34, 16  ;;  %8887 = vmatprep.mubr.msk.bf16.mxu0 %vm2623_vm12, %v5562_v9  ;;  %v5051_v18 = vsel %vm9147_vm6, %v5046_v48, %v5050_v36  ;;  %v3230_v34 = vld [vmem:[#allocation3 + $0xb4] sm:$0xe] }
 0x2c2   : > { %v5011_v35 = vor.u32 %v5010_v26, %v5007_v29  ;;  %v5016_v10 = vrot.slane %v5014_v60, 5  ;;  %v3909_v51 = vshll.u32 %v3705_v12, 16  ;;  %v8566_v16 = vcombine.low %v5041_v20, %v5051_v18  ;;  %v3232_v49 = vld [vmem:[#allocation3 + $0xbc] sm:$0x1]  ;;  %v4237_v20 = vld [vmem:[#allocation3 + $0xb4] sm:$0xe]  ;;  %v11013_v29 = vpop.permute.xlu1 %3459 }
 0x2c3   : > { %v5020_v58 = vrot.slane %v5018_v40, 4  ;;  %v5026_v3 = vrot.slane %v5024_v4, 5  ;;  %v3902_v43 = vrot.slane %v3900_v63, 4  ;;  %v3905_v42 = vrot.slane %v3903_v53, 5  ;;  %v4238_v61 = vld [vmem:[#allocation3 + $0xb8] sm:$0xf] }
 0x2c4   : > { %v5012_v23 = vrot.slane %v5011_v35, 4  ;;  %v3911_v30 = vrot.slane %v3909_v51, 5  ;;  %v3913_v62 = vshrl.u32 %v3705_v12, 16  ;;  %5196 = vrot.lane.b32.xlu0 %v8566_v16, %s9043_s16  ;;  %v3919_v11 = vshll.u32 %v3706_v7, 16  ;;  %v4239_v60 = vld [vmem:[#allocation3 + $0xbc] sm:$0x1] }
 0x2c5   : > { %3469 = vrot.lane.b32.xlu1 %v8472_v45, %s9042_s13  ;;  %v5021_v44 = vor.u32 %v5020_v58, %v5016_v10  ;;  %v3876_v50 = vshrl.u32 %v3701_v38, 16  ;;  %v3879_v0 = vshll.u32 %v3701_v38, 16  ;;  %v3906_v8 = vor.u32 %v3905_v42, %v3902_v43  ;;  %v2685_v7 = vld [vmem:[#allocation3 + $0xb4] sm:$0xf]  ;;  %v2686_v16 = vld [vmem:[#allocation3 + $0xb8] sm:$0xf]  ;;  %v11020_v58 = vpop.permute.xlu0 %4467 }
 0x2c6   : > { %v5017_v41 = vsel %vm9147_vm6, %v5012_v23, %v5016_v10  ;;  %v3915_v15 = vrot.slane %v3913_v62, 4  ;;  %v3885_v36 = vshll.u32 %v3702_v25, 16  ;;  %v3921_v59 = vrot.slane %v3919_v11, 5  ;;  %v9019_v53 = vld [vmem:[#allocation3 + $0xb4] sm:$0xff]   ;;  %v11026_v42 = vpop.permute.xlu1 %3640  ;;  %v2687_v11 = vld [vmem:[#allocation3 + $0xbc] sm:$0x1] }
 0x2c7   : > { %v5022_v6 = vrot.slane %v5021_v44, 4  ;;  %v3878_v27 = vrot.slane %v3876_v50, 4  ;;  %v3881_v54 = vrot.slane %v3879_v0, 5  ;;  %v3907_v1 = vrot.slane %v3906_v8, 4  ;;  %v9006_v18 = vld [vmem:[#allocation3 + $0xb4] sm:$0xff]   ;;  %2639 = vst.msk [vmem:[#allocation4 + $0x168] sm:$0xff] %vm2623_vm12, %v9019_v53 }
 0x2c8   : > { %v3916_v57 = vor.u32 %v3915_v15, %v3911_v30  ;;  %v3887_v46 = vrot.slane %v3885_v36, 5  ;;  %v3889_v32 = vshrl.u32 %v3702_v25, 16  ;;  %v3895_v55 = vshll.u32 %v3703_v17, 16  ;;  %v4731_v15 = vld [vmem:[#allocation3 + $0xb4] sm:$0xf] }
 0x2c9   : > { %v5027_v14 = vsel %vm9147_vm6, %v5022_v6, %v5026_v3  ;;  %3646 = vrot.lane.b32.xlu1 %v9007_v19, %s9043_s16  ;;  %v3882_v21 = vor.u32 %v3881_v54, %v3878_v27  ;;  %v8457_v31 = vrot.slane %v3230_v34, 9  ;;  %v3912_v48 = vsel %vm9147_vm6, %v3907_v1, %v3911_v30  ;;  %v11043_v27 = vpop.permute.xlu0 %4648  ;;  %v9008_v54 = vld [vmem:[#allocation3 + $0xc0] sm:$0xff]  }
 0x2ca   : > { %v8565_v12 = vcombine.low %v5017_v41, %v5027_v14  ;;  %v3917_v45 = vrot.slane %v3916_v57, 4  ;;  %v3891_v26 = vrot.slane %v3889_v32, 4  ;;  %v3897_v40 = vrot.slane %v3895_v55, 5  ;;  %v4733_v32 = vld [vmem:[#allocation3 + $0xbc] sm:$0x1] }
 0x2cb   : > { %v3883_v9 = vrot.slane %v3882_v21, 4  ;;  %v3388_v4 = vrot.slane %v3231_v56, 5  ;;  %v3391_v63 = vrot.slane %v3232_v49, 5  ;;  %v8520_v51 = vrot.slane %v4237_v20, 9  ;;  %v5275_v55 = vld [vmem:[#allocation3 + $0xb4] sm:$0xe] }
 0x2cc   : > { %5194 = vrot.lane.b32.xlu0 %v8565_v12, %s9043_s16  ;;  %v3922_v35 = vsel %vm9147_vm6, %v3917_v45, %v3921_v59  ;;  %v3892_v10 = vor.u32 %v3891_v26, %v3887_v46  ;;  %v4391_v38 = vrot.slane %v4238_v61, 5  ;;  %v4394_v19 = vrot.slane %v4239_v60, 5  ;;  %v4732_v59 = vld [vmem:[#allocation3 + $0xb8] sm:$0xf] }
 0x2cd   : > { %v8497_v3 = vcombine.low %v3912_v48, %v3922_v35  ;;  %v3888_v43 = vsel %vm9147_vm6, %v3883_v9, %v3887_v46  ;;  %v3389_v25 = vsel %vm9110_vm5, %v8457_v31, %v3388_v4  ;;  %v3390_v23 = vrot.slane %v3388_v4, 4  ;;  %v5276_v48 = vld [vmem:[#allocation3 + $0xb8] sm:$0xf]  ;;  %v5277_v9 = vld [vmem:[#allocation3 + $0xbc] sm:$0x1] }
 0x2ce   : > { %v3893_v30 = vrot.slane %v3892_v10, 4  ;;  %v11031_v62 = vsel %vm9110_vm5, %v8520_v51, %v4391_v38  ;;  %v4393_v44 = vrot.slane %v4391_v38, 4  ;;  %v3049_v0 = vshrl.u32 %v2685_v7, 16  ;;  %v5279_v38 = vld [vmem:[#allocation3 + $0xc4] sm:$0xf] }
 0x2cf   : > { %4186 = vst.msk [vmem:[#allocation4 + $0xb0] sm:$0xff] %vm2623_vm12, %v8497_v3  ;;  %v3392_v50 = vsel %vm9110_vm5, %v3390_v23, %v3391_v63  ;;  %v3052_v41 = vshll.u32 %v2685_v7, 16  ;;  %v3058_v8 = vshll.u32 %v2686_v16, 16  ;;  %v3062_v6 = vshrl.u32 %v2686_v16, 16  ;;  %v11060_v16 = vpop.permute.xlu0 %5188  ;;  %v5280_v23 = vld [vmem:[#allocation3 + $0xc8] sm:$0x1] }
 0x2d0   : > { %4654 = vrot.lane.b32.xlu0 %v9006_v18, %s9042_s13  ;;  %4506 = vst.msk [vmem:[#allocation4 + $0xb0] sm:$0xff] %vm3168_vm11, %v10879_v2  ;;  %v3898_v17 = vsel %vm9147_vm6, %v3893_v30, %v3897_v40  ;;  %v8473_v36 = vcombine.low %v3389_v25, %v3392_v50  ;;  %v4395_v34 = vsel %vm9110_vm5, %v4393_v44, %v4394_v19  ;;  %v3051_v57 = vrot.slane %v3049_v0, 4  ;;  %v5278_v18 = vld [vmem:[#allocation3 + $0xc0] sm:$0xe] }
 0x2d1   : > { %v8496_v56 = vcombine.low %v3888_v43, %v3898_v17  ;;  %v8536_v1 = vcombine.low %v11031_v62, %v4395_v34  ;;  %v3054_v46 = vrot.slane %v3052_v41, 5  ;;  %4683 = vst.msk [vmem:[#allocation4 + $0xb0] sm:$0xff] %vm3489_vm13, %v10956_v22  ;;  %v3060_v2 = vrot.slane %v3058_v8, 5  ;;  %v3141_v45 = vpop.permute.xlu1 %3140  ;;  %v4734_v30 = vld [vmem:[#allocation3 + $0xc0] sm:$0xf] }
 0x2d2   : > { %3471 = vrot.lane.b32.xlu1 %v8473_v36, %s9042_s13  ;;  %v3064_v49 = vrot.slane %v3062_v6, 4  ;;  %v3068_v14 = vshll.u32 %v2687_v11, 16  ;;  %v5053_v21 = vshrl.u32 %v4731_v15, 16  ;;  %v5056_v20 = vshll.u32 %v4731_v15, 16  ;;  %3179 = vst.msk [vmem:[#allocation4 + $0xf0] sm:$0xff] %vm3168_vm11, %v3141_v45 }
 0x2d3   : > { %4185 = vst.msk [vmem:[#allocation4 + $0x98] sm:$0xff] %vm2623_vm12, %v8496_v56  ;;  %v3055_v31 = vor.u32 %v3054_v46, %v3051_v57  ;;  %v5062_v61 = vshll.u32 %v4732_v59, 16  ;;  %v5066_v12 = vshrl.u32 %v4732_v59, 16  ;;  %v5072_v7 = vshll.u32 %v4733_v32, 16  ;;  %v4240_v11 = vld [vmem:[#allocation3 + $0xc0] sm:$0xe] }
 0x2d4   : > { %4656 = vrot.lane.b32.xlu0 %v9008_v54, %s9042_s13  ;;  %4505 = vst.msk [vmem:[#allocation4 + $0x98] sm:$0xff] %vm3168_vm11, %v10900_v47  ;;  %v3065_v22 = vor.u32 %v3064_v49, %v3060_v2  ;;  %v3070_v26 = vrot.slane %v3068_v14, 5  ;;  %v5055_v60 = vrot.slane %v5053_v21, 4  ;;  %v5058_v4 = vrot.slane %v5056_v20, 5  ;;  %v4735_v15 = vld [vmem:[#allocation3 + $0xc4] sm:$0xf] }
 0x2d5   : > { %4682 = vst.msk [vmem:[#allocation4 + $0x98] sm:$0xff] %vm3489_vm13, %v10778_v24  ;;  %v3056_v40 = vrot.slane %v3055_v31, 4  ;;  %v5064_v63 = vrot.slane %v5062_v61, 5  ;;  %v5068_v53 = vrot.slane %v5066_v12, 4  ;;  %3500 = vst.msk [vmem:[#allocation4 + $0xf0] sm:$0xff] %vm3489_vm13, %v11002_v33  ;;  %v5074_v47 = vrot.slane %v5072_v7, 5  ;;  %v3639_v62 = vpop.permute.xlu1 %3638  ;;  %v11079_v31 = vpop.permute.xlu0 %4646 }
 0x2d6   : > { %v3066_v35 = vrot.slane %v3065_v22, 4  ;;  %v8583_v10 = vrot.slane %v5275_v55, 9  ;;  %v5425_v51 = vrot.slane %v5276_v48, 5  ;;  %5226 = vst.msk [vmem:[#allocation4 + $0x98] sm:$0xff] %vm3666_vm14, %v10938_v5  ;;  %v5059_v3 = vor.u32 %v5058_v4, %v5055_v60  ;;  %3677 = vst.msk [vmem:[#allocation4 + $0xf0] sm:$0xff] %vm3666_vm14, %v3639_v62  ;;  %v9009_v20 = vld [vmem:[#allocation3 + $0xc0] sm:$0xff]  }
 0x2d7   : > { %v3061_v24 = vsel %vm9147_vm6, %v3056_v40, %v3060_v2  ;;  %v5069_v43 = vor.u32 %v5068_v53, %v5064_v63  ;;  %v5428_v25 = vrot.slane %v5277_v9, 5  ;;  %v8584_v19 = vrot.slane %v5278_v18, 9  ;;  %v4736_v34 = vld [vmem:[#allocation3 + $0xc8] sm:$0x1]  ;;  %v4241_v46 = vld [vmem:[#allocation3 + $0xc4] sm:$0xf] }
 0x2d8   : > { %4479 = vrot.lane.b32.xlu0 %v8536_v1, %s9040_s10  ;;  %v3071_v33 = vsel %vm9147_vm6, %v3066_v35, %v3070_v26  ;;  %v5426_v44 = vsel %vm9110_vm5, %v8583_v10, %v5425_v51  ;;  %v5427_v5 = vrot.slane %v5425_v51, 4  ;;  %v5060_v0 = vrot.slane %v5059_v3, 4  ;;  %v4242_v32 = vld [vmem:[#allocation3 + $0xc8] sm:$0x1]  ;;  %v4737_v55 = vld [vmem:[#allocation3 + $0xcc] sm:$0xf] }
 0x2d9   : > { %v8441_v50 = vcombine.low %v3061_v24, %v3071_v33  ;;  %v5070_v41 = vrot.slane %v5069_v43, 4  ;;  %v5432_v8 = vrot.slane %v5279_v38, 5  ;;  %v5435_v36 = vrot.slane %v5280_v23, 5  ;;  %v4738_v40 = vld [vmem:[#allocation3 + $0xd0] sm:$0xf]  ;;  %v5542_v4 = vld [vmem:[#allocation4 + $0x90] sm:$0xff] }
 0x2da   : > { %v5429_v17 = vsel %vm9110_vm5, %v5427_v5, %v5428_v25  ;;  %v5077_v6 = vshrl.u32 %v4734_v30, 16  ;;  %v5080_v59 = vshll.u32 %v4734_v30, 16  ;;  %v5065_v54 = vsel %vm9147_vm6, %v5060_v0, %v5064_v63  ;;  %v3710_v30 = vld [vmem:[#allocation3 + $0x78] sm:$0xf] }
 0x2db   : > { %3150 = vrot.lane.b32.xlu1 %v8441_v50, %s9040_s10  ;;  %v5075_v56 = vsel %vm9147_vm6, %v5070_v41, %v5074_v47  ;;  %v8599_v1 = vcombine.low %v5426_v44, %v5429_v17  ;;  %v5433_v57 = vsel %vm9110_vm5, %v8584_v19, %v5432_v8  ;;  %v5434_v49 = vrot.slane %v5432_v8, 4  ;;  %v4739_v47 = vld [vmem:[#allocation3 + $0xd4] sm:$0x1]  ;;  %v3711_v19 = vld [vmem:[#allocation3 + $0x7c] sm:$0xf] }
 0x2dc   : > { %v8567_v2 = vcombine.low %v5065_v54, %v5075_v56  ;;  %v5079_v14 = vrot.slane %v5077_v6, 4  ;;  %v5082_v21 = vrot.slane %v5080_v59, 5  ;;  %v5086_v61 = vshll.u32 %v4735_v15, 16 }
 0x2dd   : > { %5521 = vst.msk [vmem:[#allocation4 + $0x148] sm:$0xff] %vm2623_vm12, %v8599_v1  ;;  %v5090_v12 = vshrl.u32 %v4735_v15, 16  ;;  %v5096_v48 = vshll.u32 %v4736_v34, 16  ;;  %v8521_v45 = vrot.slane %v4240_v11, 9  ;;  %v5543_v22 = vld [vmem:[#allocation4 + $0x98] sm:$0xff]  ;;  %v5436_v26 = vsel %vm9110_vm5, %v5434_v49, %v5435_v36 }
 0x2de   : > { %5198 = vrot.lane.b32.xlu0 %v8567_v2, %s9043_s16  ;;  %v5083_v60 = vor.u32 %v5082_v21, %v5079_v14  ;;  %v4398_v7 = vrot.slane %v4241_v46, 5  ;;  %v4401_v9 = vrot.slane %v4242_v32, 5  ;;  %5851 = vmatprep.mubr.bf16.mxu1 %v5543_v22  ;;  %v8600_v63 = vcombine.low %v5433_v57, %v5436_v26  ;;  %v3712_v15 = vld [vmem:[#allocation3 + $0x80] sm:$0x1]  ;;  %v3707_v46 = vld [vmem:[#allocation3 + $0x6c] sm:$0xf] }
 0x2df   : > { %3648 = vrot.lane.b32.xlu1 %v9009_v20, %s9043_s16  ;;  %v5088_v53 = vrot.slane %v5086_v61, 5  ;;  %v5092_v18 = vrot.slane %v5090_v12, 4  ;;  %v5098_v35 = vrot.slane %v5096_v48, 5  ;;  %5852 = vmatmul.mubr.bf16.gmra.mrb[20].mxu1 %v5542_v4  ;;  %v5101_v24 = vshrl.u32 %v4737_v55, 16  ;;  %v3708_v21 = vld [vmem:[#allocation3 + $0x70] sm:$0xf] }
 0x2e0   : > { %v5084_v10 = vrot.slane %v5083_v60, 4  ;;  %v11088_v51 = vsel %vm9110_vm5, %v8521_v45, %v4398_v7  ;;  %v4400_v38 = vrot.slane %v4398_v7, 4  ;;  %5522 = vst.msk [vmem:[#allocation4 + $0x160] sm:$0xff] %vm2623_vm12, %v8600_v63  ;;  %v5104_v43 = vshll.u32 %v4737_v55, 16  ;;  %v5187_v11 = vpop.permute.xlu0 %5186  ;;  %v3709_v63 = vld [vmem:[#allocation3 + $0x74] sm:$0x1] }
 0x2e1   : > { %v5093_v3 = vor.u32 %v5092_v18, %v5088_v53  ;;  %v5110_v25 = vshll.u32 %v4738_v40, 16  ;;  %v5114_v23 = vshrl.u32 %v4738_v40, 16  ;;  %v5103_v44 = vrot.slane %v5101_v24, 4  ;;  %5227 = vst.msk [vmem:[#allocation4 + $0xb0] sm:$0xff] %vm3666_vm14, %v5187_v11  ;;  %v3716_v18 = vld [vmem:[#allocation3 + $0x90] sm:$0xf] }
 0x2e2   : > { %v5089_v62 = vsel %vm9147_vm6, %v5084_v10, %v5088_v53  ;;  %v4402_v33 = vsel %vm9110_vm5, %v4400_v38, %v4401_v9  ;;  %v5120_v5 = vshll.u32 %v4739_v47, 16  ;;  %v5106_v41 = vrot.slane %v5104_v43, 5  ;;  %v3717_v38 = vld [vmem:[#allocation3 + $0x94] sm:$0xf] }
 0x2e3   : > { %v5094_v50 = vrot.slane %v5093_v3, 4  ;;  %v8537_v0 = vcombine.low %v11088_v51, %v4402_v33  ;;  %v5112_v8 = vrot.slane %v5110_v25, 5  ;;  %v5116_v36 = vrot.slane %v5114_v23, 4 }
 0x2e4   : > { %v5565_v17 = vld [vmem:[#allocation4 + $0x148] sm:$0xff]  ;;  %v5122_v34 = vrot.slane %v5120_v5, 5  ;;  %v3948_v6 = vshrl.u32 %v3710_v30, 16  ;;  %v3951_v59 = vshll.u32 %v3710_v30, 16  ;;  %v5107_v56 = vor.u32 %v5106_v41, %v5103_v44  ;;  %v3718_v5 = vld [vmem:[#allocation3 + $0x98] sm:$0x1] }
 0x2e5   : > { %8888 = vmatmul.mubr.msk.bf16.gmra.mrb[60].mxu0 %vm2623_vm12, %v5565_v17  ;;  %v5099_v54 = vsel %vm9147_vm6, %v5094_v50, %v5098_v35  ;;  %v3957_v1 = vshll.u32 %v3711_v19, 16  ;;  %v3961_v57 = vshrl.u32 %v3711_v19, 16  ;;  %v5117_v2 = vor.u32 %v5116_v36, %v5112_v8  ;;  %v5545_v30 = vld [vmem:[#allocation4 + $0xa8] sm:$0xff] }
 0x2e6   : > { %v8568_v32 = vcombine.low %v5089_v62, %v5099_v54  ;;  %v3950_v49 = vrot.slane %v3948_v6, 4  ;;  %v3953_v14 = vrot.slane %v3951_v59, 5  ;;  %v5108_v55 = vrot.slane %v5107_v56, 4  ;;  %v3139_v48 = vpop.permute.xlu1 %3138  ;;  %v3714_v6 = vld [vmem:[#allocation3 + $0x88] sm:$0xf] }
 0x2e7   : > { %v3959_v20 = vrot.slane %v3957_v1, 5  ;;  %v3963_v61 = vrot.slane %v3961_v57, 4  ;;  %v3967_v12 = vshll.u32 %v3712_v15, 16  ;;  %v5568_v45 = vld [vmem:[#allocation4 + $0x160] sm:$0xff]  ;;  %v5118_v22 = vrot.slane %v5117_v2, 4  ;;  %3178 = vst.msk [vmem:[#allocation4 + $0xd8] sm:$0xff] %vm3168_vm11, %v3139_v48 }
 0x2e8   : > { %5200 = vrot.lane.b32.xlu0 %v8568_v32, %s9043_s16  ;;  %v3954_v26 = vor.u32 %v3953_v14, %v3950_v49  ;;  %v3924_v60 = vshrl.u32 %v3707_v46, 16  ;;  %v3927_v7 = vshll.u32 %v3707_v46, 16  ;;  %8891 = vmatprep.mubr.msk.bf16.mxu0 %vm2623_vm12, %v5568_v45  ;;  %v5113_v9 = vsel %vm9147_vm6, %v5108_v55, %v5112_v8  ;;  %3499 = vst.msk [vmem:[#allocation4 + $0xd8] sm:$0xff] %vm3489_vm13, %v11013_v29  ;;  %v5546_v24 = vld [vmem:[#allocation4 + $0xb0] sm:$0xff]  ;;  %v3713_v15 = vld [vmem:[#allocation3 + $0x84] sm:$0xf] }
 0x2e9   : > { %v3964_v40 = vor.u32 %v3963_v61, %v3959_v20  ;;  %v3969_v4 = vrot.slane %v3967_v12, 5  ;;  %v3933_v53 = vshll.u32 %v3708_v21, 16  ;;  %v5123_v35 = vsel %vm9147_vm6, %v5118_v22, %v5122_v34  ;;  %3676 = vst.msk [vmem:[#allocation4 + $0xd8] sm:$0xff] %vm3666_vm14, %v10918_v39  ;;  %5859 = vmatprep.mubr.bf16.mxu1 %v5546_v24  ;;  %v9011_v29 = vld [vmem:[#allocation3 + $0xcc] sm:$0xff]   ;;  %v3722_v22 = vld [vmem:[#allocation3 + $0xa8] sm:$0xf] }
 0x2ea   : > { %v3955_v47 = vrot.slane %v3954_v26, 4  ;;  %v3926_v10 = vrot.slane %v3924_v60, 4  ;;  %v3929_v51 = vrot.slane %v3927_v7, 5  ;;  %v8569_v3 = vcombine.low %v5113_v9, %v5123_v35  ;;  %5860 = vmatmul.mubr.bf16.gmra.mrb[24].mxu1 %v5545_v30  ;;  %v11116_v8 = vpop.permute.xlu1 %3465  ;;  %v3715_v55 = vld [vmem:[#allocation3 + $0x8c] sm:$0x1] }
 0x2eb   : > { %v3965_v43 = vrot.slane %v3964_v40, 4  ;;  %v3935_v25 = vrot.slane %v3933_v53, 5  ;;  %v3937_v23 = vshrl.u32 %v3708_v21, 16  ;;  %v3943_v44 = vshll.u32 %v3709_v63, 16  ;;  %v3723_v40 = vld [vmem:[#allocation3 + $0xac] sm:$0xf]  ;;  %v4474_v63 = vpop.permute.xlu0 %4473 }
 0x2ec   : > { %4481 = vrot.lane.b32.xlu0 %v8537_v0, %s9040_s10  ;;  %v3960_v62 = vsel %vm9147_vm6, %v3955_v47, %v3959_v20  ;;  %v3930_v33 = vor.u32 %v3929_v51, %v3926_v10  ;;  %v3996_v19 = vshrl.u32 %v3716_v18, 16  ;;  %v3999_v50 = vshll.u32 %v3716_v18, 16  ;;  %v3724_v10 = vld [vmem:[#allocation3 + $0xb0] sm:$0x1]  ;;  %v3719_v30 = vld [vmem:[#allocation3 + $0x9c] sm:$0xf] }
 0x2ed   : > { %v3970_v39 = vsel %vm9147_vm6, %v3965_v43, %v3969_v4  ;;  %v3939_v11 = vrot.slane %v3937_v23, 4  ;;  %v4005_v41 = vshll.u32 %v3717_v38, 16  ;;  %v3945_v36 = vrot.slane %v3943_v44, 5  ;;  %v3720_v44 = vld [vmem:[#allocation3 + $0xa0] sm:$0xf] }
 0x2ee   : > { %v8499_v17 = vcombine.low %v3960_v62, %v3970_v39  ;;  %v3931_v0 = vrot.slane %v3930_v33, 4  ;;  %v3998_v34 = vrot.slane %v3996_v19, 4  ;;  %v4001_v54 = vrot.slane %v3999_v50, 5 }
 0x2ef   : > { %v3940_v59 = vor.u32 %v3939_v11, %v3935_v25  ;;  %v4007_v56 = vrot.slane %v4005_v41, 5  ;;  %v4009_v1 = vshrl.u32 %v3717_v38, 16  ;;  %v4015_v46 = vshll.u32 %v3718_v5, 16 }
 0x2f0   : > { %4658 = vrot.lane.b32.xlu0 %v9011_v29, %s9042_s13  ;;  %4188 = vst.msk [vmem:[#allocation4 + $0xe0] sm:$0xff] %vm2623_vm12, %v8499_v17  ;;  %v3936_v57 = vsel %vm9147_vm6, %v3931_v0, %v3935_v25  ;;  %v3972_v32 = vshrl.u32 %v3713_v15, 16  ;;  %v3975_v2 = vshll.u32 %v3713_v15, 16  ;;  %v4002_v14 = vor.u32 %v4001_v54, %v3998_v34  ;;  %v3721_v17 = vld [vmem:[#allocation3 + $0xa4] sm:$0x1] }
 0x2f1   : > { %4508 = vst.msk [vmem:[#allocation4 + $0xe0] sm:$0xff] %vm3168_vm11, %v11008_v28  ;;  %v3941_v49 = vrot.slane %v3940_v59, 4  ;;  %v4011_v21 = vrot.slane %v4009_v1, 4  ;;  %v3981_v20 = vshll.u32 %v3714_v6, 16  ;;  %v4017_v61 = vrot.slane %v4015_v46, 5  ;;  %v11128_v28 = vpop.permute.xlu1 %3463 }
 0x2f2   : > { %4685 = vst.msk [vmem:[#allocation4 + $0xe0] sm:$0xff] %vm3489_vm13, %v11079_v31  ;;  %v3974_v12 = vrot.slane %v3972_v32, 4  ;;  %v3977_v48 = vrot.slane %v3975_v2, 5  ;;  %v3985_v45 = vshrl.u32 %v3714_v6, 16  ;;  %v4003_v60 = vrot.slane %v4002_v14, 4 }
 0x2f3   : > { %v3946_v26 = vsel %vm9147_vm6, %v3941_v49, %v3945_v36  ;;  %v4012_v7 = vor.u32 %v4011_v21, %v4007_v56  ;;  %v3983_v9 = vrot.slane %v3981_v20, 5  ;;  %v3991_v18 = vshll.u32 %v3715_v55, 16  ;;  %v4472_v36 = vpop.permute.xlu0 %4471  ;;  %v3725_v54 = vld [vmem:[#allocation3 + $0xb4] sm:$0xf]  ;;  %v3726_v46 = vld [vmem:[#allocation3 + $0xb8] sm:$0xf] }
 0x2f4   : > { %5202 = vrot.lane.b32.xlu0 %v8569_v3, %s9043_s16  ;;  %v8498_v4 = vcombine.low %v3936_v57, %v3946_v26  ;;  %v3978_v53 = vor.u32 %v3977_v48, %v3974_v12  ;;  %v3987_v31 = vrot.slane %v3985_v45, 4  ;;  %v4008_v35 = vsel %vm9147_vm6, %v4003_v60, %v4007_v56 }
 0x2f5   : > { %v4013_v47 = vrot.slane %v4012_v7, 4  ;;  %v4044_v51 = vshrl.u32 %v3722_v22, 16  ;;  %v4047_v38 = vshll.u32 %v3722_v22, 16  ;;  %v3993_v25 = vrot.slane %v3991_v18, 5  ;;  %v3727_v22 = vld [vmem:[#allocation3 + $0xbc] sm:$0x1] }
 0x2f6   : > { %4187 = vst.msk [vmem:[#allocation4 + $0xc8] sm:$0xff] %vm2623_vm12, %v8498_v4  ;;  %v3979_v24 = vrot.slane %v3978_v53, 4  ;;  %v3988_v43 = vor.u32 %v3987_v31, %v3983_v9  ;;  %v4053_v23 = vshll.u32 %v3723_v40, 16  ;;  %v4057_v33 = vshrl.u32 %v3723_v40, 16  ;;  %v3728_v7 = vld [vmem:[#allocation3 + $0xc0] sm:$0xf] }
 0x2f7   : > { %4507 = vst.msk [vmem:[#allocation4 + $0xc8] sm:$0xff] %vm3168_vm11, %v11020_v58  ;;  %v4018_v3 = vsel %vm9147_vm6, %v4013_v47, %v4017_v61  ;;  %v4046_v29 = vrot.slane %v4044_v51, 4  ;;  %v4049_v62 = vrot.slane %v4047_v38, 5  ;;  %v4063_v15 = vshll.u32 %v3724_v10, 16  ;;  %v5548_v31 = vld [vmem:[#allocation4 + $0xc0] sm:$0xff] }
 0x2f8   : > { %4684 = vst.msk [vmem:[#allocation4 + $0xc8] sm:$0xff] %vm3489_vm13, %v10916_v37  ;;  %v8501_v5 = vcombine.low %v4008_v35, %v4018_v3  ;;  %v3984_v19 = vsel %vm9147_vm6, %v3979_v24, %v3983_v9  ;;  %v3989_v39 = vrot.slane %v3988_v43, 4  ;;  %v4055_v11 = vrot.slane %v4053_v23, 5  ;;  %v3145_v58 = vpop.permute.xlu1 %3144  ;;  %v3729_v43 = vld [vmem:[#allocation3 + $0xc4] sm:$0xf] }
 0x2f9   : > { %5228 = vst.msk [vmem:[#allocation4 + $0xc8] sm:$0xff] %vm3666_vm14, %v11060_v16  ;;  %v4050_v50 = vor.u32 %v4049_v62, %v4046_v29  ;;  %v4059_v41 = vrot.slane %v4057_v33, 4  ;;  %v4020_v0 = vshrl.u32 %v3719_v30, 16  ;;  %v4023_v34 = vshll.u32 %v3719_v30, 16  ;;  %v5281_v29 = vld [vmem:[#allocation3 + $0xcc] sm:$0xe] }
 0x2fa   : > { %4190 = vst.msk [vmem:[#allocation4 + $0x110] sm:$0xff] %vm2623_vm12, %v8501_v5  ;;  %v3994_v37 = vsel %vm9147_vm6, %v3989_v39, %v3993_v25  ;;  %v4029_v6 = vshll.u32 %v3720_v44, 16  ;;  %v4033_v59 = vshrl.u32 %v3720_v44, 16  ;;  %v4065_v57 = vrot.slane %v4063_v15, 5  ;;  %v5282_v62 = vld [vmem:[#allocation3 + $0xd0] sm:$0xf] }
 0x2fb   : > { %3181 = vst.msk [vmem:[#allocation4 + $0x120] sm:$0xff] %vm3168_vm11, %v3145_v58  ;;  %4510 = vst.msk [vmem:[#allocation4 + $0x110] sm:$0xff] %vm3168_vm11, %v4474_v63  ;;  %v8500_v16 = vcombine.low %v3984_v19, %v3994_v37  ;;  %v4051_v56 = vrot.slane %v4050_v50, 4  ;;  %v4060_v1 = vor.u32 %v4059_v41, %v4055_v11  ;;  %v4022_v32 = vrot.slane %v4020_v0, 4  ;;  %v3730_v5 = vld [vmem:[#allocation3 + $0xc8] sm:$0x1] }
 0x2fc   : > { %3502 = vst.msk [vmem:[#allocation4 + $0x120] sm:$0xff] %vm3489_vm13, %v11116_v8  ;;  %v4025_v2 = vrot.slane %v4023_v34, 5  ;;  %v4031_v49 = vrot.slane %v4029_v6, 5  ;;  %v4035_v14 = vrot.slane %v4033_v59, 4  ;;  %v3643_v21 = vpop.permute.xlu1 %3642  ;;  %v4039_v61 = vshll.u32 %v3721_v17, 16  ;;  %v11155_v8 = vpop.permute.xlu0 %4652 }
 0x2fd   : > { %4189 = vst.msk [vmem:[#allocation4 + $0xf8] sm:$0xff] %vm2623_vm12, %v8500_v16  ;;  %v4056_v55 = vsel %vm9147_vm6, %v4051_v56, %v4055_v11  ;;  %v4061_v20 = vrot.slane %v4060_v1, 4  ;;  %v4068_v12 = vshrl.u32 %v3725_v54, 16  ;;  %v4071_v26 = vshll.u32 %v3725_v54, 16  ;;  %v5283_v0 = vld [vmem:[#allocation3 + $0xd4] sm:$0x1] }
 0x2fe   : > { %4509 = vst.msk [vmem:[#allocation4 + $0xf8] sm:$0xff] %vm3168_vm11, %v4472_v36  ;;  %v4026_v48 = vor.u32 %v4025_v2, %v4022_v32  ;;  %v4036_v45 = vor.u32 %v4035_v14, %v4031_v49  ;;  %v4077_v60 = vshll.u32 %v3726_v46, 16  ;;  %v4041_v40 = vrot.slane %v4039_v61, 5 }
 0x2ff   : > { %3679 = vst.msk [vmem:[#allocation4 + $0x120] sm:$0xff] %vm3666_vm14, %v3643_v21  ;;  %v4066_v9 = vsel %vm9147_vm6, %v4061_v20, %v4065_v57  ;;  %v4070_v4 = vrot.slane %v4068_v12, 4  ;;  %v4081_v63 = vshrl.u32 %v3726_v46, 16  ;;  %v4073_v10 = vrot.slane %v4071_v26, 5 }
 0x300   : > { %4686 = vst.msk [vmem:[#allocation4 + $0xf8] sm:$0xff] %vm3489_vm13, %v11043_v27  ;;  %v5549_v53 = vld [vmem:[#allocation4 + $0xc8] sm:$0xff]  ;;  %v8503_v18 = vcombine.low %v4056_v55, %v4066_v9  ;;  %v4027_v35 = vrot.slane %v4026_v48, 4  ;;  %v4037_v47 = vrot.slane %v4036_v45, 4  ;;  %v4079_v51 = vrot.slane %v4077_v60, 5 }
 0x301   : > { %5867 = vmatprep.mubr.bf16.mxu1 %v5549_v53  ;;  %v4083_v38 = vrot.slane %v4081_v63, 4  ;;  %v4087_v24 = vshll.u32 %v3727_v22, 16  ;;  %v4092_v25 = vshrl.u32 %v3728_v7, 16  ;;  %v4074_v30 = vor.u32 %v4073_v10, %v4070_v4  ;;  %v5554_v10 = vld [vmem:[#allocation4 + $0xf0] sm:$0xff] }
 0x302   : > { %5868 = vmatmul.mubr.bf16.gmra.mrb[28].mxu1 %v5548_v31  ;;  %4192 = vst.msk [vmem:[#allocation4 + $0x140] sm:$0xff] %vm2623_vm12, %v8503_v18  ;;  %v4032_v27 = vsel %vm9147_vm6, %v4027_v35, %v4031_v49  ;;  %v4042_v23 = vsel %vm9147_vm6, %v4037_v47, %v4041_v40  ;;  %v4095_v3 = vshll.u32 %v3728_v7, 16  ;;  %v4101_v50 = vshll.u32 %v3729_v43, 16  ;;  %v5551_v31 = vld [vmem:[#allocation4 + $0xd8] sm:$0xff] }
 0x303   : > { %v8502_v33 = vcombine.low %v4032_v27, %v4042_v23  ;;  %v4084_v44 = vor.u32 %v4083_v38, %v4079_v51  ;;  %v4094_v19 = vrot.slane %v4092_v25, 4  ;;  %v5193_v39 = vpop.permute.xlu0 %5192  ;;  %v4075_v11 = vrot.slane %v4074_v30, 4 }
 0x304   : > { %v4097_v58 = vrot.slane %v4095_v3, 5  ;;  %v4105_v41 = vshrl.u32 %v3729_v43, 16  ;;  %5230 = vst.msk [vmem:[#allocation4 + $0xf8] sm:$0xff] %vm3666_vm14, %v5193_v39  ;;  %v4089_v17 = vrot.slane %v4087_v24, 5  ;;  %v8585_v37 = vrot.slane %v5281_v29, 9 }
 0x305   : > { %4191 = vst.msk [vmem:[#allocation4 + $0x128] sm:$0xff] %vm2623_vm12, %v8502_v33  ;;  %v4085_v15 = vrot.slane %v4084_v44, 4  ;;  %v5439_v36 = vrot.slane %v5282_v62, 5  ;;  %v4103_v6 = vrot.slane %v4101_v50, 5  ;;  %v4111_v54 = vshll.u32 %v3730_v5, 16 }
 0x306   : > { %v4098_v34 = vor.u32 %v4097_v58, %v4094_v19  ;;  %v4107_v59 = vrot.slane %v4105_v41, 4  ;;  %v4080_v16 = vsel %vm9147_vm6, %v4075_v11, %v4079_v51  ;;  %v5442_v14 = vrot.slane %v5283_v0, 5  ;;  %v11208_v5 = vld [vmem:[%s12254_s4] ss:$0 sm:$0xff] }
 0x307   : > { %v4090_v56 = vsel %vm9147_vm6, %v4085_v15, %v4089_v17  ;;  %v5440_v1 = vsel %vm9110_vm5, %v8585_v37, %v5439_v36  ;;  %v5441_v57 = vrot.slane %v5439_v36, 4  ;;  %v4651_v46 = vpop.permute.xlu0 %4650  ;;  %v4113_v55 = vrot.slane %v4111_v54, 5 }
 0x308   : > { %v8504_v32 = vcombine.low %v4080_v16, %v4090_v56  ;;  %v4099_v2 = vrot.slane %v4098_v34, 4  ;;  %v4108_v49 = vor.u32 %v4107_v59, %v4103_v6  ;;  %4687 = vst.msk [vmem:[#allocation4 + $0x110] sm:$0xff] %vm3489_vm13, %v4651_v46  ;;  %v9044_v23 = vmov 1983009808  }
 0x309   : > { %v5443_v20 = vsel %vm9110_vm5, %v5441_v57, %v5442_v14  ;;  %v6159_v30 = vunpack.c.l.s4 %v9044_v23  ;;  %v6161_v3 = vlaneseq  ;;  %vm6829_vm5 = vcmask 254976  }
 0x30a   : > { %4193 = vst.msk [vmem:[#allocation4 + $0x158] sm:$0xff] %vm2623_vm12, %v8504_v32  ;;  %v4109_v21 = vrot.slane %v4108_v49, 4  ;;  %v8601_v61 = vcombine.low %v5440_v1, %v5443_v20  ;;  %v4104_v48 = vsel %vm9147_vm6, %v4099_v2, %v4103_v6  ;;  %vm7988_vm1 = vcmask 1044484  }
 0x30b   : > { %v3143_v12 = vpop.permute.xlu1 %3142  ;;  %v5555_v35 = vld [vmem:[#allocation4 + $0xf8] sm:$0xff]  ;;  %v6160_v11 = vunpack.c.0.s8 %v6159_v30  ;;  %v11211_v58 = vshrl.u32 %v6161_v3, 7  ;;  %vm8216_vm8 = vcmask 785408  }
 0x30c   : > { %v4114_v45 = vsel %vm9147_vm6, %v4109_v21, %v4113_v55  ;;  %3180 = vst.msk [vmem:[#allocation4 + $0x108] sm:$0xff] %vm3168_vm11, %v3143_v12  ;;  %vm7982_vm6 = vcmask 1041409  }
 0x30d   : > { %v8505_v22 = vcombine.low %v4104_v48, %v4114_v45  ;;  %5523 = vst.msk [vmem:[#allocation4 + $0x178] sm:$0xff] %vm2623_vm12, %v8601_v61  ;;  %12292 = vst [vmem:[#allocation5_spill] sm:$0xff] %v11211_v58  ;;  %v11216_v1 = vsub.s32 %v6160_v11, %v11211_v58 }
 0x30e   : > { %3501 = vst.msk [vmem:[#allocation4 + $0x108] sm:$0xff] %vm3489_vm13, %v11128_v28 }
 0x30f   : > { %3678 = vst.msk [vmem:[#allocation4 + $0x108] sm:$0xff] %vm3666_vm14, %v11026_v42 }
 0x310   : > { %4194 = vst.msk [vmem:[#allocation4 + $0x170] sm:$0xff] %vm2623_vm12, %v8505_v22 }
 0x314   : > { %v5571_v13 = vld [vmem:[#allocation4 + $0x178] sm:$0xff] }
 0x315   : > { %8892 = vmatmul.mubr.msk.bf16.gmra.mrb[64].mxu0 %vm2623_vm12, %v5571_v13  ;;  %v3468_v52 = vpop.permute.xlu1 %3467 }
 0x316   : > { %v5557_v0 = vld [vmem:[#allocation4 + $0x108] sm:$0xff] }
 0x319   : > { %v8707_v26 = vpop.f32.mrb[32].mxu0  ;;  %v3645_v28 = vpop.permute.xlu1 %3644 }
 0x31a   : > { %v8708_v60 = vpop.f32.mrb[33].mxu0 }
 0x31b   : > { %v8709_v7 = vadd.f32 %v8708_v60, %v8707_v26  ;;  %v8710_v9 = vpop.f32.mrb[34].mxu0 }
 0x31c   : > { %v8711_v4 = vpop.f32.mrb[35].mxu0 }
 0x31d   : > { %v5191_v40 = vpop.permute.xlu0 %5190  ;;  %v8712_v63 = vadd.f32 %v8711_v4, %v8710_v9  ;;  %v5806_v36 = vadd.f32 %v8709_v7, %v11208_v5 }
 0x31e   : > { %5229 = vst.msk [vmem:[#allocation4 + $0xe0] sm:$0xff] %vm3666_vm14, %v5191_v40 }
 0x31f   : > { %v5809_v46 = vadd.f32 %v8712_v63, %v11208_v5  ;;  %v5560_v63 = vld [vmem:[#allocation4 + $0x120] sm:$0xff] }
 0x321   : > { %v4478_v53 = vpop.permute.xlu0 %4477 }
 0x322   : > { %4512 = vst.msk [vmem:[#allocation4 + $0x140] sm:$0xff] %vm3168_vm11, %v4478_v53 }
 0x325   : > { %v5552_v42 = vld [vmem:[#allocation4 + $0xe0] sm:$0xff] }
 0x326   : > { %5875 = vmatprep.mubr.bf16.mxu1 %v5552_v42 }
 0x327   : > { %5876 = vmatmul.mubr.bf16.gmra.mrb[32].mxu1 %v5551_v31 }
 0x328   : > { %v4476_v18 = vpop.permute.xlu0 %4475  ;;  %5883 = vmatprep.mubr.bf16.mxu1 %v5555_v35 }
 0x329   : > { %v3149_v47 = vpop.permute.xlu1 %3148  ;;  %4511 = vst.msk [vmem:[#allocation4 + $0x128] sm:$0xff] %vm3168_vm11, %v4476_v18 }
 0x32a   : > { %3183 = vst.msk [vmem:[#allocation4 + $0x150] sm:$0xff] %vm3168_vm11, %v3149_v47 }
 0x32b   : > { %4688 = vst.msk [vmem:[#allocation4 + $0x128] sm:$0xff] %vm3489_vm13, %v11155_v8 }
 0x32f   : > { %5884 = vmatmul.mubr.bf16.gmra.mrb[36].mxu1 %v5554_v10 }
 0x333   : > { %v3147_v51 = vpop.permute.xlu1 %3146 }
 0x334   : > { %3182 = vst.msk [vmem:[#allocation4 + $0x138] sm:$0xff] %vm3168_vm11, %v3147_v51 }
 0x335   : > { %3503 = vst.msk [vmem:[#allocation4 + $0x138] sm:$0xff] %vm3489_vm13, %v3468_v52 }
 0x336   : > { %3680 = vst.msk [vmem:[#allocation4 + $0x138] sm:$0xff] %vm3666_vm14, %v3645_v28  ;;  %v5197_v38 = vpop.permute.xlu0 %5196 }
 0x337   : > { %v3470_v24 = vpop.permute.xlu1 %3469  ;;  %5232 = vst.msk [vmem:[#allocation4 + $0x128] sm:$0xff] %vm3666_vm14, %v5197_v38 }
 0x338   : > { %3504 = vst.msk [vmem:[#allocation4 + $0x150] sm:$0xff] %vm3489_vm13, %v3470_v24 }
 0x33b   : > { %v3647_v43 = vpop.permute.xlu1 %3646 }
 0x33c   : > { %3681 = vst.msk [vmem:[#allocation4 + $0x150] sm:$0xff] %vm3666_vm14, %v3647_v43 }
 0x33e   : > { %v5195_v25 = vpop.permute.xlu0 %5194  ;;  %v5561_v6 = vld [vmem:[#allocation4 + $0x128] sm:$0xff] }
 0x33f   : > { %5231 = vst.msk [vmem:[#allocation4 + $0x110] sm:$0xff] %vm3666_vm14, %v5195_v25  ;;  %v8713_v8 = vpop.f32.mrb[0].mxu1 }
 0x340   : > { %v8714_v27 = vpop.f32.mrb[1].mxu1 }
 0x341   : > { %v8715_v29 = vadd.f32 %v8714_v27, %v8713_v8  ;;  %v8716_v62 = vpop.f32.mrb[2].mxu1 }
 0x342   : > { %v4655_v33 = vpop.permute.xlu0 %4654  ;;  %v8717_v44 = vpop.f32.mrb[3].mxu1 }
 0x343   : > { %4689 = vst.msk [vmem:[#allocation4 + $0x140] sm:$0xff] %vm3489_vm13, %v4655_v33  ;;  %v8718_v19 = vadd.f32 %v8717_v44, %v8716_v62  ;;  %v5814_v39 = vadd.f32 %v8715_v29, %v11208_v5 }
 0x344   : > { %v3472_v15 = vpop.permute.xlu1 %3471 }
 0x345   : > { %v5817_v17 = vadd.f32 %v8718_v19, %v11208_v5 }
 0x346   : > { %v4657_v50 = vpop.permute.xlu0 %4656  ;;  %v5558_v41 = vld [vmem:[#allocation4 + $0x110] sm:$0xff]  ;;  %v8865_v37 = vpop.f32.mrb[36].mxu0 }
 0x347   : > { %5891 = vmatprep.mubr.bf16.mxu1 %v5558_v41  ;;  %v5966_v59 = vpop.f32.mrb[37].mxu0  ;;  %v5975_v54 = vadd.f32 %v8865_v37, %v5814_v39 }
 0x348   : > { %v8719_v34 = vpop.f32.mrb[4].mxu1  ;;  %5892 = vmatmul.mubr.bf16.gmra.mrb[40].mxu1 %v5557_v0  ;;  %v5967_v56 = vadd.f32 %v5966_v59, %v5806_v36  ;;  %v8866_v57 = vpop.f32.mrb[38].mxu0 }
 0x349   : > { %v8720_v16 = vpop.f32.mrb[5].mxu1  ;;  %5899 = vmatprep.mubr.bf16.mxu1 %v5561_v6  ;;  %v5969_v14 = vpop.f32.mrb[39].mxu0  ;;  %v6095_v21 = vmax.f32 %v5975_v54, 0.0  ;;  %v5978_v55 = vadd.f32 %v8866_v57, %v5817_v17 }
 0x34a   : > { %v8721_v32 = vadd.f32 %v8720_v16, %v8719_v34  ;;  %v8722_v2 = vpop.f32.mrb[6].mxu1  ;;  %v4480_v49 = vpop.permute.xlu0 %4479  ;;  %v6093_v20 = vmax.f32 %v5967_v56, 0.0  ;;  %v5970_v61 = vadd.f32 %v5969_v14, %v5809_v46 }
 0x34b   : > { %4513 = vst.msk [vmem:[#allocation4 + $0x158] sm:$0xff] %vm3168_vm11, %v4480_v49  ;;  %v8723_v12 = vpop.f32.mrb[7].mxu1  ;;  %v6191_v48 = vcombine.high %v6095_v21, %v6095_v21  ;;  %v11222_v45 = vrot.slane %v6095_v21, %v11216_v1  ;;  %v11235_v40 = vmax.f32 %v5978_v55, 0.0  ;;  %v5563_v55 = vld [vmem:[#allocation4 + $0x138] sm:$0xff] }
 0x34c   : > { %4690 = vst.msk [vmem:[#allocation4 + $0x158] sm:$0xff] %vm3489_vm13, %v4657_v50  ;;  %v11224_v22 = vadd.f32 %v8723_v12, %v8722_v2  ;;  %v6157_v26 = vcombine.high %v6093_v20, %v6093_v20  ;;  %v6164_v60 = vrot.slane %v6093_v20, %v11216_v1  ;;  %v6094_v52 = vmax.f32 %v5970_v61, 0.0 }
 0x34d   : > { %v3151_v13 = vpop.permute.xlu1 %3150  ;;  %v11229_v7 = vrot.slane %v6191_v48, %v11216_v1  ;;  %v11233_v9 = vsel %vm6829_vm5, %v11222_v45, -inf  ;;  %v11238_v4 = vadd.f32 %v8721_v32, %v11208_v5  ;;  %v6206_v10 = vcombine.high %v11222_v45, %v11222_v45 }
 0x34e   : > { %3184 = vst.msk [vmem:[#allocation4 + $0x168] sm:$0xff] %vm3168_vm11, %v3151_v13  ;;  %v6171_v53 = vrot.slane %v6157_v26, %v11216_v1  ;;  %v6172_v28 = vcombine.high %v6164_v60, %v6164_v60  ;;  %v6830_v42 = vsel %vm6829_vm5, %v6164_v60, -inf  ;;  %v6174_v31 = vcombine.high %v6094_v52, %v6094_v52 }
 0x34f   : > { %3505 = vst.msk [vmem:[#allocation4 + $0x168] sm:$0xff] %vm3489_vm13, %v3472_v15  ;;  %v6831_v35 = vrot.slane %v6830_v42, 4  ;;  %v6181_v47 = vrot.slane %v6094_v52, %v11216_v1  ;;  %v6887_v51 = vrot.slane %v11233_v9, 4 }
 0x350   : > { %v5199_v18 = vpop.permute.xlu0 %5198  ;;  %5900 = vmatmul.mubr.bf16.gmra.mrb[44].mxu1 %v5560_v63  ;;  %v6173_v24 = vcombine.high %v6171_v53, %v6171_v53  ;;  %v6837_v43 = vsel %vm6829_vm5, %v6172_v28, -inf  ;;  %v6844_v25 = vsel %vm6829_vm5, %v6171_v53, -inf  ;;  %v6188_v8 = vrot.slane %v6174_v31, %v11216_v1 }
 0x351   : > { %5233 = vst.msk [vmem:[#allocation4 + $0x140] sm:$0xff] %vm3666_vm14, %v5199_v18  ;;  %v3649_v38 = vpop.permute.xlu1 %3648  ;;  %v6832_v27 = vmax.f32 %v6830_v42, %v6831_v35  ;;  %v6838_v23 = vrot.slane %v6837_v43, 4  ;;  %v6845_v30 = vrot.slane %v6844_v25, 4  ;;  %v6189_v3 = vcombine.high %v6181_v47, %v6181_v47 }
 0x352   : > { %3682 = vst.msk [vmem:[#allocation4 + $0x168] sm:$0xff] %vm3666_vm14, %v3649_v38  ;;  %v6851_v29 = vsel %vm6829_vm5, %v6173_v24, -inf  ;;  %v6190_v62 = vcombine.high %v6188_v8, %v6188_v8  ;;  %v6858_v33 = vsel %vm6829_vm5, %v6181_v47, -inf  ;;  %v6872_v44 = vsel %vm6829_vm5, %v6188_v8, -inf }
 0x353   : > { %v6833_v19 = vrot.slane %v6832_v27, 2  ;;  %v6839_v39 = vmax.f32 %v6837_v43, %v6838_v23  ;;  %v6846_v11 = vmax.f32 %v6844_v25, %v6845_v30  ;;  %v6852_v50 = vrot.slane %v6851_v29, 4 }
 0x354   : > { %v6859_v41 = vrot.slane %v6858_v33, 4  ;;  %v6865_v15 = vsel %vm6829_vm5, %v6189_v3, -inf  ;;  %v6873_v17 = vrot.slane %v6872_v44, 4  ;;  %v6879_v0 = vsel %vm6829_vm5, %v6190_v62, -inf }
 0x355   : > { %v6834_v37 = vmax.f32 %v6832_v27, %v6833_v19  ;;  %v6840_v36 = vrot.slane %v6839_v39, 2  ;;  %v6847_v34 = vrot.slane %v6846_v11, 2  ;;  %v6853_v6 = vmax.f32 %v6851_v29, %v6852_v50 }
 0x356   : > { %v6860_v59 = vmax.f32 %v6858_v33, %v6859_v41  ;;  %v6866_v54 = vrot.slane %v6865_v15, 4  ;;  %v6874_v16 = vmax.f32 %v6872_v44, %v6873_v17  ;;  %v6880_v56 = vrot.slane %v6879_v0, 4  ;;  %v11257_v57 = vpop.f32.mrb[40].mxu0 }
 0x357   : > { %v6835_v32 = vrot.slane %v6834_v37, 1  ;;  %v6841_v2 = vmax.f32 %v6839_v39, %v6840_v36  ;;  %v6848_v49 = vmax.f32 %v6846_v11, %v6847_v34  ;;  %v6854_v14 = vrot.slane %v6853_v6, 2  ;;  %v11259_v21 = vpop.f32.mrb[41].mxu0 }
 0x358   : > { %v5564_v46 = vld [vmem:[#allocation4 + $0x140] sm:$0xff]  ;;  %v6861_v20 = vrot.slane %v6860_v59, 2  ;;  %v6867_v61 = vmax.f32 %v6865_v15, %v6866_v54  ;;  %v6875_v12 = vrot.slane %v6874_v16, 2  ;;  %v6881_v48 = vmax.f32 %v6879_v0, %v6880_v56  ;;  %v11261_v13 = vpop.f32.mrb[42].mxu0 }
 0x359   : > { %5907 = vmatprep.mubr.bf16.mxu1 %v5564_v46  ;;  %v6836_v60 = vmax.f32 %v6834_v37, %v6835_v32  ;;  %v6842_v52 = vrot.slane %v6841_v2, 1  ;;  %v6849_v63 = vrot.slane %v6848_v49, 1  ;;  %v6855_v53 = vmax.f32 %v6853_v6, %v6854_v14  ;;  %v11263_v28 = vpop.f32.mrb[43].mxu0 }
 0x35a   : > { %v5201_v26 = vpop.permute.xlu0 %5200  ;;  %5908 = vmatmul.mubr.bf16.gmra.mrb[48].mxu1 %v5563_v55  ;;  %v6862_v42 = vmax.f32 %v6860_v59, %v6861_v20  ;;  %v6868_v31 = vrot.slane %v6867_v61, 2  ;;  %v6876_v18 = vmax.f32 %v6874_v16, %v6875_v12  ;;  %v6882_v35 = vrot.slane %v6881_v48, 2 }
 0x35b   : > { %5234 = vst.msk [vmem:[#allocation4 + $0x158] sm:$0xff] %vm3666_vm14, %v5201_v26  ;;  %v6843_v47 = vmax.f32 %v6841_v2, %v6842_v52  ;;  %v6850_v38 = vmax.f32 %v6848_v49, %v6849_v63  ;;  %v6856_v24 = vrot.slane %v6855_v53, 1  ;;  %v6208_v43 = vcombine.high %v11235_v40, %v11235_v40  ;;  %v5566_v2 = vld [vmem:[#allocation4 + $0x150] sm:$0xff] }
 0x35c   : > { %v6863_v25 = vrot.slane %v6862_v42, 1  ;;  %v6869_v8 = vmax.f32 %v6867_v61, %v6868_v31  ;;  %v6877_v27 = vrot.slane %v6876_v18, 1  ;;  %v6883_v23 = vmax.f32 %v6881_v48, %v6882_v35 }
 0x35d   : > { %v6857_v3 = vmax.f32 %v6855_v53, %v6856_v24  ;;  %v11269_v29 = vsel %vm2623_vm12, %v6836_v60, -inf  ;;  %v6207_v62 = vcombine.high %v11229_v7, %v11229_v7  ;;  %v6888_v33 = vmax.f32 %v11233_v9, %v6887_v51 }
 0x35e   : > { %v4482_v30 = vpop.permute.xlu0 %4481  ;;  %v11278_v44 = vsel %vm2623_vm12, %v6843_v47, -inf  ;;  %v6864_v19 = vmax.f32 %v6862_v42, %v6863_v25  ;;  %v6870_v39 = vrot.slane %v6869_v8, 1  ;;  %v6884_v11 = vrot.slane %v6883_v23, 1  ;;  %v11280_v50 = vpop.f32.mrb[44].mxu0 }
 0x35f   : > { %4514 = vst.msk [vmem:[#allocation4 + $0x170] sm:$0xff] %vm3168_vm11, %v4482_v30  ;;  %v11283_v41 = vsel %vm2623_vm12, %v6850_v38, -inf  ;;  %v11285_v15 = vpop.f32.mrb[45].mxu0  ;;  %v6889_v17 = vrot.slane %v6888_v33, 2  ;;  %v6893_v9 = vsel %vm6829_vm5, %v6206_v10, -inf  ;;  %v6900_v51 = vsel %vm6829_vm5, %v11229_v7, -inf }
 0x360   : > { %v11293_v0 = vpop.f32.mrb[8].mxu1  ;;  %v11296_v37 = vsel %vm2623_vm12, %v6857_v3, -inf  ;;  %v6871_v36 = vmax.f32 %v6869_v8, %v6870_v39  ;;  %v11298_v34 = vmax.f32 %v6876_v18, %v6877_v27  ;;  %v11300_v6 = vmax.f32 %v6883_v23, %v6884_v11  ;;  %v11302_v59 = vpop.f32.mrb[46].mxu0 }
 0x361   : > { %v11304_v54 = vpop.f32.mrb[9].mxu1  ;;  %v11306_v10 = vpop.f32.mrb[47].mxu0  ;;  %v6890_v56 = vmax.f32 %v6888_v33, %v6889_v17  ;;  %v6894_v7 = vrot.slane %v6893_v9, 4  ;;  %v6901_v46 = vrot.slane %v6900_v51, 4  ;;  %v6907_v32 = vsel %vm6829_vm5, %v6207_v62, -inf }
 0x362   : > { %v4659_v45 = vpop.permute.xlu0 %4658  ;;  %v5567_v16 = vld [vmem:[#allocation4 + $0x158] sm:$0xff]  ;;  %v11311_v49 = vsel %vm2623_vm12, %v6864_v19, -inf  ;;  %v11314_v14 = vsel %vm2623_vm12, %v6871_v36, -inf  ;;  %v6908_v55 = vrot.slane %v6907_v32, 4  ;;  %v6215_v20 = vrot.slane %v11235_v40, %v11216_v1  ;;  %v11318_v61 = vpop.f32.mrb[10].mxu1 }
 0x363   : > { %4691 = vst.msk [vmem:[#allocation4 + $0x170] sm:$0xff] %vm3489_vm13, %v4659_v45  ;;  %5915 = vmatprep.mubr.bf16.mxu1 %v5567_v16  ;;  %v6891_v12 = vrot.slane %v6890_v56, 1  ;;  %v6895_v48 = vmax.f32 %v6893_v9, %v6894_v7  ;;  %v6902_v26 = vmax.f32 %v6900_v51, %v6901_v46  ;;  %v6222_v60 = vrot.slane %v6208_v43, %v11216_v1  ;;  %v11321_v52 = vpop.f32.mrb[11].mxu1 }
 0x364   : > { %5916 = vmatmul.mubr.bf16.gmra.mrb[52].mxu1 %v5566_v2  ;;  %v6909_v63 = vmax.f32 %v6907_v32, %v6908_v55  ;;  %v6223_v53 = vcombine.high %v6215_v20, %v6215_v20  ;;  %v6914_v42 = vsel %vm6829_vm5, %v6215_v20, -inf  ;;  %v5983_v31 = vadd.f32 %v11259_v21, %v11238_v4 }
 0x365   : > { %v6892_v35 = vmax.f32 %v6890_v56, %v6891_v12  ;;  %v6896_v40 = vrot.slane %v6895_v48, 2  ;;  %v6903_v47 = vrot.slane %v6902_v26, 2  ;;  %v6224_v38 = vcombine.high %v6222_v60, %v6222_v60 }
 0x366   : > { %v5203_v18 = vpop.permute.xlu0 %5202  ;;  %v6910_v24 = vrot.slane %v6909_v63, 2  ;;  %v6915_v43 = vrot.slane %v6914_v42, 4  ;;  %v6921_v25 = vsel %vm6829_vm5, %v6223_v53, -inf  ;;  %v6928_v8 = vsel %vm6829_vm5, %v6222_v60, -inf }
 0x367   : > { %5235 = vst.msk [vmem:[#allocation4 + $0x170] sm:$0xff] %vm3666_vm14, %v5203_v18  ;;  %v6897_v27 = vmax.f32 %v6895_v48, %v6896_v40  ;;  %v6904_v23 = vmax.f32 %v6902_v26, %v6903_v47  ;;  %v7727_v30 = vsel %vm2623_vm12, %v6892_v35, -inf  ;;  %v6922_v4 = vrot.slane %v6921_v25, 4  ;;  %v5569_v35 = vld [vmem:[#allocation4 + $0x168] sm:$0xff] }
 0x368   : > { %v6911_v21 = vmax.f32 %v6909_v63, %v6910_v24  ;;  %v7728_v3 = vmax.f32 %v11269_v29, %v7727_v30  ;;  %v6916_v62 = vmax.f32 %v6914_v42, %v6915_v43  ;;  %v6929_v33 = vrot.slane %v6928_v8, 4 }
 0x369   : > { %v6898_v19 = vrot.slane %v6897_v27, 1  ;;  %v6905_v39 = vrot.slane %v6904_v23, 1  ;;  %v6923_v11 = vmax.f32 %v6921_v25, %v6922_v4  ;;  %v6935_v17 = vsel %vm6829_vm5, %v6224_v38, -inf }
 0x36a   : > { %v11332_v9 = vpop.f32.mrb[48].mxu0  ;;  %v6912_v51 = vrot.slane %v6911_v21, 1  ;;  %v6917_v36 = vrot.slane %v6916_v62, 2  ;;  %v6930_v45 = vmax.f32 %v6928_v8, %v6929_v33  ;;  %v6936_v16 = vrot.slane %v6935_v17, 4 }
 0x36b   : > { %v11334_v56 = vpop.f32.mrb[49].mxu0  ;;  %v6899_v7 = vmax.f32 %v6897_v27, %v6898_v19  ;;  %v6906_v46 = vmax.f32 %v6904_v23, %v6905_v39  ;;  %v6924_v32 = vrot.slane %v6923_v11, 2  ;;  %v6097_v29 = vmax.f32 %v5983_v31, 0.0 }
 0x36c   : > { %v11336_v2 = vpop.f32.mrb[50].mxu0  ;;  %v6913_v55 = vmax.f32 %v6911_v21, %v6912_v51  ;;  %v6918_v20 = vmax.f32 %v6916_v62, %v6917_v36  ;;  %v6931_v12 = vrot.slane %v6930_v45, 2  ;;  %v6937_v48 = vmax.f32 %v6935_v17, %v6936_v16 }
 0x36d   : > { %v11338_v60 = vpop.f32.mrb[51].mxu0  ;;  %v7730_v63 = vsel %vm2623_vm12, %v6899_v7, -inf  ;;  %v7733_v53 = vsel %vm2623_vm12, %v6906_v46, -inf  ;;  %v6925_v42 = vmax.f32 %v6923_v11, %v6924_v32  ;;  %v6225_v18 = vcombine.high %v6097_v29, %v6097_v29 }
 0x36e   : > { %v5570_v26 = vld [vmem:[#allocation4 + $0x170] sm:$0xff]  ;;  %v7731_v40 = vmax.f32 %v11278_v44, %v7730_v63  ;;  %v7734_v31 = vmax.f32 %v11283_v41, %v7733_v53  ;;  %v7736_v47 = vsel %vm2623_vm12, %v6913_v55, -inf  ;;  %v6919_v38 = vrot.slane %v6918_v20, 1 }
 0x36f   : > { %5923 = vmatprep.mubr.bf16.mxu1 %v5570_v26  ;;  %v7737_v24 = vmax.f32 %v11296_v37, %v7736_v47  ;;  %v6926_v43 = vrot.slane %v6925_v42, 1  ;;  %v6932_v25 = vmax.f32 %v6930_v45, %v6931_v12  ;;  %v6938_v8 = vrot.slane %v6937_v48, 2 }
 0x370   : > { %5924 = vmatmul.mubr.bf16.gmra.mrb[56].mxu1 %v5569_v35  ;;  %v7983_v27 = vsel %vm7982_vm6, %v7731_v40, %v7728_v3  ;;  %v6920_v23 = vmax.f32 %v6918_v20, %v6919_v38  ;;  %v6232_v30 = vrot.slane %v6097_v29, %v11216_v1  ;;  %v6239_v4 = vrot.slane %v6225_v18, %v11216_v1 }
 0x371   : > { %v7985_v44 = vsel %vm7984_vm15, %v7734_v31, %v7983_v27  ;;  %v6927_v21 = vmax.f32 %v6925_v42, %v6926_v43  ;;  %v6933_v41 = vrot.slane %v6932_v25, 1  ;;  %v6939_v62 = vmax.f32 %v6937_v48, %v6938_v8 }
 0x372   : > { %v7739_v33 = vsel %vm2623_vm12, %v6920_v23, -inf  ;;  %v7987_v19 = vsel %vm7986_vm0, %v7737_v24, %v7985_v44  ;;  %v6240_v37 = vcombine.high %v6232_v30, %v6232_v30  ;;  %v6241_v39 = vcombine.high %v6239_v4, %v6239_v4 }
 0x373   : > { %v6934_v11 = vmax.f32 %v6932_v25, %v6933_v41  ;;  %v6940_v17 = vrot.slane %v6939_v62, 1  ;;  %v7740_v3 = vmax.f32 %v11311_v49, %v7739_v33  ;;  %v11354_v51 = vsel %vm2623_vm12, %v6927_v21, -inf }
 0x374   : > { %v6942_v45 = vsel %vm6829_vm5, %v6232_v30, -inf  ;;  %v6949_v16 = vsel %vm6829_vm5, %v6240_v37, -inf  ;;  %v6956_v7 = vsel %vm6829_vm5, %v6239_v4, -inf  ;;  %v11363_v46 = vsel %vm2623_vm12, %v11298_v34, -inf }
 0x375   : > { %12293 = vst [vmem:[#allocation6_spill] sm:$0xff] %v11363_v46  ;;  %v11366_v32 = vsel %vm2623_vm12, %v6934_v11, -inf  ;;  %v11369_v49 = vsel %vm7988_vm1, %v7740_v3, %v7987_v19  ;;  %v6943_v29 = vrot.slane %v6942_v45, 4  ;;  %v6950_v20 = vrot.slane %v6949_v16, 4 }
 0x376   : > { %12294 = vst [vmem:[#allocation7_spill] sm:$0xff] %v11366_v32  ;;  %v6957_v12 = vrot.slane %v6956_v7, 4  ;;  %v6963_v48 = vsel %vm6829_vm5, %v6241_v39, -inf  ;;  %v6941_v26 = vmax.f32 %v6939_v62, %v6940_v17  ;;  %v5825_v34 = vadd.f32 %v11224_v22, %v11208_v5 }
 0x377   : > { %v6944_v63 = vmax.f32 %v6942_v45, %v6943_v29  ;;  %v6964_v53 = vrot.slane %v6963_v48, 4  ;;  %v6951_v42 = vmax.f32 %v6949_v16, %v6950_v20  ;;  %v8727_v35 = vadd.f32 %v11304_v54, %v11293_v0 }
 0x378   : > { %v6958_v18 = vmax.f32 %v6956_v7, %v6957_v12  ;;  %v8730_v40 = vadd.f32 %v11321_v52, %v11318_v61  ;;  %v11382_v31 = vsel %vm2623_vm12, %v11300_v6, -inf  ;;  %v5986_v24 = vadd.f32 %v11263_v28, %v5825_v34 }
 0x379   : > { %v6945_v47 = vrot.slane %v6944_v63, 2  ;;  %v6965_v38 = vmax.f32 %v6963_v48, %v6964_v53  ;;  %v6952_v43 = vrot.slane %v6951_v42, 2  ;;  %v5830_v22 = vadd.f32 %v8727_v35, %v11208_v5 }
 0x37a   : > { %v6959_v25 = vrot.slane %v6958_v18, 2  ;;  %v5833_v8 = vadd.f32 %v8730_v40, %v11208_v5  ;;  %v11388_v27 = vsel %vm2623_vm12, %v6941_v26, -inf  ;;  %v6098_v61 = vmax.f32 %v5986_v24, 0.0 }
 0x37b   : > { %v6946_v0 = vmax.f32 %v6944_v63, %v6945_v47  ;;  %v6966_v54 = vrot.slane %v6965_v38, 2  ;;  %v6953_v6 = vmax.f32 %v6951_v42, %v6952_v43  ;;  %v5991_v30 = vadd.f32 %v11257_v57, %v5830_v22 }
 0x37c   : > { %v11390_v52 = vpop.f32.mrb[12].mxu1  ;;  %v6960_v23 = vmax.f32 %v6958_v18, %v6959_v25  ;;  %v5994_v28 = vadd.f32 %v11261_v13, %v5833_v8  ;;  %v6242_v41 = vcombine.high %v6098_v61, %v6098_v61  ;;  %v6249_v62 = vrot.slane %v6098_v61, %v11216_v1 }
 0x37d   : > { %v11394_v4 = vpop.f32.mrb[13].mxu1  ;;  %v6947_v44 = vrot.slane %v6946_v0, 1  ;;  %v6967_v21 = vmax.f32 %v6965_v38, %v6966_v54  ;;  %v6954_v19 = vrot.slane %v6953_v6, 1  ;;  %v6099_v39 = vmax.f32 %v5991_v30, 0.0 }
 0x37e   : > { %v11397_v33 = vpop.f32.mrb[14].mxu1  ;;  %v6961_v37 = vrot.slane %v6960_v23, 1  ;;  %v11399_v11 = vmax.f32 %v5994_v28, 0.0  ;;  %v6256_v13 = vrot.slane %v6242_v41, %v11216_v1  ;;  %v6257_v45 = vcombine.high %v6249_v62, %v6249_v62 }
 0x37f   : > { %v11401_v17 = vpop.f32.mrb[15].mxu1  ;;  %v6948_v3 = vmax.f32 %v6946_v0, %v6947_v44  ;;  %v6968_v57 = vrot.slane %v6967_v21, 1  ;;  %v6955_v16 = vmax.f32 %v6953_v6, %v6954_v19  ;;  %v6970_v29 = vsel %vm6829_vm5, %v6249_v62, -inf }
 0x380   : > { %v6962_v7 = vmax.f32 %v6960_v23, %v6961_v37  ;;  %v6259_v20 = vcombine.high %v6099_v39, %v6099_v39  ;;  %v6258_v26 = vcombine.high %v6256_v13, %v6256_v13  ;;  %v6971_v63 = vrot.slane %v6970_v29, 4 }
 0x381   : > { %v6969_v12 = vmax.f32 %v6967_v21, %v6968_v57  ;;  %v11406_v48 = vsel %vm2623_vm12, %v6948_v3, -inf  ;;  %v11409_v53 = vsel %vm2623_vm12, %v6955_v16, -inf  ;;  %v6977_v42 = vsel %vm6829_vm5, %v6257_v45, -inf }
 0x382   : > { %v11412_v34 = vsel %vm2623_vm12, %v6962_v7, -inf  ;;  %v6984_v18 = vsel %vm6829_vm5, %v6256_v13, -inf  ;;  %v6972_v40 = vmax.f32 %v6970_v29, %v6971_v63  ;;  %v6978_v47 = vrot.slane %v6977_v42, 4 }
 0x383   : > { %v11417_v35 = vsel %vm2623_vm12, %v6969_v12, -inf  ;;  %v6985_v38 = vrot.slane %v6984_v18, 4  ;;  %v6991_v24 = vsel %vm6829_vm5, %v6258_v26, -inf  ;;  %v6266_v43 = vrot.slane %v6099_v39, %v11216_v1 }
 0x384   : > { %v6273_v25 = vrot.slane %v6259_v20, %v11216_v1  ;;  %v6276_v22 = vcombine.high %v11399_v11, %v11399_v11  ;;  %v6973_v8 = vrot.slane %v6972_v40, 2  ;;  %v6979_v0 = vmax.f32 %v6977_v42, %v6978_v47 }
 0x385   : > { %v6986_v54 = vmax.f32 %v6984_v18, %v6985_v38  ;;  %v6992_v61 = vrot.slane %v6991_v24, 4  ;;  %v6274_v23 = vcombine.high %v6266_v43, %v6266_v43  ;;  %v6998_v28 = vsel %vm6829_vm5, %v6266_v43, -inf }
 0x386   : > { %v11424_v6 = vpop.f32.mrb[52].mxu0  ;;  %v6275_v30 = vcombine.high %v6273_v25, %v6273_v25  ;;  %v7012_v44 = vsel %vm6829_vm5, %v6273_v25, -inf  ;;  %v6974_v41 = vmax.f32 %v6972_v40, %v6973_v8  ;;  %v6980_v62 = vrot.slane %v6979_v0, 2 }
 0x387   : > { %v11428_v21 = vpop.f32.mrb[53].mxu0  ;;  %v6987_v19 = vrot.slane %v6986_v54, 2  ;;  %v6993_v37 = vmax.f32 %v6991_v24, %v6992_v61  ;;  %v6999_v3 = vrot.slane %v6998_v28, 4  ;;  %v7005_v57 = vsel %vm6829_vm5, %v6274_v23, -inf }
 0x388   : > { %v11430_v39 = vpop.f32.mrb[54].mxu0  ;;  %v7013_v13 = vrot.slane %v7012_v44, 4  ;;  %v7019_v45 = vsel %vm6829_vm5, %v6275_v30, -inf  ;;  %v6975_v7 = vrot.slane %v6974_v41, 1  ;;  %v6981_v29 = vmax.f32 %v6979_v0, %v6980_v62 }
 0x389   : > { %v11434_v16 = vpop.f32.mrb[55].mxu0  ;;  %v6988_v20 = vmax.f32 %v6986_v54, %v6987_v19  ;;  %v6994_v12 = vrot.slane %v6993_v37, 2  ;;  %v7000_v26 = vmax.f32 %v6998_v28, %v6999_v3  ;;  %v7006_v63 = vrot.slane %v7005_v57, 4 }
 0x38a   : > { %v7014_v42 = vmax.f32 %v7012_v44, %v7013_v13  ;;  %v7020_v18 = vrot.slane %v7019_v45, 4  ;;  %v6976_v40 = vmax.f32 %v6974_v41, %v6975_v7  ;;  %v6982_v47 = vrot.slane %v6981_v29, 1 }
 0x38b   : > { %v6989_v38 = vrot.slane %v6988_v20, 1  ;;  %v6995_v24 = vmax.f32 %v6993_v37, %v6994_v12  ;;  %v7001_v43 = vrot.slane %v7000_v26, 2  ;;  %v7007_v25 = vmax.f32 %v7005_v57, %v7006_v63 }
 0x38c   : > { %v7015_v8 = vrot.slane %v7014_v42, 2  ;;  %v7021_v61 = vmax.f32 %v7019_v45, %v7020_v18  ;;  %v6983_v23 = vmax.f32 %v6981_v29, %v6982_v47  ;;  %v11437_v36 = vsel %vm2623_vm12, %v6976_v40, -inf }
 0x38d   : > { %v6990_v30 = vmax.f32 %v6988_v20, %v6989_v38  ;;  %v6996_v55 = vrot.slane %v6995_v24, 1  ;;  %v7002_v0 = vmax.f32 %v7000_v26, %v7001_v43  ;;  %v7008_v54 = vrot.slane %v7007_v25, 2 }
 0x38e   : > { %v7016_v28 = vmax.f32 %v7014_v42, %v7015_v8  ;;  %v7022_v62 = vrot.slane %v7021_v61, 2  ;;  %v11440_v41 = vsel %vm2623_vm12, %v6983_v23, -inf  ;;  %v6283_v37 = vrot.slane %v11399_v11, %v11216_v1 }
 0x38f   : > { %v6997_v44 = vmax.f32 %v6995_v24, %v6996_v55  ;;  %12295 = vst [vmem:[#allocation8_spill] sm:$0xff] %v11440_v41  ;;  %v11443_v19 = vsel %vm2623_vm12, %v6990_v30, -inf  ;;  %v7003_v3 = vrot.slane %v7002_v0, 1  ;;  %v7009_v57 = vmax.f32 %v7007_v25, %v7008_v54 }
 0x390   : > { %12296 = vst [vmem:[#allocation9_spill] sm:$0xff] %v11443_v19  ;;  %v7017_v13 = vrot.slane %v7016_v28, 1  ;;  %v7023_v45 = vmax.f32 %v7021_v61, %v7022_v62  ;;  %v6290_v55 = vrot.slane %v6276_v22, %v11216_v1  ;;  %v6291_v20 = vcombine.high %v6283_v37, %v6283_v37  ;;  %v8737_v26 = vpop.f32.mrb[16].mxu1 }
 0x391   : > { %v11448_v7 = vsel %vm2623_vm12, %v6997_v44, -inf  ;;  %v7026_v12 = vsel %vm6829_vm5, %v6283_v37, -inf  ;;  %v7004_v42 = vmax.f32 %v7002_v0, %v7003_v3  ;;  %v7010_v18 = vrot.slane %v7009_v57, 1  ;;  %v8738_v47 = vpop.f32.mrb[17].mxu1 }
 0x392   : > { %v11450_v29 = vpop.f32.mrb[56].mxu0  ;;  %v7018_v11 = vmax.f32 %v7016_v28, %v7017_v13  ;;  %v7024_v40 = vrot.slane %v7023_v45, 1  ;;  %v6292_v24 = vcombine.high %v6290_v55, %v6290_v55  ;;  %v7027_v43 = vrot.slane %v7026_v12, 4  ;;  %v8740_v22 = vpop.f32.mrb[18].mxu1 }
 0x393   : > { %v11454_v63 = vpop.f32.mrb[57].mxu0  ;;  %v7033_v25 = vsel %vm6829_vm5, %v6291_v20, -inf  ;;  %v7040_v8 = vsel %vm6829_vm5, %v6290_v55, -inf  ;;  %v7011_v23 = vmax.f32 %v7009_v57, %v7010_v18  ;;  %v7751_v54 = vsel %vm2623_vm12, %v7004_v42, -inf  ;;  %v8741_v28 = vpop.f32.mrb[19].mxu1 }
 0x394   : > { %v11456_v38 = vpop.f32.mrb[58].mxu0  ;;  %v7025_v30 = vmax.f32 %v7023_v45, %v7024_v40  ;;  %v7757_v0 = vsel %vm2623_vm12, %v7018_v11, -inf  ;;  %v7752_v62 = vmax.f32 %v11406_v48, %v7751_v54  ;;  %v7028_v37 = vmax.f32 %v7026_v12, %v7027_v43 }
 0x395   : > { %v11460_v61 = vpop.f32.mrb[59].mxu0  ;;  %v7758_v44 = vmax.f32 %v11412_v34, %v7757_v0  ;;  %v7034_v3 = vrot.slane %v7033_v25, 4  ;;  %v7754_v13 = vsel %vm2623_vm12, %v7011_v23, -inf  ;;  %v7041_v20 = vrot.slane %v7040_v8, 4 }
 0x396   : > { %v7760_v55 = vsel %vm2623_vm12, %v7025_v30, -inf  ;;  %v7047_v58 = vsel %vm6829_vm5, %v6292_v24, -inf  ;;  %v7755_v57 = vmax.f32 %v11409_v53, %v7754_v13  ;;  %v7029_v42 = vrot.slane %v7028_v37, 2 }
 0x397   : > { %v7761_v45 = vmax.f32 %v11417_v35, %v7760_v55  ;;  %v7035_v18 = vmax.f32 %v7033_v25, %v7034_v3  ;;  %v7042_v11 = vmax.f32 %v7040_v8, %v7041_v20  ;;  %v7048_v40 = vrot.slane %v7047_v58, 4 }
 0x398   : > { %v8733_v48 = vadd.f32 %v11394_v4, %v11390_v52  ;;  %v8736_v34 = vadd.f32 %v11401_v17, %v11397_v33  ;;  %v7996_v12 = vsel %vm7982_vm6, %v7755_v57, %v7752_v62  ;;  %v7030_v43 = vmax.f32 %v7028_v37, %v7029_v42 }
 0x399   : > { %v7036_v23 = vrot.slane %v7035_v18, 2  ;;  %v8739_v30 = vadd.f32 %v8738_v47, %v8737_v26  ;;  %v7997_v24 = vsel %vm7984_vm15, %v7758_v44, %v7996_v12  ;;  %v7043_v53 = vrot.slane %v7042_v11, 2 }
 0x39a   : > { %v7049_v54 = vmax.f32 %v7047_v58, %v7048_v40  ;;  %v5838_v35 = vadd.f32 %v8733_v48, %v11208_v5  ;;  %v7031_v25 = vrot.slane %v7030_v43, 1  ;;  %v7998_v0 = vsel %vm7986_vm0, %v7761_v45, %v7997_v24 }
 0x39b   : > { %v7037_v8 = vmax.f32 %v7035_v18, %v7036_v23  ;;  %v5841_v52 = vadd.f32 %v8736_v34, %v11208_v5  ;;  %v7044_v4 = vmax.f32 %v7042_v11, %v7043_v53  ;;  %v5846_v17 = vadd.f32 %v8739_v30, %v11208_v5 }
 0x39c   : > { %v7050_v3 = vrot.slane %v7049_v54, 2  ;;  %v5999_v33 = vadd.f32 %v11285_v15, %v5838_v35  ;;  %v7032_v62 = vmax.f32 %v7030_v43, %v7031_v25  ;;  %v8742_v44 = vadd.f32 %v8741_v28, %v8740_v22 }
 0x39d   : > { %v7038_v26 = vrot.slane %v7037_v8, 1  ;;  %v6002_v47 = vadd.f32 %v11306_v10, %v5841_v52  ;;  %v7045_v58 = vrot.slane %v7044_v4, 1  ;;  %v11484_v55 = vadd.f32 %v11280_v50, %v5846_v17 }
 0x39e   : > { %v7051_v37 = vmax.f32 %v7049_v54, %v7050_v3  ;;  %v6101_v13 = vmax.f32 %v5999_v33, 0.0  ;;  %v7763_v57 = vsel %vm2623_vm12, %v7032_v62, -inf  ;;  %v11488_v42 = vadd.f32 %v8742_v44, %v11208_v5 }
 0x39f   : > { %v7039_v20 = vmax.f32 %v7037_v8, %v7038_v26  ;;  %v6102_v45 = vmax.f32 %v6002_v47, 0.0  ;;  %v7046_v15 = vmax.f32 %v7044_v4, %v7045_v58  ;;  %v7764_v11 = vmax.f32 %v11437_v36, %v7763_v57 }
 0x3a0   : > { %v7052_v18 = vrot.slane %v7051_v37, 1  ;;  %v6293_v40 = vcombine.high %v6101_v13, %v6101_v13  ;;  %v6300_v22 = vrot.slane %v6101_v13, %v11216_v1 }
 0x3a1   : > { %v11492_v10 = vsel %vm2623_vm12, %v7039_v20, -inf  ;;  %v6310_v28 = vcombine.high %v6102_v45, %v6102_v45  ;;  %v6317_v50 = vrot.slane %v6102_v45, %v11216_v1  ;;  %v11499_v5 = vsel %vm2623_vm12, %v7046_v15, -inf }
 0x3a2   : > { %12297 = vst [vmem:[#allocation10_spill] sm:$0xff] %v11492_v10  ;;  %v7053_v48 = vmax.f32 %v7051_v37, %v7052_v18  ;;  %12298 = vst [vmem:[#allocation11_spill] sm:$0xff] %v11499_v5  ;;  %v11502_v12 = vsel %vm7988_vm1, %v7764_v11, %v7998_v0  ;;  %v6307_v43 = vrot.slane %v6293_v40, %v11216_v1  ;;  %v7054_v30 = vsel %vm6829_vm5, %v6300_v22, -inf }
 0x3a3   : > { %12299 = vst [vmem:[#allocation12_spill] sm:$0xff] %v11502_v12  ;;  %v6308_v23 = vcombine.high %v6300_v22, %v6300_v22  ;;  %v7055_v53 = vrot.slane %v7054_v30, 4  ;;  %v6324_v54 = vrot.slane %v6310_v28, %v11216_v1  ;;  %v6325_v35 = vcombine.high %v6317_v50, %v6317_v50 }
 0x3a4   : > { %v11509_v24 = vsel %vm2623_vm12, %v7053_v48, -inf  ;;  %v6309_v25 = vcombine.high %v6307_v43, %v6307_v43  ;;  %v7068_v0 = vsel %vm6829_vm5, %v6307_v43, -inf  ;;  %v7082_v52 = vsel %vm6829_vm5, %v6317_v50, -inf }
 0x3a5   : > { %12300 = vst [vmem:[#allocation13_spill] sm:$0xff] %v11509_v24  ;;  %v7061_v8 = vsel %vm6829_vm5, %v6308_v23, -inf  ;;  %v7056_v4 = vmax.f32 %v7054_v30, %v7055_v53  ;;  %v7069_v33 = vrot.slane %v7068_v0, 4  ;;  %v6326_v17 = vcombine.high %v6324_v54, %v6324_v54 }
 0x3a6   : > { %v7062_v3 = vrot.slane %v7061_v8, 4  ;;  %v7075_v62 = vsel %vm6829_vm5, %v6309_v25, -inf  ;;  %v7083_v26 = vrot.slane %v7082_v52, 4  ;;  %v7089_v47 = vsel %vm6829_vm5, %v6325_v35, -inf }
 0x3a7   : > { %v7096_v44 = vsel %vm6829_vm5, %v6324_v54, -inf  ;;  %v7057_v58 = vrot.slane %v7056_v4, 2  ;;  %v7070_v13 = vmax.f32 %v7068_v0, %v7069_v33  ;;  %v7076_v20 = vrot.slane %v7075_v62, 4 }
 0x3a8   : > { %v7063_v37 = vmax.f32 %v7061_v8, %v7062_v3  ;;  %v7084_v57 = vmax.f32 %v7082_v52, %v7083_v26  ;;  %v7090_v45 = vrot.slane %v7089_v47, 4  ;;  %v7097_v15 = vrot.slane %v7096_v44, 4 }
 0x3a9   : > { %v7103_v18 = vsel %vm6829_vm5, %v6326_v17, -inf  ;;  %v7058_v11 = vmax.f32 %v7056_v4, %v7057_v58  ;;  %v7071_v22 = vrot.slane %v7070_v13, 2  ;;  %v7077_v28 = vmax.f32 %v7075_v62, %v7076_v20 }
 0x3aa   : > { %v7064_v40 = vrot.slane %v7063_v37, 2  ;;  %v7085_v50 = vrot.slane %v7084_v57, 2  ;;  %v7091_v48 = vmax.f32 %v7089_v47, %v7090_v45  ;;  %v7098_v43 = vmax.f32 %v7096_v44, %v7097_v15 }
 0x3ab   : > { %v7104_v23 = vrot.slane %v7103_v18, 4  ;;  %v7059_v30 = vrot.slane %v7058_v11, 1  ;;  %v7072_v54 = vmax.f32 %v7070_v13, %v7071_v22  ;;  %v7078_v35 = vrot.slane %v7077_v28, 2 }
 0x3ac   : > { %v7065_v53 = vmax.f32 %v7063_v37, %v7064_v40  ;;  %v7086_v25 = vmax.f32 %v7084_v57, %v7085_v50  ;;  %v7092_v8 = vrot.slane %v7091_v48, 2  ;;  %v7099_v0 = vrot.slane %v7098_v43, 2 }
 0x3ad   : > { %v7105_v52 = vmax.f32 %v7103_v18, %v7104_v23  ;;  %v7060_v3 = vmax.f32 %v7058_v11, %v7059_v30  ;;  %v7073_v26 = vrot.slane %v7072_v54, 1  ;;  %v7079_v17 = vmax.f32 %v7077_v28, %v7078_v35 }
 0x3ae   : > { %v7066_v33 = vrot.slane %v7065_v53, 1  ;;  %v7087_v4 = vrot.slane %v7086_v25, 1  ;;  %v7093_v58 = vmax.f32 %v7091_v48, %v7092_v8  ;;  %v7100_v36 = vmax.f32 %v7098_v43, %v7099_v0 }
 0x3af   : > { %v7106_v62 = vrot.slane %v7105_v52, 2  ;;  %v7074_v47 = vmax.f32 %v7072_v54, %v7073_v26  ;;  %v7080_v44 = vrot.slane %v7079_v17, 1  ;;  %v11520_v45 = vsel %vm2623_vm12, %v7060_v3, -inf }
 0x3b0   : > { %v7067_v20 = vmax.f32 %v7065_v53, %v7066_v33  ;;  %v7088_v37 = vmax.f32 %v7086_v25, %v7087_v4  ;;  %v7094_v13 = vrot.slane %v7093_v58, 1  ;;  %v7101_v57 = vrot.slane %v7100_v36, 1 }
 0x3b1   : > { %v7107_v15 = vmax.f32 %v7105_v52, %v7106_v62  ;;  %v7081_v18 = vmax.f32 %v7079_v17, %v7080_v44  ;;  %v11526_v22 = vsel %vm2623_vm12, %v7074_v47, -inf  ;;  %v6103_v28 = vmax.f32 %v11484_v55, 0.0 }
 0x3b2   : > { %v8743_v40 = vpop.f32.mrb[20].mxu1  ;;  %v11523_v11 = vsel %vm2623_vm12, %v7067_v20, -inf  ;;  %v7095_v48 = vmax.f32 %v7093_v58, %v7094_v13  ;;  %v7102_v43 = vmax.f32 %v7100_v36, %v7101_v57  ;;  %v11530_v30 = vsel %vm2623_vm12, %v7088_v37, -inf }
 0x3b3   : > { %v8744_v50 = vpop.f32.mrb[21].mxu1  ;;  %v7108_v23 = vrot.slane %v7107_v15, 1  ;;  %v11533_v54 = vsel %vm2623_vm12, %v7081_v18, -inf  ;;  %v6327_v35 = vcombine.high %v6103_v28, %v6103_v28  ;;  %v6334_v25 = vrot.slane %v6103_v28, %v11216_v1 }
 0x3b4   : > { %v8746_v53 = vpop.f32.mrb[22].mxu1  ;;  %v6010_v8 = vadd.f32 %v11302_v59, %v11488_v42  ;;  %v11539_v55 = vsel %vm2623_vm12, %v7095_v48, -inf  ;;  %v11542_v36 = vsel %vm2623_vm12, %v7102_v43, -inf  ;;  %v8745_v3 = vadd.f32 %v8744_v50, %v8743_v40  ;;  %v11554_v42 = vld [vmem:[%s12254_s4] ss:$0 sm:$0xff] }
 0x3b5   : > { %v8747_v0 = vpop.f32.mrb[23].mxu1  ;;  %v7109_v52 = vmax.f32 %v7107_v15, %v7108_v23  ;;  %12301 = vst [vmem:[#allocation14_spill] sm:$0xff] %v11539_v55  ;;  %12302 = vst [vmem:[#allocation15_spill] sm:$0xff] %v11542_v36  ;;  %v6341_v33 = vrot.slane %v6327_v35, %v11216_v1  ;;  %v6342_v26 = vcombine.high %v6334_v25, %v6334_v25  ;;  %v7110_v17 = vsel %vm6829_vm5, %v6334_v25, -inf }
 0x3b6   : > { %v6104_v4 = vmax.f32 %v6010_v8, 0.0  ;;  %v7111_v59 = vrot.slane %v7110_v17, 4  ;;  %v5854_v20 = vadd.f32 %v11554_v42, %v8745_v3  ;;  %v8748_v47 = vadd.f32 %v8747_v0, %v8746_v53 }
 0x3b7   : > { %v11549_v62 = vsel %vm2623_vm12, %v7109_v52, -inf  ;;  %v6343_v37 = vcombine.high %v6341_v33, %v6341_v33  ;;  %v7117_v13 = vsel %vm6829_vm5, %v6342_v26, -inf  ;;  %v7124_v57 = vsel %vm6829_vm5, %v6341_v33, -inf }
 0x3b8   : > { %v11546_v58 = vpop.f32.mrb[60].mxu0  ;;  %12304 = vst [vmem:[#allocation17_spill] sm:$0xff] %v11549_v62  ;;  %v6344_v15 = vcombine.high %v6104_v4, %v6104_v4  ;;  %v7112_v18 = vmax.f32 %v7110_v17, %v7111_v59  ;;  %v7118_v28 = vrot.slane %v7117_v13, 4  ;;  %v7125_v50 = vrot.slane %v7124_v57, 4 }
 0x3b9   : > { %12303 = vst [vmem:[#allocation16_spill] sm:$0xff] %v11546_v58  ;;  %v11557_v44 = vpop.f32.mrb[61].mxu0  ;;  %v6351_v48 = vrot.slane %v6104_v4, %v11216_v1  ;;  %v7131_v23 = vsel %vm6829_vm5, %v6343_v37, -inf  ;;  %v6015_v35 = vadd.f32 %v11334_v56, %v5854_v20  ;;  %v11570_v25 = vadd.f32 %v11554_v42, %v8748_v47 }
 0x3ba   : > { %v11561_v40 = vpop.f32.mrb[62].mxu0  ;;  %v6358_v53 = vrot.slane %v6344_v15, %v11216_v1  ;;  %v7113_v8 = vrot.slane %v7112_v18, 2  ;;  %v7119_v0 = vmax.f32 %v7117_v13, %v7118_v28  ;;  %v7126_v52 = vmax.f32 %v7124_v57, %v7125_v50 }
 0x3bb   : > { %12305 = vst [vmem:[#allocation18_spill] sm:$0xff] %v11561_v40  ;;  %v11564_v43 = vpop.f32.mrb[63].mxu0  ;;  %v7132_v3 = vrot.slane %v7131_v23, 4  ;;  %v6359_v33 = vcombine.high %v6351_v48, %v6351_v48  ;;  %v7138_v17 = vsel %vm6829_vm5, %v6351_v48, -inf }
 0x3bc   : > { %12306 = vst [vmem:[#allocation19_spill] sm:$0xff] %v11564_v43  ;;  %v6360_v26 = vcombine.high %v6358_v53, %v6358_v53  ;;  %v7152_v4 = vsel %vm6829_vm5, %v6358_v53, -inf  ;;  %v7114_v59 = vmax.f32 %v7112_v18, %v7113_v8  ;;  %v7120_v34 = vrot.slane %v7119_v0, 2 }
 0x3bd   : > { %v7127_v37 = vrot.slane %v7126_v52, 2  ;;  %v7133_v5 = vmax.f32 %v7131_v23, %v7132_v3  ;;  %v7139_v15 = vrot.slane %v7138_v17, 4  ;;  %v7145_v56 = vsel %vm6829_vm5, %v6359_v33, -inf  ;;  %v11576_v19 = vpop.f32.mrb[24].mxu1 }
 0x3be   : > { %v7153_v20 = vrot.slane %v7152_v4, 4  ;;  %v7159_v47 = vsel %vm6829_vm5, %v6360_v26, -inf  ;;  %v7115_v13 = vrot.slane %v7114_v59, 1  ;;  %v7121_v57 = vmax.f32 %v7119_v0, %v7120_v34  ;;  %v11578_v10 = vpop.f32.mrb[25].mxu1 }
 0x3bf   : > { %v7128_v28 = vmax.f32 %v7126_v52, %v7127_v37  ;;  %v7134_v50 = vrot.slane %v7133_v5, 2  ;;  %v7140_v48 = vmax.f32 %v7138_v17, %v7139_v15  ;;  %v7146_v53 = vrot.slane %v7145_v56, 4  ;;  %v11580_v41 = vpop.f32.mrb[26].mxu1 }
 0x3c0   : > { %v7154_v18 = vmax.f32 %v7152_v4, %v7153_v20  ;;  %v7160_v8 = vrot.slane %v7159_v47, 4  ;;  %v7116_v23 = vmax.f32 %v7114_v59, %v7115_v13  ;;  %v7122_v3 = vrot.slane %v7121_v57, 1  ;;  %v8753_v32 = vpop.f32.mrb[27].mxu1 }
 0x3c1   : > { %v7129_v33 = vrot.slane %v7128_v28, 1  ;;  %v7135_v12 = vmax.f32 %v7133_v5, %v7134_v50  ;;  %v7141_v26 = vrot.slane %v7140_v48, 2  ;;  %v7147_v46 = vmax.f32 %v7145_v56, %v7146_v53 }
 0x3c2   : > { %v7155_v40 = vrot.slane %v7154_v18, 2  ;;  %v7161_v58 = vmax.f32 %v7159_v47, %v7160_v8  ;;  %v7123_v34 = vmax.f32 %v7121_v57, %v7122_v3  ;;  %v7775_v37 = vsel %vm2623_vm12, %v7116_v23, -inf }
 0x3c3   : > { %v7130_v0 = vmax.f32 %v7128_v28, %v7129_v33  ;;  %v7136_v52 = vrot.slane %v7135_v12, 1  ;;  %v7776_v17 = vmax.f32 %v11520_v45, %v7775_v37  ;;  %v7142_v4 = vmax.f32 %v7140_v48, %v7141_v26 }
 0x3c4   : > { %v7148_v15 = vrot.slane %v7147_v46, 2  ;;  %v7156_v20 = vmax.f32 %v7154_v18, %v7155_v40  ;;  %v7778_v59 = vsel %vm2623_vm12, %v7123_v34, -inf  ;;  %v7162_v13 = vrot.slane %v7161_v58, 2 }
 0x3c5   : > { %v7137_v43 = vmax.f32 %v7135_v12, %v7136_v52  ;;  %v7781_v5 = vsel %vm2623_vm12, %v7130_v0, -inf  ;;  %v7779_v56 = vmax.f32 %v11523_v11, %v7778_v59  ;;  %v7143_v57 = vrot.slane %v7142_v4, 1 }
 0x3c6   : > { %v7782_v47 = vmax.f32 %v11526_v22, %v7781_v5  ;;  %v7149_v28 = vmax.f32 %v7147_v46, %v7148_v15  ;;  %v7157_v53 = vrot.slane %v7156_v20, 1  ;;  %v7163_v8 = vmax.f32 %v7161_v58, %v7162_v13 }
 0x3c7   : > { %v7784_v50 = vsel %vm2623_vm12, %v7137_v43, -inf  ;;  %v6105_v45 = vmax.f32 %v6015_v35, 0.0  ;;  %v8003_v12 = vsel %vm7982_vm6, %v7779_v56, %v7776_v17  ;;  %v7144_v40 = vmax.f32 %v7142_v4, %v7143_v57 }
 0x3c8   : > { %v7785_v48 = vmax.f32 %v11533_v54, %v7784_v50  ;;  %v7150_v18 = vrot.slane %v7149_v28, 1  ;;  %v8004_v23 = vsel %vm7984_vm15, %v7782_v47, %v8003_v12  ;;  %v7158_v3 = vmax.f32 %v7156_v20, %v7157_v53 }
 0x3c9   : > { %v7164_v33 = vrot.slane %v7163_v8, 1  ;;  %v6361_v11 = vcombine.high %v6105_v45, %v6105_v45  ;;  %v7787_v22 = vsel %vm2623_vm12, %v7144_v40, -inf  ;;  %v6368_v43 = vrot.slane %v6105_v45, %v11216_v1 }
 0x3ca   : > { %v7151_v26 = vmax.f32 %v7149_v28, %v7150_v18  ;;  %v8005_v46 = vsel %vm7986_vm0, %v7785_v48, %v8004_v23  ;;  %v7788_v35 = vmax.f32 %v11530_v30, %v7787_v22  ;;  %v11597_v54 = vsel %vm2623_vm12, %v7158_v3, -inf }
 0x3cb   : > { %v7165_v58 = vmax.f32 %v7163_v8, %v7164_v33  ;;  %12307 = vst [vmem:[#allocation20_spill] sm:$0xff] %v11597_v54  ;;  %v6375_v34 = vrot.slane %v6361_v11, %v11216_v1  ;;  %v6376_v37 = vcombine.high %v6368_v43, %v6368_v43  ;;  %v7166_v17 = vsel %vm6829_vm5, %v6368_v43, -inf }
 0x3cc   : > { %v11601_v0 = vsel %vm2623_vm12, %v7151_v26, -inf  ;;  %v11612_v30 = vsel %vm7988_vm1, %v7788_v35, %v8005_v46  ;;  %v7167_v59 = vrot.slane %v7166_v17, 4  ;;  %v6018_v56 = vadd.f32 %v11338_v60, %v11570_v25 }
 0x3cd   : > { %12308 = vst [vmem:[#allocation21_spill] sm:$0xff] %v11601_v0  ;;  %v11609_v15 = vsel %vm2623_vm12, %v7165_v58, -inf  ;;  %12310 = vst [vmem:[#allocation23_spill] sm:$0xff] %v11612_v30  ;;  %v6377_v20 = vcombine.high %v6375_v34, %v6375_v34  ;;  %v7173_v5 = vsel %vm6829_vm5, %v6376_v37, -inf  ;;  %v7180_v13 = vsel %vm6829_vm5, %v6375_v34, -inf }
 0x3ce   : > { %12309 = vst [vmem:[#allocation22_spill] sm:$0xff] %v11609_v15  ;;  %v7174_v47 = vrot.slane %v7173_v5, 4  ;;  %v7181_v57 = vrot.slane %v7180_v13, 4  ;;  %v8751_v50 = vadd.f32 %v11578_v10, %v11576_v19  ;;  %v7168_v53 = vmax.f32 %v7166_v17, %v7167_v59 }
 0x3cf   : > { %v7187_v28 = vsel %vm6829_vm5, %v6377_v20, -inf  ;;  %v6106_v45 = vmax.f32 %v6018_v56, 0.0  ;;  %v8754_v48 = vadd.f32 %v8753_v32, %v11580_v41 }
 0x3d0   : > { %v7188_v8 = vrot.slane %v7187_v28, 4  ;;  %v7175_v12 = vmax.f32 %v7173_v5, %v7174_v47  ;;  %v7182_v40 = vmax.f32 %v7180_v13, %v7181_v57  ;;  %v5862_v18 = vadd.f32 %v11554_v42, %v8751_v50 }
 0x3d1   : > { %v7169_v60 = vrot.slane %v7168_v53, 2  ;;  %v6378_v3 = vcombine.high %v6106_v45, %v6106_v45  ;;  %v6385_v33 = vrot.slane %v6106_v45, %v11216_v1  ;;  %v5865_v10 = vadd.f32 %v11554_v42, %v8754_v48 }
 0x3d2   : > { %v7189_v25 = vmax.f32 %v7187_v28, %v7188_v8  ;;  %v7176_v11 = vrot.slane %v7175_v12, 2  ;;  %v7183_v26 = vrot.slane %v7182_v40, 2  ;;  %v6023_v19 = vadd.f32 %v11332_v9, %v5862_v18 }
 0x3d3   : > { %v7170_v22 = vmax.f32 %v7168_v53, %v7169_v60  ;;  %v6392_v41 = vrot.slane %v6378_v3, %v11216_v1  ;;  %v6393_v46 = vcombine.high %v6385_v33, %v6385_v33  ;;  %v7194_v34 = vsel %vm6829_vm5, %v6385_v33, -inf }
 0x3d4   : > { %v7190_v32 = vrot.slane %v7189_v25, 2  ;;  %v7177_v58 = vmax.f32 %v7175_v12, %v7176_v11  ;;  %v7184_v35 = vmax.f32 %v7182_v40, %v7183_v26  ;;  %v6107_v37 = vmax.f32 %v6023_v19, 0.0 }
 0x3d5   : > { %v8755_v43 = vpop.f32.mrb[28].mxu1  ;;  %v7171_v20 = vrot.slane %v7170_v22, 1  ;;  %v6394_v5 = vcombine.high %v6392_v41, %v6392_v41  ;;  %v7195_v13 = vrot.slane %v7194_v34, 4  ;;  %v7201_v57 = vsel %vm6829_vm5, %v6393_v46, -inf }
 0x3d6   : > { %v8756_v17 = vpop.f32.mrb[29].mxu1  ;;  %v7191_v59 = vmax.f32 %v7189_v25, %v7190_v32  ;;  %v7178_v9 = vrot.slane %v7177_v58, 1  ;;  %v7185_v47 = vrot.slane %v7184_v35, 1  ;;  %v7208_v28 = vsel %vm6829_vm5, %v6392_v41, -inf }
 0x3d7   : > { %v11630_v56 = vpop.f32.mrb[30].mxu1  ;;  %v7172_v53 = vmax.f32 %v7170_v22, %v7171_v20  ;;  %v7196_v45 = vmax.f32 %v7194_v34, %v7195_v13  ;;  %v7202_v48 = vrot.slane %v7201_v57, 4  ;;  %v7209_v18 = vrot.slane %v7208_v28, 4 }
 0x3d8   : > { %v11634_v50 = vpop.f32.mrb[31].mxu1  ;;  %v7192_v8 = vrot.slane %v7191_v59, 1  ;;  %v7179_v12 = vmax.f32 %v7177_v58, %v7178_v9  ;;  %v7186_v40 = vmax.f32 %v7184_v35, %v7185_v47  ;;  %v7215_v60 = vsel %vm6829_vm5, %v6394_v5, -inf }
 0x3d9   : > { %v11638_v3 = vsel %vm2623_vm12, %v7172_v53, -inf  ;;  %v7197_v33 = vrot.slane %v7196_v45, 2  ;;  %v7203_v11 = vmax.f32 %v7201_v57, %v7202_v48  ;;  %v7210_v22 = vmax.f32 %v7208_v28, %v7209_v18 }
 0x3da   : > { %v7193_v25 = vmax.f32 %v7191_v59, %v7192_v8  ;;  %v11641_v26 = vsel %vm2623_vm12, %v7179_v12, -inf  ;;  %v11644_v19 = vsel %vm2623_vm12, %v7186_v40, -inf  ;;  %v7216_v32 = vrot.slane %v7215_v60, 4 }
 0x3db   : > { %v7198_v46 = vmax.f32 %v7196_v45, %v7197_v33  ;;  %v7204_v58 = vrot.slane %v7203_v11, 2  ;;  %v6395_v35 = vcombine.high %v6107_v37, %v6107_v37  ;;  %v7211_v34 = vrot.slane %v7210_v22, 2 }
 0x3dc   : > { %v11647_v41 = vsel %vm2623_vm12, %v7193_v25, -inf  ;;  %v7217_v20 = vmax.f32 %v7215_v60, %v7216_v32  ;;  %v6402_v59 = vrot.slane %v6107_v37, %v11216_v1  ;;  %v6026_v5 = vadd.f32 %v11336_v2, %v5865_v10 }
 0x3dd   : > { %v7199_v13 = vrot.slane %v7198_v46, 1  ;;  %v7205_v9 = vmax.f32 %v7203_v11, %v7204_v58  ;;  %v6409_v47 = vrot.slane %v6395_v35, %v11216_v1  ;;  %v8757_v57 = vadd.f32 %v8756_v17, %v8755_v43 }
 0x3de   : > { %v7212_v53 = vmax.f32 %v7210_v22, %v7211_v34  ;;  %v7218_v28 = vrot.slane %v7217_v20, 2  ;;  %v6410_v8 = vcombine.high %v6402_v59, %v6402_v59  ;;  %v7222_v48 = vsel %vm6829_vm5, %v6402_v59, -inf }
 0x3df   : > { %v7200_v12 = vmax.f32 %v7198_v46, %v7199_v13  ;;  %v7206_v45 = vrot.slane %v7205_v9, 1  ;;  %v6411_v40 = vcombine.high %v6409_v47, %v6409_v47  ;;  %v7223_v18 = vrot.slane %v7222_v48, 4 }
 0x3e0   : > { %v7213_v25 = vrot.slane %v7212_v53, 1  ;;  %v7219_v60 = vmax.f32 %v7217_v20, %v7218_v28  ;;  %v7229_v37 = vsel %vm6829_vm5, %v6410_v8, -inf  ;;  %v7236_v2 = vsel %vm6829_vm5, %v6409_v47, -inf }
 0x3e1   : > { %v7207_v10 = vmax.f32 %v7205_v9, %v7206_v45  ;;  %v11656_v33 = vsel %vm2623_vm12, %v7200_v12, -inf  ;;  %v7224_v43 = vmax.f32 %v7222_v48, %v7223_v18  ;;  %v7230_v17 = vrot.slane %v7229_v37, 4 }
 0x3e2   : > { %v7214_v11 = vmax.f32 %v7212_v53, %v7213_v25  ;;  %v7220_v22 = vrot.slane %v7219_v60, 1  ;;  %v7237_v32 = vrot.slane %v7236_v2, 4  ;;  %v7243_v46 = vsel %vm6829_vm5, %v6411_v40, -inf }
 0x3e3   : > { %v11660_v58 = vsel %vm2623_vm12, %v7207_v10, -inf  ;;  %v7225_v35 = vrot.slane %v7224_v43, 2  ;;  %v7231_v34 = vmax.f32 %v7229_v37, %v7230_v17  ;;  %v7244_v20 = vrot.slane %v7243_v46, 4 }
 0x3e4   : > { %12311 = vst [vmem:[#allocation24_spill] sm:$0xff] %v11660_v58  ;;  %v7221_v59 = vmax.f32 %v7219_v60, %v7220_v22  ;;  %v11663_v13 = vsel %vm2623_vm12, %v7214_v11, -inf  ;;  %v7238_v9 = vmax.f32 %v7236_v2, %v7237_v32  ;;  %v6108_v47 = vmax.f32 %v6026_v5, 0.0 }
 0x3e5   : > { %12312 = vst [vmem:[#allocation25_spill] sm:$0xff] %v11663_v13  ;;  %v7226_v28 = vmax.f32 %v7224_v43, %v7225_v35  ;;  %v7232_v8 = vrot.slane %v7231_v34, 2  ;;  %v7245_v48 = vmax.f32 %v7243_v46, %v7244_v20  ;;  %v5870_v53 = vadd.f32 %v11554_v42, %v8757_v57 }
 0x3e6   : > { %v11667_v12 = vsel %vm2623_vm12, %v7221_v59, -inf  ;;  %v7239_v45 = vrot.slane %v7238_v9, 2  ;;  %v6412_v40 = vcombine.high %v6108_v47, %v6108_v47  ;;  %v6419_v18 = vrot.slane %v6108_v47, %v11216_v1 }
 0x3e7   : > { %12313 = vst [vmem:[#allocation26_spill] sm:$0xff] %v11667_v12  ;;  %v7227_v25 = vrot.slane %v7226_v28, 1  ;;  %v7233_v37 = vmax.f32 %v7231_v34, %v7232_v8  ;;  %v7246_v60 = vrot.slane %v7245_v48, 2  ;;  %v6031_v10 = vadd.f32 %v11428_v21, %v5870_v53 }
 0x3e8   : > { %v7240_v17 = vmax.f32 %v7238_v9, %v7239_v45  ;;  %v6426_v5 = vrot.slane %v6412_v40, %v11216_v1  ;;  %v6427_v2 = vcombine.high %v6419_v18, %v6419_v18  ;;  %v7250_v43 = vsel %vm6829_vm5, %v6419_v18, -inf }
 0x3e9   : > { %v7228_v11 = vmax.f32 %v7226_v28, %v7227_v25  ;;  %v7234_v57 = vrot.slane %v7233_v37, 1  ;;  %v7247_v22 = vmax.f32 %v7245_v48, %v7246_v60  ;;  %v7251_v32 = vrot.slane %v7250_v43, 4 }
 0x3ea   : > { %v7241_v46 = vrot.slane %v7240_v17, 1  ;;  %v6428_v35 = vcombine.high %v6426_v5, %v6426_v5  ;;  %v7257_v20 = vsel %vm6829_vm5, %v6427_v2, -inf  ;;  %v7264_v59 = vsel %vm6829_vm5, %v6426_v5, -inf }
 0x3eb   : > { %v7235_v34 = vmax.f32 %v7233_v37, %v7234_v57  ;;  %v7248_v47 = vrot.slane %v7247_v22, 1  ;;  %v7799_v21 = vsel %vm2623_vm12, %v7228_v11, -inf  ;;  %v7252_v9 = vmax.f32 %v7250_v43, %v7251_v32 }
 0x3ec   : > { %v7242_v8 = vmax.f32 %v7240_v17, %v7241_v46  ;;  %v7800_v53 = vmax.f32 %v11638_v3, %v7799_v21  ;;  %v7258_v45 = vrot.slane %v7257_v20, 4  ;;  %v7265_v40 = vrot.slane %v7264_v59, 4 }
 0x3ed   : > { %v7249_v28 = vmax.f32 %v7247_v22, %v7248_v47  ;;  %v7802_v48 = vsel %vm2623_vm12, %v7235_v34, -inf  ;;  %v7253_v18 = vrot.slane %v7252_v9, 2  ;;  %v7271_v25 = vsel %vm6829_vm5, %v6428_v35, -inf }
 0x3ee   : > { %v7803_v60 = vmax.f32 %v11641_v26, %v7802_v48  ;;  %v7805_v5 = vsel %vm2623_vm12, %v7242_v8, -inf  ;;  %v7259_v37 = vmax.f32 %v7257_v20, %v7258_v45  ;;  %v7266_v2 = vmax.f32 %v7264_v59, %v7265_v40 }
 0x3ef   : > { %v7806_v11 = vmax.f32 %v11644_v19, %v7805_v5  ;;  %v7808_v17 = vsel %vm2623_vm12, %v7249_v28, -inf  ;;  %v7254_v43 = vmax.f32 %v7252_v9, %v7253_v18  ;;  %v7272_v3 = vrot.slane %v7271_v25, 4 }
 0x3f0   : > { %v7809_v57 = vmax.f32 %v11647_v41, %v7808_v17  ;;  %v8010_v22 = vsel %vm7982_vm6, %v7803_v60, %v7800_v53  ;;  %v7260_v32 = vrot.slane %v7259_v37, 2  ;;  %v7267_v46 = vrot.slane %v7266_v2, 2 }
 0x3f1   : > { %v8011_v35 = vsel %vm7984_vm15, %v7806_v11, %v8010_v22  ;;  %v7255_v34 = vrot.slane %v7254_v43, 1  ;;  %v7273_v26 = vmax.f32 %v7271_v25, %v7272_v3  ;;  %v6109_v47 = vmax.f32 %v6031_v10, 0.0 }
 0x3f2   : > { %v7261_v21 = vmax.f32 %v7259_v37, %v7260_v32  ;;  %v7268_v20 = vmax.f32 %v7266_v2, %v7267_v46  ;;  %v8012_v59 = vsel %vm7986_vm0, %v7809_v57, %v8011_v35  ;;  %v8760_v19 = vadd.f32 %v11634_v50, %v11630_v56 }
 0x3f3   : > { %v7256_v9 = vmax.f32 %v7254_v43, %v7255_v34  ;;  %v7274_v8 = vrot.slane %v7273_v26, 2  ;;  %v6429_v45 = vcombine.high %v6109_v47, %v6109_v47  ;;  %v6436_v41 = vrot.slane %v6109_v47, %v11216_v1 }
 0x3f4   : > { %v7262_v53 = vrot.slane %v7261_v21, 1  ;;  %v7269_v40 = vrot.slane %v7268_v20, 1  ;;  %v5873_v28 = vadd.f32 %v11554_v42, %v8760_v19 }
 0x3f5   : > { %v7275_v10 = vmax.f32 %v7273_v26, %v7274_v8  ;;  %v7811_v18 = vsel %vm2623_vm12, %v7256_v9, -inf  ;;  %v6443_v25 = vrot.slane %v6429_v45, %v11216_v1  ;;  %v6444_v60 = vcombine.high %v6436_v41, %v6436_v41 }
 0x3f6   : > { %v7263_v5 = vmax.f32 %v7261_v21, %v7262_v53  ;;  %v7270_v56 = vmax.f32 %v7268_v20, %v7269_v40  ;;  %v7812_v50 = vmax.f32 %v11656_v33, %v7811_v18  ;;  %v7278_v37 = vsel %vm6829_vm5, %v6436_v41, -inf }
 0x3f7   : > { %v7276_v2 = vrot.slane %v7275_v10, 1  ;;  %v6445_v11 = vcombine.high %v6443_v25, %v6443_v25  ;;  %v7279_v17 = vrot.slane %v7278_v37, 4  ;;  %v7285_v43 = vsel %vm6829_vm5, %v6444_v60, -inf }
 0x3f8   : > { %v11699_v3 = vsel %vm2623_vm12, %v7263_v5, -inf  ;;  %v11702_v57 = vsel %vm2623_vm12, %v7270_v56, -inf  ;;  %v11705_v22 = vsel %vm7988_vm1, %v7812_v50, %v8012_v59  ;;  %v7286_v32 = vrot.slane %v7285_v43, 4 }
 0x3f9   : > { %12314 = vst [vmem:[#allocation27_spill] sm:$0xff] %v11699_v3  ;;  %12315 = vst [vmem:[#allocation28_spill] sm:$0xff] %v11702_v57  ;;  %v7277_v46 = vmax.f32 %v7275_v10, %v7276_v2  ;;  %v7280_v34 = vmax.f32 %v7278_v37, %v7279_v17  ;;  %v7292_v21 = vsel %vm6829_vm5, %v6443_v25, -inf  ;;  %v7299_v20 = vsel %vm6829_vm5, %v6445_v11, -inf }
 0x3fa   : > { %12316 = vst [vmem:[#allocation29_spill] sm:$0xff] %v11705_v22  ;;  %v8761_v26 = vpop.f32.mrb[32].mxu1  ;;  %v7287_v47 = vmax.f32 %v7285_v43, %v7286_v32  ;;  %v6034_v19 = vadd.f32 %v11434_v16, %v5873_v28  ;;  %v7293_v45 = vrot.slane %v7292_v21, 4  ;;  %v7300_v41 = vrot.slane %v7299_v20, 4 }
 0x3fb   : > { %v8762_v9 = vpop.f32.mrb[33].mxu1  ;;  %v11715_v59 = vsel %vm2623_vm12, %v7277_v46, -inf  ;;  %v7281_v8 = vrot.slane %v7280_v34, 2 }
 0x3fc   : > { %12317 = vst [vmem:[#allocation30_spill] sm:$0xff] %v11715_v59  ;;  %v8764_v53 = vpop.f32.mrb[34].mxu1  ;;  %v7288_v40 = vrot.slane %v7287_v47, 2  ;;  %v6110_v10 = vmax.f32 %v6034_v19, 0.0  ;;  %v8763_v18 = vadd.f32 %v8762_v9, %v8761_v26  ;;  %v7294_v56 = vmax.f32 %v7292_v21, %v7293_v45  ;;  %v11722_v26 = vpop.f32.mrb[64].mxu0 }
 0x3fd   : > { %v8765_v60 = vpop.f32.mrb[35].mxu1  ;;  %v7282_v25 = vmax.f32 %v7280_v34, %v7281_v8  ;;  %v7301_v50 = vmax.f32 %v7299_v20, %v7300_v41  ;;  %v11726_v20 = vpop.f32.mrb[65].mxu0 }
 0x3fe   : > { %v8766_v37 = vadd.f32 %v8765_v60, %v8764_v53  ;;  %v7289_v16 = vmax.f32 %v7287_v47, %v7288_v40  ;;  %v6446_v28 = vcombine.high %v6110_v10, %v6110_v10  ;;  %v6453_v2 = vrot.slane %v6110_v10, %v11216_v1 }
 0x3ff   : > { %v5878_v11 = vadd.f32 %v11554_v42, %v8763_v18  ;;  %v7283_v17 = vrot.slane %v7282_v25, 1  ;;  %v7295_v43 = vrot.slane %v7294_v56, 2  ;;  %v7302_v32 = vrot.slane %v7301_v50, 2 }
 0x400   : > { %v5881_v46 = vadd.f32 %v11554_v42, %v8766_v37  ;;  %v7290_v19 = vrot.slane %v7289_v16, 1  ;;  %v6460_v9 = vrot.slane %v6446_v28, %v11216_v1  ;;  %v6461_v34 = vcombine.high %v6453_v2, %v6453_v2 }
 0x401   : > { %v7306_v21 = vsel %vm6829_vm5, %v6453_v2, -inf  ;;  %v7284_v47 = vmax.f32 %v7282_v25, %v7283_v17  ;;  %v7296_v8 = vmax.f32 %v7294_v56, %v7295_v43  ;;  %v7303_v45 = vmax.f32 %v7301_v50, %v7302_v32 }
 0x402   : > { %v7307_v41 = vrot.slane %v7306_v21, 4  ;;  %v8767_v53 = vpop.f32.mrb[36].mxu1  ;;  %v7291_v40 = vmax.f32 %v7289_v16, %v7290_v19  ;;  %v6462_v10 = vcombine.high %v6460_v9, %v6460_v9  ;;  %v7313_v18 = vsel %vm6829_vm5, %v6461_v34, -inf }
 0x403   : > { %v7320_v60 = vsel %vm6829_vm5, %v6460_v9, -inf  ;;  %v8768_v37 = vpop.f32.mrb[37].mxu1  ;;  %v7297_v5 = vrot.slane %v7296_v8, 1  ;;  %v7304_v35 = vrot.slane %v7303_v45, 1  ;;  %v11731_v28 = vsel %vm2623_vm12, %v7284_v47, -inf }
 0x404   : > { %v7308_v2 = vmax.f32 %v7306_v21, %v7307_v41  ;;  %v8770_v52 = vpop.f32.mrb[38].mxu1  ;;  %v11734_v25 = vsel %vm2623_vm12, %v7291_v40, -inf  ;;  %v7314_v56 = vrot.slane %v7313_v18, 4  ;;  %v7321_v50 = vrot.slane %v7320_v60, 4 }
 0x405   : > { %v7327_v16 = vsel %vm6829_vm5, %v6462_v10, -inf  ;;  %v8771_v17 = vpop.f32.mrb[39].mxu1  ;;  %v7298_v43 = vmax.f32 %v7296_v8, %v7297_v5  ;;  %v7305_v32 = vmax.f32 %v7303_v45, %v7304_v35  ;;  %v6039_v4 = vadd.f32 %v11424_v6, %v5878_v11 }
 0x406   : > { %v7309_v19 = vrot.slane %v7308_v2, 2  ;;  %v7328_v9 = vrot.slane %v7327_v16, 4  ;;  %v7315_v34 = vmax.f32 %v7313_v18, %v7314_v56  ;;  %v7322_v33 = vmax.f32 %v7320_v60, %v7321_v50 }
 0x407   : > { %v6042_v47 = vadd.f32 %v11430_v39, %v5881_v46  ;;  %v11740_v21 = vsel %vm2623_vm12, %v7298_v43, -inf  ;;  %v11743_v41 = vsel %vm2623_vm12, %v7305_v32, -inf  ;;  %v6111_v5 = vmax.f32 %v6039_v4, 0.0 }
 0x408   : > { %v7310_v40 = vmax.f32 %v7308_v2, %v7309_v19  ;;  %v7329_v48 = vmax.f32 %v7327_v16, %v7328_v9  ;;  %v7316_v10 = vrot.slane %v7315_v34, 2  ;;  %v7323_v23 = vrot.slane %v7322_v33, 2 }
 0x409   : > { %v6112_v35 = vmax.f32 %v6042_v47, 0.0  ;;  %v11745_v18 = vadd.f32 %v8768_v37, %v8767_v53  ;;  %v11747_v60 = vadd.f32 %v8771_v17, %v8770_v52  ;;  %v6463_v11 = vcombine.high %v6111_v5, %v6111_v5 }
 0x40a   : > { %v7311_v8 = vrot.slane %v7310_v40, 1  ;;  %v7330_v45 = vrot.slane %v7329_v48, 2  ;;  %v7317_v6 = vmax.f32 %v7315_v34, %v7316_v10  ;;  %v7324_v39 = vmax.f32 %v7322_v33, %v7323_v23  ;;  %v11757_v33 = vpop.f32.mrb[66].mxu0 }
 0x40b   : > { %v6470_v46 = vrot.slane %v6111_v5, %v11216_v1  ;;  %v6480_v43 = vcombine.high %v6112_v35, %v6112_v35  ;;  %v6487_v2 = vrot.slane %v6112_v35, %v11216_v1  ;;  %v6477_v4 = vrot.slane %v6463_v11, %v11216_v1  ;;  %v11759_v47 = vpop.f32.mrb[67].mxu0 }
 0x40c   : > { %v7312_v56 = vmax.f32 %v7310_v40, %v7311_v8  ;;  %v7331_v50 = vmax.f32 %v7329_v48, %v7330_v45  ;;  %v7318_v16 = vrot.slane %v7317_v6, 1  ;;  %v7325_v32 = vrot.slane %v7324_v39, 1 }
 0x40d   : > { %v6478_v19 = vcombine.high %v6470_v46, %v6470_v46  ;;  %v7334_v52 = vsel %vm6829_vm5, %v6470_v46, -inf  ;;  %v6494_v23 = vrot.slane %v6480_v43, %v11216_v1  ;;  %v6479_v17 = vcombine.high %v6477_v4, %v6477_v4 }
 0x40e   : > { %v7332_v9 = vrot.slane %v7331_v50, 1  ;;  %v11753_v53 = vsel %vm2623_vm12, %v7312_v56, -inf  ;;  %v7319_v37 = vmax.f32 %v7317_v6, %v7318_v16  ;;  %v7326_v48 = vmax.f32 %v7324_v39, %v7325_v32 }
 0x40f   : > { %v7335_v34 = vrot.slane %v7334_v52, 4  ;;  %v7341_v10 = vsel %vm6829_vm5, %v6478_v19, -inf  ;;  %v7348_v5 = vsel %vm6829_vm5, %v6477_v4, -inf  ;;  %v6495_v35 = vcombine.high %v6487_v2, %v6487_v2 }
 0x410   : > { %v7333_v40 = vmax.f32 %v7331_v50, %v7332_v9  ;;  %v11764_v8 = vsel %vm2623_vm12, %v7319_v37, -inf  ;;  %v11767_v45 = vsel %vm2623_vm12, %v7326_v48, -inf  ;;  %v7342_v46 = vrot.slane %v7341_v10, 4 }
 0x411   : > { %12318 = vst [vmem:[#allocation31_spill] sm:$0xff] %v11764_v8  ;;  %12319 = vst [vmem:[#allocation32_spill] sm:$0xff] %v11767_v45  ;;  %v7336_v11 = vmax.f32 %v7334_v52, %v7335_v34  ;;  %v7349_v39 = vrot.slane %v7348_v5, 4  ;;  %v7355_v56 = vsel %vm6829_vm5, %v6479_v17, -inf  ;;  %v6496_v50 = vcombine.high %v6494_v23, %v6494_v23 }
 0x412   : > { %v11770_v6 = vsel %vm2623_vm12, %v7333_v40, -inf  ;;  %v7343_v16 = vmax.f32 %v7341_v10, %v7342_v46  ;;  %v7356_v32 = vrot.slane %v7355_v56, 4  ;;  %v7362_v4 = vsel %vm6829_vm5, %v6487_v2, -inf }
 0x413   : > { %12320 = vst [vmem:[#allocation33_spill] sm:$0xff] %v11770_v6  ;;  %v7337_v43 = vrot.slane %v7336_v11, 2  ;;  %v7350_v19 = vmax.f32 %v7348_v5, %v7349_v39  ;;  %v7363_v9 = vrot.slane %v7362_v4, 4  ;;  %v7369_v37 = vsel %vm6829_vm5, %v6495_v35, -inf }
 0x414   : > { %v7376_v48 = vsel %vm6829_vm5, %v6494_v23, -inf  ;;  %v7344_v34 = vrot.slane %v7343_v16, 2  ;;  %v7357_v15 = vmax.f32 %v7355_v56, %v7356_v32  ;;  %v7370_v40 = vrot.slane %v7369_v37, 4 }
 0x415   : > { %v7338_v52 = vmax.f32 %v7336_v11, %v7337_v43  ;;  %v7351_v62 = vrot.slane %v7350_v19, 2  ;;  %v7364_v57 = vmax.f32 %v7362_v4, %v7363_v9  ;;  %v7377_v13 = vrot.slane %v7376_v48, 4 }
 0x416   : > { %v7383_v17 = vsel %vm6829_vm5, %v6496_v50, -inf  ;;  %v7345_v10 = vmax.f32 %v7343_v16, %v7344_v34  ;;  %v7358_v46 = vrot.slane %v7357_v15, 2  ;;  %v7371_v36 = vmax.f32 %v7369_v37, %v7370_v40 }
 0x417   : > { %v7339_v54 = vrot.slane %v7338_v52, 1  ;;  %v7352_v2 = vmax.f32 %v7350_v19, %v7351_v62  ;;  %v7365_v5 = vrot.slane %v7364_v57, 2  ;;  %v7378_v39 = vmax.f32 %v7376_v48, %v7377_v13 }
 0x418   : > { %v7384_v3 = vrot.slane %v7383_v17, 4  ;;  %v7346_v58 = vrot.slane %v7345_v10, 1  ;;  %v7359_v23 = vmax.f32 %v7357_v15, %v7358_v46  ;;  %v7372_v11 = vrot.slane %v7371_v36, 2 }
 0x419   : > { %v7340_v35 = vmax.f32 %v7338_v52, %v7339_v54  ;;  %v7353_v43 = vrot.slane %v7352_v2, 1  ;;  %v7366_v56 = vmax.f32 %v7364_v57, %v7365_v5  ;;  %v7379_v32 = vrot.slane %v7378_v39, 2 }
 0x41a   : > { %v7385_v22 = vmax.f32 %v7383_v17, %v7384_v3  ;;  %v7347_v9 = vmax.f32 %v7345_v10, %v7346_v58  ;;  %v7360_v0 = vrot.slane %v7359_v23, 1  ;;  %v7373_v16 = vmax.f32 %v7371_v36, %v7372_v11 }
 0x41b   : > { %v8773_v4 = vpop.f32.mrb[40].mxu1  ;;  %v7823_v50 = vsel %vm2623_vm12, %v7340_v35, -inf  ;;  %v7354_v37 = vmax.f32 %v7352_v2, %v7353_v43  ;;  %v7367_v13 = vrot.slane %v7366_v56, 1  ;;  %v7380_v19 = vmax.f32 %v7378_v39, %v7379_v32 }
 0x41c   : > { %v8774_v34 = vpop.f32.mrb[41].mxu1  ;;  %v7824_v62 = vmax.f32 %v11731_v28, %v7823_v50  ;;  %v7361_v48 = vmax.f32 %v7359_v23, %v7360_v0  ;;  %v7826_v15 = vsel %vm2623_vm12, %v7347_v9, -inf  ;;  %v7374_v52 = vrot.slane %v7373_v16, 1 }
 0x41d   : > { %v8776_v54 = vpop.f32.mrb[42].mxu1  ;;  %v7386_v57 = vrot.slane %v7385_v22, 2  ;;  %v7827_v3 = vmax.f32 %v11734_v25, %v7826_v15  ;;  %v7829_v58 = vsel %vm2623_vm12, %v7354_v37, -inf  ;;  %v7368_v17 = vmax.f32 %v7366_v56, %v7367_v13 }
 0x41e   : > { %v8777_v40 = vpop.f32.mrb[43].mxu1  ;;  %v7381_v10 = vrot.slane %v7380_v19, 1  ;;  %v7830_v36 = vmax.f32 %v11740_v21, %v7829_v58  ;;  %v7832_v46 = vsel %vm2623_vm12, %v7361_v48, -inf  ;;  %v7375_v28 = vmax.f32 %v7373_v16, %v7374_v52 }
 0x41f   : > { %v7387_v2 = vmax.f32 %v7385_v22, %v7386_v57  ;;  %v7833_v5 = vmax.f32 %v11743_v41, %v7832_v46  ;;  %v8017_v0 = vsel %vm7982_vm6, %v7827_v3, %v7824_v62  ;;  %v7835_v35 = vsel %vm2623_vm12, %v7368_v17, -inf }
 0x420   : > { %v7382_v39 = vmax.f32 %v7380_v19, %v7381_v10  ;;  %v8018_v23 = vsel %vm7984_vm15, %v7830_v36, %v8017_v0  ;;  %v7836_v11 = vmax.f32 %v11753_v53, %v7835_v35  ;;  %v11790_v43 = vsel %vm2623_vm12, %v7375_v28, -inf }
 0x421   : > { %v7388_v25 = vrot.slane %v7387_v2, 1  ;;  %12321 = vst [vmem:[#allocation34_spill] sm:$0xff] %v11790_v43  ;;  %v8019_v41 = vsel %vm7986_vm0, %v7833_v5, %v8018_v23  ;;  %v5886_v56 = vadd.f32 %v11554_v42, %v11745_v18  ;;  %v5889_v16 = vadd.f32 %v11554_v42, %v11747_v60 }
 0x422   : > { %v11795_v22 = vsel %vm2623_vm12, %v7382_v39, -inf  ;;  %v11803_v53 = vsel %vm7988_vm1, %v7836_v11, %v8019_v41  ;;  %v8775_v13 = vadd.f32 %v8774_v34, %v8773_v4  ;;  %v8778_v19 = vadd.f32 %v8777_v40, %v8776_v54 }
 0x423   : > { %12322 = vst [vmem:[#allocation35_spill] sm:$0xff] %v11795_v22  ;;  %v8779_v32 = vpop.f32.mrb[44].mxu1  ;;  %v7389_v9 = vmax.f32 %v7387_v2, %v7388_v25  ;;  %12323 = vst [vmem:[#allocation36_spill] sm:$0xff] %v11803_v53  ;;  %v6047_v62 = vadd.f32 %v11454_v63, %v5886_v56  ;;  %v6050_v52 = vadd.f32 %v11460_v61, %v5889_v16 }
 0x424   : > { %v8780_v37 = vpop.f32.mrb[45].mxu1  ;;  %v5894_v60 = vadd.f32 %v11554_v42, %v8775_v13  ;;  %v5897_v17 = vadd.f32 %v11554_v42, %v8778_v19  ;;  %v12325_v61 = vmax.f32 %v11314_v14, %v11354_v51 }
 0x425   : > { %v8781_v48 = vadd.f32 %v8780_v37, %v8779_v32  ;;  %v8782_v15 = vpop.f32.mrb[46].mxu1  ;;  %v11809_v18 = vsel %vm2623_vm12, %v7389_v9, -inf  ;;  %v6113_v58 = vmax.f32 %v6047_v62, 0.0  ;;  %v6114_v4 = vmax.f32 %v6050_v52, 0.0 }
 0x426   : > { %12324 = vst [vmem:[#allocation37_spill] sm:$0xff] %v11809_v18  ;;  %v8783_v57 = vpop.f32.mrb[47].mxu1  ;;  %v11824_v40 = vsel %vm7990_vm2, %v12325_v61, %v11369_v49  ;;  %v6055_v46 = vadd.f32 %v11450_v29, %v5894_v60  ;;  %v11829_v28 = vadd.f32 %v11456_v38, %v5897_v17 }
 0x427   : > { %v5902_v63 = vadd.f32 %v11554_v42, %v8781_v48  ;;  %v8784_v34 = vadd.f32 %v8783_v57, %v8782_v15  ;;  %v6497_v10 = vcombine.high %v6113_v58, %v6113_v58  ;;  %v6504_v36 = vrot.slane %v6113_v58, %v11216_v1 }
 0x428   : > { %v6514_v2 = vcombine.high %v6114_v4, %v6114_v4  ;;  %v6521_v5 = vrot.slane %v6114_v4, %v11216_v1  ;;  %v11840_v35 = vmax.f32 %v6055_v46, 0.0 }
 0x429   : > { %v11833_v0 = vadd.f32 %v11557_v44, %v5902_v63  ;;  %v11836_v39 = vadd.f32 %v11554_v42, %v8784_v34  ;;  %v6511_v14 = vrot.slane %v6497_v10, %v11216_v1  ;;  %v6512_v51 = vcombine.high %v6504_v36, %v6504_v36 }
 0x42a   : > { %v7390_v49 = vsel %vm6829_vm5, %v6504_v36, -inf  ;;  %v6528_v38 = vrot.slane %v6514_v2, %v11216_v1  ;;  %v6529_v23 = vcombine.high %v6521_v5, %v6521_v5  ;;  %v7418_v25 = vsel %vm6829_vm5, %v6521_v5, -inf }
 0x42b   : > { %v7391_v29 = vrot.slane %v7390_v49, 4  ;;  %v6513_v11 = vcombine.high %v6511_v14, %v6511_v14  ;;  %v7397_v44 = vsel %vm6829_vm5, %v6512_v51, -inf  ;;  %v7404_v41 = vsel %vm6829_vm5, %v6511_v14, -inf }
 0x42c   : > { %v7419_v42 = vrot.slane %v7418_v25, 4  ;;  %v7398_v9 = vrot.slane %v7397_v44, 4  ;;  %v7405_v16 = vrot.slane %v7404_v41, 4  ;;  %v6530_v37 = vcombine.high %v6528_v38, %v6528_v38 }
 0x42d   : > { %v11846_v56 = vpop.f32.mrb[48].mxu1  ;;  %v7392_v32 = vmax.f32 %v7390_v49, %v7391_v29  ;;  %v7411_v13 = vsel %vm6829_vm5, %v6513_v11, -inf  ;;  %v7425_v48 = vsel %vm6829_vm5, %v6529_v23, -inf  ;;  %v7432_v15 = vsel %vm6829_vm5, %v6528_v38, -inf }
 0x42e   : > { %v11848_v62 = vpop.f32.mrb[49].mxu1  ;;  %v7420_v19 = vmax.f32 %v7418_v25, %v7419_v42  ;;  %v7399_v58 = vmax.f32 %v7397_v44, %v7398_v9  ;;  %v7406_v60 = vmax.f32 %v7404_v41, %v7405_v16  ;;  %v7412_v17 = vrot.slane %v7411_v13, 4 }
 0x42f   : > { %v11853_v52 = vpop.f32.mrb[50].mxu1  ;;  %v7393_v57 = vrot.slane %v7392_v32, 2  ;;  %v7426_v34 = vrot.slane %v7425_v48, 4  ;;  %v7433_v61 = vrot.slane %v7432_v15, 4  ;;  %v7439_v10 = vsel %vm6829_vm5, %v6530_v37, -inf }
 0x430   : > { %v11855_v63 = vpop.f32.mrb[51].mxu1  ;;  %v7421_v4 = vrot.slane %v7420_v19, 2  ;;  %v7400_v46 = vrot.slane %v7399_v58, 2  ;;  %v7407_v2 = vrot.slane %v7406_v60, 2  ;;  %v7413_v5 = vmax.f32 %v7411_v13, %v7412_v17 }
 0x431   : > { %v7394_v36 = vmax.f32 %v7392_v32, %v7393_v57  ;;  %v7427_v51 = vmax.f32 %v7425_v48, %v7426_v34  ;;  %v7434_v49 = vmax.f32 %v7432_v15, %v7433_v61  ;;  %v7440_v29 = vrot.slane %v7439_v10, 4 }
 0x432   : > { %v7422_v14 = vmax.f32 %v7420_v19, %v7421_v4  ;;  %v7401_v23 = vmax.f32 %v7399_v58, %v7400_v46  ;;  %v7408_v25 = vmax.f32 %v7406_v60, %v7407_v2  ;;  %v7414_v11 = vrot.slane %v7413_v5, 2 }
 0x433   : > { %v7395_v38 = vrot.slane %v7394_v36, 1  ;;  %v7428_v41 = vrot.slane %v7427_v51, 2  ;;  %v7435_v42 = vrot.slane %v7434_v49, 2  ;;  %v7441_v9 = vmax.f32 %v7439_v10, %v7440_v29 }
 0x434   : > { %v7423_v44 = vrot.slane %v7422_v14, 1  ;;  %v7402_v54 = vrot.slane %v7401_v23, 1  ;;  %v7409_v50 = vrot.slane %v7408_v25, 1  ;;  %v7415_v37 = vmax.f32 %v7413_v5, %v7414_v11 }
 0x435   : > { %v7396_v16 = vmax.f32 %v7394_v36, %v7395_v38  ;;  %v7429_v57 = vmax.f32 %v7427_v51, %v7428_v41  ;;  %v7436_v21 = vmax.f32 %v7434_v49, %v7435_v42  ;;  %v7442_v13 = vrot.slane %v7441_v9, 2 }
 0x436   : > { %v7424_v32 = vmax.f32 %v7422_v14, %v7423_v44  ;;  %v7403_v48 = vmax.f32 %v7401_v23, %v7402_v54  ;;  %v7410_v15 = vmax.f32 %v7408_v25, %v7409_v50  ;;  %v7416_v17 = vrot.slane %v7415_v37, 1 }
 0x437   : > { %v11858_v19 = vpop.f32.mrb[52].mxu1  ;;  %v11861_v58 = vsel %vm2623_vm12, %v7396_v16, -inf  ;;  %v7430_v4 = vrot.slane %v7429_v57, 1  ;;  %v7437_v34 = vrot.slane %v7436_v21, 1  ;;  %v7443_v61 = vmax.f32 %v7441_v9, %v7442_v13 }
 0x438   : > { %v11863_v60 = vpop.f32.mrb[53].mxu1  ;;  %v11866_v10 = vsel %vm2623_vm12, %v7424_v32, -inf  ;;  %v7417_v46 = vmax.f32 %v7415_v37, %v7416_v17  ;;  %v11871_v2 = vsel %vm2623_vm12, %v7403_v48, -inf  ;;  %v11874_v50 = vsel %vm2623_vm12, %v7410_v15, -inf }
 0x439   : > { %v11868_v36 = vpop.f32.mrb[54].mxu1  ;;  %v6531_v54 = vcombine.high %v11840_v35, %v11840_v35  ;;  %v7431_v14 = vmax.f32 %v7429_v57, %v7430_v4  ;;  %v7438_v51 = vmax.f32 %v7436_v21, %v7437_v34  ;;  %v7444_v49 = vrot.slane %v7443_v61, 1 }
 0x43a   : > { %v11878_v5 = vpop.f32.mrb[55].mxu1  ;;  %v6538_v29 = vrot.slane %v11840_v35, %v11216_v1  ;;  %v11883_v38 = vsel %vm2623_vm12, %v7417_v46, -inf  ;;  %v6116_v25 = vmax.f32 %v11829_v28, 0.0  ;;  %v11888_v11 = vmax.f32 %v11833_v0, 0.0 }
 0x43b   : > { %v6545_v23 = vrot.slane %v6531_v54, %v11216_v1  ;;  %v7445_v44 = vmax.f32 %v7443_v61, %v7444_v49  ;;  %v11891_v41 = vsel %vm2623_vm12, %v7431_v14, -inf  ;;  %v11894_v21 = vsel %vm2623_vm12, %v7438_v51, -inf }
 0x43c   : > { %v6546_v42 = vcombine.high %v6538_v29, %v6538_v29  ;;  %v7446_v35 = vsel %vm6829_vm5, %v6538_v29, -inf  ;;  %v6548_v37 = vcombine.high %v6116_v25, %v6116_v25  ;;  %v6555_v15 = vrot.slane %v6116_v25, %v11216_v1 }
 0x43d   : > { %v6547_v9 = vcombine.high %v6545_v23, %v6545_v23  ;;  %v7460_v16 = vsel %vm6829_vm5, %v6545_v23, -inf  ;;  %v11899_v32 = vsel %vm2623_vm12, %v7445_v44, -inf  ;;  %v7447_v28 = vrot.slane %v7446_v35, 4 }
 0x43e   : > { %v7453_v0 = vsel %vm6829_vm5, %v6546_v42, -inf  ;;  %v7461_v57 = vrot.slane %v7460_v16, 4  ;;  %v6562_v17 = vrot.slane %v6548_v37, %v11216_v1  ;;  %v6565_v46 = vcombine.high %v11888_v11, %v11888_v11 }
 0x43f   : > { %v7454_v13 = vrot.slane %v7453_v0, 4  ;;  %v7467_v48 = vsel %vm6829_vm5, %v6547_v9, -inf  ;;  %v7448_v4 = vmax.f32 %v7446_v35, %v7447_v28  ;;  %v6563_v14 = vcombine.high %v6555_v15, %v6555_v15 }
 0x440   : > { %v7462_v34 = vmax.f32 %v7460_v16, %v7461_v57  ;;  %v7468_v61 = vrot.slane %v7467_v48, 4  ;;  %v6564_v51 = vcombine.high %v6562_v17, %v6562_v17  ;;  %v7474_v49 = vsel %vm6829_vm5, %v6555_v15, -inf }
 0x441   : > { %v7455_v54 = vmax.f32 %v7453_v0, %v7454_v13  ;;  %v7449_v29 = vrot.slane %v7448_v4, 2  ;;  %v7475_v42 = vrot.slane %v7474_v49, 4  ;;  %v7481_v37 = vsel %vm6829_vm5, %v6563_v14, -inf }
 0x442   : > { %v7463_v23 = vrot.slane %v7462_v34, 2  ;;  %v7469_v44 = vmax.f32 %v7467_v48, %v7468_v61  ;;  %v7488_v35 = vsel %vm6829_vm5, %v6562_v17, -inf  ;;  %v7495_v16 = vsel %vm6829_vm5, %v6564_v51, -inf }
 0x443   : > { %v11908_v9 = vpop.f32.mrb[56].mxu1  ;;  %v7456_v25 = vrot.slane %v7455_v54, 2  ;;  %v7450_v0 = vmax.f32 %v7448_v4, %v7449_v29  ;;  %v7476_v3 = vmax.f32 %v7474_v49, %v7475_v42  ;;  %v7482_v48 = vrot.slane %v7481_v37, 4 }
 0x444   : > { %v11913_v28 = vpop.f32.mrb[57].mxu1  ;;  %v7464_v57 = vmax.f32 %v7462_v34, %v7463_v23  ;;  %v7470_v13 = vrot.slane %v7469_v44, 2  ;;  %v7489_v61 = vrot.slane %v7488_v35, 4  ;;  %v7496_v6 = vrot.slane %v7495_v16, 4 }
 0x445   : > { %v11915_v15 = vpop.f32.mrb[58].mxu1  ;;  %v7457_v18 = vmax.f32 %v7455_v54, %v7456_v25  ;;  %v7451_v45 = vrot.slane %v7450_v0, 1  ;;  %v7477_v17 = vrot.slane %v7476_v3, 2  ;;  %v7483_v51 = vmax.f32 %v7481_v37, %v7482_v48 }
 0x446   : > { %v11917_v22 = vpop.f32.mrb[59].mxu1  ;;  %v7465_v14 = vrot.slane %v7464_v57, 1  ;;  %v7471_v43 = vmax.f32 %v7469_v44, %v7470_v13  ;;  %v7490_v53 = vmax.f32 %v7488_v35, %v7489_v61  ;;  %v7497_v59 = vmax.f32 %v7495_v16, %v7496_v6 }
 0x447   : > { %v7458_v8 = vrot.slane %v7457_v18, 1  ;;  %v7452_v4 = vmax.f32 %v7450_v0, %v7451_v45  ;;  %v7478_v49 = vmax.f32 %v7476_v3, %v7477_v17  ;;  %v7484_v42 = vrot.slane %v7483_v51, 2 }
 0x448   : > { %v7466_v34 = vmax.f32 %v7464_v57, %v7465_v14  ;;  %v7472_v29 = vrot.slane %v7471_v43, 1  ;;  %v7491_v54 = vrot.slane %v7490_v53, 2  ;;  %v7498_v25 = vrot.slane %v7497_v59, 2 }
 0x449   : > { %v7459_v23 = vmax.f32 %v7457_v18, %v7458_v8  ;;  %v7847_v55 = vsel %vm2623_vm12, %v7452_v4, -inf  ;;  %v7479_v24 = vrot.slane %v7478_v49, 1  ;;  %v7485_v45 = vmax.f32 %v7483_v51, %v7484_v42 }
 0x44a   : > { %v7473_v12 = vmax.f32 %v7471_v43, %v7472_v29  ;;  %v7853_v30 = vsel %vm2623_vm12, %v7466_v34, -inf  ;;  %v7848_v44 = vmax.f32 %v11861_v58, %v7847_v55  ;;  %v7492_v3 = vmax.f32 %v7490_v53, %v7491_v54 }
 0x44b   : > { %v7850_v37 = vsel %vm2623_vm12, %v7459_v23, -inf  ;;  %v7854_v6 = vmax.f32 %v11874_v50, %v7853_v30  ;;  %v7480_v18 = vmax.f32 %v7478_v49, %v7479_v24  ;;  %v7486_v16 = vrot.slane %v7485_v45, 1 }
 0x44c   : > { %v7851_v35 = vmax.f32 %v11871_v2, %v7850_v37  ;;  %v7856_v8 = vsel %vm2623_vm12, %v7473_v12, -inf  ;;  %v7499_v0 = vmax.f32 %v7497_v59, %v7498_v25  ;;  %v6572_v57 = vrot.slane %v11888_v11, %v11216_v1 }
 0x44d   : > { %v7857_v43 = vmax.f32 %v11883_v38, %v7856_v8  ;;  %v7493_v58 = vrot.slane %v7492_v3, 1  ;;  %v7859_v13 = vsel %vm2623_vm12, %v7480_v18, -inf  ;;  %v6579_v30 = vrot.slane %v6565_v46, %v11216_v1 }
 0x44e   : > { %v8024_v55 = vsel %vm7982_vm6, %v7851_v35, %v7848_v44  ;;  %v7487_v50 = vmax.f32 %v7485_v45, %v7486_v16  ;;  %v7500_v12 = vrot.slane %v7499_v0, 1  ;;  %v7860_v24 = vmax.f32 %v11866_v10, %v7859_v13  ;;  %v12326_v44 = vld [vmem:[#allocation19_spill] sm:$0xff] }
 0x44f   : > { %v8025_v2 = vsel %vm7984_vm15, %v7854_v6, %v8024_v55  ;;  %v7494_v53 = vmax.f32 %v7492_v3, %v7493_v58  ;;  %v6580_v59 = vcombine.high %v6572_v57, %v6572_v57  ;;  %v6581_v48 = vcombine.high %v6579_v30, %v6579_v30 }
 0x450   : > { %v8026_v38 = vsel %vm7986_vm0, %v7857_v43, %v8025_v2  ;;  %v7501_v61 = vmax.f32 %v7499_v0, %v7500_v12  ;;  %v11936_v11 = vsel %vm2623_vm12, %v7487_v50, -inf  ;;  %v7502_v46 = vsel %vm6829_vm5, %v6572_v57, -inf  ;;  %v12328_v2 = vld [vmem:[#allocation18_spill] sm:$0xff] }
 0x451   : > { %v11939_v14 = vsel %vm7988_vm1, %v7860_v24, %v8026_v38  ;;  %v7863_v17 = vmax.f32 %v11891_v41, %v11936_v11  ;;  %v11945_v51 = vsel %vm2623_vm12, %v7494_v53, -inf  ;;  %v7503_v10 = vrot.slane %v7502_v46, 4 }
 0x452   : > { %v7509_v4 = vsel %vm6829_vm5, %v6580_v59, -inf  ;;  %v7866_v34 = vmax.f32 %v11894_v21, %v11945_v51  ;;  %v11951_v29 = vsel %vm2623_vm12, %v7501_v61, -inf  ;;  %v7516_v23 = vsel %vm6829_vm5, %v6579_v30, -inf }
 0x453   : > { %v7510_v49 = vrot.slane %v7509_v4, 4  ;;  %v7504_v42 = vmax.f32 %v7502_v46, %v7503_v10  ;;  %v7517_v54 = vrot.slane %v7516_v23, 4  ;;  %v7523_v25 = vsel %vm6829_vm5, %v6581_v48, -inf }
 0x454   : > { %v6066_v37 = vadd.f32 %v12326_v44, %v11836_v39  ;;  %v7524_v45 = vrot.slane %v7523_v25, 4  ;;  %v8787_v35 = vadd.f32 %v11848_v62, %v11846_v56  ;;  %v8790_v8 = vadd.f32 %v11855_v63, %v11853_v52  ;;  %v11968_v39 = vld [vmem:[%s12254_s4] ss:$0 sm:$0xff] }
 0x455   : > { %v7511_v6 = vmax.f32 %v7509_v4, %v7510_v49  ;;  %v7505_v18 = vrot.slane %v7504_v42, 2  ;;  %v7518_v3 = vmax.f32 %v7516_v23, %v7517_v54  ;;  %v11963_v16 = vadd.f32 %v11863_v60, %v11858_v19  ;;  %v12327_v19 = vld [vmem:[#allocation16_spill] sm:$0xff] }
 0x456   : > { %v6118_v43 = vmax.f32 %v6066_v37, 0.0  ;;  %v7525_v57 = vmax.f32 %v7523_v25, %v7524_v45  ;;  %v5910_v55 = vadd.f32 %v11968_v39, %v8787_v35  ;;  %v5913_v56 = vadd.f32 %v11968_v39, %v8790_v8 }
 0x457   : > { %v7512_v0 = vrot.slane %v7511_v6, 2  ;;  %v7506_v62 = vmax.f32 %v7504_v42, %v7505_v18  ;;  %v7519_v52 = vrot.slane %v7518_v3, 2 }
 0x458   : > { %v6582_v63 = vcombine.high %v6118_v43, %v6118_v43  ;;  %v6589_v58 = vrot.slane %v6118_v43, %v11216_v1  ;;  %v7526_v30 = vrot.slane %v7525_v57, 2  ;;  %v6071_v60 = vadd.f32 %v12327_v19, %v5910_v55 }
 0x459   : > { %v7513_v13 = vmax.f32 %v7511_v6, %v7512_v0  ;;  %v6074_v50 = vadd.f32 %v12328_v2, %v5913_v56  ;;  %v7507_v12 = vrot.slane %v7506_v62, 1  ;;  %v7520_v24 = vmax.f32 %v7518_v3, %v7519_v52 }
 0x45a   : > { %v6596_v53 = vrot.slane %v6582_v63, %v11216_v1  ;;  %v6597_v38 = vcombine.high %v6589_v58, %v6589_v58  ;;  %v7527_v48 = vmax.f32 %v7525_v57, %v7526_v30  ;;  %v7530_v61 = vsel %vm6829_vm5, %v6589_v58, -inf }
 0x45b   : > { %v7514_v59 = vrot.slane %v7513_v13, 1  ;;  %v6119_v46 = vmax.f32 %v6071_v60, 0.0  ;;  %v7508_v10 = vmax.f32 %v7506_v62, %v7507_v12  ;;  %v7521_v4 = vrot.slane %v7520_v24, 1 }
 0x45c   : > { %v6598_v49 = vcombine.high %v6596_v53, %v6596_v53  ;;  %v7531_v23 = vrot.slane %v7530_v61, 4  ;;  %v7528_v54 = vrot.slane %v7527_v48, 1  ;;  %v7537_v25 = vsel %vm6829_vm5, %v6597_v38, -inf }
 0x45d   : > { %v7515_v42 = vmax.f32 %v7513_v13, %v7514_v59  ;;  %v7544_v44 = vsel %vm6829_vm5, %v6596_v53, -inf  ;;  %v7522_v37 = vmax.f32 %v7520_v24, %v7521_v4  ;;  %v11980_v6 = vsel %vm2623_vm12, %v7508_v10, -inf }
 0x45e   : > { %v7532_v45 = vmax.f32 %v7530_v61, %v7531_v23  ;;  %v7538_v35 = vrot.slane %v7537_v25, 4  ;;  %v7529_v8 = vmax.f32 %v7527_v48, %v7528_v54  ;;  %v7545_v3 = vrot.slane %v7544_v44, 4 }
 0x45f   : > { %v11983_v18 = vsel %vm2623_vm12, %v7515_v42, -inf  ;;  %v7551_v43 = vsel %vm6829_vm5, %v6598_v49, -inf  ;;  %v11987_v0 = vsel %vm2623_vm12, %v7522_v37, -inf  ;;  %v6599_v63 = vcombine.high %v6119_v46, %v6119_v46 }
 0x460   : > { %v7533_v57 = vrot.slane %v7532_v45, 2  ;;  %v7539_v55 = vmax.f32 %v7537_v25, %v7538_v35  ;;  %v7552_v56 = vrot.slane %v7551_v43, 4  ;;  %v11990_v62 = vsel %vm2623_vm12, %v7529_v8, -inf }
 0x461   : > { %v7546_v52 = vmax.f32 %v7544_v44, %v7545_v3  ;;  %v6606_v58 = vrot.slane %v6119_v46, %v11216_v1  ;;  %v6120_v60 = vmax.f32 %v6074_v50, 0.0  ;;  %v6613_v12 = vrot.slane %v6599_v63, %v11216_v1 }
 0x462   : > { %v7534_v13 = vmax.f32 %v7532_v45, %v7533_v57  ;;  %v7540_v30 = vrot.slane %v7539_v55, 2  ;;  %v7553_v19 = vmax.f32 %v7551_v43, %v7552_v56 }
 0x463   : > { %v7547_v2 = vrot.slane %v7546_v52, 2  ;;  %v6614_v24 = vcombine.high %v6606_v58, %v6606_v58  ;;  %v7558_v53 = vsel %vm6829_vm5, %v6606_v58, -inf  ;;  %v6615_v4 = vcombine.high %v6613_v12, %v6613_v12 }
 0x464   : > { %v7535_v38 = vrot.slane %v7534_v13, 1  ;;  %v7541_v59 = vmax.f32 %v7539_v55, %v7540_v30  ;;  %v7554_v48 = vrot.slane %v7553_v19, 2  ;;  %v7559_v61 = vrot.slane %v7558_v53, 4 }
 0x465   : > { %v7548_v10 = vmax.f32 %v7546_v52, %v7547_v2  ;;  %v7565_v49 = vsel %vm6829_vm5, %v6614_v24, -inf  ;;  %v7572_v46 = vsel %vm6829_vm5, %v6613_v12, -inf  ;;  %v7579_v45 = vsel %vm6829_vm5, %v6615_v4, -inf }
 0x466   : > { %v7536_v23 = vmax.f32 %v7534_v13, %v7535_v38  ;;  %v7542_v42 = vrot.slane %v7541_v59, 1  ;;  %v7555_v54 = vmax.f32 %v7553_v19, %v7554_v48  ;;  %v7560_v50 = vmax.f32 %v7558_v53, %v7559_v61 }
 0x467   : > { %v7549_v25 = vrot.slane %v7548_v10, 1  ;;  %v7566_v44 = vrot.slane %v7565_v49, 4  ;;  %v7573_v37 = vrot.slane %v7572_v46, 4  ;;  %v7580_v52 = vrot.slane %v7579_v45, 4 }
 0x468   : > { %v7543_v35 = vmax.f32 %v7541_v59, %v7542_v42  ;;  %v7556_v8 = vrot.slane %v7555_v54, 1  ;;  %v11999_v3 = vsel %vm2623_vm12, %v7536_v23, -inf  ;;  %v7561_v43 = vrot.slane %v7560_v50, 2 }
 0x469   : > { %v7550_v57 = vmax.f32 %v7548_v10, %v7549_v25  ;;  %v7567_v55 = vmax.f32 %v7565_v49, %v7566_v44  ;;  %v7574_v56 = vmax.f32 %v7572_v46, %v7573_v37  ;;  %v6616_v30 = vcombine.high %v6120_v60, %v6120_v60 }
 0x46a   : > { %v7557_v63 = vmax.f32 %v7555_v54, %v7556_v8  ;;  %v12002_v58 = vsel %vm2623_vm12, %v7543_v35, -inf  ;;  %v7562_v13 = vmax.f32 %v7560_v50, %v7561_v43  ;;  %v7581_v24 = vmax.f32 %v7579_v45, %v7580_v52 }
 0x46b   : > { %v12005_v19 = vsel %vm2623_vm12, %v7550_v57, -inf  ;;  %v7568_v2 = vrot.slane %v7567_v55, 2  ;;  %v7575_v12 = vrot.slane %v7574_v56, 2  ;;  %v6623_v59 = vrot.slane %v6120_v60, %v11216_v1 }
 0x46c   : > { %v12008_v53 = vsel %vm2623_vm12, %v7557_v63, -inf  ;;  %v7563_v38 = vrot.slane %v7562_v13, 1  ;;  %v6630_v48 = vrot.slane %v6616_v30, %v11216_v1  ;;  %v7582_v4 = vrot.slane %v7581_v24, 2 }
 0x46d   : > { %v7569_v61 = vmax.f32 %v7567_v55, %v7568_v2  ;;  %v7576_v10 = vmax.f32 %v7574_v56, %v7575_v12  ;;  %v8796_v49 = vadd.f32 %v11878_v5, %v11868_v36  ;;  %v6631_v23 = vcombine.high %v6623_v59, %v6623_v59 }
 0x46e   : > { %v7564_v46 = vmax.f32 %v7562_v13, %v7563_v38  ;;  %v6632_v42 = vcombine.high %v6630_v48, %v6630_v48  ;;  %v7586_v54 = vsel %vm6829_vm5, %v6623_v59, -inf  ;;  %v7583_v44 = vmax.f32 %v7581_v24, %v7582_v4 }
 0x46f   : > { %v7570_v50 = vrot.slane %v7569_v61, 1  ;;  %v7577_v25 = vrot.slane %v7576_v10, 1  ;;  %v7587_v37 = vrot.slane %v7586_v54, 4  ;;  %v7593_v60 = vsel %vm6829_vm5, %v6631_v23, -inf }
 0x470   : > { %v7871_v45 = vsel %vm2623_vm12, %v7564_v46, -inf  ;;  %v7600_v35 = vsel %vm6829_vm5, %v6630_v48, -inf  ;;  %v7607_v8 = vsel %vm6829_vm5, %v6632_v42, -inf  ;;  %v7584_v36 = vrot.slane %v7583_v44, 1 }
 0x471   : > { %v7571_v43 = vmax.f32 %v7569_v61, %v7570_v50  ;;  %v7578_v57 = vmax.f32 %v7576_v10, %v7577_v25  ;;  %v7872_v5 = vmax.f32 %v11980_v6, %v7871_v45  ;;  %v7588_v55 = vmax.f32 %v7586_v54, %v7587_v37 }
 0x472   : > { %v7594_v56 = vrot.slane %v7593_v60, 4  ;;  %v7601_v52 = vrot.slane %v7600_v35, 4  ;;  %v7608_v63 = vrot.slane %v7607_v8, 4  ;;  %v7585_v13 = vmax.f32 %v7583_v44, %v7584_v36 }
 0x473   : > { %v7874_v30 = vsel %vm2623_vm12, %v7571_v43, -inf  ;;  %v7877_v2 = vsel %vm2623_vm12, %v7578_v57, -inf  ;;  %v5918_v12 = vadd.f32 %v11968_v39, %v11963_v16  ;;  %v7589_v59 = vrot.slane %v7588_v55, 2 }
 0x474   : > { %v7875_v24 = vmax.f32 %v11983_v18, %v7874_v30  ;;  %v7878_v38 = vmax.f32 %v11987_v0, %v7877_v2  ;;  %v7595_v48 = vmax.f32 %v7593_v60, %v7594_v56  ;;  %v7880_v6 = vsel %vm2623_vm12, %v7585_v13, -inf }
 0x475   : > { %v7602_v61 = vmax.f32 %v7600_v35, %v7601_v52  ;;  %v7609_v10 = vmax.f32 %v7607_v8, %v7608_v63  ;;  %v6079_v4 = vadd.f32 %v11726_v20, %v5918_v12  ;;  %v7881_v46 = vmax.f32 %v11990_v62, %v7880_v6 }
 0x476   : > { %v8031_v23 = vsel %vm7982_vm6, %v7875_v24, %v7872_v5  ;;  %v7590_v42 = vmax.f32 %v7588_v55, %v7589_v59  ;;  %v7596_v54 = vrot.slane %v7595_v48, 2  ;;  %v5921_v45 = vadd.f32 %v11968_v39, %v8796_v49 }
 0x477   : > { %v8032_v16 = vsel %vm7984_vm15, %v7878_v38, %v8031_v23  ;;  %v7603_v50 = vrot.slane %v7602_v61, 2  ;;  %v7610_v18 = vrot.slane %v7609_v10, 2  ;;  %v6121_v25 = vmax.f32 %v6079_v4, 0.0 }
 0x478   : > { %v7591_v0 = vrot.slane %v7590_v42, 1  ;;  %v7597_v44 = vmax.f32 %v7595_v48, %v7596_v54  ;;  %v8033_v37 = vsel %vm7986_vm0, %v7881_v46, %v8032_v16  ;;  %v6082_v57 = vadd.f32 %v11759_v47, %v5921_v45 }
 0x479   : > { %v7604_v60 = vmax.f32 %v7602_v61, %v7603_v50  ;;  %v7611_v35 = vmax.f32 %v7609_v10, %v7610_v18  ;;  %v6633_v20 = vcombine.high %v6121_v25, %v6121_v25  ;;  %v6640_v62 = vrot.slane %v6121_v25, %v11216_v1 }
 0x47a   : > { %v7592_v8 = vmax.f32 %v7590_v42, %v7591_v0  ;;  %v7598_v43 = vrot.slane %v7597_v44, 1  ;;  %v8799_v36 = vadd.f32 %v11913_v28, %v11908_v9  ;;  %v6122_v30 = vmax.f32 %v6082_v57, 0.0 }
 0x47b   : > { %v7605_v5 = vrot.slane %v7604_v60, 1  ;;  %v7612_v55 = vrot.slane %v7611_v35, 1  ;;  %v6647_v56 = vrot.slane %v6633_v20, %v11216_v1  ;;  %v6648_v52 = vcombine.high %v6640_v62, %v6640_v62 }
 0x47c   : > { %v7599_v63 = vmax.f32 %v7597_v44, %v7598_v43  ;;  %v7883_v49 = vsel %vm2623_vm12, %v7592_v8, -inf  ;;  %v7614_v13 = vsel %vm6829_vm5, %v6640_v62, -inf  ;;  %v6650_v54 = vcombine.high %v6122_v30, %v6122_v30 }
 0x47d   : > { %v7606_v2 = vmax.f32 %v7604_v60, %v7605_v5  ;;  %v7613_v12 = vmax.f32 %v7611_v35, %v7612_v55  ;;  %v7884_v24 = vmax.f32 %v11999_v3, %v7883_v49  ;;  %v6649_v38 = vcombine.high %v6647_v56, %v6647_v56 }
 0x47e   : > { %v12042_v47 = vsel %vm2623_vm12, %v7599_v63, -inf  ;;  %v7615_v9 = vrot.slane %v7614_v13, 4  ;;  %v7621_v28 = vsel %vm6829_vm5, %v6648_v52, -inf  ;;  %v7628_v59 = vsel %vm6829_vm5, %v6647_v56, -inf }
 0x47f   : > { %v7887_v48 = vmax.f32 %v12002_v58, %v12042_v47  ;;  %v12049_v6 = vsel %vm2623_vm12, %v7606_v2, -inf  ;;  %v12052_v61 = vsel %vm2623_vm12, %v7613_v12, -inf  ;;  %v12055_v3 = vsel %vm7988_vm1, %v7884_v24, %v8033_v37 }
 0x480   : > { %v7890_v10 = vmax.f32 %v12005_v19, %v12049_v6  ;;  %v7616_v4 = vmax.f32 %v7614_v13, %v7615_v9  ;;  %v7622_v46 = vrot.slane %v7621_v28, 4  ;;  %v7629_v23 = vrot.slane %v7628_v59, 4 }
 0x481   : > { %v7635_v42 = vsel %vm6829_vm5, %v6649_v38, -inf  ;;  %v6657_v16 = vrot.slane %v6122_v30, %v11216_v1  ;;  %v5926_v50 = vadd.f32 %v11968_v39, %v8799_v36  ;;  %v6664_v37 = vrot.slane %v6650_v54, %v11216_v1 }
 0x482   : > { %v7617_v18 = vrot.slane %v7616_v4, 2  ;;  %v7623_v25 = vmax.f32 %v7621_v28, %v7622_v46  ;;  %v7630_v0 = vmax.f32 %v7628_v59, %v7629_v23  ;;  %v7636_v44 = vrot.slane %v7635_v42, 4 }
 0x483   : > { %v6665_v45 = vcombine.high %v6657_v16, %v6657_v16  ;;  %v7642_v60 = vsel %vm6829_vm5, %v6657_v16, -inf  ;;  %v6087_v35 = vadd.f32 %v11722_v26, %v5926_v50  ;;  %v6666_v57 = vcombine.high %v6664_v37, %v6664_v37 }
 0x484   : > { %v7618_v20 = vmax.f32 %v7616_v4, %v7617_v18  ;;  %v7624_v62 = vrot.slane %v7623_v25, 2  ;;  %v7631_v8 = vrot.slane %v7630_v0, 2  ;;  %v7637_v43 = vmax.f32 %v7635_v42, %v7636_v44 }
 0x485   : > { %v7643_v5 = vrot.slane %v7642_v60, 4  ;;  %v7649_v55 = vsel %vm6829_vm5, %v6665_v45, -inf  ;;  %v7656_v36 = vsel %vm6829_vm5, %v6664_v37, -inf  ;;  %v7663_v12 = vsel %vm6829_vm5, %v6666_v57, -inf }
 0x486   : > { %v7619_v56 = vrot.slane %v7618_v20, 1  ;;  %v7625_v52 = vmax.f32 %v7623_v25, %v7624_v62  ;;  %v7632_v63 = vmax.f32 %v7630_v0, %v7631_v8  ;;  %v7638_v49 = vrot.slane %v7637_v43, 2 }
 0x487   : > { %v7644_v13 = vmax.f32 %v7642_v60, %v7643_v5  ;;  %v7650_v30 = vrot.slane %v7649_v55, 4  ;;  %v7657_v2 = vrot.slane %v7656_v36, 4  ;;  %v7664_v46 = vrot.slane %v7663_v12, 4 }
 0x488   : > { %v7620_v26 = vmax.f32 %v7618_v20, %v7619_v56  ;;  %v7626_v24 = vrot.slane %v7625_v52, 1  ;;  %v7633_v38 = vrot.slane %v7632_v63, 1  ;;  %v7639_v9 = vmax.f32 %v7637_v43, %v7638_v49 }
 0x489   : > { %v7645_v28 = vrot.slane %v7644_v13, 2  ;;  %v7651_v59 = vmax.f32 %v7649_v55, %v7650_v30  ;;  %v7658_v4 = vmax.f32 %v7656_v36, %v7657_v2  ;;  %v7665_v0 = vmax.f32 %v7663_v12, %v7664_v46 }
 0x48a   : > { %v7627_v23 = vmax.f32 %v7625_v52, %v7626_v24  ;;  %v7634_v42 = vmax.f32 %v7632_v63, %v7633_v38  ;;  %v7640_v54 = vrot.slane %v7639_v9, 1  ;;  %v12069_v16 = vsel %vm2623_vm12, %v7620_v26, -inf }
 0x48b   : > { %v7646_v50 = vmax.f32 %v7644_v13, %v7645_v28  ;;  %v7652_v18 = vrot.slane %v7651_v59, 2  ;;  %v7659_v25 = vrot.slane %v7658_v4, 2  ;;  %v6123_v60 = vmax.f32 %v6087_v35, 0.0 }
 0x48c   : > { %v7641_v44 = vmax.f32 %v7639_v9, %v7640_v54  ;;  %v12072_v37 = vsel %vm2623_vm12, %v7627_v23, -inf  ;;  %v12075_v45 = vsel %vm2623_vm12, %v7634_v42, -inf  ;;  %v7666_v43 = vrot.slane %v7665_v0, 2 }
 0x48d   : > { %v7647_v20 = vrot.slane %v7646_v50, 1  ;;  %v7653_v62 = vmax.f32 %v7651_v59, %v7652_v18  ;;  %v7660_v8 = vmax.f32 %v7658_v4, %v7659_v25  ;;  %v6667_v5 = vcombine.high %v6123_v60, %v6123_v60 }
 0x48e   : > { %v12078_v57 = vsel %vm2623_vm12, %v7641_v44, -inf  ;;  %v6674_v55 = vrot.slane %v6123_v60, %v11216_v1  ;;  %v8802_v36 = vadd.f32 %v11917_v22, %v11915_v15  ;;  %v7667_v49 = vmax.f32 %v7665_v0, %v7666_v43 }
 0x48f   : > { %v7648_v56 = vmax.f32 %v7646_v50, %v7647_v20  ;;  %v7654_v52 = vrot.slane %v7653_v62, 1  ;;  %v7661_v63 = vrot.slane %v7660_v8, 1  ;;  %v6681_v13 = vrot.slane %v6667_v5, %v11216_v1 }
 0x490   : > { %v6682_v35 = vcombine.high %v6674_v55, %v6674_v55  ;;  %v7670_v30 = vsel %vm6829_vm5, %v6674_v55, -inf  ;;  %v5929_v2 = vadd.f32 %v11968_v39, %v8802_v36  ;;  %v7668_v24 = vrot.slane %v7667_v49, 1 }
 0x491   : > { %v7655_v12 = vmax.f32 %v7653_v62, %v7654_v52  ;;  %v7662_v26 = vmax.f32 %v7660_v8, %v7661_v63  ;;  %v12087_v38 = vsel %vm2623_vm12, %v7648_v56, -inf  ;;  %v6683_v9 = vcombine.high %v6681_v13, %v6681_v13 }
 0x492   : > { %v7671_v28 = vrot.slane %v7670_v30, 4  ;;  %v7677_v22 = vsel %vm6829_vm5, %v6682_v35, -inf  ;;  %v7684_v15 = vsel %vm6829_vm5, %v6681_v13, -inf  ;;  %v7669_v59 = vmax.f32 %v7667_v49, %v7668_v24  ;;  %v12329_v49 = vld [vmem:[#allocation6_spill] sm:$0xff]  ;;  %v12330_v13 = vld [vmem:[#allocation7_spill] sm:$0xff] }
 0x493   : > { %v12092_v4 = vsel %vm2623_vm12, %v7655_v12, -inf  ;;  %v12095_v46 = vsel %vm2623_vm12, %v7662_v26, -inf  ;;  %v7678_v39 = vrot.slane %v7677_v22, 4  ;;  %v7685_v42 = vrot.slane %v7684_v15, 4  ;;  %v12333_v12 = vld [vmem:[#allocation8_spill] sm:$0xff]  ;;  %v12334_v26 = vld [vmem:[#allocation10_spill] sm:$0xff] }
 0x494   : > { %v7672_v23 = vmax.f32 %v7670_v30, %v7671_v28  ;;  %v7691_v54 = vsel %vm6829_vm5, %v6683_v9, -inf  ;;  %v6090_v50 = vadd.f32 %v11757_v33, %v5929_v2  ;;  %v12100_v18 = vsel %vm2623_vm12, %v7669_v59, -inf  ;;  %v12332_v2 = vld [vmem:[#allocation12_spill] sm:$0xff] }
 0x495   : > { %v7679_v25 = vmax.f32 %v7677_v22, %v7678_v39  ;;  %v7692_v0 = vrot.slane %v7691_v54, 4  ;;  %v7869_v44 = vmax.f32 %v11899_v32, %v11951_v29  ;;  %v7686_v20 = vmax.f32 %v7684_v15, %v7685_v42 }
 0x496   : > { %v7673_v60 = vrot.slane %v7672_v23, 2  ;;  %v6124_v62 = vmax.f32 %v6090_v50, 0.0  ;;  %v7893_v8 = vmax.f32 %v12008_v53, %v12052_v61  ;;  %v12331_v35 = vmax.f32 %v12329_v49, %v12330_v13 }
 0x497   : > { %v7680_v43 = vrot.slane %v7679_v25, 2  ;;  %v7693_v5 = vmax.f32 %v7691_v54, %v7692_v0  ;;  %v7687_v33 = vrot.slane %v7686_v20, 2  ;;  %v12335_v24 = vmax.f32 %v12333_v12, %v12334_v26 }
 0x498   : > { %v7674_v55 = vmax.f32 %v7672_v23, %v7673_v60  ;;  %v6684_v36 = vcombine.high %v6124_v62, %v6124_v62  ;;  %v6691_v56 = vrot.slane %v6124_v62, %v11216_v1  ;;  %v7993_v30 = vsel %vm7992_vm3, %v12331_v35, %v11824_v40 }
 0x499   : > { %v7681_v52 = vmax.f32 %v7679_v25, %v7680_v43  ;;  %v7694_v63 = vrot.slane %v7693_v5, 2  ;;  %v8000_v9 = vsel %vm7990_vm2, %v12335_v24, %v12332_v2  ;;  %v7688_v22 = vmax.f32 %v7686_v20, %v7687_v33 }
 0x49a   : > { %v7675_v28 = vrot.slane %v7674_v55, 1  ;;  %v6698_v15 = vrot.slane %v6684_v36, %v11216_v1  ;;  %v6699_v59 = vcombine.high %v6691_v56, %v6691_v56  ;;  %v7698_v42 = vsel %vm6829_vm5, %v6691_v56, -inf }
 0x49b   : > { %v7682_v39 = vrot.slane %v7681_v52, 1  ;;  %v7695_v23 = vmax.f32 %v7693_v5, %v7694_v63  ;;  %v12336_v54 = vmax.f32 %v11382_v31, %v11388_v27  ;;  %v7689_v25 = vrot.slane %v7688_v22, 1 }
 0x49c   : > { %v7676_v50 = vmax.f32 %v7674_v55, %v7675_v28  ;;  %v6700_v0 = vcombine.high %v6698_v15, %v6698_v15  ;;  %v7699_v60 = vrot.slane %v7698_v42, 4  ;;  %v7705_v20 = vsel %vm6829_vm5, %v6699_v59, -inf }
 0x49d   : > { %v12123_v40 = vsel %vm7994_vm4, %v12336_v54, %v7993_v30  ;;  %v7683_v62 = vmax.f32 %v7681_v52, %v7682_v39  ;;  %v7696_v43 = vrot.slane %v7695_v23, 1  ;;  %v7712_v33 = vsel %vm6829_vm5, %v6698_v15, -inf }
 0x49e   : > { %v7690_v36 = vmax.f32 %v7688_v22, %v7689_v25  ;;  %v7895_v5 = vsel %vm2623_vm12, %v7676_v50, -inf  ;;  %v7700_v56 = vmax.f32 %v7698_v42, %v7699_v60  ;;  %v7706_v63 = vrot.slane %v7705_v20, 4  ;;  %v12338_v42 = vld [vmem:[#allocation11_spill] sm:$0xff] }
 0x49f   : > { %v7697_v49 = vmax.f32 %v7695_v23, %v7696_v43  ;;  %v7896_v31 = vmax.f32 %v12069_v16, %v7895_v5  ;;  %v7898_v27 = vsel %vm2623_vm12, %v7683_v62, -inf  ;;  %v7713_v55 = vrot.slane %v7712_v33, 4  ;;  %v12337_v23 = vld [vmem:[#allocation9_spill] sm:$0xff] }
 0x4a0   : > { %v7899_v13 = vmax.f32 %v12072_v37, %v7898_v27  ;;  %v7901_v52 = vsel %vm2623_vm12, %v7690_v36, -inf  ;;  %v7701_v35 = vrot.slane %v7700_v56, 2  ;;  %v7707_v30 = vmax.f32 %v7705_v20, %v7706_v63  ;;  %v12343_v36 = vld [vmem:[#allocation14_spill] sm:$0xff]  ;;  %v12344_v5 = vld [vmem:[#allocation21_spill] sm:$0xff] }
 0x4a1   : > { %v7902_v2 = vmax.f32 %v12075_v45, %v7901_v52  ;;  %v7904_v12 = vsel %vm2623_vm12, %v7697_v49, -inf  ;;  %v7714_v26 = vmax.f32 %v7712_v33, %v7713_v55  ;;  %v7719_v24 = vsel %vm6829_vm5, %v6700_v0, -inf  ;;  %v12340_v0 = vld [vmem:[#allocation13_spill] sm:$0xff]  ;;  %v12342_v33 = vld [vmem:[#allocation23_spill] sm:$0xff] }
 0x4a2   : > { %v7905_v28 = vmax.f32 %v12078_v57, %v7904_v12  ;;  %v8038_v16 = vsel %vm7982_vm6, %v7899_v13, %v7896_v31  ;;  %v7702_v22 = vmax.f32 %v7700_v56, %v7701_v35  ;;  %v7708_v15 = vrot.slane %v7707_v30, 2  ;;  %v12346_v49 = vld [vmem:[#allocation29_spill] sm:$0xff]  ;;  %v12347_v31 = vld [vmem:[#allocation24_spill] sm:$0xff]  ;;  %v12350_v35 = vld [vmem:[#allocation15_spill] sm:$0xff] }
 0x4a3   : > { %v8039_v59 = vsel %vm7984_vm15, %v7902_v2, %v8038_v16  ;;  %v7715_v37 = vrot.slane %v7714_v26, 2  ;;  %v7720_v39 = vrot.slane %v7719_v24, 4  ;;  %v12339_v54 = vmax.f32 %v12337_v23, %v12338_v42  ;;  %v12353_v12 = vld [vmem:[#allocation25_spill] sm:$0xff]  ;;  %v12359_v42 = vld [vmem:[#allocation26_spill] sm:$0xff] }
 0x4a4   : > { %v7703_v50 = vrot.slane %v7702_v22, 1  ;;  %v7709_v25 = vmax.f32 %v7707_v30, %v7708_v15  ;;  %v8040_v60 = vsel %vm7986_vm0, %v7905_v28, %v8039_v59  ;;  %v12341_v57 = vmax.f32 %v11448_v7, %v12340_v0  ;;  %v12351_v7 = vld [vmem:[#allocation20_spill] sm:$0xff]  ;;  %v12356_v59 = vld [vmem:[#allocation17_spill] sm:$0xff] }
 0x4a5   : > { %v8001_v45 = vsel %vm7992_vm3, %v12339_v54, %v8000_v9  ;;  %v7716_v43 = vmax.f32 %v7714_v26, %v7715_v37  ;;  %v7721_v20 = vmax.f32 %v7719_v24, %v7720_v39  ;;  %v12345_v56 = vmax.f32 %v12343_v36, %v12344_v5  ;;  %v12348_v9 = vld [vmem:[#allocation27_spill] sm:$0xff]  ;;  %v12354_v26 = vld [vmem:[#allocation28_spill] sm:$0xff]  ;;  %v12357_v37 = vld [vmem:[#allocation22_spill] sm:$0xff] }
 0x4a6   : > { %v8002_v62 = vsel %vm7994_vm4, %v12341_v57, %v8001_v45  ;;  %v12349_v27 = vmax.f32 %v12347_v31, %v12348_v9  ;;  %v7704_v13 = vmax.f32 %v7702_v22, %v7703_v50  ;;  %v7710_v52 = vrot.slane %v7709_v25, 1  ;;  %v12360_v22 = vld [vmem:[#allocation30_spill] sm:$0xff]  ;;  %v12362_v57 = vld [vmem:[#allocation36_spill] sm:$0xff] }
 0x4a7   : > { %v8007_v63 = vsel %vm7990_vm2, %v12345_v56, %v12342_v33  ;;  %v12352_v30 = vmax.f32 %v12350_v35, %v12351_v7  ;;  %v12355_v24 = vmax.f32 %v12353_v12, %v12354_v26  ;;  %v7717_v16 = vrot.slane %v7716_v43, 1  ;;  %v12363_v33 = vld [vmem:[#allocation31_spill] sm:$0xff]  ;;  %v12364_v36 = vld [vmem:[#allocation34_spill] sm:$0xff]  ;;  %v12369_v35 = vld [vmem:[#allocation33_spill] sm:$0xff] }
 0x4a8   : > { %v8014_v55 = vsel %vm7990_vm2, %v12349_v27, %v12346_v49  ;;  %v7722_v15 = vrot.slane %v7721_v20, 2  ;;  %v12358_v39 = vmax.f32 %v12356_v59, %v12357_v37  ;;  %v12361_v54 = vmax.f32 %v12359_v42, %v12360_v22  ;;  %v12366_v27 = vld [vmem:[#allocation32_spill] sm:$0xff]  ;;  %v12370_v7 = vld [vmem:[#allocation37_spill] sm:$0xff] }
 0x4a9   : > { %v8008_v2 = vsel %vm7992_vm3, %v12352_v30, %v8007_v63  ;;  %v8015_v28 = vsel %vm7992_vm3, %v12355_v24, %v8014_v55  ;;  %v7711_v50 = vmax.f32 %v7709_v25, %v7710_v52  ;;  %v7907_v0 = vsel %vm2623_vm12, %v7704_v13, -inf  ;;  %v12367_v25 = vld [vmem:[#allocation35_spill] sm:$0xff]  ;;  %v12372_v37 = vld [vmem:[#allocation5_spill] sm:$0xff] }
 0x4aa   : > { %v8009_v23 = vsel %vm7994_vm4, %v12358_v39, %v8008_v2  ;;  %v8016_v45 = vsel %vm7994_vm4, %v12361_v54, %v8015_v28  ;;  %v12365_v5 = vmax.f32 %v12363_v33, %v12364_v36  ;;  %v8028_v63 = vsel %vm7990_vm2, %v7863_v17, %v11939_v14 }
 0x4ab   : > { %v7718_v49 = vmax.f32 %v7716_v43, %v7717_v16  ;;  %v7723_v31 = vmax.f32 %v7721_v20, %v7722_v15  ;;  %v7908_v9 = vmax.f32 %v12087_v38, %v7907_v0  ;;  %v12368_v55 = vmax.f32 %v12366_v27, %v12367_v25 }
 0x4ac   : > { %v8021_v56 = vsel %vm7990_vm2, %v12365_v5, %v12362_v57  ;;  %v7910_v52 = vsel %vm2623_vm12, %v7711_v50, -inf  ;;  %v12371_v30 = vmax.f32 %v12369_v35, %v12370_v7  ;;  %v8029_v41 = vsel %vm7992_vm3, %v7866_v34, %v8028_v63 }
 0x4ad   : > { %v8022_v13 = vsel %vm7992_vm3, %v12368_v55, %v8021_v56  ;;  %v8035_v11 = vsel %vm7990_vm2, %v7887_v48, %v12055_v3  ;;  %v7724_v14 = vrot.slane %v7723_v31, 1  ;;  %v7911_v17 = vmax.f32 %v12092_v4, %v7910_v52 }
 0x4ae   : > { %v8023_v2 = vsel %vm7994_vm4, %v12371_v30, %v8022_v13  ;;  %v7913_v38 = vsel %vm2623_vm12, %v7718_v49, -inf  ;;  %v8041_v43 = vsel %vm7988_vm1, %v7908_v9, %v8040_v60  ;;  %v8030_v21 = vsel %vm7994_vm4, %v7869_v44, %v8029_v41 }
 0x4af   : > { %v7914_v20 = vmax.f32 %v12095_v46, %v7913_v38  ;;  %v8036_v51 = vsel %vm7992_vm3, %v7890_v10, %v8035_v11  ;;  %v8054_v34 = vcombine.high %v12123_v40, %v8009_v23  ;;  %v7725_v58 = vmax.f32 %v7723_v31, %v7724_v14 }
 0x4b0   : > { %v8037_v47 = vsel %vm7994_vm4, %v7893_v8, %v8036_v51  ;;  %v8042_v48 = vsel %vm7990_vm2, %v7911_v17, %v8041_v43  ;;  %v8070_v3 = vcombine.high %v8002_v62, %v8016_v45  ;;  %v9045_v10 = vmov 1934713408  }
 0x4b1   : > { %v8043_v32 = vsel %vm7992_vm3, %v7914_v20, %v8042_v48  ;;  %v8068_v29 = vrot.slane %v8054_v34, %v11216_v1  ;;  %v8086_v4 = vcombine.high %v8023_v2, %v8037_v47  ;;  %v7916_v19 = vsel %vm2623_vm12, %v7725_v58, -inf }
 0x4b2   : > { %v8084_v6 = vrot.slane %v8070_v3, %v11216_v1  ;;  %v8120_v46 = vunpack.c.l.s4 %v9045_v10  ;;  %v8053_v44 = vcombine.low %v12123_v40, %v8009_v23  ;;  %v7917_v53 = vmax.f32 %v12100_v18, %v7916_v19 }
 0x4b3   : > { %v8069_v61 = vcombine.low %v8002_v62, %v8016_v45  ;;  %v8085_v8 = vcombine.low %v8023_v2, %v8037_v47  ;;  %v8100_v40 = vrot.slane %v8086_v4, %v11216_v1 }
 0x4b4   : > { %v8121_v60 = vunpack.c.0.s8 %v8120_v46  ;;  %v8133_v12 = vcombine.low %v8068_v29, %v8084_v6  ;;  %v8134_v26 = vcombine.high %v8068_v29, %v8084_v6  ;;  %v8044_v24 = vsel %vm7994_vm4, %v7917_v53, %v8043_v32 }
 0x4b5   : > { %v8061_v28 = vrot.slane %v8053_v44, %v11216_v1  ;;  %v8077_v16 = vrot.slane %v8069_v61, %v11216_v1  ;;  %v8102_v15 = vcombine.high %v8030_v21, %v8044_v24  ;;  %v8101_v59 = vcombine.low %v8030_v21, %v8044_v24 }
 0x4b6   : > { %v8124_v39 = vsub.s32 %v8121_v60, %v12372_v37  ;;  %v8093_v62 = vrot.slane %v8085_v8, %v11216_v1 }
 0x4b7   : > { %v8117_v42 = vcombine.low %v8061_v28, %v8077_v16  ;;  %v8118_v22 = vcombine.high %v8061_v28, %v8077_v16  ;;  %v8116_v18 = vrot.slane %v8102_v15, %v11216_v1  ;;  %v8109_v23 = vrot.slane %v8101_v59, %v11216_v1 }
 0x4b8   : > { %v8141_v57 = vrot.slane %v8133_v12, %v8124_v39  ;;  %v8148_v36 = vrot.slane %v8134_v26, %v8124_v39 }
 0x4b9   : > { %v8165_v54 = vcombine.low %v8100_v40, %v8116_v18  ;;  %v8149_v45 = vcombine.low %v8093_v62, %v8109_v23  ;;  %v8166_v50 = vcombine.high %v8100_v40, %v8116_v18  ;;  %v8150_v0 = vcombine.high %v8093_v62, %v8109_v23 }
 0x4ba   : > { %v8125_v33 = vrot.slane %v8117_v42, %v8124_v39  ;;  %v8132_v5 = vrot.slane %v8118_v22, %v8124_v39 }
 0x4bb   : > { %v8173_v56 = vrot.slane %v8165_v54, %v8124_v39  ;;  %v8157_v63 = vrot.slane %v8149_v45, %v8124_v39  ;;  %v8180_v49 = vrot.slane %v8166_v50, %v8124_v39  ;;  %v8164_v31 = vrot.slane %v8150_v0, %v8124_v39 }
 0x4bd   : > { %v8186_v9 = vcombine.high %v8141_v57, %v8173_v56  ;;  %v8182_v27 = vcombine.high %v8125_v33, %v8157_v63  ;;  %v8187_v25 = vcombine.low %v8148_v36, %v8180_v49  ;;  %v8183_v55 = vcombine.low %v8132_v5, %v8164_v31 }
 0x4be   : > { %v8188_v13 = vcombine.high %v8148_v36, %v8180_v49  ;;  %v8184_v52 = vcombine.high %v8132_v5, %v8164_v31  ;;  %v8185_v1 = vcombine.low %v8141_v57, %v8173_v56  ;;  %v8181_v35 = vcombine.low %v8125_v33, %v8157_v63 }
 0x4bf   : > { %8202 = vrot.lane.b32.xlu1 %v8186_v9, %s9040_s10  ;;  %8190 = vrot.lane.b32.xlu0 %v8182_v27, %s9040_s10 }
 0x4c3   : > { %8206 = vrot.lane.b32.xlu1 %v8187_v25, %s9042_s13  ;;  %8194 = vrot.lane.b32.xlu0 %v8183_v55, %s9042_s13 }
 0x4c7   : > { %8210 = vrot.lane.b32.xlu1 %v8188_v13, %s9043_s16  ;;  %8198 = vrot.lane.b32.xlu0 %v8184_v52, %s9043_s16 }
 0x531   : > { %v8203_v7 = vpop.permute.xlu1 %8202  ;;  %v8191_v30 = vpop.permute.xlu0 %8190 }
 0x532   : > { %v8218_v11 = vsel %vm2623_vm12, %v8185_v1, %v8203_v7  ;;  %v8213_v14 = vsel %vm2623_vm12, %v8181_v35, %v8191_v30 }
 0x535   : > { %v8207_v2 = vpop.permute.xlu1 %8206  ;;  %v8195_v41 = vpop.permute.xlu0 %8194 }
 0x536   : > { %v8219_v17 = vsel %vm8214_vm7, %v8218_v11, %v8207_v2  ;;  %v8215_v38 = vsel %vm8214_vm7, %v8213_v14, %v8195_v41 }
 0x539   : > { %v8211_v43 = vpop.permute.xlu1 %8210  ;;  %v8199_v20 = vpop.permute.xlu0 %8198 }
 0x53a   : > { %v8220_v21 = vsel %vm8216_vm8, %v8219_v17, %v8211_v43  ;;  %v8217_v51 = vsel %vm8216_vm8, %v8215_v38, %v8199_v20 }
 0x53b   : > { %8222 = vst [vmem:[%s224_s29 + $0x8] sm:$0xff] %v8220_v21  ;;  %8221 = vst [vmem:[%s224_s29] sm:$0xff] %v8217_v51 }
 0x53c PF: > { %s15_s18 = sadd.s32 1, %s9031_s18  }
 0x53d   : > { %p12_p4 = scmp.ge.s32.totalorder %s15_s18, 4  }
 0x53f   :  { %14 = sbr.rel (!%p12_p4) target bundleno = 1 (0x1), region = 72 }

</bundles_post_ra>
